<compile_context>
chip_gen: v6e
topology: v6e:2x2x1
jax: 0.10.0
libtpu: 0.0.40
codegen_flags: <defaults>
</compile_context>

<pallas_src>
import jax
import jax.numpy as jnp
from jax.experimental import pallas as pl
from jax.experimental.pallas import tpu as pltpu


# bf16 at the MXU / for the big weight + patch streams (f32 accumulate).
# Set to jnp.float32 for bit-closer f32 validation runs.
MXU_DTYPE = jnp.bfloat16


def _round_up(n, m):
    return ((n + m - 1) // m) * m


# ----------------------------------------------------------------------------
# XLA glue: pool-corner-grouped im2col (fused under jit)
# ----------------------------------------------------------------------------
def _pool_conv_patches(a_cbhw, k, out_dtype):
    """Patches for conv(k, stride 1, valid) followed by 2x2/2 max-pool.

    a_cbhw: (C, B, H, W) activations.
    Returns (pt, (Hp, Wp, hwp)) with pt of shape (C*k*k, B*4*hwp):
      rows ordered   (ci, dy, dx)              -- matches torch weight reshape
      cols ordered   (b, pool-corner, hw_pad)  -- hw = hp*Wp + wp, 128-aligned
    Padded columns are zero.
    """
    C, B, H, W = a_cbhw.shape
    Hp, Wp = (H - k + 1) // 2, (W - k + 1) // 2
    hw = Hp * Wp
    hwp = _round_up(hw, 128)
    corners = []
    for py in range(2):
        for px in range(2):
            taps = []
            for dy in range(k):
                for dx in range(k):
                    taps.append(a_cbhw[:, :,
                                       py + dy: py + dy + 2 * Hp - 1: 2,
                                       px + dx: px + dx + 2 * Wp - 1: 2])
            t = jnp.stack(taps, axis=1)                  # (C, k*k, B, Hp, Wp)
            t = t.reshape(C * k * k, B, hw)
            t = jnp.pad(t, ((0, 0), (0, 0), (0, hwp - hw)))
            corners.append(t)                            # (K, B, hwp)
    pt = jnp.stack(corners, axis=2)                      # (K, B, 4, hwp)
    pt = pt.reshape(C * k * k, B * 4 * hwp).astype(out_dtype)
    return pt, (Hp, Wp, hwp)


# ----------------------------------------------------------------------------
# Pallas kernels
# ----------------------------------------------------------------------------
def _conv_pool_relu_kernel(pt_ref, wt_ref, b_ref, o_ref):
    """One batch block: conv-as-matmul, 2x2 maxpool via corner max, bias, ReLU.

    pt_ref: (K, 4*hwp)  patches for this batch (4 pool-corner slabs)
    wt_ref: (Cout, K)   weights, columns ordered (ci, dy, dx)
    b_ref:  (Cout, 1)   bias
    o_ref:  (Cout, hwp) pooled + ReLU output (columns = hw_pad of this batch)
    """
    wt = wt_ref[...]
    mp = o_ref.shape[-1]
    y = jnp.dot(wt, pt_ref[:, 0:mp], preferred_element_type=jnp.float32)
    for q in range(1, 4):                   # incremental corner max -> low vreg
        yq = jnp.dot(wt, pt_ref[:, q * mp:(q + 1) * mp],
                     preferred_element_type=jnp.float32)
        y = jnp.maximum(y, yq)
    # bias is pool-corner-invariant, so adding after the max is exact.
    o_ref[...] = jnp.maximum(y + b_ref[...], 0.0).astype(o_ref.dtype)


def _conv2_head_kernel(pt_ref, wt_ref, bc2_ref, wf_hbm,
                       act_ref, wa_ref, bl_ref,
                       wih_ref, whh_ref, bih_ref, bhh_ref,
                       w1_ref, b1_ref, w2_ref, b2_ref, wc_ref, bc_ref,
                       q_ref,
                       wf_vmem, feat_ref, wf_sem):
    """Fused conv2(+pool+ReLU) -> flatten -> lin -> GRU -> hl1/hl2/critic."""
    B = q_ref.shape[0]
    Cout = wt_ref.shape[0]
    dl = whh_ref.shape[0]
    hwp = feat_ref.shape[1] // Cout

    # Prefetch the big (dr, Cout*hwp) linear weight behind the conv2 work.
    wf_copy = pltpu.make_async_copy(wf_hbm, wf_vmem, wf_sem)
    wf_copy.start()

    # --- conv2 matmul + 2x2 maxpool (corner max) + bias + ReLU, per batch ----
    wt = wt_ref[...]
    for b in range(B):
        base = b * 4 * hwp
        y = jnp.dot(wt, pt_ref[:, base:base + hwp],
                    preferred_element_type=jnp.float32)
        for q in range(1, 4):
            yq = jnp.dot(wt, pt_ref[:, base + q * hwp: base + (q + 1) * hwp],
                         preferred_element_type=jnp.float32)
            y = jnp.maximum(y, yq)
        a2 = jnp.maximum(y + bc2_ref[...], 0.0)          # (Cout, hwp) f32
        # Scatter into torch's (c, h, w) flatten order: feat[b, c*hwp + hw].
        # (128-aligned slab copies only; padded hw columns hit zero weights.)
        for c in range(Cout):
            feat_ref[b:b + 1, c * hwp:(c + 1) * hwp] = a2[c:c + 1, :]

    # --- lin: xn = relu(feat @ Wf^T + act @ Wa + b), big dot on the MXU ------
    wf_copy.wait()
    feat = feat_ref[...].astype(MXU_DTYPE)               # (B, Cout*hwp) bf16
    xn = jax.lax.dot_general(feat, wf_vmem[...],
                             dimension_numbers=(((1,), (1,)), ((), ())),
                             preferred_element_type=jnp.float32)   # (B, dr)
    xn = xn + jnp.dot(act_ref[...], wa_ref[...],
                      preferred_element_type=jnp.float32)
    xn = jnp.maximum(xn + bl_ref[...], 0.0)

    # --- GRU (seq_len = B, batch = 1, h0 = 0), gate order (r, z, n) ----------
    gi = jnp.dot(xn, wih_ref[...],
                 preferred_element_type=jnp.float32) + bih_ref[...]   # (B, 3dl)
    h = jnp.zeros((1, dl), dtype=jnp.float32)
    hs = []
    for t in range(B):                                   # static seq loop
        gh = jnp.dot(h, whh_ref[...],
                     preferred_element_type=jnp.float32) + bhh_ref[...]
        gi_t = gi[t:t + 1, :]
        r = jax.nn.sigmoid(gi_t[:, 0:dl] + gh[:, 0:dl])
        z = jax.nn.sigmoid(gi_t[:, dl:2 * dl] + gh[:, dl:2 * dl])
        n = jnp.tanh(gi_t[:, 2 * dl:3 * dl] + r * gh[:, 2 * dl:3 * dl])
        h = (1.0 - z) * n + z * h
        hs.append(h)
    hsm = jnp.concatenate(hs, axis=0)                    # (B, dl)

    # --- hl1 / hl2 / critic ---------------------------------------------------
    g1 = jnp.maximum(
        jnp.dot(hsm, w1_ref[...], preferred_element_type=jnp.float32)
        + b1_ref[...], 0.0)
    g2 = jnp.maximum(
        jnp.dot(g1, w2_ref[...], preferred_element_type=jnp.float32)
        + b2_ref[...], 0.0)
    q_ref[...] = (jnp.dot(g2, wc_ref[...], preferred_element_type=jnp.float32)
                  + bc_ref[...])


# ----------------------------------------------------------------------------
# Wrappers
# ----------------------------------------------------------------------------
def conv_pool_relu(pt, wt, bias, *, n_batch, hwp):
    """relu(maxpool2x2(conv2d_valid(.))) from pre-built pool-corner patches."""
    Cout, K = wt.shape
    return pl.pallas_call(
        _conv_pool_relu_kernel,
        out_shape=jax.ShapeDtypeStruct((Cout, n_batch * hwp), MXU_DTYPE),
        grid=(n_batch,),
        in_specs=[
            pl.BlockSpec((K, 4 * hwp), lambda i: (0, i)),
            pl.BlockSpec((Cout, K), lambda i: (0, 0)),
            pl.BlockSpec((Cout, 1), lambda i: (0, 0)),
        ],
        out_specs=pl.BlockSpec((Cout, hwp), lambda i: (0, i)),
        compiler_params=pltpu.CompilerParams(
            dimension_semantics=("parallel",),
            vmem_limit_bytes=4 * 1024 * 1024),
    )(pt, wt, bias)


def conv2_head(pt2, act, p):
    """Fused conv2 + flatten + lin + GRU + hl1/hl2/critic in one pallas_call."""
    B = act.shape[0]
    Cout = p["wt2"].shape[0]
    dr = p["wfp"].shape[0]
    hwp = p["wfp"].shape[1] // Cout

    args = (pt2, p["wt2"], p["b2"], p["wfp"], act, p["wa"], p["blin"],
            p["wih"], p["whh"], p["bih"], p["bhh"],
            p["wh1"], p["bh1"], p["wh2"], p["bh2"], p["wcr"], p["bcr"])

    def full_spec(a):
        return pl.BlockSpec(a.shape, lambda i, n=a.ndim: (0,) * n)

    in_specs = [full_spec(a) for a in args]
    in_specs[3] = pl.BlockSpec(memory_space=pl.ANY)      # wfp: manual DMA

    return pl.pallas_call(
        _conv2_head_kernel,
        out_shape=jax.ShapeDtypeStruct((B, 1), jnp.float32),
        grid=(1,),
        in_specs=in_specs,
        out_specs=pl.BlockSpec((B, 1), lambda i: (0, 0)),
        scratch_shapes=[
            pltpu.VMEM((dr, Cout * hwp), MXU_DTYPE),     # big weight buffer
            pltpu.VMEM((B, Cout * hwp), jnp.float32),    # flattened features
            pltpu.SemaphoreType.DMA,
        ],
        compiler_params=pltpu.CompilerParams(
            dimension_semantics=("arbitrary",),
            vmem_limit_bytes=8 * 1024 * 1024),
    )(*args)


# ----------------------------------------------------------------------------
# Parameters & end-to-end forward
# ----------------------------------------------------------------------------
def init_params(key, settings):
    d1, d2 = settings['d1'], settings['d2']
    dr, dl = settings['dr'], settings['dl']
    keys = jax.random.split(key, 16)

    def rnd(k, shape, scale=0.05):
        return scale * jax.random.normal(k, shape, dtype=jnp.float32)

    # Conv weights in torch layout (Cout, Cin, kh, kw); patch rows are ordered
    # (ci, dy, dx), so a plain row-major reshape matches (no transposes).
    w1 = rnd(keys[0], (d1, 3, 3, 3));   b1 = rnd(keys[1], (d1,))
    w2 = rnd(keys[2], (d2, d1, 3, 3));  b2 = rnd(keys[3], (d2,))
    wt1 = w1.reshape(d1, 3 * 9).astype(MXU_DTYPE)
    wt2 = w2.reshape(d2, d1 * 9).astype(MXU_DTYPE)

    hw2 = 19 * 19                    # conv2 pooled spatial size
    hwp2 = _round_up(hw2, 128)       # 384: lane-aligned per-channel slab
    out_shape = hw2 * d2             # 23104
    cat_shape = out_shape + 2

    wlin = rnd(keys[4], (dr, cat_shape), scale=0.01); blin = rnd(keys[5], (dr,))
    # Big weight kept transposed (dr, F) so the long axis stays lane-dense,
    # regrouped per conv2 channel and zero-padded to the 384-wide slabs the
    # fused kernel produces (padded feat columns therefore contribute 0).
    wf = wlin[:, :out_shape].reshape(dr, d2, hw2)
    wf = jnp.pad(wf, ((0, 0), (0, 0), (0, hwp2 - hw2)))
    wfp = wf.reshape(dr, d2 * hwp2).astype(MXU_DTYPE)    # (dr, 24576)
    wa = wlin[:, out_shape:].T                           # (2, dr) f32

    # GRU params in torch layout, gate order (r, z, n), fused (in, 3dl)/(dl, 3dl).
    wih = rnd(keys[6], (3 * dl, dr)); whh = rnd(keys[7], (3 * dl, dl))
    bih = rnd(keys[8], (3 * dl,));    bhh = rnd(keys[9], (3 * dl,))

    wh1 = rnd(keys[10], (200, dl));  bh1 = rnd(keys[11], (200,))
    wh2 = rnd(keys[12], (100, 200)); bh2 = rnd(keys[13], (100,))
    wcr = rnd(keys[14], (1, 100));   bcr = rnd(keys[15], (1,))

    return dict(
        wt1=wt1, b1=b1.reshape(d1, 1),
        wt2=wt2, b2=b2.reshape(d2, 1),
        wfp=wfp, wa=wa, blin=blin.reshape(1, dr),
        wih=wih.T, whh=whh.T,
        bih=bih.reshape(1, 3 * dl), bhh=bhh.reshape(1, 3 * dl),
        wh1=wh1.T, bh1=bh1.reshape(1, 200),
        wh2=wh2.T, bh2=bh2.reshape(1, 100),
        wcr=wcr.T, bcr=bcr.reshape(1, 1))


@jax.jit
def critic_forward(params, rgb, action):
    """Mirrors Critic.forward; returns (q_value of shape (B, 1, 1), None)."""
    B = rgb.shape[0]
    d1 = params["wt1"].shape[0]

    x = rgb.reshape(-1, 3, 84, 84).astype(jnp.float32)
    x = jnp.transpose(x, (1, 0, 2, 3))                   # (3, B, 84, 84)

    # conv1 + pool + ReLU (one fused kernel, grid over batch blocks).
    pt1, (Hp1, Wp1, hwp1) = _pool_conv_patches(x, 3, MXU_DTYPE)
    c1 = conv_pool_relu(pt1, params["wt1"], params["b1"],
                        n_batch=B, hwp=hwp1)             # (d1, B*hwp1) bf16

    # conv2 patches built directly from c1's native (C, b, hw) layout.
    a1 = (c1.reshape(d1, B, hwp1)[:, :, :Hp1 * Wp1]
            .reshape(d1, B, Hp1, Wp1))
    pt2, _ = _pool_conv_patches(a1, 3, MXU_DTYPE)

    act = action.reshape(-1, 2).astype(jnp.float32)

    # conv2 + pool + ReLU + flatten + lin + GRU + hl1/hl2/critic, one kernel.
    q = conv2_head(pt2, act, params)                     # (B, 1)
    return q.reshape(B, 1, 1), None


if __name__ == "__main__":
    settings = {'RGB_state_space': (3, 84, 84), 'channels': 3,
                'd1': 8, 'd2': 64, 'dr': 32, 'dl': 32}
    key = jax.random.PRNGKey(0)
    pkey, xkey, akey = jax.random.split(key, 3)
    params = init_params(pkey, settings)

    B = 2  # batch (also the GRU sequence length, per the module's view())
    rgb = jax.random.uniform(xkey, (B, 3, 84, 84), dtype=jnp.float32)
    action = jax.random.uniform(akey, (B, 2), dtype=jnp.float32,
                                minval=-1.0, maxval=1.0)

    q_value, _ = critic_forward(params, rgb, action)
    q_value = jax.block_until_ready(q_value)
    assert q_value.shape == (B, 1, 1)
    assert bool(jnp.all(jnp.isfinite(q_value)))
    print("KERNEL_OK")
</pallas_src>

<mosaic_0001>
module attributes {stable_mosaic.version = 11 : i64} {
  func.func @_conv_pool_relu_kernel(%arg0: i32, %arg1: memref<27x7168xbf16, #tpu.memory_space<vmem>>, %arg2: memref<8x27xbf16, #tpu.memory_space<vmem>>, %arg3: memref<8x1xf32, #tpu.memory_space<vmem>>, %arg4: memref<8x1792xbf16, #tpu.memory_space<vmem>>) attributes {dimension_semantics = [#tpu.dimension_semantics<parallel>], iteration_bounds = array<i64: 2>, scalar_prefetch = 0 : i64, scratch_operands = 0 : i64, tpu.core_type = #tpu.core_type<tc>, window_params = [{transform_indices = @transform_0, window_bounds = array<i64: 27, 7168>}, {pipeline_mode = #tpu.pipeline_mode<synchronous>, transform_indices = @transform_1, window_bounds = array<i64: 8, 27>}, {pipeline_mode = #tpu.pipeline_mode<synchronous>, transform_indices = @transform_2, window_bounds = array<i64: 8, 1>}, {transform_indices = @transform_3, window_bounds = array<i64: 8, 1792>}]} {
    %c0 = arith.constant 0 : index
    %c0_0 = arith.constant 0 : index
    %0 = vector.load %arg2[%c0, %c0_0] : memref<8x27xbf16, #tpu.memory_space<vmem>>, vector<8x27xbf16>
    %c0_1 = arith.constant 0 : index
    %c0_2 = arith.constant 0 : index
    %1 = vector.load %arg1[%c0_1, %c0_2] : memref<27x7168xbf16, #tpu.memory_space<vmem>>, vector<27x1792xbf16>
    %cst = arith.constant dense<0.000000e+00> : vector<8x1792xf32>
    %2 = tpu.matmul %0, %1, %cst {dimension_numbers = #tpu.dot_dimension_numbers<[1], [0], [0], [1], [0, 0, 1, 1], [], []>} : vector<8x27xbf16>, vector<27x1792xbf16>, vector<8x1792xf32> -> vector<8x1792xf32>
    %c0_3 = arith.constant 0 : index
    %c1792 = arith.constant 1792 : index
    %3 = vector.load %arg1[%c0_3, %c1792] : memref<27x7168xbf16, #tpu.memory_space<vmem>>, vector<27x1792xbf16>
    %cst_4 = arith.constant dense<0.000000e+00> : vector<8x1792xf32>
    %4 = tpu.matmul %0, %3, %cst_4 {dimension_numbers = #tpu.dot_dimension_numbers<[1], [0], [0], [1], [0, 0, 1, 1], [], []>} : vector<8x27xbf16>, vector<27x1792xbf16>, vector<8x1792xf32> -> vector<8x1792xf32>
    %5 = arith.maximumf %2, %4 : vector<8x1792xf32>
    %c0_5 = arith.constant 0 : index
    %c3584 = arith.constant 3584 : index
    %6 = vector.load %arg1[%c0_5, %c3584] : memref<27x7168xbf16, #tpu.memory_space<vmem>>, vector<27x1792xbf16>
    %cst_6 = arith.constant dense<0.000000e+00> : vector<8x1792xf32>
    %7 = tpu.matmul %0, %6, %cst_6 {dimension_numbers = #tpu.dot_dimension_numbers<[1], [0], [0], [1], [0, 0, 1, 1], [], []>} : vector<8x27xbf16>, vector<27x1792xbf16>, vector<8x1792xf32> -> vector<8x1792xf32>
    %8 = arith.maximumf %5, %7 : vector<8x1792xf32>
    %c0_7 = arith.constant 0 : index
    %c5376 = arith.constant 5376 : index
    %9 = vector.load %arg1[%c0_7, %c5376] : memref<27x7168xbf16, #tpu.memory_space<vmem>>, vector<27x1792xbf16>
    %cst_8 = arith.constant dense<0.000000e+00> : vector<8x1792xf32>
    %10 = tpu.matmul %0, %9, %cst_8 {dimension_numbers = #tpu.dot_dimension_numbers<[1], [0], [0], [1], [0, 0, 1, 1], [], []>} : vector<8x27xbf16>, vector<27x1792xbf16>, vector<8x1792xf32> -> vector<8x1792xf32>
    %11 = arith.maximumf %8, %10 : vector<8x1792xf32>
    %c0_9 = arith.constant 0 : index
    %c0_10 = arith.constant 0 : index
    %12 = vector.load %arg3[%c0_9, %c0_10] : memref<8x1xf32, #tpu.memory_space<vmem>>, vector<8x1xf32>
    %13 = vector.broadcast %12 : vector<8x1xf32> to vector<8x1792xf32>
    %14 = arith.addf %11, %13 : vector<8x1792xf32>
    %cst_11 = arith.constant 0.000000e+00 : f32
    %15 = vector.broadcast %cst_11 : f32 to vector<8x1792xf32>
    %16 = arith.maximumf %14, %15 : vector<8x1792xf32>
    %17 = arith.truncf %16 : vector<8x1792xf32> to vector<8x1792xbf16>
    %c0_12 = arith.constant 0 : index
    %c0_13 = arith.constant 0 : index
    %18 = vector.load %arg4[%c0_12, %c0_13] : memref<8x1792xbf16, #tpu.memory_space<vmem>>, vector<8x1792xbf16>
    tpu.vector_store %arg4[%c0_12, %c0_13], %17 {strides = array<i32>} : memref<8x1792xbf16, #tpu.memory_space<vmem>>, vector<8x1792xbf16>,
    return
  }
  func.func @transform_0(%arg0: i32) -> (i32, i32) {
    %c0_i32 = arith.constant 0 : i32
    %c0_i32_0 = arith.constant 0 : i32
    return %c0_i32, %arg0 : i32, i32
  }
  func.func @transform_1(%arg0: i32) -> (i32, i32) {
    %c0_i32 = arith.constant 0 : i32
    %c0_i32_0 = arith.constant 0 : i32
    %c0_i32_1 = arith.constant 0 : i32
    return %c0_i32, %c0_i32_0 : i32, i32
  }
  func.func @transform_2(%arg0: i32) -> (i32, i32) {
    %c0_i32 = arith.constant 0 : i32
    %c0_i32_0 = arith.constant 0 : i32
    %c0_i32_1 = arith.constant 0 : i32
    return %c0_i32, %c0_i32_0 : i32, i32
  }
  func.func @transform_3(%arg0: i32) -> (i32, i32) {
    %c0_i32 = arith.constant 0 : i32
    %c0_i32_0 = arith.constant 0 : i32
    return %c0_i32, %arg0 : i32, i32
  }
}

module attributes {stable_mosaic.version = 11 : i64} {
  func.func @_conv2_head_kernel(%arg0: i32, %arg1: memref<72x3072xbf16, #tpu.memory_space<vmem>>, %arg2: memref<64x72xbf16, #tpu.memory_space<vmem>>, %arg3: memref<64x1xf32, #tpu.memory_space<vmem>>, %arg4: memref<32x24576xbf16, #tpu.memory_space<any>>, %arg5: memref<2x2xf32, #tpu.memory_space<vmem>>, %arg6: memref<2x32xf32, #tpu.memory_space<vmem>>, %arg7: memref<1x32xf32, #tpu.memory_space<vmem>>, %arg8: memref<32x96xf32, #tpu.memory_space<vmem>>, %arg9: memref<32x96xf32, #tpu.memory_space<vmem>>, %arg10: memref<1x96xf32, #tpu.memory_space<vmem>>, %arg11: memref<1x96xf32, #tpu.memory_space<vmem>>, %arg12: memref<32x200xf32, #tpu.memory_space<vmem>>, %arg13: memref<1x200xf32, #tpu.memory_space<vmem>>, %arg14: memref<200x100xf32, #tpu.memory_space<vmem>>, %arg15: memref<1x100xf32, #tpu.memory_space<vmem>>, %arg16: memref<100x1xf32, #tpu.memory_space<vmem>>, %arg17: memref<1x1xf32, #tpu.memory_space<vmem>>, %arg18: memref<2x1xf32, #tpu.memory_space<vmem>>, %arg19: memref<32x24576xbf16, #tpu.memory_space<vmem>>, %arg20: memref<2x24576xf32, #tpu.memory_space<vmem>>, %arg21: memref<!tpu.dma_semaphore, #tpu.memory_space<semaphore_mem>>) attributes {dimension_semantics = [#tpu.dimension_semantics<arbitrary>], iteration_bounds = array<i64: 1>, scalar_prefetch = 0 : i64, scratch_operands = 3 : i64, tpu.core_type = #tpu.core_type<tc>, window_params = [{pipeline_mode = #tpu.pipeline_mode<synchronous>, transform_indices = @transform_0, window_bounds = array<i64: 72, 3072>}, {pipeline_mode = #tpu.pipeline_mode<synchronous>, transform_indices = @transform_1, window_bounds = array<i64: 64, 72>}, {pipeline_mode = #tpu.pipeline_mode<synchronous>, transform_indices = @transform_2, window_bounds = array<i64: 64, 1>}, {}, {pipeline_mode = #tpu.pipeline_mode<synchronous>, transform_indices = @transform_4, window_bounds = array<i64: 2, 2>}, {pipeline_mode = #tpu.pipeline_mode<synchronous>, transform_indices = @transform_5, window_bounds = array<i64: 2, 32>}, {pipeline_mode = #tpu.pipeline_mode<synchronous>, transform_indices = @transform_6, window_bounds = array<i64: 1, 32>}, {pipeline_mode = #tpu.pipeline_mode<synchronous>, transform_indices = @transform_7, window_bounds = array<i64: 32, 96>}, {pipeline_mode = #tpu.pipeline_mode<synchronous>, transform_indices = @transform_8, window_bounds = array<i64: 32, 96>}, {pipeline_mode = #tpu.pipeline_mode<synchronous>, transform_indices = @transform_9, window_bounds = array<i64: 1, 96>}, {pipeline_mode = #tpu.pipeline_mode<synchronous>, transform_indices = @transform_10, window_bounds = array<i64: 1, 96>}, {pipeline_mode = #tpu.pipeline_mode<synchronous>, transform_indices = @transform_11, window_bounds = array<i64: 32, 200>}, {pipeline_mode = #tpu.pipeline_mode<synchronous>, transform_indices = @transform_12, window_bounds = array<i64: 1, 200>}, {pipeline_mode = #tpu.pipeline_mode<synchronous>, transform_indices = @transform_13, window_bounds = array<i64: 200, 100>}, {pipeline_mode = #tpu.pipeline_mode<synchronous>, transform_indices = @transform_14, window_bounds = array<i64: 1, 100>}, {pipeline_mode = #tpu.pipeline_mode<synchronous>, transform_indices = @transform_15, window_bounds = array<i64: 100, 1>}, {pipeline_mode = #tpu.pipeline_mode<synchronous>, transform_indices = @transform_16, window_bounds = array<i64: 1, 1>}, {pipeline_mode = #tpu.pipeline_mode<synchronous>, transform_indices = @transform_17, window_bounds = array<i64: 2, 1>}]} {
    tpu.enqueue_dma source(%arg4 : memref<32x24576xbf16, #tpu.memory_space<any>>) target(%arg19 : memref<32x24576xbf16, #tpu.memory_space<vmem>>) target_semaphore(%arg21 : memref<!tpu.dma_semaphore, #tpu.memory_space<semaphore_mem>>)
    %c0 = arith.constant 0 : index
    %c0_0 = arith.constant 0 : index
    %0 = vector.load %arg2[%c0, %c0_0] : memref<64x72xbf16, #tpu.memory_space<vmem>>, vector<64x72xbf16>
    %c0_1 = arith.constant 0 : index
    %c0_2 = arith.constant 0 : index
    %1 = vector.load %arg1[%c0_1, %c0_2] : memref<72x3072xbf16, #tpu.memory_space<vmem>>, vector<72x384xbf16>
    %cst = arith.constant dense<0.000000e+00> : vector<64x384xf32>
    %2 = tpu.matmul %0, %1, %cst {dimension_numbers = #tpu.dot_dimension_numbers<[1], [0], [0], [1], [0, 0, 1, 1], [], []>} : vector<64x72xbf16>, vector<72x384xbf16>, vector<64x384xf32> -> vector<64x384xf32>
    %c0_3 = arith.constant 0 : index
    %c384 = arith.constant 384 : index
    %3 = vector.load %arg1[%c0_3, %c384] : memref<72x3072xbf16, #tpu.memory_space<vmem>>, vector<72x384xbf16>
    %cst_4 = arith.constant dense<0.000000e+00> : vector<64x384xf32>
    %4 = tpu.matmul %0, %3, %cst_4 {dimension_numbers = #tpu.dot_dimension_numbers<[1], [0], [0], [1], [0, 0, 1, 1], [], []>} : vector<64x72xbf16>, vector<72x384xbf16>, vector<64x384xf32> -> vector<64x384xf32>
    %5 = arith.maximumf %2, %4 : vector<64x384xf32>
    %c0_5 = arith.constant 0 : index
    %c768 = arith.constant 768 : index
    %6 = vector.load %arg1[%c0_5, %c768] : memref<72x3072xbf16, #tpu.memory_space<vmem>>, vector<72x384xbf16>
    %cst_6 = arith.constant dense<0.000000e+00> : vector<64x384xf32>
    %7 = tpu.matmul %0, %6, %cst_6 {dimension_numbers = #tpu.dot_dimension_numbers<[1], [0], [0], [1], [0, 0, 1, 1], [], []>} : vector<64x72xbf16>, vector<72x384xbf16>, vector<64x384xf32> -> vector<64x384xf32>
    %8 = arith.maximumf %5, %7 : vector<64x384xf32>
    %c0_7 = arith.constant 0 : index
    %c1152 = arith.constant 1152 : index
    %9 = vector.load %arg1[%c0_7, %c1152] : memref<72x3072xbf16, #tpu.memory_space<vmem>>, vector<72x384xbf16>
    %cst_8 = arith.constant dense<0.000000e+00> : vector<64x384xf32>
    %10 = tpu.matmul %0, %9, %cst_8 {dimension_numbers = #tpu.dot_dimension_numbers<[1], [0], [0], [1], [0, 0, 1, 1], [], []>} : vector<64x72xbf16>, vector<72x384xbf16>, vector<64x384xf32> -> vector<64x384xf32>
    %11 = arith.maximumf %8, %10 : vector<64x384xf32>
    %c0_9 = arith.constant 0 : index
    %c0_10 = arith.constant 0 : index
    %12 = vector.load %arg3[%c0_9, %c0_10] : memref<64x1xf32, #tpu.memory_space<vmem>>, vector<64x1xf32>
    %13 = vector.broadcast %12 : vector<64x1xf32> to vector<64x384xf32>
    %14 = arith.addf %11, %13 : vector<64x384xf32>
    %cst_11 = arith.constant 0.000000e+00 : f32
    %15 = vector.broadcast %cst_11 : f32 to vector<64x384xf32>
    %16 = arith.maximumf %14, %15 : vector<64x384xf32>
    %17 = vector.extract_strided_slice %16 {offsets = [0, 0], sizes = [1, 384], strides = [1, 1]} : vector<64x384xf32> to vector<1x384xf32>
    %c0_12 = arith.constant 0 : index
    %c0_13 = arith.constant 0 : index
    %18 = vector.load %arg20[%c0_12, %c0_13] : memref<2x24576xf32, #tpu.memory_space<vmem>>, vector<1x384xf32>
    tpu.vector_store %arg20[%c0_12, %c0_13], %17 {strides = array<i32>} : memref<2x24576xf32, #tpu.memory_space<vmem>>, vector<1x384xf32>,
    %19 = vector.extract_strided_slice %16 {offsets = [1, 0], sizes = [1, 384], strides = [1, 1]} : vector<64x384xf32> to vector<1x384xf32>
    %c0_14 = arith.constant 0 : index
    %c384_15 = arith.constant 384 : index
    %20 = vector.load %arg20[%c0_14, %c384_15] : memref<2x24576xf32, #tpu.memory_space<vmem>>, vector<1x384xf32>
    tpu.vector_store %arg20[%c0_14, %c384_15], %19 {strides = array<i32>} : memref<2x24576xf32, #tpu.memory_space<vmem>>, vector<1x384xf32>,
    %21 = vector.extract_strided_slice %16 {offsets = [2, 0], sizes = [1, 384], strides = [1, 1]} : vector<64x384xf32> to vector<1x384xf32>
    %c0_16 = arith.constant 0 : index
    %c768_17 = arith.constant 768 : index
    %22 = vector.load %arg20[%c0_16, %c768_17] : memref<2x24576xf32, #tpu.memory_space<vmem>>, vector<1x384xf32>
    tpu.vector_store %arg20[%c0_16, %c768_17], %21 {strides = array<i32>} : memref<2x24576xf32, #tpu.memory_space<vmem>>, vector<1x384xf32>,
    %23 = vector.extract_strided_slice %16 {offsets = [3, 0], sizes = [1, 384], strides = [1, 1]} : vector<64x384xf32> to vector<1x384xf32>
    %c0_18 = arith.constant 0 : index
    %c1152_19 = arith.constant 1152 : index
    %24 = vector.load %arg20[%c0_18, %c1152_19] : memref<2x24576xf32, #tpu.memory_space<vmem>>, vector<1x384xf32>
    tpu.vector_store %arg20[%c0_18, %c1152_19], %23 {strides = array<i32>} : memref<2x24576xf32, #tpu.memory_space<vmem>>, vector<1x384xf32>,
    %25 = vector.extract_strided_slice %16 {offsets = [4, 0], sizes = [1, 384], strides = [1, 1]} : vector<64x384xf32> to vector<1x384xf32>
    %c0_20 = arith.constant 0 : index
    %c1536 = arith.constant 1536 : index
    %26 = vector.load %arg20[%c0_20, %c1536] : memref<2x24576xf32, #tpu.memory_space<vmem>>, vector<1x384xf32>
    tpu.vector_store %arg20[%c0_20, %c1536], %25 {strides = array<i32>} : memref<2x24576xf32, #tpu.memory_space<vmem>>, vector<1x384xf32>,
    %27 = vector.extract_strided_slice %16 {offsets = [5, 0], sizes = [1, 384], strides = [1, 1]} : vector<64x384xf32> to vector<1x384xf32>
    %c0_21 = arith.constant 0 : index
    %c1920 = arith.constant 1920 : index
    %28 = vector.load %arg20[%c0_21, %c1920] : memref<2x24576xf32, #tpu.memory_space<vmem>>, vector<1x384xf32>
    tpu.vector_store %arg20[%c0_21, %c1920], %27 {strides = array<i32>} : memref<2x24576xf32, #tpu.memory_space<vmem>>, vector<1x384xf32>,
    %29 = vector.extract_strided_slice %16 {offsets = [6, 0], sizes = [1, 384], strides = [1, 1]} : vector<64x384xf32> to vector<1x384xf32>
    %c0_22 = arith.constant 0 : index
    %c2304 = arith.constant 2304 : index
    %30 = vector.load %arg20[%c0_22, %c2304] : memref<2x24576xf32, #tpu.memory_space<vmem>>, vector<1x384xf32>
    tpu.vector_store %arg20[%c0_22, %c2304], %29 {strides = array<i32>} : memref<2x24576xf32, #tpu.memory_space<vmem>>, vector<1x384xf32>,
    %31 = vector.extract_strided_slice %16 {offsets = [7, 0], sizes = [1, 384], strides = [1, 1]} : vector<64x384xf32> to vector<1x384xf32>
    %c0_23 = arith.constant 0 : index
    %c2688 = arith.constant 2688 : index
    %32 = vector.load %arg20[%c0_23, %c2688] : memref<2x24576xf32, #tpu.memory_space<vmem>>, vector<1x384xf32>
    tpu.vector_store %arg20[%c0_23, %c2688], %31 {strides = array<i32>} : memref<2x24576xf32, #tpu.memory_space<vmem>>, vector<1x384xf32>,
    %33 = vector.extract_strided_slice %16 {offsets = [8, 0], sizes = [1, 384], strides = [1, 1]} : vector<64x384xf32> to vector<1x384xf32>
    %c0_24 = arith.constant 0 : index
    %c3072 = arith.constant 3072 : index
    %34 = vector.load %arg20[%c0_24, %c3072] : memref<2x24576xf32, #tpu.memory_space<vmem>>, vector<1x384xf32>
    tpu.vector_store %arg20[%c0_24, %c3072], %33 {strides = array<i32>} : memref<2x24576xf32, #tpu.memory_space<vmem>>, vector<1x384xf32>,
    %35 = vector.extract_strided_slice %16 {offsets = [9, 0], sizes = [1, 384], strides = [1, 1]} : vector<64x384xf32> to vector<1x384xf32>
    %c0_25 = arith.constant 0 : index
    %c3456 = arith.constant 3456 : index
    %36 = vector.load %arg20[%c0_25, %c3456] : memref<2x24576xf32, #tpu.memory_space<vmem>>, vector<1x384xf32>
    tpu.vector_store %arg20[%c0_25, %c3456], %35 {strides = array<i32>} : memref<2x24576xf32, #tpu.memory_space<vmem>>, vector<1x384xf32>,
    %37 = vector.extract_strided_slice %16 {offsets = [10, 0], sizes = [1, 384], strides = [1, 1]} : vector<64x384xf32> to vector<1x384xf32>
    %c0_26 = arith.constant 0 : index
    %c3840 = arith.constant 3840 : index
    %38 = vector.load %arg20[%c0_26, %c3840] : memref<2x24576xf32, #tpu.memory_space<vmem>>, vector<1x384xf32>
    tpu.vector_store %arg20[%c0_26, %c3840], %37 {strides = array<i32>} : memref<2x24576xf32, #tpu.memory_space<vmem>>, vector<1x384xf32>,
    %39 = vector.extract_strided_slice %16 {offsets = [11, 0], sizes = [1, 384], strides = [1, 1]} : vector<64x384xf32> to vector<1x384xf32>
    %c0_27 = arith.constant 0 : index
    %c4224 = arith.constant 4224 : index
    %40 = vector.load %arg20[%c0_27, %c4224] : memref<2x24576xf32, #tpu.memory_space<vmem>>, vector<1x384xf32>
    tpu.vector_store %arg20[%c0_27, %c4224], %39 {strides = array<i32>} : memref<2x24576xf32, #tpu.memory_space<vmem>>, vector<1x384xf32>,
    %41 = vector.extract_strided_slice %16 {offsets = [12, 0], sizes = [1, 384], strides = [1, 1]} : vector<64x384xf32> to vector<1x384xf32>
    %c0_28 = arith.constant 0 : index
    %c4608 = arith.constant 4608 : index
    %42 = vector.load %arg20[%c0_28, %c4608] : memref<2x24576xf32, #tpu.memory_space<vmem>>, vector<1x384xf32>
    tpu.vector_store %arg20[%c0_28, %c4608], %41 {strides = array<i32>} : memref<2x24576xf32, #tpu.memory_space<vmem>>, vector<1x384xf32>,
    %43 = vector.extract_strided_slice %16 {offsets = [13, 0], sizes = [1, 384], strides = [1, 1]} : vector<64x384xf32> to vector<1x384xf32>
    %c0_29 = arith.constant 0 : index
    %c4992 = arith.constant 4992 : index
    %44 = vector.load %arg20[%c0_29, %c4992] : memref<2x24576xf32, #tpu.memory_space<vmem>>, vector<1x384xf32>
    tpu.vector_store %arg20[%c0_29, %c4992], %43 {strides = array<i32>} : memref<2x24576xf32, #tpu.memory_space<vmem>>, vector<1x384xf32>,
    %45 = vector.extract_strided_slice %16 {offsets = [14, 0], sizes = [1, 384], strides = [1, 1]} : vector<64x384xf32> to vector<1x384xf32>
    %c0_30 = arith.constant 0 : index
    %c5376 = arith.constant 5376 : index
    %46 = vector.load %arg20[%c0_30, %c5376] : memref<2x24576xf32, #tpu.memory_space<vmem>>, vector<1x384xf32>
    tpu.vector_store %arg20[%c0_30, %c5376], %45 {strides = array<i32>} : memref<2x24576xf32, #tpu.memory_space<vmem>>, vector<1x384xf32>,
    %47 = vector.extract_strided_slice %16 {offsets = [15, 0], sizes = [1, 384], strides = [1, 1]} : vector<64x384xf32> to vector<1x384xf32>
    %c0_31 = arith.constant 0 : index
    %c5760 = arith.constant 5760 : index
    %48 = vector.load %arg20[%c0_31, %c5760] : memref<2x24576xf32, #tpu.memory_space<vmem>>, vector<1x384xf32>
    tpu.vector_store %arg20[%c0_31, %c5760], %47 {strides = array<i32>} : memref<2x24576xf32, #tpu.memory_space<vmem>>, vector<1x384xf32>,
    %49 = vector.extract_strided_slice %16 {offsets = [16, 0], sizes = [1, 384], strides = [1, 1]} : vector<64x384xf32> to vector<1x384xf32>
    %c0_32 = arith.constant 0 : index
    %c6144 = arith.constant 6144 : index
    %50 = vector.load %arg20[%c0_32, %c6144] : memref<2x24576xf32, #tpu.memory_space<vmem>>, vector<1x384xf32>
    tpu.vector_store %arg20[%c0_32, %c6144], %49 {strides = array<i32>} : memref<2x24576xf32, #tpu.memory_space<vmem>>, vector<1x384xf32>,
    %51 = vector.extract_strided_slice %16 {offsets = [17, 0], sizes = [1, 384], strides = [1, 1]} : vector<64x384xf32> to vector<1x384xf32>
    %c0_33 = arith.constant 0 : index
    %c6528 = arith.constant 6528 : index
    %52 = vector.load %arg20[%c0_33, %c6528] : memref<2x24576xf32, #tpu.memory_space<vmem>>, vector<1x384xf32>
    tpu.vector_store %arg20[%c0_33, %c6528], %51 {strides = array<i32>} : memref<2x24576xf32, #tpu.memory_space<vmem>>, vector<1x384xf32>,
    %53 = vector.extract_strided_slice %16 {offsets = [18, 0], sizes = [1, 384], strides = [1, 1]} : vector<64x384xf32> to vector<1x384xf32>
    %c0_34 = arith.constant 0 : index
    %c6912 = arith.constant 6912 : index
    %54 = vector.load %arg20[%c0_34, %c6912] : memref<2x24576xf32, #tpu.memory_space<vmem>>, vector<1x384xf32>
    tpu.vector_store %arg20[%c0_34, %c6912], %53 {strides = array<i32>} : memref<2x24576xf32, #tpu.memory_space<vmem>>, vector<1x384xf32>,
    %55 = vector.extract_strided_slice %16 {offsets = [19, 0], sizes = [1, 384], strides = [1, 1]} : vector<64x384xf32> to vector<1x384xf32>
    %c0_35 = arith.constant 0 : index
    %c7296 = arith.constant 7296 : index
    %56 = vector.load %arg20[%c0_35, %c7296] : memref<2x24576xf32, #tpu.memory_space<vmem>>, vector<1x384xf32>
    tpu.vector_store %arg20[%c0_35, %c7296], %55 {strides = array<i32>} : memref<2x24576xf32, #tpu.memory_space<vmem>>, vector<1x384xf32>,
    %57 = vector.extract_strided_slice %16 {offsets = [20, 0], sizes = [1, 384], strides = [1, 1]} : vector<64x384xf32> to vector<1x384xf32>
    %c0_36 = arith.constant 0 : index
    %c7680 = arith.constant 7680 : index
    %58 = vector.load %arg20[%c0_36, %c7680] : memref<2x24576xf32, #tpu.memory_space<vmem>>, vector<1x384xf32>
    tpu.vector_store %arg20[%c0_36, %c7680], %57 {strides = array<i32>} : memref<2x24576xf32, #tpu.memory_space<vmem>>, vector<1x384xf32>,
    %59 = vector.extract_strided_slice %16 {offsets = [21, 0], sizes = [1, 384], strides = [1, 1]} : vector<64x384xf32> to vector<1x384xf32>
    %c0_37 = arith.constant 0 : index
    %c8064 = arith.constant 8064 : index
    %60 = vector.load %arg20[%c0_37, %c8064] : memref<2x24576xf32, #tpu.memory_space<vmem>>, vector<1x384xf32>
    tpu.vector_store %arg20[%c0_37, %c8064], %59 {strides = array<i32>} : memref<2x24576xf32, #tpu.memory_space<vmem>>, vector<1x384xf32>,
    %61 = vector.extract_strided_slice %16 {offsets = [22, 0], sizes = [1, 384], strides = [1, 1]} : vector<64x384xf32> to vector<1x384xf32>
    %c0_38 = arith.constant 0 : index
    %c8448 = arith.constant 8448 : index
    %62 = vector.load %arg20[%c0_38, %c8448] : memref<2x24576xf32, #tpu.memory_space<vmem>>, vector<1x384xf32>
    tpu.vector_store %arg20[%c0_38, %c8448], %61 {strides = array<i32>} : memref<2x24576xf32, #tpu.memory_space<vmem>>, vector<1x384xf32>,
    %63 = vector.extract_strided_slice %16 {offsets = [23, 0], sizes = [1, 384], strides = [1, 1]} : vector<64x384xf32> to vector<1x384xf32>
    %c0_39 = arith.constant 0 : index
    %c8832 = arith.constant 8832 : index
    %64 = vector.load %arg20[%c0_39, %c8832] : memref<2x24576xf32, #tpu.memory_space<vmem>>, vector<1x384xf32>
    tpu.vector_store %arg20[%c0_39, %c8832], %63 {strides = array<i32>} : memref<2x24576xf32, #tpu.memory_space<vmem>>, vector<1x384xf32>,
    %65 = vector.extract_strided_slice %16 {offsets = [24, 0], sizes = [1, 384], strides = [1, 1]} : vector<64x384xf32> to vector<1x384xf32>
    %c0_40 = arith.constant 0 : index
    %c9216 = arith.constant 9216 : index
    %66 = vector.load %arg20[%c0_40, %c9216] : memref<2x24576xf32, #tpu.memory_space<vmem>>, vector<1x384xf32>
    tpu.vector_store %arg20[%c0_40, %c9216], %65 {strides = array<i32>} : memref<2x24576xf32, #tpu.memory_space<vmem>>, vector<1x384xf32>,
    %67 = vector.extract_strided_slice %16 {offsets = [25, 0], sizes = [1, 384], strides = [1, 1]} : vector<64x384xf32> to vector<1x384xf32>
    %c0_41 = arith.constant 0 : index
    %c9600 = arith.constant 9600 : index
    %68 = vector.load %arg20[%c0_41, %c9600] : memref<2x24576xf32, #tpu.memory_space<vmem>>, vector<1x384xf32>
    tpu.vector_store %arg20[%c0_41, %c9600], %67 {strides = array<i32>} : memref<2x24576xf32, #tpu.memory_space<vmem>>, vector<1x384xf32>,
    %69 = vector.extract_strided_slice %16 {offsets = [26, 0], sizes = [1, 384], strides = [1, 1]} : vector<64x384xf32> to vector<1x384xf32>
    %c0_42 = arith.constant 0 : index
    %c9984 = arith.constant 9984 : index
    %70 = vector.load %arg20[%c0_42, %c9984] : memref<2x24576xf32, #tpu.memory_space<vmem>>, vector<1x384xf32>
    tpu.vector_store %arg20[%c0_42, %c9984], %69 {strides = array<i32>} : memref<2x24576xf32, #tpu.memory_space<vmem>>, vector<1x384xf32>,
    %71 = vector.extract_strided_slice %16 {offsets = [27, 0], sizes = [1, 384], strides = [1, 1]} : vector<64x384xf32> to vector<1x384xf32>
    %c0_43 = arith.constant 0 : index
    %c10368 = arith.constant 10368 : index
    %72 = vector.load %arg20[%c0_43, %c10368] : memref<2x24576xf32, #tpu.memory_space<vmem>>, vector<1x384xf32>
    tpu.vector_store %arg20[%c0_43, %c10368], %71 {strides = array<i32>} : memref<2x24576xf32, #tpu.memory_space<vmem>>, vector<1x384xf32>,
    %73 = vector.extract_strided_slice %16 {offsets = [28, 0], sizes = [1, 384], strides = [1, 1]} : vector<64x384xf32> to vector<1x384xf32>
    %c0_44 = arith.constant 0 : index
    %c10752 = arith.constant 10752 : index
    %74 = vector.load %arg20[%c0_44, %c10752] : memref<2x24576xf32, #tpu.memory_space<vmem>>, vector<1x384xf32>
    tpu.vector_store %arg20[%c0_44, %c10752], %73 {strides = array<i32>} : memref<2x24576xf32, #tpu.memory_space<vmem>>, vector<1x384xf32>,
    %75 = vector.extract_strided_slice %16 {offsets = [29, 0], sizes = [1, 384], strides = [1, 1]} : vector<64x384xf32> to vector<1x384xf32>
    %c0_45 = arith.constant 0 : index
    %c11136 = arith.constant 11136 : index
    %76 = vector.load %arg20[%c0_45, %c11136] : memref<2x24576xf32, #tpu.memory_space<vmem>>, vector<1x384xf32>
    tpu.vector_store %arg20[%c0_45, %c11136], %75 {strides = array<i32>} : memref<2x24576xf32, #tpu.memory_space<vmem>>, vector<1x384xf32>,
    %77 = vector.extract_strided_slice %16 {offsets = [30, 0], sizes = [1, 384], strides = [1, 1]} : vector<64x384xf32> to vector<1x384xf32>
    %c0_46 = arith.constant 0 : index
    %c11520 = arith.constant 11520 : index
    %78 = vector.load %arg20[%c0_46, %c11520] : memref<2x24576xf32, #tpu.memory_space<vmem>>, vector<1x384xf32>
    tpu.vector_store %arg20[%c0_46, %c11520], %77 {strides = array<i32>} : memref<2x24576xf32, #tpu.memory_space<vmem>>, vector<1x384xf32>,
    %79 = vector.extract_strided_slice %16 {offsets = [31, 0], sizes = [1, 384], strides = [1, 1]} : vector<64x384xf32> to vector<1x384xf32>
    %c0_47 = arith.constant 0 : index
    %c11904 = arith.constant 11904 : index
    %80 = vector.load %arg20[%c0_47, %c11904] : memref<2x24576xf32, #tpu.memory_space<vmem>>, vector<1x384xf32>
    tpu.vector_store %arg20[%c0_47, %c11904], %79 {strides = array<i32>} : memref<2x24576xf32, #tpu.memory_space<vmem>>, vector<1x384xf32>,
    %81 = vector.extract_strided_slice %16 {offsets = [32, 0], sizes = [1, 384], strides = [1, 1]} : vector<64x384xf32> to vector<1x384xf32>
    %c0_48 = arith.constant 0 : index
    %c12288 = arith.constant 12288 : index
    %82 = vector.load %arg20[%c0_48, %c12288] : memref<2x24576xf32, #tpu.memory_space<vmem>>, vector<1x384xf32>
    tpu.vector_store %arg20[%c0_48, %c12288], %81 {strides = array<i32>} : memref<2x24576xf32, #tpu.memory_space<vmem>>, vector<1x384xf32>,
    %83 = vector.extract_strided_slice %16 {offsets = [33, 0], sizes = [1, 384], strides = [1, 1]} : vector<64x384xf32> to vector<1x384xf32>
    %c0_49 = arith.constant 0 : index
    %c12672 = arith.constant 12672 : index
    %84 = vector.load %arg20[%c0_49, %c12672] : memref<2x24576xf32, #tpu.memory_space<vmem>>, vector<1x384xf32>
    tpu.vector_store %arg20[%c0_49, %c12672], %83 {strides = array<i32>} : memref<2x24576xf32, #tpu.memory_space<vmem>>, vector<1x384xf32>,
    %85 = vector.extract_strided_slice %16 {offsets = [34, 0], sizes = [1, 384], strides = [1, 1]} : vector<64x384xf32> to vector<1x384xf32>
    %c0_50 = arith.constant 0 : index
    %c13056 = arith.constant 13056 : index
    %86 = vector.load %arg20[%c0_50, %c13056] : memref<2x24576xf32, #tpu.memory_space<vmem>>, vector<1x384xf32>
    tpu.vector_store %arg20[%c0_50, %c13056], %85 {strides = array<i32>} : memref<2x24576xf32, #tpu.memory_space<vmem>>, vector<1x384xf32>,
    %87 = vector.extract_strided_slice %16 {offsets = [35, 0], sizes = [1, 384], strides = [1, 1]} : vector<64x384xf32> to vector<1x384xf32>
    %c0_51 = arith.constant 0 : index
    %c13440 = arith.constant 13440 : index
    %88 = vector.load %arg20[%c0_51, %c13440] : memref<2x24576xf32, #tpu.memory_space<vmem>>, vector<1x384xf32>
    tpu.vector_store %arg20[%c0_51, %c13440], %87 {strides = array<i32>} : memref<2x24576xf32, #tpu.memory_space<vmem>>, vector<1x384xf32>,
    %89 = vector.extract_strided_slice %16 {offsets = [36, 0], sizes = [1, 384], strides = [1, 1]} : vector<64x384xf32> to vector<1x384xf32>
    %c0_52 = arith.constant 0 : index
    %c13824 = arith.constant 13824 : index
    %90 = vector.load %arg20[%c0_52, %c13824] : memref<2x24576xf32, #tpu.memory_space<vmem>>, vector<1x384xf32>
    tpu.vector_store %arg20[%c0_52, %c13824], %89 {strides = array<i32>} : memref<2x24576xf32, #tpu.memory_space<vmem>>, vector<1x384xf32>,
    %91 = vector.extract_strided_slice %16 {offsets = [37, 0], sizes = [1, 384], strides = [1, 1]} : vector<64x384xf32> to vector<1x384xf32>
    %c0_53 = arith.constant 0 : index
    %c14208 = arith.constant 14208 : index
    %92 = vector.load %arg20[%c0_53, %c14208] : memref<2x24576xf32, #tpu.memory_space<vmem>>, vector<1x384xf32>
    tpu.vector_store %arg20[%c0_53, %c14208], %91 {strides = array<i32>} : memref<2x24576xf32, #tpu.memory_space<vmem>>, vector<1x384xf32>,
    %93 = vector.extract_strided_slice %16 {offsets = [38, 0], sizes = [1, 384], strides = [1, 1]} : vector<64x384xf32> to vector<1x384xf32>
    %c0_54 = arith.constant 0 : index
    %c14592 = arith.constant 14592 : index
    %94 = vector.load %arg20[%c0_54, %c14592] : memref<2x24576xf32, #tpu.memory_space<vmem>>, vector<1x384xf32>
    tpu.vector_store %arg20[%c0_54, %c14592], %93 {strides = array<i32>} : memref<2x24576xf32, #tpu.memory_space<vmem>>, vector<1x384xf32>,
    %95 = vector.extract_strided_slice %16 {offsets = [39, 0], sizes = [1, 384], strides = [1, 1]} : vector<64x384xf32> to vector<1x384xf32>
    %c0_55 = arith.constant 0 : index
    %c14976 = arith.constant 14976 : index
    %96 = vector.load %arg20[%c0_55, %c14976] : memref<2x24576xf32, #tpu.memory_space<vmem>>, vector<1x384xf32>
    tpu.vector_store %arg20[%c0_55, %c14976], %95 {strides = array<i32>} : memref<2x24576xf32, #tpu.memory_space<vmem>>, vector<1x384xf32>,
    %97 = vector.extract_strided_slice %16 {offsets = [40, 0], sizes = [1, 384], strides = [1, 1]} : vector<64x384xf32> to vector<1x384xf32>
    %c0_56 = arith.constant 0 : index
    %c15360 = arith.constant 15360 : index
    %98 = vector.load %arg20[%c0_56, %c15360] : memref<2x24576xf32, #tpu.memory_space<vmem>>, vector<1x384xf32>
    tpu.vector_store %arg20[%c0_56, %c15360], %97 {strides = array<i32>} : memref<2x24576xf32, #tpu.memory_space<vmem>>, vector<1x384xf32>,
    %99 = vector.extract_strided_slice %16 {offsets = [41, 0], sizes = [1, 384], strides = [1, 1]} : vector<64x384xf32> to vector<1x384xf32>
    %c0_57 = arith.constant 0 : index
    %c15744 = arith.constant 15744 : index
    %100 = vector.load %arg20[%c0_57, %c15744] : memref<2x24576xf32, #tpu.memory_space<vmem>>, vector<1x384xf32>
    tpu.vector_store %arg20[%c0_57, %c15744], %99 {strides = array<i32>} : memref<2x24576xf32, #tpu.memory_space<vmem>>, vector<1x384xf32>,
    %101 = vector.extract_strided_slice %16 {offsets = [42, 0], sizes = [1, 384], strides = [1, 1]} : vector<64x384xf32> to vector<1x384xf32>
    %c0_58 = arith.constant 0 : index
    %c16128 = arith.constant 16128 : index
    %102 = vector.load %arg20[%c0_58, %c16128] : memref<2x24576xf32, #tpu.memory_space<vmem>>, vector<1x384xf32>
    tpu.vector_store %arg20[%c0_58, %c16128], %101 {strides = array<i32>} : memref<2x24576xf32, #tpu.memory_space<vmem>>, vector<1x384xf32>,
    %103 = vector.extract_strided_slice %16 {offsets = [43, 0], sizes = [1, 384], strides = [1, 1]} : vector<64x384xf32> to vector<1x384xf32>
    %c0_59 = arith.constant 0 : index
    %c16512 = arith.constant 16512 : index
    %104 = vector.load %arg20[%c0_59, %c16512] : memref<2x24576xf32, #tpu.memory_space<vmem>>, vector<1x384xf32>
    tpu.vector_store %arg20[%c0_59, %c16512], %103 {strides = array<i32>} : memref<2x24576xf32, #tpu.memory_space<vmem>>, vector<1x384xf32>,
    %105 = vector.extract_strided_slice %16 {offsets = [44, 0], sizes = [1, 384], strides = [1, 1]} : vector<64x384xf32> to vector<1x384xf32>
    %c0_60 = arith.constant 0 : index
    %c16896 = arith.constant 16896 : index
    %106 = vector.load %arg20[%c0_60, %c16896] : memref<2x24576xf32, #tpu.memory_space<vmem>>, vector<1x384xf32>
    tpu.vector_store %arg20[%c0_60, %c16896], %105 {strides = array<i32>} : memref<2x24576xf32, #tpu.memory_space<vmem>>, vector<1x384xf32>,
    %107 = vector.extract_strided_slice %16 {offsets = [45, 0], sizes = [1, 384], strides = [1, 1]} : vector<64x384xf32> to vector<1x384xf32>
    %c0_61 = arith.constant 0 : index
    %c17280 = arith.constant 17280 : index
    %108 = vector.load %arg20[%c0_61, %c17280] : memref<2x24576xf32, #tpu.memory_space<vmem>>, vector<1x384xf32>
    tpu.vector_store %arg20[%c0_61, %c17280], %107 {strides = array<i32>} : memref<2x24576xf32, #tpu.memory_space<vmem>>, vector<1x384xf32>,
    %109 = vector.extract_strided_slice %16 {offsets = [46, 0], sizes = [1, 384], strides = [1, 1]} : vector<64x384xf32> to vector<1x384xf32>
    %c0_62 = arith.constant 0 : index
    %c17664 = arith.constant 17664 : index
    %110 = vector.load %arg20[%c0_62, %c17664] : memref<2x24576xf32, #tpu.memory_space<vmem>>, vector<1x384xf32>
    tpu.vector_store %arg20[%c0_62, %c17664], %109 {strides = array<i32>} : memref<2x24576xf32, #tpu.memory_space<vmem>>, vector<1x384xf32>,
    %111 = vector.extract_strided_slice %16 {offsets = [47, 0], sizes = [1, 384], strides = [1, 1]} : vector<64x384xf32> to vector<1x384xf32>
    %c0_63 = arith.constant 0 : index
    %c18048 = arith.constant 18048 : index
    %112 = vector.load %arg20[%c0_63, %c18048] : memref<2x24576xf32, #tpu.memory_space<vmem>>, vector<1x384xf32>
    tpu.vector_store %arg20[%c0_63, %c18048], %111 {strides = array<i32>} : memref<2x24576xf32, #tpu.memory_space<vmem>>, vector<1x384xf32>,
    %113 = vector.extract_strided_slice %16 {offsets = [48, 0], sizes = [1, 384], strides = [1, 1]} : vector<64x384xf32> to vector<1x384xf32>
    %c0_64 = arith.constant 0 : index
    %c18432 = arith.constant 18432 : index
    %114 = vector.load %arg20[%c0_64, %c18432] : memref<2x24576xf32, #tpu.memory_space<vmem>>, vector<1x384xf32>
    tpu.vector_store %arg20[%c0_64, %c18432], %113 {strides = array<i32>} : memref<2x24576xf32, #tpu.memory_space<vmem>>, vector<1x384xf32>,
    %115 = vector.extract_strided_slice %16 {offsets = [49, 0], sizes = [1, 384], strides = [1, 1]} : vector<64x384xf32> to vector<1x384xf32>
    %c0_65 = arith.constant 0 : index
    %c18816 = arith.constant 18816 : index
    %116 = vector.load %arg20[%c0_65, %c18816] : memref<2x24576xf32, #tpu.memory_space<vmem>>, vector<1x384xf32>
    tpu.vector_store %arg20[%c0_65, %c18816], %115 {strides = array<i32>} : memref<2x24576xf32, #tpu.memory_space<vmem>>, vector<1x384xf32>,
    %117 = vector.extract_strided_slice %16 {offsets = [50, 0], sizes = [1, 384], strides = [1, 1]} : vector<64x384xf32> to vector<1x384xf32>
    %c0_66 = arith.constant 0 : index
    %c19200 = arith.constant 19200 : index
    %118 = vector.load %arg20[%c0_66, %c19200] : memref<2x24576xf32, #tpu.memory_space<vmem>>, vector<1x384xf32>
    tpu.vector_store %arg20[%c0_66, %c19200], %117 {strides = array<i32>} : memref<2x24576xf32, #tpu.memory_space<vmem>>, vector<1x384xf32>,
    %119 = vector.extract_strided_slice %16 {offsets = [51, 0], sizes = [1, 384], strides = [1, 1]} : vector<64x384xf32> to vector<1x384xf32>
    %c0_67 = arith.constant 0 : index
    %c19584 = arith.constant 19584 : index
    %120 = vector.load %arg20[%c0_67, %c19584] : memref<2x24576xf32, #tpu.memory_space<vmem>>, vector<1x384xf32>
    tpu.vector_store %arg20[%c0_67, %c19584], %119 {strides = array<i32>} : memref<2x24576xf32, #tpu.memory_space<vmem>>, vector<1x384xf32>,
    %121 = vector.extract_strided_slice %16 {offsets = [52, 0], sizes = [1, 384], strides = [1, 1]} : vector<64x384xf32> to vector<1x384xf32>
    %c0_68 = arith.constant 0 : index
    %c19968 = arith.constant 19968 : index
    %122 = vector.load %arg20[%c0_68, %c19968] : memref<2x24576xf32, #tpu.memory_space<vmem>>, vector<1x384xf32>
    tpu.vector_store %arg20[%c0_68, %c19968], %121 {strides = array<i32>} : memref<2x24576xf32, #tpu.memory_space<vmem>>, vector<1x384xf32>,
    %123 = vector.extract_strided_slice %16 {offsets = [53, 0], sizes = [1, 384], strides = [1, 1]} : vector<64x384xf32> to vector<1x384xf32>
    %c0_69 = arith.constant 0 : index
    %c20352 = arith.constant 20352 : index
    %124 = vector.load %arg20[%c0_69, %c20352] : memref<2x24576xf32, #tpu.memory_space<vmem>>, vector<1x384xf32>
    tpu.vector_store %arg20[%c0_69, %c20352], %123 {strides = array<i32>} : memref<2x24576xf32, #tpu.memory_space<vmem>>, vector<1x384xf32>,
    %125 = vector.extract_strided_slice %16 {offsets = [54, 0], sizes = [1, 384], strides = [1, 1]} : vector<64x384xf32> to vector<1x384xf32>
    %c0_70 = arith.constant 0 : index
    %c20736 = arith.constant 20736 : index
    %126 = vector.load %arg20[%c0_70, %c20736] : memref<2x24576xf32, #tpu.memory_space<vmem>>, vector<1x384xf32>
    tpu.vector_store %arg20[%c0_70, %c20736], %125 {strides = array<i32>} : memref<2x24576xf32, #tpu.memory_space<vmem>>, vector<1x384xf32>,
    %127 = vector.extract_strided_slice %16 {offsets = [55, 0], sizes = [1, 384], strides = [1, 1]} : vector<64x384xf32> to vector<1x384xf32>
    %c0_71 = arith.constant 0 : index
    %c21120 = arith.constant 21120 : index
    %128 = vector.load %arg20[%c0_71, %c21120] : memref<2x24576xf32, #tpu.memory_space<vmem>>, vector<1x384xf32>
    tpu.vector_store %arg20[%c0_71, %c21120], %127 {strides = array<i32>} : memref<2x24576xf32, #tpu.memory_space<vmem>>, vector<1x384xf32>,
    %129 = vector.extract_strided_slice %16 {offsets = [56, 0], sizes = [1, 384], strides = [1, 1]} : vector<64x384xf32> to vector<1x384xf32>
    %c0_72 = arith.constant 0 : index
    %c21504 = arith.constant 21504 : index
    %130 = vector.load %arg20[%c0_72, %c21504] : memref<2x24576xf32, #tpu.memory_space<vmem>>, vector<1x384xf32>
    tpu.vector_store %arg20[%c0_72, %c21504], %129 {strides = array<i32>} : memref<2x24576xf32, #tpu.memory_space<vmem>>, vector<1x384xf32>,
    %131 = vector.extract_strided_slice %16 {offsets = [57, 0], sizes = [1, 384], strides = [1, 1]} : vector<64x384xf32> to vector<1x384xf32>
    %c0_73 = arith.constant 0 : index
    %c21888 = arith.constant 21888 : index
    %132 = vector.load %arg20[%c0_73, %c21888] : memref<2x24576xf32, #tpu.memory_space<vmem>>, vector<1x384xf32>
    tpu.vector_store %arg20[%c0_73, %c21888], %131 {strides = array<i32>} : memref<2x24576xf32, #tpu.memory_space<vmem>>, vector<1x384xf32>,
    %133 = vector.extract_strided_slice %16 {offsets = [58, 0], sizes = [1, 384], strides = [1, 1]} : vector<64x384xf32> to vector<1x384xf32>
    %c0_74 = arith.constant 0 : index
    %c22272 = arith.constant 22272 : index
    %134 = vector.load %arg20[%c0_74, %c22272] : memref<2x24576xf32, #tpu.memory_space<vmem>>, vector<1x384xf32>
    tpu.vector_store %arg20[%c0_74, %c22272], %133 {strides = array<i32>} : memref<2x24576xf32, #tpu.memory_space<vmem>>, vector<1x384xf32>,
    %135 = vector.extract_strided_slice %16 {offsets = [59, 0], sizes = [1, 384], strides = [1, 1]} : vector<64x384xf32> to vector<1x384xf32>
    %c0_75 = arith.constant 0 : index
    %c22656 = arith.constant 22656 : index
    %136 = vector.load %arg20[%c0_75, %c22656] : memref<2x24576xf32, #tpu.memory_space<vmem>>, vector<1x384xf32>
    tpu.vector_store %arg20[%c0_75, %c22656], %135 {strides = array<i32>} : memref<2x24576xf32, #tpu.memory_space<vmem>>, vector<1x384xf32>,
    %137 = vector.extract_strided_slice %16 {offsets = [60, 0], sizes = [1, 384], strides = [1, 1]} : vector<64x384xf32> to vector<1x384xf32>
    %c0_76 = arith.constant 0 : index
    %c23040 = arith.constant 23040 : index
    %138 = vector.load %arg20[%c0_76, %c23040] : memref<2x24576xf32, #tpu.memory_space<vmem>>, vector<1x384xf32>
    tpu.vector_store %arg20[%c0_76, %c23040], %137 {strides = array<i32>} : memref<2x24576xf32, #tpu.memory_space<vmem>>, vector<1x384xf32>,
    %139 = vector.extract_strided_slice %16 {offsets = [61, 0], sizes = [1, 384], strides = [1, 1]} : vector<64x384xf32> to vector<1x384xf32>
    %c0_77 = arith.constant 0 : index
    %c23424 = arith.constant 23424 : index
    %140 = vector.load %arg20[%c0_77, %c23424] : memref<2x24576xf32, #tpu.memory_space<vmem>>, vector<1x384xf32>
    tpu.vector_store %arg20[%c0_77, %c23424], %139 {strides = array<i32>} : memref<2x24576xf32, #tpu.memory_space<vmem>>, vector<1x384xf32>,
    %141 = vector.extract_strided_slice %16 {offsets = [62, 0], sizes = [1, 384], strides = [1, 1]} : vector<64x384xf32> to vector<1x384xf32>
    %c0_78 = arith.constant 0 : index
    %c23808 = arith.constant 23808 : index
    %142 = vector.load %arg20[%c0_78, %c23808] : memref<2x24576xf32, #tpu.memory_space<vmem>>, vector<1x384xf32>
    tpu.vector_store %arg20[%c0_78, %c23808], %141 {strides = array<i32>} : memref<2x24576xf32, #tpu.memory_space<vmem>>, vector<1x384xf32>,
    %143 = vector.extract_strided_slice %16 {offsets = [63, 0], sizes = [1, 384], strides = [1, 1]} : vector<64x384xf32> to vector<1x384xf32>
    %c0_79 = arith.constant 0 : index
    %c24192 = arith.constant 24192 : index
    %144 = vector.load %arg20[%c0_79, %c24192] : memref<2x24576xf32, #tpu.memory_space<vmem>>, vector<1x384xf32>
    tpu.vector_store %arg20[%c0_79, %c24192], %143 {strides = array<i32>} : memref<2x24576xf32, #tpu.memory_space<vmem>>, vector<1x384xf32>,
    %c0_80 = arith.constant 0 : index
    %c1536_81 = arith.constant 1536 : index
    %145 = vector.load %arg1[%c0_80, %c1536_81] : memref<72x3072xbf16, #tpu.memory_space<vmem>>, vector<72x384xbf16>
    %cst_82 = arith.constant dense<0.000000e+00> : vector<64x384xf32>
    %146 = tpu.matmul %0, %145, %cst_82 {dimension_numbers = #tpu.dot_dimension_numbers<[1], [0], [0], [1], [0, 0, 1, 1], [], []>} : vector<64x72xbf16>, vector<72x384xbf16>, vector<64x384xf32> -> vector<64x384xf32>
    %c0_83 = arith.constant 0 : index
    %c1920_84 = arith.constant 1920 : index
    %147 = vector.load %arg1[%c0_83, %c1920_84] : memref<72x3072xbf16, #tpu.memory_space<vmem>>, vector<72x384xbf16>
    %cst_85 = arith.constant dense<0.000000e+00> : vector<64x384xf32>
    %148 = tpu.matmul %0, %147, %cst_85 {dimension_numbers = #tpu.dot_dimension_numbers<[1], [0], [0], [1], [0, 0, 1, 1], [], []>} : vector<64x72xbf16>, vector<72x384xbf16>, vector<64x384xf32> -> vector<64x384xf32>
    %149 = arith.maximumf %146, %148 : vector<64x384xf32>
    %c0_86 = arith.constant 0 : index
    %c2304_87 = arith.constant 2304 : index
    %150 = vector.load %arg1[%c0_86, %c2304_87] : memref<72x3072xbf16, #tpu.memory_space<vmem>>, vector<72x384xbf16>
    %cst_88 = arith.constant dense<0.000000e+00> : vector<64x384xf32>
    %151 = tpu.matmul %0, %150, %cst_88 {dimension_numbers = #tpu.dot_dimension_numbers<[1], [0], [0], [1], [0, 0, 1, 1], [], []>} : vector<64x72xbf16>, vector<72x384xbf16>, vector<64x384xf32> -> vector<64x384xf32>
    %152 = arith.maximumf %149, %151 : vector<64x384xf32>
    %c0_89 = arith.constant 0 : index
    %c2688_90 = arith.constant 2688 : index
    %153 = vector.load %arg1[%c0_89, %c2688_90] : memref<72x3072xbf16, #tpu.memory_space<vmem>>, vector<72x384xbf16>
    %cst_91 = arith.constant dense<0.000000e+00> : vector<64x384xf32>
    %154 = tpu.matmul %0, %153, %cst_91 {dimension_numbers = #tpu.dot_dimension_numbers<[1], [0], [0], [1], [0, 0, 1, 1], [], []>} : vector<64x72xbf16>, vector<72x384xbf16>, vector<64x384xf32> -> vector<64x384xf32>
    %155 = arith.maximumf %152, %154 : vector<64x384xf32>
    %c0_92 = arith.constant 0 : index
    %c0_93 = arith.constant 0 : index
    %156 = vector.load %arg3[%c0_92, %c0_93] : memref<64x1xf32, #tpu.memory_space<vmem>>, vector<64x1xf32>
    %157 = vector.broadcast %156 : vector<64x1xf32> to vector<64x384xf32>
    %158 = arith.addf %155, %157 : vector<64x384xf32>
    %cst_94 = arith.constant 0.000000e+00 : f32
    %159 = vector.broadcast %cst_94 : f32 to vector<64x384xf32>
    %160 = arith.maximumf %158, %159 : vector<64x384xf32>
    %161 = vector.extract_strided_slice %160 {offsets = [0, 0], sizes = [1, 384], strides = [1, 1]} : vector<64x384xf32> to vector<1x384xf32>
    %c1 = arith.constant 1 : index
    %c0_95 = arith.constant 0 : index
    %162 = vector.load %arg20[%c1, %c0_95] : memref<2x24576xf32, #tpu.memory_space<vmem>>, vector<1x384xf32>
    tpu.vector_store %arg20[%c1, %c0_95], %161 {strides = array<i32>} : memref<2x24576xf32, #tpu.memory_space<vmem>>, vector<1x384xf32>,
    %163 = vector.extract_strided_slice %160 {offsets = [1, 0], sizes = [1, 384], strides = [1, 1]} : vector<64x384xf32> to vector<1x384xf32>
    %c1_96 = arith.constant 1 : index
    %c384_97 = arith.constant 384 : index
    %164 = vector.load %arg20[%c1_96, %c384_97] : memref<2x24576xf32, #tpu.memory_space<vmem>>, vector<1x384xf32>
    tpu.vector_store %arg20[%c1_96, %c384_97], %163 {strides = array<i32>} : memref<2x24576xf32, #tpu.memory_space<vmem>>, vector<1x384xf32>,
    %165 = vector.extract_strided_slice %160 {offsets = [2, 0], sizes = [1, 384], strides = [1, 1]} : vector<64x384xf32> to vector<1x384xf32>
    %c1_98 = arith.constant 1 : index
    %c768_99 = arith.constant 768 : index
    %166 = vector.load %arg20[%c1_98, %c768_99] : memref<2x24576xf32, #tpu.memory_space<vmem>>, vector<1x384xf32>
    tpu.vector_store %arg20[%c1_98, %c768_99], %165 {strides = array<i32>} : memref<2x24576xf32, #tpu.memory_space<vmem>>, vector<1x384xf32>,
    %167 = vector.extract_strided_slice %160 {offsets = [3, 0], sizes = [1, 384], strides = [1, 1]} : vector<64x384xf32> to vector<1x384xf32>
    %c1_100 = arith.constant 1 : index
    %c1152_101 = arith.constant 1152 : index
    %168 = vector.load %arg20[%c1_100, %c1152_101] : memref<2x24576xf32, #tpu.memory_space<vmem>>, vector<1x384xf32>
    tpu.vector_store %arg20[%c1_100, %c1152_101], %167 {strides = array<i32>} : memref<2x24576xf32, #tpu.memory_space<vmem>>, vector<1x384xf32>,
    %169 = vector.extract_strided_slice %160 {offsets = [4, 0], sizes = [1, 384], strides = [1, 1]} : vector<64x384xf32> to vector<1x384xf32>
    %c1_102 = arith.constant 1 : index
    %c1536_103 = arith.constant 1536 : index
    %170 = vector.load %arg20[%c1_102, %c1536_103] : memref<2x24576xf32, #tpu.memory_space<vmem>>, vector<1x384xf32>
    tpu.vector_store %arg20[%c1_102, %c1536_103], %169 {strides = array<i32>} : memref<2x24576xf32, #tpu.memory_space<vmem>>, vector<1x384xf32>,
    %171 = vector.extract_strided_slice %160 {offsets = [5, 0], sizes = [1, 384], strides = [1, 1]} : vector<64x384xf32> to vector<1x384xf32>
    %c1_104 = arith.constant 1 : index
    %c1920_105 = arith.constant 1920 : index
    %172 = vector.load %arg20[%c1_104, %c1920_105] : memref<2x24576xf32, #tpu.memory_space<vmem>>, vector<1x384xf32>
    tpu.vector_store %arg20[%c1_104, %c1920_105], %171 {strides = array<i32>} : memref<2x24576xf32, #tpu.memory_space<vmem>>, vector<1x384xf32>,
    %173 = vector.extract_strided_slice %160 {offsets = [6, 0], sizes = [1, 384], strides = [1, 1]} : vector<64x384xf32> to vector<1x384xf32>
    %c1_106 = arith.constant 1 : index
    %c2304_107 = arith.constant 2304 : index
    %174 = vector.load %arg20[%c1_106, %c2304_107] : memref<2x24576xf32, #tpu.memory_space<vmem>>, vector<1x384xf32>
    tpu.vector_store %arg20[%c1_106, %c2304_107], %173 {strides = array<i32>} : memref<2x24576xf32, #tpu.memory_space<vmem>>, vector<1x384xf32>,
    %175 = vector.extract_strided_slice %160 {offsets = [7, 0], sizes = [1, 384], strides = [1, 1]} : vector<64x384xf32> to vector<1x384xf32>
    %c1_108 = arith.constant 1 : index
    %c2688_109 = arith.constant 2688 : index
    %176 = vector.load %arg20[%c1_108, %c2688_109] : memref<2x24576xf32, #tpu.memory_space<vmem>>, vector<1x384xf32>
    tpu.vector_store %arg20[%c1_108, %c2688_109], %175 {strides = array<i32>} : memref<2x24576xf32, #tpu.memory_space<vmem>>, vector<1x384xf32>,
    %177 = vector.extract_strided_slice %160 {offsets = [8, 0], sizes = [1, 384], strides = [1, 1]} : vector<64x384xf32> to vector<1x384xf32>
    %c1_110 = arith.constant 1 : index
    %c3072_111 = arith.constant 3072 : index
    %178 = vector.load %arg20[%c1_110, %c3072_111] : memref<2x24576xf32, #tpu.memory_space<vmem>>, vector<1x384xf32>
    tpu.vector_store %arg20[%c1_110, %c3072_111], %177 {strides = array<i32>} : memref<2x24576xf32, #tpu.memory_space<vmem>>, vector<1x384xf32>,
    %179 = vector.extract_strided_slice %160 {offsets = [9, 0], sizes = [1, 384], strides = [1, 1]} : vector<64x384xf32> to vector<1x384xf32>
    %c1_112 = arith.constant 1 : index
    %c3456_113 = arith.constant 3456 : index
    %180 = vector.load %arg20[%c1_112, %c3456_113] : memref<2x24576xf32, #tpu.memory_space<vmem>>, vector<1x384xf32>
    tpu.vector_store %arg20[%c1_112, %c3456_113], %179 {strides = array<i32>} : memref<2x24576xf32, #tpu.memory_space<vmem>>, vector<1x384xf32>,
    %181 = vector.extract_strided_slice %160 {offsets = [10, 0], sizes = [1, 384], strides = [1, 1]} : vector<64x384xf32> to vector<1x384xf32>
    %c1_114 = arith.constant 1 : index
    %c3840_115 = arith.constant 3840 : index
    %182 = vector.load %arg20[%c1_114, %c3840_115] : memref<2x24576xf32, #tpu.memory_space<vmem>>, vector<1x384xf32>
    tpu.vector_store %arg20[%c1_114, %c3840_115], %181 {strides = array<i32>} : memref<2x24576xf32, #tpu.memory_space<vmem>>, vector<1x384xf32>,
    %183 = vector.extract_strided_slice %160 {offsets = [11, 0], sizes = [1, 384], strides = [1, 1]} : vector<64x384xf32> to vector<1x384xf32>
    %c1_116 = arith.constant 1 : index
    %c4224_117 = arith.constant 4224 : index
    %184 = vector.load %arg20[%c1_116, %c4224_117] : memref<2x24576xf32, #tpu.memory_space<vmem>>, vector<1x384xf32>
    tpu.vector_store %arg20[%c1_116, %c4224_117], %183 {strides = array<i32>} : memref<2x24576xf32, #tpu.memory_space<vmem>>, vector<1x384xf32>,
    %185 = vector.extract_strided_slice %160 {offsets = [12, 0], sizes = [1, 384], strides = [1, 1]} : vector<64x384xf32> to vector<1x384xf32>
    %c1_118 = arith.constant 1 : index
    %c4608_119 = arith.constant 4608 : index
    %186 = vector.load %arg20[%c1_118, %c4608_119] : memref<2x24576xf32, #tpu.memory_space<vmem>>, vector<1x384xf32>
    tpu.vector_store %arg20[%c1_118, %c4608_119], %185 {strides = array<i32>} : memref<2x24576xf32, #tpu.memory_space<vmem>>, vector<1x384xf32>,
    %187 = vector.extract_strided_slice %160 {offsets = [13, 0], sizes = [1, 384], strides = [1, 1]} : vector<64x384xf32> to vector<1x384xf32>
    %c1_120 = arith.constant 1 : index
    %c4992_121 = arith.constant 4992 : index
    %188 = vector.load %arg20[%c1_120, %c4992_121] : memref<2x24576xf32, #tpu.memory_space<vmem>>, vector<1x384xf32>
    tpu.vector_store %arg20[%c1_120, %c4992_121], %187 {strides = array<i32>} : memref<2x24576xf32, #tpu.memory_space<vmem>>, vector<1x384xf32>,
    %189 = vector.extract_strided_slice %160 {offsets = [14, 0], sizes = [1, 384], strides = [1, 1]} : vector<64x384xf32> to vector<1x384xf32>
    %c1_122 = arith.constant 1 : index
    %c5376_123 = arith.constant 5376 : index
    %190 = vector.load %arg20[%c1_122, %c5376_123] : memref<2x24576xf32, #tpu.memory_space<vmem>>, vector<1x384xf32>
    tpu.vector_store %arg20[%c1_122, %c5376_123], %189 {strides = array<i32>} : memref<2x24576xf32, #tpu.memory_space<vmem>>, vector<1x384xf32>,
    %191 = vector.extract_strided_slice %160 {offsets = [15, 0], sizes = [1, 384], strides = [1, 1]} : vector<64x384xf32> to vector<1x384xf32>
    %c1_124 = arith.constant 1 : index
    %c5760_125 = arith.constant 5760 : index
    %192 = vector.load %arg20[%c1_124, %c5760_125] : memref<2x24576xf32, #tpu.memory_space<vmem>>, vector<1x384xf32>
    tpu.vector_store %arg20[%c1_124, %c5760_125], %191 {strides = array<i32>} : memref<2x24576xf32, #tpu.memory_space<vmem>>, vector<1x384xf32>,
    %193 = vector.extract_strided_slice %160 {offsets = [16, 0], sizes = [1, 384], strides = [1, 1]} : vector<64x384xf32> to vector<1x384xf32>
    %c1_126 = arith.constant 1 : index
    %c6144_127 = arith.constant 6144 : index
    %194 = vector.load %arg20[%c1_126, %c6144_127] : memref<2x24576xf32, #tpu.memory_space<vmem>>, vector<1x384xf32>
    tpu.vector_store %arg20[%c1_126, %c6144_127], %193 {strides = array<i32>} : memref<2x24576xf32, #tpu.memory_space<vmem>>, vector<1x384xf32>,
    %195 = vector.extract_strided_slice %160 {offsets = [17, 0], sizes = [1, 384], strides = [1, 1]} : vector<64x384xf32> to vector<1x384xf32>
    %c1_128 = arith.constant 1 : index
    %c6528_129 = arith.constant 6528 : index
    %196 = vector.load %arg20[%c1_128, %c6528_129] : memref<2x24576xf32, #tpu.memory_space<vmem>>, vector<1x384xf32>
    tpu.vector_store %arg20[%c1_128, %c6528_129], %195 {strides = array<i32>} : memref<2x24576xf32, #tpu.memory_space<vmem>>, vector<1x384xf32>,
    %197 = vector.extract_strided_slice %160 {offsets = [18, 0], sizes = [1, 384], strides = [1, 1]} : vector<64x384xf32> to vector<1x384xf32>
    %c1_130 = arith.constant 1 : index
    %c6912_131 = arith.constant 6912 : index
    %198 = vector.load %arg20[%c1_130, %c6912_131] : memref<2x24576xf32, #tpu.memory_space<vmem>>, vector<1x384xf32>
    tpu.vector_store %arg20[%c1_130, %c6912_131], %197 {strides = array<i32>} : memref<2x24576xf32, #tpu.memory_space<vmem>>, vector<1x384xf32>,
    %199 = vector.extract_strided_slice %160 {offsets = [19, 0], sizes = [1, 384], strides = [1, 1]} : vector<64x384xf32> to vector<1x384xf32>
    %c1_132 = arith.constant 1 : index
    %c7296_133 = arith.constant 7296 : index
    %200 = vector.load %arg20[%c1_132, %c7296_133] : memref<2x24576xf32, #tpu.memory_space<vmem>>, vector<1x384xf32>
    tpu.vector_store %arg20[%c1_132, %c7296_133], %199 {strides = array<i32>} : memref<2x24576xf32, #tpu.memory_space<vmem>>, vector<1x384xf32>,
    %201 = vector.extract_strided_slice %160 {offsets = [20, 0], sizes = [1, 384], strides = [1, 1]} : vector<64x384xf32> to vector<1x384xf32>
    %c1_134 = arith.constant 1 : index
    %c7680_135 = arith.constant 7680 : index
    %202 = vector.load %arg20[%c1_134, %c7680_135] : memref<2x24576xf32, #tpu.memory_space<vmem>>, vector<1x384xf32>
    tpu.vector_store %arg20[%c1_134, %c7680_135], %201 {strides = array<i32>} : memref<2x24576xf32, #tpu.memory_space<vmem>>, vector<1x384xf32>,
    %203 = vector.extract_strided_slice %160 {offsets = [21, 0], sizes = [1, 384], strides = [1, 1]} : vector<64x384xf32> to vector<1x384xf32>
    %c1_136 = arith.constant 1 : index
    %c8064_137 = arith.constant 8064 : index
    %204 = vector.load %arg20[%c1_136, %c8064_137] : memref<2x24576xf32, #tpu.memory_space<vmem>>, vector<1x384xf32>
    tpu.vector_store %arg20[%c1_136, %c8064_137], %203 {strides = array<i32>} : memref<2x24576xf32, #tpu.memory_space<vmem>>, vector<1x384xf32>,
    %205 = vector.extract_strided_slice %160 {offsets = [22, 0], sizes = [1, 384], strides = [1, 1]} : vector<64x384xf32> to vector<1x384xf32>
    %c1_138 = arith.constant 1 : index
    %c8448_139 = arith.constant 8448 : index
    %206 = vector.load %arg20[%c1_138, %c8448_139] : memref<2x24576xf32, #tpu.memory_space<vmem>>, vector<1x384xf32>
    tpu.vector_store %arg20[%c1_138, %c8448_139], %205 {strides = array<i32>} : memref<2x24576xf32, #tpu.memory_space<vmem>>, vector<1x384xf32>,
    %207 = vector.extract_strided_slice %160 {offsets = [23, 0], sizes = [1, 384], strides = [1, 1]} : vector<64x384xf32> to vector<1x384xf32>
    %c1_140 = arith.constant 1 : index
    %c8832_141 = arith.constant 8832 : index
    %208 = vector.load %arg20[%c1_140, %c8832_141] : memref<2x24576xf32, #tpu.memory_space<vmem>>, vector<1x384xf32>
    tpu.vector_store %arg20[%c1_140, %c8832_141], %207 {strides = array<i32>} : memref<2x24576xf32, #tpu.memory_space<vmem>>, vector<1x384xf32>,
    %209 = vector.extract_strided_slice %160 {offsets = [24, 0], sizes = [1, 384], strides = [1, 1]} : vector<64x384xf32> to vector<1x384xf32>
    %c1_142 = arith.constant 1 : index
    %c9216_143 = arith.constant 9216 : index
    %210 = vector.load %arg20[%c1_142, %c9216_143] : memref<2x24576xf32, #tpu.memory_space<vmem>>, vector<1x384xf32>
    tpu.vector_store %arg20[%c1_142, %c9216_143], %209 {strides = array<i32>} : memref<2x24576xf32, #tpu.memory_space<vmem>>, vector<1x384xf32>,
    %211 = vector.extract_strided_slice %160 {offsets = [25, 0], sizes = [1, 384], strides = [1, 1]} : vector<64x384xf32> to vector<1x384xf32>
    %c1_144 = arith.constant 1 : index
    %c9600_145 = arith.constant 9600 : index
    %212 = vector.load %arg20[%c1_144, %c9600_145] : memref<2x24576xf32, #tpu.memory_space<vmem>>, vector<1x384xf32>
    tpu.vector_store %arg20[%c1_144, %c9600_145], %211 {strides = array<i32>} : memref<2x24576xf32, #tpu.memory_space<vmem>>, vector<1x384xf32>,
    %213 = vector.extract_strided_slice %160 {offsets = [26, 0], sizes = [1, 384], strides = [1, 1]} : vector<64x384xf32> to vector<1x384xf32>
    %c1_146 = arith.constant 1 : index
    %c9984_147 = arith.constant 9984 : index
    %214 = vector.load %arg20[%c1_146, %c9984_147] : memref<2x24576xf32, #tpu.memory_space<vmem>>, vector<1x384xf32>
    tpu.vector_store %arg20[%c1_146, %c9984_147], %213 {strides = array<i32>} : memref<2x24576xf32, #tpu.memory_space<vmem>>, vector<1x384xf32>,
    %215 = vector.extract_strided_slice %160 {offsets = [27, 0], sizes = [1, 384], strides = [1, 1]} : vector<64x384xf32> to vector<1x384xf32>
    %c1_148 = arith.constant 1 : index
    %c10368_149 = arith.constant 10368 : index
    %216 = vector.load %arg20[%c1_148, %c10368_149] : memref<2x24576xf32, #tpu.memory_space<vmem>>, vector<1x384xf32>
    tpu.vector_store %arg20[%c1_148, %c10368_149], %215 {strides = array<i32>} : memref<2x24576xf32, #tpu.memory_space<vmem>>, vector<1x384xf32>,
    %217 = vector.extract_strided_slice %160 {offsets = [28, 0], sizes = [1, 384], strides = [1, 1]} : vector<64x384xf32> to vector<1x384xf32>
    %c1_150 = arith.constant 1 : index
    %c10752_151 = arith.constant 10752 : index
    %218 = vector.load %arg20[%c1_150, %c10752_151] : memref<2x24576xf32, #tpu.memory_space<vmem>>, vector<1x384xf32>
    tpu.vector_store %arg20[%c1_150, %c10752_151], %217 {strides = array<i32>} : memref<2x24576xf32, #tpu.memory_space<vmem>>, vector<1x384xf32>,
    %219 = vector.extract_strided_slice %160 {offsets = [29, 0], sizes = [1, 384], strides = [1, 1]} : vector<64x384xf32> to vector<1x384xf32>
    %c1_152 = arith.constant 1 : index
    %c11136_153 = arith.constant 11136 : index
    %220 = vector.load %arg20[%c1_152, %c11136_153] : memref<2x24576xf32, #tpu.memory_space<vmem>>, vector<1x384xf32>
    tpu.vector_store %arg20[%c1_152, %c11136_153], %219 {strides = array<i32>} : memref<2x24576xf32, #tpu.memory_space<vmem>>, vector<1x384xf32>,
    %221 = vector.extract_strided_slice %160 {offsets = [30, 0], sizes = [1, 384], strides = [1, 1]} : vector<64x384xf32> to vector<1x384xf32>
    %c1_154 = arith.constant 1 : index
    %c11520_155 = arith.constant 11520 : index
    %222 = vector.load %arg20[%c1_154, %c11520_155] : memref<2x24576xf32, #tpu.memory_space<vmem>>, vector<1x384xf32>
    tpu.vector_store %arg20[%c1_154, %c11520_155], %221 {strides = array<i32>} : memref<2x24576xf32, #tpu.memory_space<vmem>>, vector<1x384xf32>,
    %223 = vector.extract_strided_slice %160 {offsets = [31, 0], sizes = [1, 384], strides = [1, 1]} : vector<64x384xf32> to vector<1x384xf32>
    %c1_156 = arith.constant 1 : index
    %c11904_157 = arith.constant 11904 : index
    %224 = vector.load %arg20[%c1_156, %c11904_157] : memref<2x24576xf32, #tpu.memory_space<vmem>>, vector<1x384xf32>
    tpu.vector_store %arg20[%c1_156, %c11904_157], %223 {strides = array<i32>} : memref<2x24576xf32, #tpu.memory_space<vmem>>, vector<1x384xf32>,
    %225 = vector.extract_strided_slice %160 {offsets = [32, 0], sizes = [1, 384], strides = [1, 1]} : vector<64x384xf32> to vector<1x384xf32>
    %c1_158 = arith.constant 1 : index
    %c12288_159 = arith.constant 12288 : index
    %226 = vector.load %arg20[%c1_158, %c12288_159] : memref<2x24576xf32, #tpu.memory_space<vmem>>, vector<1x384xf32>
    tpu.vector_store %arg20[%c1_158, %c12288_159], %225 {strides = array<i32>} : memref<2x24576xf32, #tpu.memory_space<vmem>>, vector<1x384xf32>,
    %227 = vector.extract_strided_slice %160 {offsets = [33, 0], sizes = [1, 384], strides = [1, 1]} : vector<64x384xf32> to vector<1x384xf32>
    %c1_160 = arith.constant 1 : index
    %c12672_161 = arith.constant 12672 : index
    %228 = vector.load %arg20[%c1_160, %c12672_161] : memref<2x24576xf32, #tpu.memory_space<vmem>>, vector<1x384xf32>
    tpu.vector_store %arg20[%c1_160, %c12672_161], %227 {strides = array<i32>} : memref<2x24576xf32, #tpu.memory_space<vmem>>, vector<1x384xf32>,
    %229 = vector.extract_strided_slice %160 {offsets = [34, 0], sizes = [1, 384], strides = [1, 1]} : vector<64x384xf32> to vector<1x384xf32>
    %c1_162 = arith.constant 1 : index
    %c13056_163 = arith.constant 13056 : index
    %230 = vector.load %arg20[%c1_162, %c13056_163] : memref<2x24576xf32, #tpu.memory_space<vmem>>, vector<1x384xf32>
    tpu.vector_store %arg20[%c1_162, %c13056_163], %229 {strides = array<i32>} : memref<2x24576xf32, #tpu.memory_space<vmem>>, vector<1x384xf32>,
    %231 = vector.extract_strided_slice %160 {offsets = [35, 0], sizes = [1, 384], strides = [1, 1]} : vector<64x384xf32> to vector<1x384xf32>
    %c1_164 = arith.constant 1 : index
    %c13440_165 = arith.constant 13440 : index
    %232 = vector.load %arg20[%c1_164, %c13440_165] : memref<2x24576xf32, #tpu.memory_space<vmem>>, vector<1x384xf32>
    tpu.vector_store %arg20[%c1_164, %c13440_165], %231 {strides = array<i32>} : memref<2x24576xf32, #tpu.memory_space<vmem>>, vector<1x384xf32>,
    %233 = vector.extract_strided_slice %160 {offsets = [36, 0], sizes = [1, 384], strides = [1, 1]} : vector<64x384xf32> to vector<1x384xf32>
    %c1_166 = arith.constant 1 : index
    %c13824_167 = arith.constant 13824 : index
    %234 = vector.load %arg20[%c1_166, %c13824_167] : memref<2x24576xf32, #tpu.memory_space<vmem>>, vector<1x384xf32>
    tpu.vector_store %arg20[%c1_166, %c13824_167], %233 {strides = array<i32>} : memref<2x24576xf32, #tpu.memory_space<vmem>>, vector<1x384xf32>,
    %235 = vector.extract_strided_slice %160 {offsets = [37, 0], sizes = [1, 384], strides = [1, 1]} : vector<64x384xf32> to vector<1x384xf32>
    %c1_168 = arith.constant 1 : index
    %c14208_169 = arith.constant 14208 : index
    %236 = vector.load %arg20[%c1_168, %c14208_169] : memref<2x24576xf32, #tpu.memory_space<vmem>>, vector<1x384xf32>
    tpu.vector_store %arg20[%c1_168, %c14208_169], %235 {strides = array<i32>} : memref<2x24576xf32, #tpu.memory_space<vmem>>, vector<1x384xf32>,
    %237 = vector.extract_strided_slice %160 {offsets = [38, 0], sizes = [1, 384], strides = [1, 1]} : vector<64x384xf32> to vector<1x384xf32>
    %c1_170 = arith.constant 1 : index
    %c14592_171 = arith.constant 14592 : index
    %238 = vector.load %arg20[%c1_170, %c14592_171] : memref<2x24576xf32, #tpu.memory_space<vmem>>, vector<1x384xf32>
    tpu.vector_store %arg20[%c1_170, %c14592_171], %237 {strides = array<i32>} : memref<2x24576xf32, #tpu.memory_space<vmem>>, vector<1x384xf32>,
    %239 = vector.extract_strided_slice %160 {offsets = [39, 0], sizes = [1, 384], strides = [1, 1]} : vector<64x384xf32> to vector<1x384xf32>
    %c1_172 = arith.constant 1 : index
    %c14976_173 = arith.constant 14976 : index
    %240 = vector.load %arg20[%c1_172, %c14976_173] : memref<2x24576xf32, #tpu.memory_space<vmem>>, vector<1x384xf32>
    tpu.vector_store %arg20[%c1_172, %c14976_173], %239 {strides = array<i32>} : memref<2x24576xf32, #tpu.memory_space<vmem>>, vector<1x384xf32>,
    %241 = vector.extract_strided_slice %160 {offsets = [40, 0], sizes = [1, 384], strides = [1, 1]} : vector<64x384xf32> to vector<1x384xf32>
    %c1_174 = arith.constant 1 : index
    %c15360_175 = arith.constant 15360 : index
    %242 = vector.load %arg20[%c1_174, %c15360_175] : memref<2x24576xf32, #tpu.memory_space<vmem>>, vector<1x384xf32>
    tpu.vector_store %arg20[%c1_174, %c15360_175], %241 {strides = array<i32>} : memref<2x24576xf32, #tpu.memory_space<vmem>>, vector<1x384xf32>,
    %243 = vector.extract_strided_slice %160 {offsets = [41, 0], sizes = [1, 384], strides = [1, 1]} : vector<64x384xf32> to vector<1x384xf32>
    %c1_176 = arith.constant 1 : index
    %c15744_177 = arith.constant 15744 : index
    %244 = vector.load %arg20[%c1_176, %c15744_177] : memref<2x24576xf32, #tpu.memory_space<vmem>>, vector<1x384xf32>
    tpu.vector_store %arg20[%c1_176, %c15744_177], %243 {strides = array<i32>} : memref<2x24576xf32, #tpu.memory_space<vmem>>, vector<1x384xf32>,
    %245 = vector.extract_strided_slice %160 {offsets = [42, 0], sizes = [1, 384], strides = [1, 1]} : vector<64x384xf32> to vector<1x384xf32>
    %c1_178 = arith.constant 1 : index
    %c16128_179 = arith.constant 16128 : index
    %246 = vector.load %arg20[%c1_178, %c16128_179] : memref<2x24576xf32, #tpu.memory_space<vmem>>, vector<1x384xf32>
    tpu.vector_store %arg20[%c1_178, %c16128_179], %245 {strides = array<i32>} : memref<2x24576xf32, #tpu.memory_space<vmem>>, vector<1x384xf32>,
    %247 = vector.extract_strided_slice %160 {offsets = [43, 0], sizes = [1, 384], strides = [1, 1]} : vector<64x384xf32> to vector<1x384xf32>
    %c1_180 = arith.constant 1 : index
    %c16512_181 = arith.constant 16512 : index
    %248 = vector.load %arg20[%c1_180, %c16512_181] : memref<2x24576xf32, #tpu.memory_space<vmem>>, vector<1x384xf32>
    tpu.vector_store %arg20[%c1_180, %c16512_181], %247 {strides = array<i32>} : memref<2x24576xf32, #tpu.memory_space<vmem>>, vector<1x384xf32>,
    %249 = vector.extract_strided_slice %160 {offsets = [44, 0], sizes = [1, 384], strides = [1, 1]} : vector<64x384xf32> to vector<1x384xf32>
    %c1_182 = arith.constant 1 : index
    %c16896_183 = arith.constant 16896 : index
    %250 = vector.load %arg20[%c1_182, %c16896_183] : memref<2x24576xf32, #tpu.memory_space<vmem>>, vector<1x384xf32>
    tpu.vector_store %arg20[%c1_182, %c16896_183], %249 {strides = array<i32>} : memref<2x24576xf32, #tpu.memory_space<vmem>>, vector<1x384xf32>,
    %251 = vector.extract_strided_slice %160 {offsets = [45, 0], sizes = [1, 384], strides = [1, 1]} : vector<64x384xf32> to vector<1x384xf32>
    %c1_184 = arith.constant 1 : index
    %c17280_185 = arith.constant 17280 : index
    %252 = vector.load %arg20[%c1_184, %c17280_185] : memref<2x24576xf32, #tpu.memory_space<vmem>>, vector<1x384xf32>
    tpu.vector_store %arg20[%c1_184, %c17280_185], %251 {strides = array<i32>} : memref<2x24576xf32, #tpu.memory_space<vmem>>, vector<1x384xf32>,
    %253 = vector.extract_strided_slice %160 {offsets = [46, 0], sizes = [1, 384], strides = [1, 1]} : vector<64x384xf32> to vector<1x384xf32>
    %c1_186 = arith.constant 1 : index
    %c17664_187 = arith.constant 17664 : index
    %254 = vector.load %arg20[%c1_186, %c17664_187] : memref<2x24576xf32, #tpu.memory_space<vmem>>, vector<1x384xf32>
    tpu.vector_store %arg20[%c1_186, %c17664_187], %253 {strides = array<i32>} : memref<2x24576xf32, #tpu.memory_space<vmem>>, vector<1x384xf32>,
    %255 = vector.extract_strided_slice %160 {offsets = [47, 0], sizes = [1, 384], strides = [1, 1]} : vector<64x384xf32> to vector<1x384xf32>
    %c1_188 = arith.constant 1 : index
    %c18048_189 = arith.constant 18048 : index
    %256 = vector.load %arg20[%c1_188, %c18048_189] : memref<2x24576xf32, #tpu.memory_space<vmem>>, vector<1x384xf32>
    tpu.vector_store %arg20[%c1_188, %c18048_189], %255 {strides = array<i32>} : memref<2x24576xf32, #tpu.memory_space<vmem>>, vector<1x384xf32>,
    %257 = vector.extract_strided_slice %160 {offsets = [48, 0], sizes = [1, 384], strides = [1, 1]} : vector<64x384xf32> to vector<1x384xf32>
    %c1_190 = arith.constant 1 : index
    %c18432_191 = arith.constant 18432 : index
    %258 = vector.load %arg20[%c1_190, %c18432_191] : memref<2x24576xf32, #tpu.memory_space<vmem>>, vector<1x384xf32>
    tpu.vector_store %arg20[%c1_190, %c18432_191], %257 {strides = array<i32>} : memref<2x24576xf32, #tpu.memory_space<vmem>>, vector<1x384xf32>,
    %259 = vector.extract_strided_slice %160 {offsets = [49, 0], sizes = [1, 384], strides = [1, 1]} : vector<64x384xf32> to vector<1x384xf32>
    %c1_192 = arith.constant 1 : index
    %c18816_193 = arith.constant 18816 : index
    %260 = vector.load %arg20[%c1_192, %c18816_193] : memref<2x24576xf32, #tpu.memory_space<vmem>>, vector<1x384xf32>
    tpu.vector_store %arg20[%c1_192, %c18816_193], %259 {strides = array<i32>} : memref<2x24576xf32, #tpu.memory_space<vmem>>, vector<1x384xf32>,
    %261 = vector.extract_strided_slice %160 {offsets = [50, 0], sizes = [1, 384], strides = [1, 1]} : vector<64x384xf32> to vector<1x384xf32>
    %c1_194 = arith.constant 1 : index
    %c19200_195 = arith.constant 19200 : index
    %262 = vector.load %arg20[%c1_194, %c19200_195] : memref<2x24576xf32, #tpu.memory_space<vmem>>, vector<1x384xf32>
    tpu.vector_store %arg20[%c1_194, %c19200_195], %261 {strides = array<i32>} : memref<2x24576xf32, #tpu.memory_space<vmem>>, vector<1x384xf32>,
    %263 = vector.extract_strided_slice %160 {offsets = [51, 0], sizes = [1, 384], strides = [1, 1]} : vector<64x384xf32> to vector<1x384xf32>
    %c1_196 = arith.constant 1 : index
    %c19584_197 = arith.constant 19584 : index
    %264 = vector.load %arg20[%c1_196, %c19584_197] : memref<2x24576xf32, #tpu.memory_space<vmem>>, vector<1x384xf32>
    tpu.vector_store %arg20[%c1_196, %c19584_197], %263 {strides = array<i32>} : memref<2x24576xf32, #tpu.memory_space<vmem>>, vector<1x384xf32>,
    %265 = vector.extract_strided_slice %160 {offsets = [52, 0], sizes = [1, 384], strides = [1, 1]} : vector<64x384xf32> to vector<1x384xf32>
    %c1_198 = arith.constant 1 : index
    %c19968_199 = arith.constant 19968 : index
    %266 = vector.load %arg20[%c1_198, %c19968_199] : memref<2x24576xf32, #tpu.memory_space<vmem>>, vector<1x384xf32>
    tpu.vector_store %arg20[%c1_198, %c19968_199], %265 {strides = array<i32>} : memref<2x24576xf32, #tpu.memory_space<vmem>>, vector<1x384xf32>,
    %267 = vector.extract_strided_slice %160 {offsets = [53, 0], sizes = [1, 384], strides = [1, 1]} : vector<64x384xf32> to vector<1x384xf32>
    %c1_200 = arith.constant 1 : index
    %c20352_201 = arith.constant 20352 : index
    %268 = vector.load %arg20[%c1_200, %c20352_201] : memref<2x24576xf32, #tpu.memory_space<vmem>>, vector<1x384xf32>
    tpu.vector_store %arg20[%c1_200, %c20352_201], %267 {strides = array<i32>} : memref<2x24576xf32, #tpu.memory_space<vmem>>, vector<1x384xf32>,
    %269 = vector.extract_strided_slice %160 {offsets = [54, 0], sizes = [1, 384], strides = [1, 1]} : vector<64x384xf32> to vector<1x384xf32>
    %c1_202 = arith.constant 1 : index
    %c20736_203 = arith.constant 20736 : index
    %270 = vector.load %arg20[%c1_202, %c20736_203] : memref<2x24576xf32, #tpu.memory_space<vmem>>, vector<1x384xf32>
    tpu.vector_store %arg20[%c1_202, %c20736_203], %269 {strides = array<i32>} : memref<2x24576xf32, #tpu.memory_space<vmem>>, vector<1x384xf32>,
    %271 = vector.extract_strided_slice %160 {offsets = [55, 0], sizes = [1, 384], strides = [1, 1]} : vector<64x384xf32> to vector<1x384xf32>
    %c1_204 = arith.constant 1 : index
    %c21120_205 = arith.constant 21120 : index
    %272 = vector.load %arg20[%c1_204, %c21120_205] : memref<2x24576xf32, #tpu.memory_space<vmem>>, vector<1x384xf32>
    tpu.vector_store %arg20[%c1_204, %c21120_205], %271 {strides = array<i32>} : memref<2x24576xf32, #tpu.memory_space<vmem>>, vector<1x384xf32>,
    %273 = vector.extract_strided_slice %160 {offsets = [56, 0], sizes = [1, 384], strides = [1, 1]} : vector<64x384xf32> to vector<1x384xf32>
    %c1_206 = arith.constant 1 : index
    %c21504_207 = arith.constant 21504 : index
    %274 = vector.load %arg20[%c1_206, %c21504_207] : memref<2x24576xf32, #tpu.memory_space<vmem>>, vector<1x384xf32>
    tpu.vector_store %arg20[%c1_206, %c21504_207], %273 {strides = array<i32>} : memref<2x24576xf32, #tpu.memory_space<vmem>>, vector<1x384xf32>,
    %275 = vector.extract_strided_slice %160 {offsets = [57, 0], sizes = [1, 384], strides = [1, 1]} : vector<64x384xf32> to vector<1x384xf32>
    %c1_208 = arith.constant 1 : index
    %c21888_209 = arith.constant 21888 : index
    %276 = vector.load %arg20[%c1_208, %c21888_209] : memref<2x24576xf32, #tpu.memory_space<vmem>>, vector<1x384xf32>
    tpu.vector_store %arg20[%c1_208, %c21888_209], %275 {strides = array<i32>} : memref<2x24576xf32, #tpu.memory_space<vmem>>, vector<1x384xf32>,
    %277 = vector.extract_strided_slice %160 {offsets = [58, 0], sizes = [1, 384], strides = [1, 1]} : vector<64x384xf32> to vector<1x384xf32>
    %c1_210 = arith.constant 1 : index
    %c22272_211 = arith.constant 22272 : index
    %278 = vector.load %arg20[%c1_210, %c22272_211] : memref<2x24576xf32, #tpu.memory_space<vmem>>, vector<1x384xf32>
    tpu.vector_store %arg20[%c1_210, %c22272_211], %277 {strides = array<i32>} : memref<2x24576xf32, #tpu.memory_space<vmem>>, vector<1x384xf32>,
    %279 = vector.extract_strided_slice %160 {offsets = [59, 0], sizes = [1, 384], strides = [1, 1]} : vector<64x384xf32> to vector<1x384xf32>
    %c1_212 = arith.constant 1 : index
    %c22656_213 = arith.constant 22656 : index
    %280 = vector.load %arg20[%c1_212, %c22656_213] : memref<2x24576xf32, #tpu.memory_space<vmem>>, vector<1x384xf32>
    tpu.vector_store %arg20[%c1_212, %c22656_213], %279 {strides = array<i32>} : memref<2x24576xf32, #tpu.memory_space<vmem>>, vector<1x384xf32>,
    %281 = vector.extract_strided_slice %160 {offsets = [60, 0], sizes = [1, 384], strides = [1, 1]} : vector<64x384xf32> to vector<1x384xf32>
    %c1_214 = arith.constant 1 : index
    %c23040_215 = arith.constant 23040 : index
    %282 = vector.load %arg20[%c1_214, %c23040_215] : memref<2x24576xf32, #tpu.memory_space<vmem>>, vector<1x384xf32>
    tpu.vector_store %arg20[%c1_214, %c23040_215], %281 {strides = array<i32>} : memref<2x24576xf32, #tpu.memory_space<vmem>>, vector<1x384xf32>,
    %283 = vector.extract_strided_slice %160 {offsets = [61, 0], sizes = [1, 384], strides = [1, 1]} : vector<64x384xf32> to vector<1x384xf32>
    %c1_216 = arith.constant 1 : index
    %c23424_217 = arith.constant 23424 : index
    %284 = vector.load %arg20[%c1_216, %c23424_217] : memref<2x24576xf32, #tpu.memory_space<vmem>>, vector<1x384xf32>
    tpu.vector_store %arg20[%c1_216, %c23424_217], %283 {strides = array<i32>} : memref<2x24576xf32, #tpu.memory_space<vmem>>, vector<1x384xf32>,
    %285 = vector.extract_strided_slice %160 {offsets = [62, 0], sizes = [1, 384], strides = [1, 1]} : vector<64x384xf32> to vector<1x384xf32>
    %c1_218 = arith.constant 1 : index
    %c23808_219 = arith.constant 23808 : index
    %286 = vector.load %arg20[%c1_218, %c23808_219] : memref<2x24576xf32, #tpu.memory_space<vmem>>, vector<1x384xf32>
    tpu.vector_store %arg20[%c1_218, %c23808_219], %285 {strides = array<i32>} : memref<2x24576xf32, #tpu.memory_space<vmem>>, vector<1x384xf32>,
    %287 = vector.extract_strided_slice %160 {offsets = [63, 0], sizes = [1, 384], strides = [1, 1]} : vector<64x384xf32> to vector<1x384xf32>
    %c1_220 = arith.constant 1 : index
    %c24192_221 = arith.constant 24192 : index
    %288 = vector.load %arg20[%c1_220, %c24192_221] : memref<2x24576xf32, #tpu.memory_space<vmem>>, vector<1x384xf32>
    tpu.vector_store %arg20[%c1_220, %c24192_221], %287 {strides = array<i32>} : memref<2x24576xf32, #tpu.memory_space<vmem>>, vector<1x384xf32>,
    tpu.wait_dma2 semaphore(%arg21 : memref<!tpu.dma_semaphore, #tpu.memory_space<semaphore_mem>>) src(%arg4 : memref<32x24576xbf16, #tpu.memory_space<any>>) dst(%arg19 : memref<32x24576xbf16, #tpu.memory_space<vmem>>)
    %c0_222 = arith.constant 0 : index
    %c0_223 = arith.constant 0 : index
    %289 = vector.load %arg20[%c0_222, %c0_223] : memref<2x24576xf32, #tpu.memory_space<vmem>>, vector<2x24576xf32>
    %290 = arith.truncf %289 : vector<2x24576xf32> to vector<2x24576xbf16>
    %c0_224 = arith.constant 0 : index
    %c0_225 = arith.constant 0 : index
    %291 = vector.load %arg19[%c0_224, %c0_225] : memref<32x24576xbf16, #tpu.memory_space<vmem>>, vector<32x24576xbf16>
    %cst_226 = arith.constant dense<0.000000e+00> : vector<2x32xf32>
    %292 = tpu.matmul %290, %291, %cst_226 {dimension_numbers = #tpu.dot_dimension_numbers<[1], [1], [0], [0], [0, 0, 1, 0], [], []>} : vector<2x24576xbf16>, vector<32x24576xbf16>, vector<2x32xf32> -> vector<2x32xf32>
    %c0_227 = arith.constant 0 : index
    %c0_228 = arith.constant 0 : index
    %293 = vector.load %arg5[%c0_227, %c0_228] : memref<2x2xf32, #tpu.memory_space<vmem>>, vector<2x2xf32>
    %c0_229 = arith.constant 0 : index
    %c0_230 = arith.constant 0 : index
    %294 = vector.load %arg6[%c0_229, %c0_230] : memref<2x32xf32, #tpu.memory_space<vmem>>, vector<2x32xf32>
    %cst_231 = arith.constant dense<0.000000e+00> : vector<2x32xf32>
    %295 = tpu.matmul %293, %294, %cst_231 {dimension_numbers = #tpu.dot_dimension_numbers<[1], [0], [0], [1], [0, 0, 1, 1], [], []>} : vector<2x2xf32>, vector<2x32xf32>, vector<2x32xf32> -> vector<2x32xf32>
    %296 = arith.addf %292, %295 : vector<2x32xf32>
    %c0_232 = arith.constant 0 : index
    %c0_233 = arith.constant 0 : index
    %297 = vector.load %arg7[%c0_232, %c0_233] : memref<1x32xf32, #tpu.memory_space<vmem>>, vector<1x32xf32>
    %298 = vector.broadcast %297 : vector<1x32xf32> to vector<2x32xf32>
    %299 = arith.addf %296, %298 : vector<2x32xf32>
    %cst_234 = arith.constant 0.000000e+00 : f32
    %300 = vector.broadcast %cst_234 : f32 to vector<2x32xf32>
    %301 = arith.maximumf %299, %300 : vector<2x32xf32>
    %c0_235 = arith.constant 0 : index
    %c0_236 = arith.constant 0 : index
    %302 = vector.load %arg8[%c0_235, %c0_236] : memref<32x96xf32, #tpu.memory_space<vmem>>, vector<32x96xf32>
    %cst_237 = arith.constant dense<0.000000e+00> : vector<2x96xf32>
    %303 = tpu.matmul %301, %302, %cst_237 {dimension_numbers = #tpu.dot_dimension_numbers<[1], [0], [0], [1], [0, 0, 1, 1], [], []>} : vector<2x32xf32>, vector<32x96xf32>, vector<2x96xf32> -> vector<2x96xf32>
    %c0_238 = arith.constant 0 : index
    %c0_239 = arith.constant 0 : index
    %304 = vector.load %arg10[%c0_238, %c0_239] : memref<1x96xf32, #tpu.memory_space<vmem>>, vector<1x96xf32>
    %305 = vector.broadcast %304 : vector<1x96xf32> to vector<2x96xf32>
    %306 = arith.addf %303, %305 : vector<2x96xf32>
    %cst_240 = arith.constant 0.000000e+00 : f32
    %307 = vector.broadcast %cst_240 : f32 to vector<1x32xf32>
    %c0_241 = arith.constant 0 : index
    %c0_242 = arith.constant 0 : index
    %308 = vector.load %arg9[%c0_241, %c0_242] : memref<32x96xf32, #tpu.memory_space<vmem>>, vector<32x96xf32>
    %cst_243 = arith.constant dense<0.000000e+00> : vector<1x96xf32>
    %309 = tpu.matmul %307, %308, %cst_243 {dimension_numbers = #tpu.dot_dimension_numbers<[1], [0], [0], [1], [0, 0, 1, 1], [], []>} : vector<1x32xf32>, vector<32x96xf32>, vector<1x96xf32> -> vector<1x96xf32>
    %c0_244 = arith.constant 0 : index
    %c0_245 = arith.constant 0 : index
    %310 = vector.load %arg11[%c0_244, %c0_245] : memref<1x96xf32, #tpu.memory_space<vmem>>, vector<1x96xf32>
    %311 = arith.addf %309, %310 : vector<1x96xf32>
    %312 = vector.extract_strided_slice %306 {offsets = [0, 0], sizes = [1, 96], strides = [1, 1]} : vector<2x96xf32> to vector<1x96xf32>
    %313 = vector.extract_strided_slice %312 {offsets = [0, 0], sizes = [1, 32], strides = [1, 1]} : vector<1x96xf32> to vector<1x32xf32>
    %314 = vector.extract_strided_slice %311 {offsets = [0, 0], sizes = [1, 32], strides = [1, 1]} : vector<1x96xf32> to vector<1x32xf32>
    %315 = arith.addf %313, %314 : vector<1x32xf32>
    %316 = arith.negf %315 : vector<1x32xf32>
    %317 = math.exp %316 : vector<1x32xf32>
    %cst_246 = arith.constant 1.000000e+00 : f32
    %318 = vector.broadcast %cst_246 : f32 to vector<1x32xf32>
    %319 = arith.addf %318, %317 : vector<1x32xf32>
    %320 = arith.divf %318, %319 : vector<1x32xf32>
    %321 = vector.extract_strided_slice %312 {offsets = [0, 32], sizes = [1, 32], strides = [1, 1]} : vector<1x96xf32> to vector<1x32xf32>
    %322 = vector.extract_strided_slice %311 {offsets = [0, 32], sizes = [1, 32], strides = [1, 1]} : vector<1x96xf32> to vector<1x32xf32>
    %323 = arith.addf %321, %322 : vector<1x32xf32>
    %324 = arith.negf %323 : vector<1x32xf32>
    %325 = math.exp %324 : vector<1x32xf32>
    %cst_247 = arith.constant 1.000000e+00 : f32
    %326 = vector.broadcast %cst_247 : f32 to vector<1x32xf32>
    %327 = arith.addf %326, %325 : vector<1x32xf32>
    %328 = arith.divf %326, %327 : vector<1x32xf32>
    %329 = vector.extract_strided_slice %312 {offsets = [0, 64], sizes = [1, 32], strides = [1, 1]} : vector<1x96xf32> to vector<1x32xf32>
    %330 = vector.extract_strided_slice %311 {offsets = [0, 64], sizes = [1, 32], strides = [1, 1]} : vector<1x96xf32> to vector<1x32xf32>
    %331 = arith.mulf %320, %330 : vector<1x32xf32>
    %332 = arith.addf %329, %331 : vector<1x32xf32>
    %333 = math.tanh %332 : vector<1x32xf32>
    %cst_248 = arith.constant 1.000000e+00 : f32
    %334 = vector.broadcast %cst_248 : f32 to vector<1x32xf32>
    %335 = arith.subf %334, %328 : vector<1x32xf32>
    %336 = arith.mulf %335, %333 : vector<1x32xf32>
    %337 = arith.mulf %328, %307 : vector<1x32xf32>
    %338 = arith.addf %336, %337 : vector<1x32xf32>
    %c0_249 = arith.constant 0 : index
    %c0_250 = arith.constant 0 : index
    %339 = vector.load %arg9[%c0_249, %c0_250] : memref<32x96xf32, #tpu.memory_space<vmem>>, vector<32x96xf32>
    %cst_251 = arith.constant dense<0.000000e+00> : vector<1x96xf32>
    %340 = tpu.matmul %338, %339, %cst_251 {dimension_numbers = #tpu.dot_dimension_numbers<[1], [0], [0], [1], [0, 0, 1, 1], [], []>} : vector<1x32xf32>, vector<32x96xf32>, vector<1x96xf32> -> vector<1x96xf32>
    %c0_252 = arith.constant 0 : index
    %c0_253 = arith.constant 0 : index
    %341 = vector.load %arg11[%c0_252, %c0_253] : memref<1x96xf32, #tpu.memory_space<vmem>>, vector<1x96xf32>
    %342 = arith.addf %340, %341 : vector<1x96xf32>
    %343 = vector.extract_strided_slice %306 {offsets = [1, 0], sizes = [1, 96], strides = [1, 1]} : vector<2x96xf32> to vector<1x96xf32>
    %344 = vector.extract_strided_slice %343 {offsets = [0, 0], sizes = [1, 32], strides = [1, 1]} : vector<1x96xf32> to vector<1x32xf32>
    %345 = vector.extract_strided_slice %342 {offsets = [0, 0], sizes = [1, 32], strides = [1, 1]} : vector<1x96xf32> to vector<1x32xf32>
    %346 = arith.addf %344, %345 : vector<1x32xf32>
    %347 = arith.negf %346 : vector<1x32xf32>
    %348 = math.exp %347 : vector<1x32xf32>
    %cst_254 = arith.constant 1.000000e+00 : f32
    %349 = vector.broadcast %cst_254 : f32 to vector<1x32xf32>
    %350 = arith.addf %349, %348 : vector<1x32xf32>
    %351 = arith.divf %349, %350 : vector<1x32xf32>
    %352 = vector.extract_strided_slice %343 {offsets = [0, 32], sizes = [1, 32], strides = [1, 1]} : vector<1x96xf32> to vector<1x32xf32>
    %353 = vector.extract_strided_slice %342 {offsets = [0, 32], sizes = [1, 32], strides = [1, 1]} : vector<1x96xf32> to vector<1x32xf32>
    %354 = arith.addf %352, %353 : vector<1x32xf32>
    %355 = arith.negf %354 : vector<1x32xf32>
    %356 = math.exp %355 : vector<1x32xf32>
    %cst_255 = arith.constant 1.000000e+00 : f32
    %357 = vector.broadcast %cst_255 : f32 to vector<1x32xf32>
    %358 = arith.addf %357, %356 : vector<1x32xf32>
    %359 = arith.divf %357, %358 : vector<1x32xf32>
    %360 = vector.extract_strided_slice %343 {offsets = [0, 64], sizes = [1, 32], strides = [1, 1]} : vector<1x96xf32> to vector<1x32xf32>
    %361 = vector.extract_strided_slice %342 {offsets = [0, 64], sizes = [1, 32], strides = [1, 1]} : vector<1x96xf32> to vector<1x32xf32>
    %362 = arith.mulf %351, %361 : vector<1x32xf32>
    %363 = arith.addf %360, %362 : vector<1x32xf32>
    %364 = math.tanh %363 : vector<1x32xf32>
    %cst_256 = arith.constant 1.000000e+00 : f32
    %365 = vector.broadcast %cst_256 : f32 to vector<1x32xf32>
    %366 = arith.subf %365, %359 : vector<1x32xf32>
    %367 = arith.mulf %366, %364 : vector<1x32xf32>
    %368 = arith.mulf %359, %338 : vector<1x32xf32>
    %369 = arith.addf %367, %368 : vector<1x32xf32>
    %370 = tpu.concatenate %338, %369 in 0 : vector<1x32xf32>, vector<1x32xf32> -> vector<2x32xf32>
    %c0_257 = arith.constant 0 : index
    %c0_258 = arith.constant 0 : index
    %371 = vector.load %arg12[%c0_257, %c0_258] : memref<32x200xf32, #tpu.memory_space<vmem>>, vector<32x200xf32>
    %cst_259 = arith.constant dense<0.000000e+00> : vector<2x200xf32>
    %372 = tpu.matmul %370, %371, %cst_259 {dimension_numbers = #tpu.dot_dimension_numbers<[1], [0], [0], [1], [0, 0, 1, 1], [], []>} : vector<2x32xf32>, vector<32x200xf32>, vector<2x200xf32> -> vector<2x200xf32>
    %c0_260 = arith.constant 0 : index
    %c0_261 = arith.constant 0 : index
    %373 = vector.load %arg13[%c0_260, %c0_261] : memref<1x200xf32, #tpu.memory_space<vmem>>, vector<1x200xf32>
    %374 = vector.broadcast %373 : vector<1x200xf32> to vector<2x200xf32>
    %375 = arith.addf %372, %374 : vector<2x200xf32>
    %cst_262 = arith.constant 0.000000e+00 : f32
    %376 = vector.broadcast %cst_262 : f32 to vector<2x200xf32>
    %377 = arith.maximumf %375, %376 : vector<2x200xf32>
    %c0_263 = arith.constant 0 : index
    %c0_264 = arith.constant 0 : index
    %378 = vector.load %arg14[%c0_263, %c0_264] : memref<200x100xf32, #tpu.memory_space<vmem>>, vector<200x100xf32>
    %cst_265 = arith.constant dense<0.000000e+00> : vector<2x100xf32>
    %379 = tpu.matmul %377, %378, %cst_265 {dimension_numbers = #tpu.dot_dimension_numbers<[1], [0], [0], [1], [0, 0, 1, 1], [], []>} : vector<2x200xf32>, vector<200x100xf32>, vector<2x100xf32> -> vector<2x100xf32>
    %c0_266 = arith.constant 0 : index
    %c0_267 = arith.constant 0 : index
    %380 = vector.load %arg15[%c0_266, %c0_267] : memref<1x100xf32, #tpu.memory_space<vmem>>, vector<1x100xf32>
    %381 = vector.broadcast %380 : vector<1x100xf32> to vector<2x100xf32>
    %382 = arith.addf %379, %381 : vector<2x100xf32>
    %cst_268 = arith.constant 0.000000e+00 : f32
    %383 = vector.broadcast %cst_268 : f32 to vector<2x100xf32>
    %384 = arith.maximumf %382, %383 : vector<2x100xf32>
    %c0_269 = arith.constant 0 : index
    %c0_270 = arith.constant 0 : index
    %385 = vector.load %arg16[%c0_269, %c0_270] : memref<100x1xf32, #tpu.memory_space<vmem>>, vector<100x1xf32>
    %cst_271 = arith.constant dense<0.000000e+00> : vector<2x1xf32>
    %386 = tpu.matmul %384, %385, %cst_271 {dimension_numbers = #tpu.dot_dimension_numbers<[1], [0], [0], [1], [0, 0, 1, 1], [], []>} : vector<2x100xf32>, vector<100x1xf32>, vector<2x1xf32> -> vector<2x1xf32>
    %c0_272 = arith.constant 0 : index
    %c0_273 = arith.constant 0 : index
    %387 = vector.load %arg17[%c0_272, %c0_273] : memref<1x1xf32, #tpu.memory_space<vmem>>, vector<1x1xf32>
    %388 = vector.broadcast %387 : vector<1x1xf32> to vector<2x1xf32>
    %389 = arith.addf %386, %388 : vector<2x1xf32>
    %c0_274 = arith.constant 0 : index
    %c0_275 = arith.constant 0 : index
    %390 = vector.load %arg18[%c0_274, %c0_275] : memref<2x1xf32, #tpu.memory_space<vmem>>, vector<2x1xf32>
    tpu.vector_store %arg18[%c0_274, %c0_275], %389 {strides = array<i32>} : memref<2x1xf32, #tpu.memory_space<vmem>>, vector<2x1xf32>,
    return
  }
  func.func @transform_0(%arg0: i32) -> (i32, i32) {
    %c0_i32 = arith.constant 0 : i32
    %c0_i32_0 = arith.constant 0 : i32
    %c0_i32_1 = arith.constant 0 : i32
    return %c0_i32, %c0_i32_0 : i32, i32
  }
  func.func @transform_1(%arg0: i32) -> (i32, i32) {
    %c0_i32 = arith.constant 0 : i32
    %c0_i32_0 = arith.constant 0 : i32
    %c0_i32_1 = arith.constant 0 : i32
    return %c0_i32, %c0_i32_0 : i32, i32
  }
  func.func @transform_2(%arg0: i32) -> (i32, i32) {
    %c0_i32 = arith.constant 0 : i32
    %c0_i32_0 = arith.constant 0 : i32
    %c0_i32_1 = arith.constant 0 : i32
    return %c0_i32, %c0_i32_0 : i32, i32
  }
  func.func @transform_4(%arg0: i32) -> (i32, i32) {
    %c0_i32 = arith.constant 0 : i32
    %c0_i32_0 = arith.constant 0 : i32
    %c0_i32_1 = arith.constant 0 : i32
    return %c0_i32, %c0_i32_0 : i32, i32
  }
  func.func @transform_5(%arg0: i32) -> (i32, i32) {
    %c0_i32 = arith.constant 0 : i32
    %c0_i32_0 = arith.constant 0 : i32
    %c0_i32_1 = arith.constant 0 : i32
    return %c0_i32, %c0_i32_0 : i32, i32
  }
  func.func @transform_6(%arg0: i32) -> (i32, i32) {
    %c0_i32 = arith.constant 0 : i32
    %c0_i32_0 = arith.constant 0 : i32
    %c0_i32_1 = arith.constant 0 : i32
    return %c0_i32, %c0_i32_0 : i32, i32
  }
  func.func @transform_7(%arg0: i32) -> (i32, i32) {
    %c0_i32 = arith.constant 0 : i32
    %c0_i32_0 = arith.constant 0 : i32
    %c0_i32_1 = arith.constant 0 : i32
    return %c0_i32, %c0_i32_0 : i32, i32
  }
  func.func @transform_8(%arg0: i32) -> (i32, i32) {
    %c0_i32 = arith.constant 0 : i32
    %c0_i32_0 = arith.constant 0 : i32
    %c0_i32_1 = arith.constant 0 : i32
    return %c0_i32, %c0_i32_0 : i32, i32
  }
  func.func @transform_9(%arg0: i32) -> (i32, i32) {
    %c0_i32 = arith.constant 0 : i32
    %c0_i32_0 = arith.constant 0 : i32
    %c0_i32_1 = arith.constant 0 : i32
    return %c0_i32, %c0_i32_0 : i32, i32
  }
  func.func @transform_10(%arg0: i32) -> (i32, i32) {
    %c0_i32 = arith.constant 0 : i32
    %c0_i32_0 = arith.constant 0 : i32
    %c0_i32_1 = arith.constant 0 : i32
    return %c0_i32, %c0_i32_0 : i32, i32
  }
  func.func @transform_11(%arg0: i32) -> (i32, i32) {
    %c0_i32 = arith.constant 0 : i32
    %c0_i32_0 = arith.constant 0 : i32
    %c0_i32_1 = arith.constant 0 : i32
    return %c0_i32, %c0_i32_0 : i32, i32
  }
  func.func @transform_12(%arg0: i32) -> (i32, i32) {
    %c0_i32 = arith.constant 0 : i32
    %c0_i32_0 = arith.constant 0 : i32
    %c0_i32_1 = arith.constant 0 : i32
    return %c0_i32, %c0_i32_0 : i32, i32
  }
  func.func @transform_13(%arg0: i32) -> (i32, i32) {
    %c0_i32 = arith.constant 0 : i32
    %c0_i32_0 = arith.constant 0 : i32
    %c0_i32_1 = arith.constant 0 : i32
    return %c0_i32, %c0_i32_0 : i32, i32
  }
  func.func @transform_14(%arg0: i32) -> (i32, i32) {
    %c0_i32 = arith.constant 0 : i32
    %c0_i32_0 = arith.constant 0 : i32
    %c0_i32_1 = arith.constant 0 : i32
    return %c0_i32, %c0_i32_0 : i32, i32
  }
  func.func @transform_15(%arg0: i32) -> (i32, i32) {
    %c0_i32 = arith.constant 0 : i32
    %c0_i32_0 = arith.constant 0 : i32
    %c0_i32_1 = arith.constant 0 : i32
    return %c0_i32, %c0_i32_0 : i32, i32
  }
  func.func @transform_16(%arg0: i32) -> (i32, i32) {
    %c0_i32 = arith.constant 0 : i32
    %c0_i32_0 = arith.constant 0 : i32
    %c0_i32_1 = arith.constant 0 : i32
    return %c0_i32, %c0_i32_0 : i32, i32
  }
  func.func @transform_17(%arg0: i32) -> (i32, i32) {
    %c0_i32 = arith.constant 0 : i32
    %c0_i32_0 = arith.constant 0 : i32
    %c0_i32_1 = arith.constant 0 : i32
    return %c0_i32, %c0_i32_0 : i32, i32
  }
}

</mosaic_0001>

<bundles_post_ra>
// kernel: critic_forward.2
= control target key start
LH: loop header
LB: loop body
LE: loop exit
PB: predicated region body
PF: predicated region fallthrough
CT: control target
= control target key end

     0   :  { %s2797_s12 = smov 0   ;;  %s2799_s13 = smov 0   ;;  %s3611_s0 = inlined_call_operand.vmem [shape: bf16[27,14336], index: 0, kind: input, shape index: {}]   ;;  %s3612_s1 = inlined_call_operand.vmem [shape: bf16[8,27], index: 1, kind: input, shape index: {}]   ;;  %s3613_s2 = inlined_call_operand.vmem [shape: f32[8,1], index: 2, kind: input, shape index: {}]   ;;  %s3614_s3 = inlined_call_operand.vmem [shape: bf16[8,3584], index: 3, kind: output, shape index: {}]  }
   0x1   :  { %s2801_s14 = smov 0  }
   0x2 LB: > { %s2558_s15 = sadd.s32 4294967295, %s2773_s14   ;;  %s2814_s16 = sadd.s32 1, %s2773_s14   ;;  %s2773_s14 = sphi %s2801_s14, %s3617_s14   ;;  %s2769_s13 = sphi %s2799_s13, %s3616_s13   ;;  %s2765_s12 = sphi %s2797_s12, %s3615_s12  }
   0x3   : > { %s17_s17 = ssub.s32 %s2773_s14, %s2814_s16  ;;  %s20_s18 = sadd.s32 1, %s2769_s13 }
   0x4   : > { %p18_p0 = scmp.eq.s32.totalorder %s17_s17, 0  ;;  %p27_p1 = scmp.ne.s32.totalorder %s2769_s13, %s2765_s12 }
   0x5   : > { %p28_p2 = scmp.eq.s32.totalorder %s2773_s14, 0  ;;  %p2561_p4 = scmp.ge.s32.totalorder %s2773_s14, 2 }
   0x6   : > { %s2823_s19 = scalar_select %p18_p0, %s2769_s13, %s20_s18  }
   0x7   : > { %p29_p3 = por %p28_p2, %p27_p1  ;;  %127 = sbr.rel (%p2561_p4) target bundleno = 73 (0x49), region = 24 }
   0xc   : > { %130 = sbr.rel (!%p29_p3) target bundleno = 73 (0x49), region = 28  ;;  %s132_s20 = sand.u32 (%p29_p3), 1, %s2769_s13  }
   0xd   : > { %s2714_s21 = smul.u32 (%p29_p3), 224, %s2773_s14 }
   0xe   : > { %s2722_s22 = smul.u32 (%p29_p3), 896, %s132_s20 }
   0xf   : > { %s2831_s25 = scalar_lea.vmem (%p29_p3), %s3611_s0, %s2714_s21 }
  0x10   : > { %v150_v0 = vld [vmem:[%s2831_s25] sm:$0xff] (%p29_p3)  ;;  %v152_v1 = vld [vmem:[%s2831_s25 + $0x8] sm:$0xff] (%p29_p3)  ;;  %v154_v2 = vld [vmem:[%s2831_s25 + $0x10] sm:$0xff] (%p29_p3)  ;;  %s2836_s26 = scalar_lea.vmem (%p29_p3), [#allocation2], %s2722_s22 }
  0x11   : > { %151 = vst [vmem:[%s2836_s26] sm:$0xff] %v150_v0  ;;  %153 = vst [vmem:[%s2836_s26 + $0x8] sm:$0xff] %v152_v1  ;;  %v156_v3 = vld [vmem:[%s2831_s25 + $0x18] sm:$0xff]  ;;  %v158_v4 = vld [vmem:[%s2831_s25 + $0x20] sm:$0xff] }
  0x12   : > { %155 = vst [vmem:[%s2836_s26 + $0x10] sm:$0xff] %v154_v2  ;;  %v160_v5 = vld [vmem:[%s2831_s25 + $0x28] sm:$0xff]  ;;  %157 = vst [vmem:[%s2836_s26 + $0x18] sm:$0xff] %v156_v3  ;;  %v162_v6 = vld [vmem:[%s2831_s25 + $0x30] sm:$0xff] }
  0x13   : > { %159 = vst [vmem:[%s2836_s26 + $0x20] sm:$0xff] %v158_v4  ;;  %161 = vst [vmem:[%s2836_s26 + $0x28] sm:$0xff] %v160_v5  ;;  %v164_v7 = vld [vmem:[%s2831_s25 + $0x38] sm:$0xff]  ;;  %v166_v8 = vld [vmem:[%s2831_s25 + $0x40] sm:$0xff] }
  0x14   : > { %163 = vst [vmem:[%s2836_s26 + $0x30] sm:$0xff] %v162_v6  ;;  %165 = vst [vmem:[%s2836_s26 + $0x38] sm:$0xff] %v164_v7  ;;  %v168_v9 = vld [vmem:[%s2831_s25 + $0x48] sm:$0xff]  ;;  %v170_v10 = vld [vmem:[%s2831_s25 + $0x50] sm:$0xff] }
  0x15   : > { %167 = vst [vmem:[%s2836_s26 + $0x40] sm:$0xff] %v166_v8  ;;  %v172_v11 = vld [vmem:[%s2831_s25 + $0x58] sm:$0xff]  ;;  %169 = vst [vmem:[%s2836_s26 + $0x48] sm:$0xff] %v168_v9  ;;  %v174_v12 = vld [vmem:[%s2831_s25 + $0x60] sm:$0xff] }
  0x16   : > { %171 = vst [vmem:[%s2836_s26 + $0x50] sm:$0xff] %v170_v10  ;;  %173 = vst [vmem:[%s2836_s26 + $0x58] sm:$0xff] %v172_v11  ;;  %v176_v13 = vld [vmem:[%s2831_s25 + $0x68] sm:$0xff]  ;;  %v178_v14 = vld [vmem:[%s2831_s25 + $0x70] sm:$0xff] }
  0x17   : > { %175 = vst [vmem:[%s2836_s26 + $0x60] sm:$0xff] %v174_v12  ;;  %177 = vst [vmem:[%s2836_s26 + $0x68] sm:$0xff] %v176_v13  ;;  %v180_v15 = vld [vmem:[%s2831_s25 + $0x78] sm:$0xff]  ;;  %v182_v16 = vld [vmem:[%s2831_s25 + $0x80] sm:$0xff] }
  0x18   : > { %179 = vst [vmem:[%s2836_s26 + $0x70] sm:$0xff] %v178_v14  ;;  %v184_v17 = vld [vmem:[%s2831_s25 + $0x88] sm:$0xff]  ;;  %181 = vst [vmem:[%s2836_s26 + $0x78] sm:$0xff] %v180_v15  ;;  %v186_v18 = vld [vmem:[%s2831_s25 + $0x90] sm:$0xff] }
  0x19   : > { %183 = vst [vmem:[%s2836_s26 + $0x80] sm:$0xff] %v182_v16  ;;  %185 = vst [vmem:[%s2836_s26 + $0x88] sm:$0xff] %v184_v17  ;;  %v188_v19 = vld [vmem:[%s2831_s25 + $0x98] sm:$0xff]  ;;  %v190_v20 = vld [vmem:[%s2831_s25 + $0xa0] sm:$0xff] }
  0x1a   : > { %187 = vst [vmem:[%s2836_s26 + $0x90] sm:$0xff] %v186_v18  ;;  %189 = vst [vmem:[%s2836_s26 + $0x98] sm:$0xff] %v188_v19  ;;  %v192_v21 = vld [vmem:[%s2831_s25 + $0xa8] sm:$0xff]  ;;  %v194_v22 = vld [vmem:[%s2831_s25 + $0xb0] sm:$0xff] }
  0x1b   : > { %191 = vst [vmem:[%s2836_s26 + $0xa0] sm:$0xff] %v190_v20  ;;  %v196_v23 = vld [vmem:[%s2831_s25 + $0xb8] sm:$0xff]  ;;  %193 = vst [vmem:[%s2836_s26 + $0xa8] sm:$0xff] %v192_v21  ;;  %v198_v24 = vld [vmem:[%s2831_s25 + $0xc0] sm:$0xff] }
  0x1c   : > { %195 = vst [vmem:[%s2836_s26 + $0xb0] sm:$0xff] %v194_v22  ;;  %197 = vst [vmem:[%s2836_s26 + $0xb8] sm:$0xff] %v196_v23  ;;  %v200_v25 = vld [vmem:[%s2831_s25 + $0xc8] sm:$0xff]  ;;  %v202_v26 = vld [vmem:[%s2831_s25 + $0xd0] sm:$0xff] }
  0x1d   : > { %199 = vst [vmem:[%s2836_s26 + $0xc0] sm:$0xff] %v198_v24  ;;  %201 = vst [vmem:[%s2836_s26 + $0xc8] sm:$0xff] %v200_v25  ;;  %v204_v27 = vld [vmem:[%s2831_s25 + $0xd8] sm:$0xff]  ;;  %v206_v28 = vld [vmem:[%s2831_s25 + $0x1c0] sm:$0xff] }
  0x1e   : > { %203 = vst [vmem:[%s2836_s26 + $0xd0] sm:$0xff] %v202_v26  ;;  %v208_v29 = vld [vmem:[%s2831_s25 + $0x1c8] sm:$0xff]  ;;  %205 = vst [vmem:[%s2836_s26 + $0xd8] sm:$0xff] %v204_v27  ;;  %v210_v30 = vld [vmem:[%s2831_s25 + $0x1d0] sm:$0xff] }
  0x1f   : > { %207 = vst [vmem:[%s2836_s26 + $0xe0] sm:$0xff] %v206_v28  ;;  %209 = vst [vmem:[%s2836_s26 + $0xe8] sm:$0xff] %v208_v29  ;;  %v212_v31 = vld [vmem:[%s2831_s25 + $0x1d8] sm:$0xff]  ;;  %v214_v32 = vld [vmem:[%s2831_s25 + $0x1e0] sm:$0xff] }
  0x20   : > { %211 = vst [vmem:[%s2836_s26 + $0xf0] sm:$0xff] %v210_v30  ;;  %213 = vst [vmem:[%s2836_s26 + $0xf8] sm:$0xff] %v212_v31  ;;  %v216_v33 = vld [vmem:[%s2831_s25 + $0x1e8] sm:$0xff]  ;;  %v218_v34 = vld [vmem:[%s2831_s25 + $0x1f0] sm:$0xff] }
  0x21   : > { %215 = vst [vmem:[%s2836_s26 + $0x100] sm:$0xff] %v214_v32  ;;  %v220_v35 = vld [vmem:[%s2831_s25 + $0x1f8] sm:$0xff]  ;;  %217 = vst [vmem:[%s2836_s26 + $0x108] sm:$0xff] %v216_v33  ;;  %v222_v36 = vld [vmem:[%s2831_s25 + $0x200] sm:$0xff] }
  0x22   : > { %219 = vst [vmem:[%s2836_s26 + $0x110] sm:$0xff] %v218_v34  ;;  %221 = vst [vmem:[%s2836_s26 + $0x118] sm:$0xff] %v220_v35  ;;  %v224_v37 = vld [vmem:[%s2831_s25 + $0x208] sm:$0xff]  ;;  %v226_v38 = vld [vmem:[%s2831_s25 + $0x210] sm:$0xff] }
  0x23   : > { %223 = vst [vmem:[%s2836_s26 + $0x120] sm:$0xff] %v222_v36  ;;  %225 = vst [vmem:[%s2836_s26 + $0x128] sm:$0xff] %v224_v37  ;;  %v228_v39 = vld [vmem:[%s2831_s25 + $0x218] sm:$0xff]  ;;  %v230_v40 = vld [vmem:[%s2831_s25 + $0x220] sm:$0xff] }
  0x24   : > { %227 = vst [vmem:[%s2836_s26 + $0x130] sm:$0xff] %v226_v38  ;;  %v232_v41 = vld [vmem:[%s2831_s25 + $0x228] sm:$0xff]  ;;  %229 = vst [vmem:[%s2836_s26 + $0x138] sm:$0xff] %v228_v39  ;;  %v234_v42 = vld [vmem:[%s2831_s25 + $0x230] sm:$0xff] }
  0x25   : > { %231 = vst [vmem:[%s2836_s26 + $0x140] sm:$0xff] %v230_v40  ;;  %233 = vst [vmem:[%s2836_s26 + $0x148] sm:$0xff] %v232_v41  ;;  %v236_v43 = vld [vmem:[%s2831_s25 + $0x238] sm:$0xff]  ;;  %v238_v44 = vld [vmem:[%s2831_s25 + $0x240] sm:$0xff] }
  0x26   : > { %235 = vst [vmem:[%s2836_s26 + $0x150] sm:$0xff] %v234_v42  ;;  %237 = vst [vmem:[%s2836_s26 + $0x158] sm:$0xff] %v236_v43  ;;  %v240_v45 = vld [vmem:[%s2831_s25 + $0x248] sm:$0xff]  ;;  %v242_v46 = vld [vmem:[%s2831_s25 + $0x250] sm:$0xff] }
  0x27   : > { %239 = vst [vmem:[%s2836_s26 + $0x160] sm:$0xff] %v238_v44  ;;  %v244_v47 = vld [vmem:[%s2831_s25 + $0x258] sm:$0xff]  ;;  %241 = vst [vmem:[%s2836_s26 + $0x168] sm:$0xff] %v240_v45  ;;  %v246_v48 = vld [vmem:[%s2831_s25 + $0x260] sm:$0xff] }
  0x28   : > { %243 = vst [vmem:[%s2836_s26 + $0x170] sm:$0xff] %v242_v46  ;;  %245 = vst [vmem:[%s2836_s26 + $0x178] sm:$0xff] %v244_v47  ;;  %v248_v49 = vld [vmem:[%s2831_s25 + $0x268] sm:$0xff]  ;;  %v250_v50 = vld [vmem:[%s2831_s25 + $0x270] sm:$0xff] }
  0x29   : > { %247 = vst [vmem:[%s2836_s26 + $0x180] sm:$0xff] %v246_v48  ;;  %249 = vst [vmem:[%s2836_s26 + $0x188] sm:$0xff] %v248_v49  ;;  %v252_v51 = vld [vmem:[%s2831_s25 + $0x278] sm:$0xff]  ;;  %v254_v52 = vld [vmem:[%s2831_s25 + $0x280] sm:$0xff] }
  0x2a   : > { %251 = vst [vmem:[%s2836_s26 + $0x190] sm:$0xff] %v250_v50  ;;  %v256_v53 = vld [vmem:[%s2831_s25 + $0x288] sm:$0xff]  ;;  %253 = vst [vmem:[%s2836_s26 + $0x198] sm:$0xff] %v252_v51  ;;  %v258_v54 = vld [vmem:[%s2831_s25 + $0x290] sm:$0xff] }
  0x2b   : > { %255 = vst [vmem:[%s2836_s26 + $0x1a0] sm:$0xff] %v254_v52  ;;  %257 = vst [vmem:[%s2836_s26 + $0x1a8] sm:$0xff] %v256_v53  ;;  %v260_v55 = vld [vmem:[%s2831_s25 + $0x298] sm:$0xff]  ;;  %v262_v56 = vld [vmem:[%s2831_s25 + $0x380] sm:$0xff] }
  0x2c   : > { %259 = vst [vmem:[%s2836_s26 + $0x1b0] sm:$0xff] %v258_v54  ;;  %261 = vst [vmem:[%s2836_s26 + $0x1b8] sm:$0xff] %v260_v55  ;;  %v264_v57 = vld [vmem:[%s2831_s25 + $0x388] sm:$0xff]  ;;  %v266_v58 = vld [vmem:[%s2831_s25 + $0x390] sm:$0xff] }
  0x2d   : > { %263 = vst [vmem:[%s2836_s26 + $0x1c0] sm:$0xff] %v262_v56  ;;  %v268_v59 = vld [vmem:[%s2831_s25 + $0x398] sm:$0xff]  ;;  %265 = vst [vmem:[%s2836_s26 + $0x1c8] sm:$0xff] %v264_v57  ;;  %v270_v60 = vld [vmem:[%s2831_s25 + $0x3a0] sm:$0xff] }
  0x2e   : > { %267 = vst [vmem:[%s2836_s26 + $0x1d0] sm:$0xff] %v266_v58  ;;  %269 = vst [vmem:[%s2836_s26 + $0x1d8] sm:$0xff] %v268_v59  ;;  %v272_v61 = vld [vmem:[%s2831_s25 + $0x3a8] sm:$0xff]  ;;  %v274_v62 = vld [vmem:[%s2831_s25 + $0x3b0] sm:$0xff] }
  0x2f   : > { %271 = vst [vmem:[%s2836_s26 + $0x1e0] sm:$0xff] %v270_v60  ;;  %273 = vst [vmem:[%s2836_s26 + $0x1e8] sm:$0xff] %v272_v61  ;;  %v276_v63 = vld [vmem:[%s2831_s25 + $0x3b8] sm:$0xff]  ;;  %v278_v0 = vld [vmem:[%s2831_s25 + $0x3c0] sm:$0xff] }
  0x30   : > { %275 = vst [vmem:[%s2836_s26 + $0x1f0] sm:$0xff] %v274_v62  ;;  %v280_v1 = vld [vmem:[%s2831_s25 + $0x3c8] sm:$0xff]  ;;  %277 = vst [vmem:[%s2836_s26 + $0x1f8] sm:$0xff] %v276_v63  ;;  %v282_v2 = vld [vmem:[%s2831_s25 + $0x3d0] sm:$0xff] }
  0x31   : > { %279 = vst [vmem:[%s2836_s26 + $0x200] sm:$0xff] %v278_v0  ;;  %281 = vst [vmem:[%s2836_s26 + $0x208] sm:$0xff] %v280_v1  ;;  %v284_v3 = vld [vmem:[%s2831_s25 + $0x3d8] sm:$0xff]  ;;  %v286_v4 = vld [vmem:[%s2831_s25 + $0x3e0] sm:$0xff] }
  0x32   : > { %283 = vst [vmem:[%s2836_s26 + $0x210] sm:$0xff] %v282_v2  ;;  %285 = vst [vmem:[%s2836_s26 + $0x218] sm:$0xff] %v284_v3  ;;  %v288_v5 = vld [vmem:[%s2831_s25 + $0x3e8] sm:$0xff]  ;;  %v290_v6 = vld [vmem:[%s2831_s25 + $0x3f0] sm:$0xff] }
  0x33   : > { %287 = vst [vmem:[%s2836_s26 + $0x220] sm:$0xff] %v286_v4  ;;  %v292_v7 = vld [vmem:[%s2831_s25 + $0x3f8] sm:$0xff]  ;;  %289 = vst [vmem:[%s2836_s26 + $0x228] sm:$0xff] %v288_v5  ;;  %v294_v8 = vld [vmem:[%s2831_s25 + $0x400] sm:$0xff] }
  0x34   : > { %291 = vst [vmem:[%s2836_s26 + $0x230] sm:$0xff] %v290_v6  ;;  %293 = vst [vmem:[%s2836_s26 + $0x238] sm:$0xff] %v292_v7  ;;  %v296_v9 = vld [vmem:[%s2831_s25 + $0x408] sm:$0xff]  ;;  %v298_v10 = vld [vmem:[%s2831_s25 + $0x410] sm:$0xff] }
  0x35   : > { %295 = vst [vmem:[%s2836_s26 + $0x240] sm:$0xff] %v294_v8  ;;  %297 = vst [vmem:[%s2836_s26 + $0x248] sm:$0xff] %v296_v9  ;;  %v300_v11 = vld [vmem:[%s2831_s25 + $0x418] sm:$0xff]  ;;  %v302_v12 = vld [vmem:[%s2831_s25 + $0x420] sm:$0xff] }
  0x36   : > { %299 = vst [vmem:[%s2836_s26 + $0x250] sm:$0xff] %v298_v10  ;;  %v304_v13 = vld [vmem:[%s2831_s25 + $0x428] sm:$0xff]  ;;  %301 = vst [vmem:[%s2836_s26 + $0x258] sm:$0xff] %v300_v11  ;;  %v306_v14 = vld [vmem:[%s2831_s25 + $0x430] sm:$0xff] }
  0x37   : > { %303 = vst [vmem:[%s2836_s26 + $0x260] sm:$0xff] %v302_v12  ;;  %305 = vst [vmem:[%s2836_s26 + $0x268] sm:$0xff] %v304_v13  ;;  %v308_v15 = vld [vmem:[%s2831_s25 + $0x438] sm:$0xff]  ;;  %v310_v16 = vld [vmem:[%s2831_s25 + $0x440] sm:$0xff] }
  0x38   : > { %307 = vst [vmem:[%s2836_s26 + $0x270] sm:$0xff] %v306_v14  ;;  %309 = vst [vmem:[%s2836_s26 + $0x278] sm:$0xff] %v308_v15  ;;  %v312_v17 = vld [vmem:[%s2831_s25 + $0x448] sm:$0xff]  ;;  %v314_v18 = vld [vmem:[%s2831_s25 + $0x450] sm:$0xff] }
  0x39   : > { %311 = vst [vmem:[%s2836_s26 + $0x280] sm:$0xff] %v310_v16  ;;  %v316_v19 = vld [vmem:[%s2831_s25 + $0x458] sm:$0xff]  ;;  %313 = vst [vmem:[%s2836_s26 + $0x288] sm:$0xff] %v312_v17  ;;  %v318_v20 = vld [vmem:[%s2831_s25 + $0x540] sm:$0xff] }
  0x3a   : > { %315 = vst [vmem:[%s2836_s26 + $0x290] sm:$0xff] %v314_v18  ;;  %317 = vst [vmem:[%s2836_s26 + $0x298] sm:$0xff] %v316_v19  ;;  %v320_v21 = vld [vmem:[%s2831_s25 + $0x548] sm:$0xff]  ;;  %v322_v22 = vld [vmem:[%s2831_s25 + $0x550] sm:$0xff] }
  0x3b   : > { %319 = vst [vmem:[%s2836_s26 + $0x2a0] sm:$0xff] %v318_v20  ;;  %321 = vst [vmem:[%s2836_s26 + $0x2a8] sm:$0xff] %v320_v21  ;;  %v324_v23 = vld [vmem:[%s2831_s25 + $0x558] sm:$0xff]  ;;  %v326_v24 = vld [vmem:[%s2831_s25 + $0x560] sm:$0xff] }
  0x3c   : > { %323 = vst [vmem:[%s2836_s26 + $0x2b0] sm:$0xff] %v322_v22  ;;  %v328_v25 = vld [vmem:[%s2831_s25 + $0x568] sm:$0xff]  ;;  %325 = vst [vmem:[%s2836_s26 + $0x2b8] sm:$0xff] %v324_v23  ;;  %v330_v26 = vld [vmem:[%s2831_s25 + $0x570] sm:$0xff] }
  0x3d   : > { %327 = vst [vmem:[%s2836_s26 + $0x2c0] sm:$0xff] %v326_v24  ;;  %329 = vst [vmem:[%s2836_s26 + $0x2c8] sm:$0xff] %v328_v25  ;;  %v332_v27 = vld [vmem:[%s2831_s25 + $0x578] sm:$0xff]  ;;  %v334_v28 = vld [vmem:[%s2831_s25 + $0x580] sm:$0xff] }
  0x3e   : > { %331 = vst [vmem:[%s2836_s26 + $0x2d0] sm:$0xff] %v330_v26  ;;  %333 = vst [vmem:[%s2836_s26 + $0x2d8] sm:$0xff] %v332_v27  ;;  %v336_v29 = vld [vmem:[%s2831_s25 + $0x588] sm:$0xff]  ;;  %v338_v30 = vld [vmem:[%s2831_s25 + $0x590] sm:$0xff] }
  0x3f   : > { %335 = vst [vmem:[%s2836_s26 + $0x2e0] sm:$0xff] %v334_v28  ;;  %v340_v31 = vld [vmem:[%s2831_s25 + $0x598] sm:$0xff]  ;;  %337 = vst [vmem:[%s2836_s26 + $0x2e8] sm:$0xff] %v336_v29  ;;  %v342_v32 = vld [vmem:[%s2831_s25 + $0x5a0] sm:$0xff] }
  0x40   : > { %339 = vst [vmem:[%s2836_s26 + $0x2f0] sm:$0xff] %v338_v30  ;;  %341 = vst [vmem:[%s2836_s26 + $0x2f8] sm:$0xff] %v340_v31  ;;  %v344_v33 = vld [vmem:[%s2831_s25 + $0x5a8] sm:$0xff]  ;;  %v346_v34 = vld [vmem:[%s2831_s25 + $0x5b0] sm:$0xff] }
  0x41   : > { %343 = vst [vmem:[%s2836_s26 + $0x300] sm:$0xff] %v342_v32  ;;  %345 = vst [vmem:[%s2836_s26 + $0x308] sm:$0xff] %v344_v33  ;;  %v348_v35 = vld [vmem:[%s2831_s25 + $0x5b8] sm:$0xff]  ;;  %v350_v36 = vld [vmem:[%s2831_s25 + $0x5c0] sm:$0xff] }
  0x42   : > { %347 = vst [vmem:[%s2836_s26 + $0x310] sm:$0xff] %v346_v34  ;;  %v352_v37 = vld [vmem:[%s2831_s25 + $0x5c8] sm:$0xff]  ;;  %349 = vst [vmem:[%s2836_s26 + $0x318] sm:$0xff] %v348_v35  ;;  %v354_v38 = vld [vmem:[%s2831_s25 + $0x5d0] sm:$0xff] }
  0x43   : > { %351 = vst [vmem:[%s2836_s26 + $0x320] sm:$0xff] %v350_v36  ;;  %353 = vst [vmem:[%s2836_s26 + $0x328] sm:$0xff] %v352_v37  ;;  %v356_v39 = vld [vmem:[%s2831_s25 + $0x5d8] sm:$0xff]  ;;  %v358_v40 = vld [vmem:[%s2831_s25 + $0x5e0] sm:$0xff] }
  0x44   : > { %355 = vst [vmem:[%s2836_s26 + $0x330] sm:$0xff] %v354_v38  ;;  %357 = vst [vmem:[%s2836_s26 + $0x338] sm:$0xff] %v356_v39  ;;  %v360_v41 = vld [vmem:[%s2831_s25 + $0x5e8] sm:$0xff]  ;;  %v362_v42 = vld [vmem:[%s2831_s25 + $0x5f0] sm:$0xff] }
  0x45   : > { %359 = vst [vmem:[%s2836_s26 + $0x340] sm:$0xff] %v358_v40  ;;  %v364_v43 = vld [vmem:[%s2831_s25 + $0x5f8] sm:$0xff]  ;;  %361 = vst [vmem:[%s2836_s26 + $0x348] sm:$0xff] %v360_v41  ;;  %v366_v44 = vld [vmem:[%s2831_s25 + $0x600] sm:$0xff] }
  0x46   : > { %363 = vst [vmem:[%s2836_s26 + $0x350] sm:$0xff] %v362_v42  ;;  %365 = vst [vmem:[%s2836_s26 + $0x358] sm:$0xff] %v364_v43  ;;  %v368_v45 = vld [vmem:[%s2831_s25 + $0x608] sm:$0xff]  ;;  %v370_v46 = vld [vmem:[%s2831_s25 + $0x610] sm:$0xff] }
  0x47   : > { %367 = vst [vmem:[%s2836_s26 + $0x360] sm:$0xff] %v366_v44  ;;  %369 = vst [vmem:[%s2836_s26 + $0x368] sm:$0xff] %v368_v45  ;;  %v372_v47 = vld [vmem:[%s2831_s25 + $0x618] sm:$0xff] }
  0x48   : > { %371 = vst [vmem:[%s2836_s26 + $0x370] sm:$0xff] %v370_v46  ;;  %373 = vst [vmem:[%s2836_s26 + $0x378] sm:$0xff] %v372_v47 }
  0x49 PF: > { %p2563_p5 = scmp.ge.s32.totalorder %s2773_s14, 1  ;;  %p378_p6 = scmp.lt.s32.totalorder %s2773_s14, 3 }
  0x4b   : > { %p379_p7 = pnand %p2563_p5, %p378_p6 }
  0x4c   : > { %s385_s27 = sand.u32 (!%p379_p7), 1, %s2765_s12   ;;  %s409_s7 = smul.u32 (!%p379_p7), 14, %s2558_s15 }
  0x4d   : > { %382 = sbr.rel (%p379_p7) target bundleno = 405 (0x195), region = 51 }
  0x4e   : > { %s2723_s30 = smul.u32 (!%p379_p7), 896, %s385_s27  ;;  %p410_p8 = scmp.lt.s32.totalorder (!%p379_p7), %s409_s7, 27 }
  0x50   : > { %s3068_s4 = scalar_lea.vmem (!%p379_p7), [#allocation2], %s2723_s30 }
  0x52   : > { %vm575_vm0 = vcmask 1044480   ;;  %v2399_v48 = vld [vmem:[%s3613_s2] sm:$0xff]  ;;  %vm576_vm1 = vcmask 1045504   ;;  %v2775_v49 = vmov 65535   ;;  %v2776_v51 = vmov 0   ;;  %v432_v55 = vld [vmem:[%s3068_s4 + $0x1c8] sm:$0xff] }
  0x53   : > { %v577_v50 = vsel %vm575_vm0, 4294967295, %v2775_v49  ;;  %653 = vmatprep.mubr.bf16.mxu0 %v2776_v51  ;;  %694 = vmatprep.mubr.bf16.mxu1 %v2776_v51  ;;  %v431_v52 = vld [vmem:[%s3068_s4 + $0x1c0] sm:$0xff]  ;;  %v439_v57 = vld [vmem:[%s3068_s4 + $0x2a8] sm:$0x33]  ;;  %v433_v1 = vld [vmem:[%s3068_s4 + $0x1d0] sm:$0xff]  ;;  %vm571_vm2 = vcmask 220160  }
  0x54   : > { %2750 = vset.pattern.permute.xlu0 %v2776_v51  ;;  %v438_v53 = vld [vmem:[%s3068_s4 + $0x2a0] sm:$0x33]  ;;  %v3072_v54 = vsel %vm576_vm1, %v577_v50, 0  ;;  %v2582_v61 = vcombine.high %v432_v55, %v439_v57  ;;  %v2581_v62 = vcombine.low %v432_v55, %v439_v57  ;;  %v418_v63 = vld [vmem:[%s3068_s4 + $0x8] sm:$0xff]  ;;  %v440_v5 = vld [vmem:[%s3068_s4 + $0x2b0] sm:$0x33] }
  0x55   : > { %2402 = vperm.xlu0 %2750, %v2399_v48   ;;  %v2580_v56 = vcombine.high %v431_v52, %v438_v53  ;;  %v2579_v58 = vcombine.low %v431_v52, %v438_v53  ;;  %v417_v59 = vld [vmem:[%s3068_s4] sm:$0xff]  ;;  %v425_v0 = vld [vmem:[%s3068_s4 + $0xe8] sm:$0xff]  ;;  %v434_v6 = vld [vmem:[%s3068_s4 + $0x1d8] sm:$0xff]  ;;  %v2584_v11 = vcombine.high %v433_v1, %v440_v5  ;;  %v2583_v14 = vcombine.low %v433_v1, %v440_v5  ;;  %s3619_s7 = smov (!%p410_p8, %s409_s7), 27 }
  0x56   : > { %v424_v60 = vld [vmem:[%s3068_s4 + $0xe0] sm:$0xff]  ;;  %v441_v7 = vld [vmem:[%s3068_s4 + $0x2b8] sm:$0x33]  ;;  %v589_v8 = vand.u32 %v2582_v61, %v3072_v54  ;;  %v586_v9 = vand.u32 %v2581_v62, %v3072_v54  ;;  %v2568_v10 = vcombine.high %v418_v63, %v425_v0  ;;  %v2567_v15 = vcombine.low %v418_v63, %v425_v0  ;;  %v419_v18 = vld [vmem:[%s3068_s4 + $0x10] sm:$0xff]  ;;  %s2564_s8 = sshll.u32 %s3619_s7, 2 }
  0x57   : > { %v583_v2 = vand.u32 %v2580_v56, %v3072_v54  ;;  %v580_v3 = vand.u32 %v2579_v58, %v3072_v54  ;;  %v2566_v4 = vcombine.high %v417_v59, %v424_v60  ;;  %v2586_v12 = vcombine.high %v434_v6, %v441_v7  ;;  %v426_v19 = vld [vmem:[%s3068_s4 + $0xf0] sm:$0xff]  ;;  %v420_v21 = vld [vmem:[%s3068_s4 + $0x18] sm:$0xff]  ;;  %v435_v22 = vld [vmem:[%s3068_s4 + $0x1e0] sm:$0xff]  ;;  %s3556_s11 = scalar_lea.vmem %s3614_s3, %s2564_s8 }
  0x58   : > { %674 = vmatprep.subr.bf16.mxu1 %v589_v8  ;;  %v2565_v13 = vcombine.low %v417_v59, %v424_v60  ;;  %v595_v16 = vand.u32 %v2584_v11, %v3072_v54  ;;  %v2585_v17 = vcombine.low %v434_v6, %v441_v7  ;;  %v442_v23 = vld [vmem:[%s3068_s4 + $0x2c0] sm:$0x33]  ;;  %v427_v24 = vld [vmem:[%s3068_s4 + $0xf8] sm:$0xff]  ;;  %v436_v25 = vld [vmem:[%s3068_s4 + $0x1e8] sm:$0xff]  ;;  %v592_v28 = vand.u32 %v2583_v14, %v3072_v54 }
  0x59   : > { %633 = vmatprep.subr.bf16.mxu0 %v583_v2  ;;  %675 = vmatpush1.bf16.msra.mxu1 %v586_v9  ;;  %v601_v20 = vand.u32 %v2586_v12, %v3072_v54  ;;  %v443_v26 = vld [vmem:[%s3068_s4 + $0x2c8] sm:$0x33]  ;;  %v3101_v27 = vld [vmem:[%s3612_s1] sm:$0xf]  ;;  %v2570_v30 = vcombine.high %v419_v18, %v426_v19  ;;  %v2588_v31 = vcombine.high %v435_v22, %v442_v23  ;;  %v437_v43 = vld [vmem:[%s3068_s4 + $0x1f0] sm:$0xff] }
  0x5a   : > { %634 = vmatpush1.bf16.msra.mxu0 %v580_v3  ;;  %676 = vmatprep.subr.bf16.mxu1 %v2568_v10  ;;  %v598_v29 = vand.u32 %v2585_v17, %v3072_v54  ;;  %v2572_v32 = vcombine.high %v420_v21, %v427_v24  ;;  %v2590_v33 = vcombine.high %v436_v25, %v443_v26  ;;  %v421_v39 = vld [vmem:[%s3068_s4 + $0x20] sm:$0xff]  ;;  %v422_v42 = vld [vmem:[%s3068_s4 + $0x28] sm:$0xff]  ;;  %v444_v44 = vld [vmem:[%s3068_s4 + $0x2d0] sm:$0x33] }
  0x5b   : > { %635 = vmatprep.subr.bf16.mxu0 %v2566_v4  ;;  %v2569_v34 = vcombine.low %v419_v18, %v426_v19  ;;  %v2587_v35 = vcombine.low %v435_v22, %v442_v23  ;;  %v2571_v36 = vcombine.low %v420_v21, %v427_v24  ;;  %v607_v37 = vand.u32 %v2588_v31, %v3072_v54  ;;  %v428_v40 = vld [vmem:[%s3068_s4 + $0x100] sm:$0xff]  ;;  %v429_v45 = vld [vmem:[%s3068_s4 + $0x108] sm:$0xff]  ;;  %v922_v46 = vld [vmem:[%s3068_s4 + $0x1f8] sm:$0xff] }
  0x5c   : > { %v2589_v38 = vcombine.low %v436_v25, %v443_v26  ;;  %v613_v41 = vand.u32 %v2590_v33, %v3072_v54  ;;  %v929_v47 = vld [vmem:[%s3068_s4 + $0x2d8] sm:$0x33]  ;;  %v2574_v50 = vcombine.high %v421_v39, %v428_v40  ;;  %v2592_v52 = vcombine.high %v437_v43, %v444_v44  ;;  %v923_v58 = vld [vmem:[%s3068_s4 + $0x200] sm:$0xff]  ;;  %v924_v63 = vld [vmem:[%s3068_s4 + $0x208] sm:$0xff] }
  0x5d   : > { %677 = vmatpush1.bf16.msra.mxu1 %v2567_v15  ;;  %v604_v48 = vand.u32 %v2587_v35, %v3072_v54  ;;  %v2576_v53 = vcombine.high %v422_v42, %v429_v45  ;;  %v2615_v55 = vcombine.high %v922_v46, %v929_v47  ;;  %v2573_v56 = vcombine.low %v421_v39, %v428_v40  ;;  %v930_v59 = vld [vmem:[%s3068_s4 + $0x2e0] sm:$0x33]  ;;  %v931_v0 = vld [vmem:[%s3068_s4 + $0x2e8] sm:$0x33]  ;;  %v423_v2 = vld [vmem:[%s3068_s4 + $0x30] sm:$0xff] }
  0x5e   : > { %636 = vmatpush1.bf16.msra.mxu0 %v2565_v13  ;;  %756 = vmatprep.subr.bf16.mxu1 %v601_v20  ;;  %v610_v49 = vand.u32 %v2589_v38, %v3072_v54  ;;  %v2591_v57 = vcombine.low %v437_v43, %v444_v44  ;;  %v2575_v60 = vcombine.low %v422_v42, %v429_v45  ;;  %v430_v3 = vld [vmem:[%s3068_s4 + $0x110] sm:$0xff]  ;;  %v3138_v4 = vld [vmem:[%s3068_s4 + $0x38] sm:$0xff]  ;;  %v3145_v10 = vld [vmem:[%s3068_s4 + $0x40] sm:$0xff] }
  0x5f   : > { %715 = vmatprep.subr.bf16.mxu0 %v595_v16  ;;  %v619_v61 = vand.u32 %v2592_v52, %v3072_v54  ;;  %v2614_v62 = vcombine.low %v922_v46, %v929_v47  ;;  %v1066_v1 = vand.u32 %v2615_v55, %v3072_v54  ;;  %v3141_v5 = vld [vmem:[%s3068_s4 + $0x118] sm:$0xff]  ;;  %v2617_v6 = vcombine.high %v923_v58, %v930_v59  ;;  %v3148_v11 = vld [vmem:[%s3068_s4 + $0x120] sm:$0xff]  ;;  %v3152_v15 = vld [vmem:[%s3068_s4 + $0x48] sm:$0xff] }
  0x60   : > { %2594 = vmatmul.mubr.msk.bf16.vlgmr.msra.gmra.mxu1 %vm571_vm2, %v3101_v27  ;;  %v616_v7 = vand.u32 %v2591_v57, %v3072_v54  ;;  %v2616_v8 = vcombine.low %v923_v58, %v930_v59  ;;  %v2619_v9 = vcombine.high %v924_v63, %v931_v0  ;;  %v2578_v13 = vcombine.high %v423_v2, %v430_v3  ;;  %v3157_v17 = vld [vmem:[%s3068_s4 + $0x128] sm:$0xff]  ;;  %v1423_v18 = vld [vmem:[%s3068_s4 + $0x250] sm:$0xff]  ;;  %v1424_v24 = vld [vmem:[%s3068_s4 + $0x258] sm:$0xff] }
  0x61   : > { %2593 = vmatmul.mubr.msk.bf16.vlgmr.msra.gmra.mxu0 %vm571_vm2, %v3101_v27  ;;  %757 = vmatpush1.bf16.msra.mxu1 %v598_v29  ;;  %v1063_v12 = vand.u32 %v2614_v62, %v3072_v54  ;;  %v2618_v14 = vcombine.low %v924_v63, %v931_v0  ;;  %v2601_v16 = vcombine.high %v3138_v4, %v3141_v5  ;;  %v1430_v19 = vld [vmem:[%s3068_s4 + $0x330] sm:$0x33]  ;;  %v1431_v25 = vld [vmem:[%s3068_s4 + $0x338] sm:$0x33]  ;;  %v1916_v42 = vld [vmem:[%s3068_s4 + $0x268] sm:$0xff] }
  0x62   : > { %716 = vmatpush1.bf16.msra.mxu0 %v592_v28  ;;  %758 = vmatprep.subr.bf16.mxu1 %v2572_v32  ;;  %v2577_v20 = vcombine.low %v423_v2, %v430_v3  ;;  %v2600_v21 = vcombine.low %v3138_v4, %v3141_v5  ;;  %v1072_v22 = vand.u32 %v2617_v6, %v3072_v54  ;;  %v3180_v31 = vld [vmem:[%s3068_s4 + $0x2f0] sm:$0x33]  ;;  %v3189_v35 = vld [vmem:[%s3068_s4 + $0x2f8] sm:$0x33]  ;;  %v1923_v43 = vld [vmem:[%s3068_s4 + $0x348] sm:$0x33] }
  0x63   : > { %717 = vmatprep.subr.bf16.mxu0 %v2570_v30  ;;  %735 = vmatprep.mubr.bf16.mxu0 %v2776_v51  ;;  %v2602_v23 = vcombine.low %v3145_v10, %v3148_v11  ;;  %v1078_v26 = vand.u32 %v2619_v9, %v3072_v54  ;;  %v1069_v28 = vand.u32 %v2616_v8, %v3072_v54  ;;  %v3177_v30 = vld [vmem:[%s3068_s4 + $0x210] sm:$0xff]  ;;  %v3215_v52 = vld [vmem:[%s3068_s4 + $0x58] sm:$0xff]  ;;  %v3255_v9 = vld [vmem:[%s3068_s4 + $0x220] sm:$0xff] }
  0x64   : > { %776 = vmatprep.mubr.bf16.mxu1 %v2776_v51  ;;  %v2603_v29 = vcombine.high %v3145_v10, %v3148_v11  ;;  %v1075_v32 = vand.u32 %v2618_v14, %v3072_v54  ;;  %v2604_v33 = vcombine.low %v3152_v15, %v3157_v17  ;;  %v2658_v38 = vcombine.high %v1423_v18, %v1430_v19  ;;  %v3204_v47 = vld [vmem:[%s3068_s4 + $0x50] sm:$0xff]  ;;  %v1918_v3 = vld [vmem:[%s3068_s4 + $0x278] sm:$0xff] }
  0x65   : > { %759 = vmatpush1.bf16.msra.mxu1 %v2571_v36  ;;  %v2657_v36 = vcombine.low %v1423_v18, %v1430_v19  ;;  %v2659_v39 = vcombine.low %v1424_v24, %v1431_v25  ;;  %v2660_v40 = vcombine.high %v1424_v24, %v1431_v25  ;;  %v2605_v44 = vcombine.high %v3152_v15, %v3157_v17  ;;  %v1924_v62 = vld [vmem:[%s3068_s4 + $0x350] sm:$0x33]  ;;  %v1925_v4 = vld [vmem:[%s3068_s4 + $0x358] sm:$0x33]  ;;  %v1919_v18 = vld [vmem:[%s3068_s4 + $0x280] sm:$0xff] }
  0x66   : > { %718 = vmatpush1.bf16.msra.mxu0 %v2569_v34  ;;  %838 = vmatprep.subr.bf16.mxu1 %v613_v41  ;;  %v3186_v34 = vld [vmem:[%s3068_s4 + $0x218] sm:$0xff]  ;;  %v1432_v41 = vld [vmem:[%s3068_s4 + $0x340] sm:$0x33]  ;;  %v2620_v45 = vcombine.low %v3177_v30, %v3180_v31  ;;  %v2621_v46 = vcombine.high %v3177_v30, %v3180_v31  ;;  %v3221_v55 = vand.u32 %v2658_v38, %v3072_v54  ;;  %v1920_v24 = vld [vmem:[%s3068_s4 + $0x288] sm:$0xff] }
  0x67   : > { %797 = vmatprep.subr.bf16.mxu0 %v607_v37  ;;  %v1425_v37 = vld [vmem:[%s3068_s4 + $0x260] sm:$0xff]  ;;  %v3227_v57 = vand.u32 %v2659_v39, %v3072_v54  ;;  %v2623_v63 = vcombine.high %v3186_v34, %v3189_v35  ;;  %v2685_v2 = vcombine.high %v1916_v42, %v1923_v43  ;;  %v1927_v25 = vld [vmem:[%s3068_s4 + $0x368] sm:$0x33]  ;;  %v1921_v39 = vld [vmem:[%s3068_s4 + $0x290] sm:$0xff] }
  0x68   : > { %2596 = vmatmul.mubr.msk.bf16.vlgmr.msra.gmra.mxu1 %vm571_vm2, %v3101_v27  ;;  %v2661_v58 = vcombine.low %v1425_v37, %v1432_v41  ;;  %v2662_v59 = vcombine.high %v1425_v37, %v1432_v41  ;;  %v1084_v19 = vand.u32 %v2621_v46, %v3072_v54  ;;  %v935_v30 = vld [vmem:[%s3068_s4 + $0x308] sm:$0x33]  ;;  %v1929_v46 = vld [vmem:[%s3068_s4 + $0x378] sm:$0x33] }
  0x69   : > { %2595 = vmatmul.mubr.msk.bf16.vlgmr.msra.gmra.mxu0 %vm571_vm2, %v3101_v27  ;;  %839 = vmatpush1.bf16.msra.mxu1 %v610_v49  ;;  %v3210_v49 = vand.u32 %v2657_v36, %v3072_v54 }
  0x6a   : > { %798 = vmatpush1.bf16.msra.mxu0 %v604_v48  ;;  %840 = vmatprep.subr.bf16.mxu1 %v2576_v53  ;;  %v3207_v48 = vld [vmem:[%s3068_s4 + $0x130] sm:$0xff]  ;;  %v3218_v53 = vld [vmem:[%s3068_s4 + $0x138] sm:$0xff]  ;;  %v3244_v6 = vand.u32 %v2662_v59, %v3072_v54 }
  0x6b   : > { %799 = vmatprep.subr.bf16.mxu0 %v2574_v50  ;;  %817 = vmatprep.mubr.bf16.mxu0 %v2776_v51  ;;  %v2622_v50 = vcombine.low %v3186_v34, %v3189_v35  ;;  %v2606_v0 = vcombine.low %v3204_v47, %v3207_v48  ;;  %v2608_v5 = vcombine.low %v3215_v52, %v3218_v53 }
  0x6c   : > { %858 = vmatprep.mubr.bf16.mxu1 %v2776_v51  ;;  %v2609_v10 = vcombine.high %v3215_v52, %v3218_v53 }
  0x6d   : > { %841 = vmatpush1.bf16.msra.mxu1 %v2575_v60  ;;  %v2684_v60 = vcombine.low %v1916_v42, %v1923_v43  ;;  %v2692_v42 = vcombine.low %v1920_v24, %v1927_v25  ;;  %v2693_v43 = vcombine.high %v1920_v24, %v1927_v25 }
  0x6e   : > { %800 = vmatpush1.bf16.msra.mxu0 %v2573_v56  ;;  %1116 = vmatprep.subr.bf16.mxu1 %v1066_v1  ;;  %v3224_v56 = vand.u32 %v2660_v40, %v3072_v54  ;;  %v2607_v1 = vcombine.high %v3204_v47, %v3207_v48 }
  0x6f   : > { %879 = vmatprep.subr.bf16.mxu0 %v619_v61  ;;  %v1917_v61 = vld [vmem:[%s3068_s4 + $0x270] sm:$0xff]  ;;  %v3250_v8 = vand.u32 %v2684_v60, %v3072_v54  ;;  %v3308_v59 = vand.u32 %v2693_v43, %v3072_v54  ;;  %v3314_v17 = vand.u32 %v2692_v42, %v3072_v54  ;;  %v1413_v42 = vld [vmem:[%s3068_s4 + $0x158] sm:$0xff]  ;;  %v1422_v43 = vld [vmem:[%s3068_s4 + $0x248] sm:$0xff] }
  0x70   : > { %2598 = vmatmul.mubr.msk.bf16.vlgmr.msra.gmra.mxu1 %vm571_vm2, %v3101_v27  ;;  %v2686_v14 = vcombine.low %v1917_v61, %v1924_v62 }
  0x71   : > { %2597 = vmatmul.mubr.msk.bf16.vlgmr.msra.gmra.mxu0 %vm571_vm2, %v3101_v27  ;;  %1117 = vmatpush1.bf16.msra.mxu1 %v1063_v12  ;;  %v3258_v12 = vld [vmem:[%s3068_s4 + $0x300] sm:$0x33] }
  0x72   : > { %880 = vmatpush1.bf16.msra.mxu0 %v616_v7  ;;  %1118 = vmatprep.subr.bf16.mxu1 %v2601_v16  ;;  %v3247_v7 = vand.u32 %v2661_v58, %v3072_v54  ;;  %v2687_v16 = vcombine.high %v1917_v61, %v1924_v62  ;;  %v3276_v31 = vand.u32 %v2686_v14, %v3072_v54  ;;  %v914_v14 = vld [vmem:[%s3068_s4 + $0x68] sm:$0xff] }
  0x73   : > { %881 = vmatprep.subr.bf16.mxu0 %v2578_v13  ;;  %899 = vmatprep.mubr.bf16.mxu0 %v2776_v51  ;;  %v3261_v13 = vand.u32 %v2685_v2, %v3072_v54  ;;  %v2625_v36 = vcombine.high %v3255_v9, %v3258_v12  ;;  %v1087_v58 = vand.u32 %v2622_v50, %v3072_v54  ;;  %v920_v2 = vld [vmem:[%s3068_s4 + $0x140] sm:$0xff] }
  0x74   : > { %1136 = vmatprep.mubr.bf16.mxu1 %v2776_v51 }
  0x75   : > { %1119 = vmatpush1.bf16.msra.mxu1 %v2600_v21  ;;  %v2689_v21 = vcombine.high %v1918_v3, %v1925_v4  ;;  %v1096_v60 = vand.u32 %v2625_v36, %v3072_v54 }
  0x76   : > { %882 = vmatpush1.bf16.msra.mxu0 %v2577_v20  ;;  %1198 = vmatprep.subr.bf16.mxu1 %v1078_v26  ;;  %v2688_v20 = vcombine.low %v1918_v3, %v1925_v4  ;;  %v1090_v26 = vand.u32 %v2623_v63, %v3072_v54  ;;  %v913_v63 = vld [vmem:[%s3068_s4 + $0x60] sm:$0xff] }
  0x77   : > { %1157 = vmatprep.subr.bf16.mxu0 %v1072_v22  ;;  %v1926_v22 = vld [vmem:[%s3068_s4 + $0x360] sm:$0x33]  ;;  %v3283_v37 = vand.u32 %v2689_v21, %v3072_v54  ;;  %v1427_v21 = vld [vmem:[%s3068_s4 + $0x318] sm:$0x33]  ;;  %v2611_v25 = vcombine.high %v913_v63, %v920_v2  ;;  %v2610_v47 = vcombine.low %v913_v63, %v920_v2 }
  0x78   : > { %2628 = vmatmul.mubr.msk.bf16.vlgmr.msra.gmra.mxu1 %vm571_vm2, %v3101_v27  ;;  %v3286_v38 = vand.u32 %v2688_v20, %v3072_v54  ;;  %v2690_v40 = vcombine.low %v1919_v18, %v1926_v22  ;;  %v2691_v41 = vcombine.high %v1919_v18, %v1926_v22  ;;  %v1420_v20 = vld [vmem:[%s3068_s4 + $0x238] sm:$0xff]  ;;  %v1407_v63 = vld [vmem:[%s3068_s4 + $0x80] sm:$0xff] }
  0x79   : > { %2599 = vmatmul.mubr.msk.bf16.vlgmr.msra.gmra.mxu0 %vm571_vm2, %v3101_v27  ;;  %1199 = vmatpush1.bf16.msra.mxu1 %v1075_v32  ;;  %v1081_v32 = vand.u32 %v2620_v45, %v3072_v54  ;;  %v1922_v45 = vld [vmem:[%s3068_s4 + $0x298] sm:$0xff]  ;;  %v1414_v2 = vld [vmem:[%s3068_s4 + $0x160] sm:$0xff] }
  0x7a   : > { %1158 = vmatpush1.bf16.msra.mxu0 %v1069_v28  ;;  %1200 = vmatprep.subr.bf16.mxu1 %v2605_v44  ;;  %v928_v28 = vld [vmem:[%s3068_s4 + $0x228] sm:$0xff]  ;;  %v1928_v44 = vld [vmem:[%s3068_s4 + $0x370] sm:$0x33]  ;;  %v3311_v15 = vand.u32 %v2690_v40, %v3072_v54  ;;  %v2696_v50 = vcombine.low %v1922_v45, %v1929_v46  ;;  %v2697_v62 = vcombine.high %v1922_v45, %v1929_v46  ;;  %v1421_v40 = vld [vmem:[%s3068_s4 + $0x240] sm:$0xff] }
  0x7b   : > { %1159 = vmatprep.subr.bf16.mxu0 %v2603_v29  ;;  %1177 = vmatprep.mubr.bf16.mxu0 %v2776_v51  ;;  %v3273_v29 = vand.u32 %v2687_v16, %v3072_v54  ;;  %v2627_v11 = vcombine.high %v928_v28, %v935_v30  ;;  %v2694_v34 = vcombine.low %v1921_v39, %v1928_v44  ;;  %v1419_v16 = vld [vmem:[%s3068_s4 + $0x230] sm:$0xff] }
  0x7c   : > { %1218 = vmatprep.mubr.bf16.mxu1 %v2776_v51  ;;  %v2695_v35 = vcombine.high %v1921_v39, %v1928_v44  ;;  %v2626_v61 = vcombine.low %v928_v28, %v935_v30  ;;  %v3343_v18 = vand.u32 %v2697_v62, %v3072_v54  ;;  %v2652_v30 = vcombine.high %v1420_v20, %v1427_v21  ;;  %v1406_v39 = vld [vmem:[%s3068_s4 + $0x78] sm:$0xff]  ;;  %v1429_v44 = vld [vmem:[%s3068_s4 + $0x328] sm:$0x33] }
  0x7d   : > { %1201 = vmatpush1.bf16.msra.mxu1 %v2604_v33  ;;  %v2624_v33 = vcombine.low %v3255_v9, %v3258_v12  ;;  %v3332_v4 = vand.u32 %v2694_v34, %v3072_v54  ;;  %v3335_v9 = vand.u32 %v2696_v50, %v3072_v54  ;;  %v1102_v12 = vand.u32 %v2627_v11, %v3072_v54 }
  0x7e   : > { %1160 = vmatpush1.bf16.msra.mxu0 %v2602_v23  ;;  %1280 = vmatprep.subr.bf16.mxu1 %v1090_v26  ;;  %v3305_v23 = vand.u32 %v2691_v41, %v3072_v54  ;;  %v3329_v3 = vand.u32 %v2695_v35, %v3072_v54  ;;  %v1099_v24 = vand.u32 %v2626_v61, %v3072_v54  ;;  %v1428_v41 = vld [vmem:[%s3068_s4 + $0x320] sm:$0x33] }
  0x7f   : > { %1239 = vmatprep.subr.bf16.mxu0 %v1084_v19  ;;  %v921_v19 = vld [vmem:[%s3068_s4 + $0x148] sm:$0xff]  ;;  %v1093_v22 = vand.u32 %v2624_v33, %v3072_v54  ;;  %v1569_v36 = vand.u32 %v2652_v30, %v3072_v54  ;;  %v2638_v11 = vcombine.high %v1406_v39, %v1413_v42  ;;  %v2656_v33 = vcombine.high %v1422_v43, %v1429_v44 }
  0x80   : > { %2630 = vmatmul.mubr.msk.bf16.vlgmr.msra.gmra.mxu1 %vm571_vm2, %v3101_v27  ;;  %v2613_v28 = vcombine.high %v914_v14, %v921_v19  ;;  %v2612_v52 = vcombine.low %v914_v14, %v921_v19  ;;  %v2653_v35 = vcombine.low %v1421_v40, %v1428_v41  ;;  %v2637_v50 = vcombine.low %v1406_v39, %v1413_v42  ;;  %v1415_v14 = vld [vmem:[%s3068_s4 + $0x168] sm:$0xff] }
  0x81   : > { %2629 = vmatmul.mubr.msk.bf16.vlgmr.msra.gmra.mxu0 %vm571_vm2, %v3101_v27  ;;  %1281 = vmatpush1.bf16.msra.mxu1 %v1087_v58  ;;  %v2655_v61 = vcombine.low %v1422_v43, %v1429_v44  ;;  %v1581_v62 = vand.u32 %v2656_v33, %v3072_v54  ;;  %v2640_v19 = vcombine.high %v1407_v63, %v1414_v2  ;;  %v1913_v42 = vld [vmem:[%s3068_s4 + $0x1a8] sm:$0xff] }
  0x82   : > { %1240 = vmatpush1.bf16.msra.mxu0 %v1081_v32  ;;  %1282 = vmatprep.subr.bf16.mxu1 %v2609_v10  ;;  %v1412_v32 = vld [vmem:[%s3068_s4 + $0x150] sm:$0xff]  ;;  %v2654_v10 = vcombine.high %v1421_v40, %v1428_v41  ;;  %v1912_v41 = vld [vmem:[%s3068_s4 + $0x1a0] sm:$0xff] }
  0x83   : > { %1241 = vmatprep.subr.bf16.mxu0 %v2607_v1  ;;  %1259 = vmatprep.mubr.bf16.mxu0 %v2776_v51  ;;  %v1426_v1 = vld [vmem:[%s3068_s4 + $0x310] sm:$0x33] }
  0x84   : > { %1300 = vmatprep.mubr.bf16.mxu1 %v2776_v51  ;;  %v2650_v26 = vcombine.high %v1419_v16, %v1426_v1  ;;  %v2649_v48 = vcombine.low %v1419_v16, %v1426_v1  ;;  %v1572_v16 = vand.u32 %v2653_v35, %v3072_v54  ;;  %v1578_v1 = vand.u32 %v2655_v61, %v3072_v54 }
  0x85   : > { %1283 = vmatpush1.bf16.msra.mxu1 %v2608_v5  ;;  %v1405_v5 = vld [vmem:[%s3068_s4 + $0x70] sm:$0xff] }
  0x86   : > { %1242 = vmatpush1.bf16.msra.mxu0 %v2606_v0  ;;  %1362 = vmatprep.subr.bf16.mxu1 %v1102_v12  ;;  %v1563_v53 = vand.u32 %v2650_v26, %v3072_v54  ;;  %v2651_v0 = vcombine.low %v1420_v20, %v1427_v21  ;;  %v1560_v45 = vand.u32 %v2649_v48, %v3072_v54  ;;  %v1408_v12 = vld [vmem:[%s3068_s4 + $0x88] sm:$0xff]  ;;  %v1417_v26 = vld [vmem:[%s3068_s4 + $0x178] sm:$0xff] }
  0x87   : > { %1321 = vmatprep.subr.bf16.mxu0 %v1096_v60  ;;  %v2636_v58 = vcombine.high %v1405_v5, %v1412_v32  ;;  %v2635_v34 = vcombine.low %v1405_v5, %v1412_v32  ;;  %v1575_v60 = vand.u32 %v2654_v10, %v3072_v54  ;;  %v2642_v20 = vcombine.high %v1408_v12, %v1415_v14  ;;  %v1910_v32 = vld [vmem:[%s3068_s4 + $0x190] sm:$0xff] }
  0x88   : > { %2632 = vmatmul.mubr.msk.bf16.vlgmr.msra.gmra.mxu1 %vm571_vm2, %v3101_v27  ;;  %v1566_v46 = vand.u32 %v2651_v0, %v3072_v54  ;;  %v2639_v21 = vcombine.low %v1407_v63, %v1414_v2  ;;  %v1409_v54 = vld [vmem:[%s3068_s4 + $0x90] sm:$0xff] }
  0x89   : > { %2631 = vmatmul.mubr.msk.bf16.vlgmr.msra.gmra.mxu0 %vm571_vm2, %v3101_v27  ;;  %1363 = vmatpush1.bf16.msra.mxu1 %v1099_v24  ;;  %v1416_v24 = vld [vmem:[%s3068_s4 + $0x170] sm:$0xff] }
  0x8a   : > { %1322 = vmatpush1.bf16.msra.mxu0 %v1093_v22  ;;  %1364 = vmatprep.subr.bf16.mxu1 %v2613_v28  ;;  %v2641_v22 = vcombine.low %v1408_v12, %v1415_v14  ;;  %v2644_v28 = vcombine.high %v1409_v54, %v1416_v24 }
  0x8b   : > { %1323 = vmatprep.subr.bf16.mxu0 %v2611_v25  ;;  %1341 = vmatprep.mubr.bf16.mxu0 %v2776_v51  ;;  %v1410_v25 = vld [vmem:[%s3068_s4 + $0x98] sm:$0xff] }
  0x8c   : > { %1382 = vmatprep.mubr.bf16.mxu1 %v2776_v51  ;;  %v2646_v30 = vcombine.high %v1410_v25, %v1417_v26  ;;  %v2645_v48 = vcombine.low %v1410_v25, %v1417_v26 }
  0x8d   : > { %1365 = vmatpush1.bf16.msra.mxu1 %v2612_v52  ;;  %v1418_v52 = vld [vmem:[%s3068_s4 + $0x180] sm:$0xff] }
  0x8e   : > { %1324 = vmatpush1.bf16.msra.mxu0 %v2610_v47  ;;  %1654 = vmatprep.subr.bf16.mxu1 %v1569_v36  ;;  %v2643_v47 = vcombine.low %v1409_v54, %v1416_v24  ;;  %v1911_v36 = vld [vmem:[%s3068_s4 + $0x198] sm:$0xff] }
  0x8f   : > { %1613 = vmatprep.subr.bf16.mxu0 %v1563_v53  ;;  %v1909_v53 = vld [vmem:[%s3068_s4 + $0x188] sm:$0xff] }
  0x90   : > { %2634 = vmatmul.mubr.msk.bf16.vlgmr.msra.gmra.mxu1 %vm571_vm2, %v3101_v27 }
  0x91   : > { %2633 = vmatmul.mubr.msk.bf16.vlgmr.msra.gmra.mxu0 %vm571_vm2, %v3101_v27  ;;  %1655 = vmatpush1.bf16.msra.mxu1 %v1566_v46  ;;  %v1915_v46 = vld [vmem:[%s3068_s4 + $0x1b8] sm:$0xff] }
  0x92   : > { %1614 = vmatpush1.bf16.msra.mxu0 %v1560_v45  ;;  %1656 = vmatprep.subr.bf16.mxu1 %v2638_v11  ;;  %v1914_v45 = vld [vmem:[%s3068_s4 + $0x1b0] sm:$0xff] }
  0x93   : > { %1615 = vmatprep.subr.bf16.mxu0 %v2636_v58  ;;  %1633 = vmatprep.mubr.bf16.mxu0 %v2776_v51 }
  0x94   : > { %1674 = vmatprep.mubr.bf16.mxu1 %v2776_v51 }
  0x95   : > { %1657 = vmatpush1.bf16.msra.mxu1 %v2637_v50 }
  0x96   : > { %1616 = vmatpush1.bf16.msra.mxu0 %v2635_v34  ;;  %1736 = vmatprep.subr.bf16.mxu1 %v1581_v62 }
  0x97   : > { %1695 = vmatprep.subr.bf16.mxu0 %v1575_v60 }
  0x98   : > { %2664 = vmatmul.mubr.msk.bf16.vlgmr.msra.gmra.mxu1 %vm571_vm2, %v3101_v27 }
  0x99   : > { %2663 = vmatmul.mubr.msk.bf16.vlgmr.msra.gmra.mxu0 %vm571_vm2, %v3101_v27  ;;  %1737 = vmatpush1.bf16.msra.mxu1 %v1578_v1 }
  0x9a   : > { %1696 = vmatpush1.bf16.msra.mxu0 %v1572_v16  ;;  %1738 = vmatprep.subr.bf16.mxu1 %v2642_v20 }
  0x9b   : > { %1697 = vmatprep.subr.bf16.mxu0 %v2640_v19  ;;  %1715 = vmatprep.mubr.bf16.mxu0 %v2776_v51 }
  0x9c   : > { %1756 = vmatprep.mubr.bf16.mxu1 %v2776_v51 }
  0x9d   : > { %1739 = vmatpush1.bf16.msra.mxu1 %v2641_v22 }
  0x9e   : > { %1698 = vmatpush1.bf16.msra.mxu0 %v2639_v21  ;;  %1818 = vmatprep.subr.bf16.mxu1 %v3224_v56  ;;  %v1902_v56 = vld [vmem:[%s3068_s4 + $0xa8] sm:$0xff] }
  0x9f   : > { %1777 = vmatprep.subr.bf16.mxu0 %v3221_v55  ;;  %v1411_v55 = vld [vmem:[%s3068_s4 + $0xa0] sm:$0xff]  ;;  %v2670_v5 = vcombine.low %v1902_v56, %v1909_v53 }
  0xa0   : > { %2666 = vmatmul.mubr.msk.bf16.vlgmr.msra.gmra.mxu1 %vm571_vm2, %v3101_v27  ;;  %v2647_v0 = vcombine.low %v1411_v55, %v1418_v52 }
  0xa1   : > { %2665 = vmatmul.mubr.msk.bf16.vlgmr.msra.gmra.mxu0 %vm571_vm2, %v3101_v27  ;;  %1819 = vmatpush1.bf16.msra.mxu1 %v3227_v57  ;;  %v2671_v57 = vcombine.high %v1902_v56, %v1909_v53 }
  0xa2   : > { %1778 = vmatpush1.bf16.msra.mxu0 %v3210_v49  ;;  %1820 = vmatprep.subr.bf16.mxu1 %v2646_v30  ;;  %v2648_v49 = vcombine.high %v1411_v55, %v1418_v52 }
  0xa3   : > { %1779 = vmatprep.subr.bf16.mxu0 %v2644_v28  ;;  %1797 = vmatprep.mubr.bf16.mxu0 %v2776_v51 }
  0xa4   : > { %1838 = vmatprep.mubr.bf16.mxu1 %v2776_v51 }
  0xa5   : > { %1821 = vmatpush1.bf16.msra.mxu1 %v2645_v48 }
  0xa6   : > { %1780 = vmatpush1.bf16.msra.mxu0 %v2643_v47  ;;  %2110 = vmatprep.subr.bf16.mxu1 %v3261_v13  ;;  %v1904_v13 = vld [vmem:[%s3068_s4 + $0xb8] sm:$0xff] }
  0xa7   : > { %1859 = vmatprep.subr.bf16.mxu0 %v3244_v6  ;;  %v1903_v6 = vld [vmem:[%s3068_s4 + $0xb0] sm:$0xff]  ;;  %v2674_v40 = vcombine.low %v1904_v13, %v1911_v36 }
  0xa8   : > { %2668 = vmatmul.mubr.msk.bf16.vlgmr.msra.gmra.mxu1 %vm571_vm2, %v3101_v27  ;;  %v2672_v39 = vcombine.low %v1903_v6, %v1910_v32 }
  0xa9   : > { %2667 = vmatmul.mubr.msk.bf16.vlgmr.msra.gmra.mxu0 %vm571_vm2, %v3101_v27  ;;  %2111 = vmatpush1.bf16.msra.mxu1 %v3250_v8  ;;  %v2675_v8 = vcombine.high %v1904_v13, %v1911_v36 }
  0xaa   : > { %1860 = vmatpush1.bf16.msra.mxu0 %v3247_v7  ;;  %2112 = vmatprep.subr.bf16.mxu1 %v2671_v57  ;;  %v2673_v7 = vcombine.high %v1903_v6, %v1910_v32 }
  0xab   : > { %1861 = vmatprep.subr.bf16.mxu0 %v2648_v49  ;;  %1879 = vmatprep.mubr.bf16.mxu0 %v2776_v51 }
  0xac   : > { %2130 = vmatprep.mubr.bf16.mxu1 %v2776_v51 }
  0xad   : > { %2113 = vmatpush1.bf16.msra.mxu1 %v2670_v5 }
  0xae   : > { %1862 = vmatpush1.bf16.msra.mxu0 %v2647_v0  ;;  %2192 = vmatprep.subr.bf16.mxu1 %v3283_v37  ;;  %v1906_v37 = vld [vmem:[%s3068_s4 + $0xc8] sm:$0xff] }
  0xaf   : > { %2151 = vmatprep.subr.bf16.mxu0 %v3273_v29  ;;  %v1905_v29 = vld [vmem:[%s3068_s4 + $0xc0] sm:$0xff]  ;;  %v2678_v44 = vcombine.low %v1906_v37, %v1913_v42 }
  0xb0   : > { %2698 = vmatmul.mubr.msk.bf16.vlgmr.msra.gmra.mxu1 %vm571_vm2, %v3101_v27  ;;  %v2676_v43 = vcombine.low %v1905_v29, %v1912_v41 }
  0xb1   : > { %2669 = vmatmul.mubr.msk.bf16.vlgmr.msra.gmra.mxu0 %vm571_vm2, %v3101_v27  ;;  %2193 = vmatpush1.bf16.msra.mxu1 %v3286_v38  ;;  %v2679_v38 = vcombine.high %v1906_v37, %v1913_v42 }
  0xb2   : > { %2152 = vmatpush1.bf16.msra.mxu0 %v3276_v31  ;;  %2194 = vmatprep.subr.bf16.mxu1 %v2675_v8  ;;  %v2677_v31 = vcombine.high %v1905_v29, %v1912_v41 }
  0xb3   : > { %2153 = vmatprep.subr.bf16.mxu0 %v2673_v7  ;;  %2171 = vmatprep.mubr.bf16.mxu0 %v2776_v51 }
  0xb4   : > { %2212 = vmatprep.mubr.bf16.mxu1 %v2776_v51 }
  0xb5   : > { %2195 = vmatpush1.bf16.msra.mxu1 %v2674_v40 }
  0xb6   : > { %2154 = vmatpush1.bf16.msra.mxu0 %v2672_v39  ;;  %2274 = vmatprep.subr.bf16.mxu1 %v3308_v59  ;;  %v1908_v59 = vld [vmem:[%s3068_s4 + $0xd8] sm:$0xff] }
  0xb7   : > { %2233 = vmatprep.subr.bf16.mxu0 %v3305_v23  ;;  %v1907_v23 = vld [vmem:[%s3068_s4 + $0xd0] sm:$0xff]  ;;  %v2682_v10 = vcombine.low %v1908_v59, %v1915_v46 }
  0xb8   : > { %2700 = vmatmul.mubr.msk.bf16.vlgmr.msra.gmra.mxu1 %vm571_vm2, %v3101_v27  ;;  %v2681_v58 = vcombine.high %v1907_v23, %v1914_v45 }
  0xb9   : > { %2699 = vmatmul.mubr.msk.bf16.vlgmr.msra.gmra.mxu0 %vm571_vm2, %v3101_v27  ;;  %2275 = vmatpush1.bf16.msra.mxu1 %v3314_v17  ;;  %v2680_v17 = vcombine.low %v1907_v23, %v1914_v45 }
  0xba   : > { %2234 = vmatpush1.bf16.msra.mxu0 %v3311_v15  ;;  %2276 = vmatprep.subr.bf16.mxu1 %v2679_v38  ;;  %v2683_v15 = vcombine.high %v1908_v59, %v1915_v46 }
  0xbb   : > { %2235 = vmatprep.subr.bf16.mxu0 %v2677_v31  ;;  %2253 = vmatprep.mubr.bf16.mxu0 %v2776_v51 }
  0xbc   : > { %2294 = vmatprep.mubr.bf16.mxu1 %v2776_v51 }
  0xbd   : > { %2277 = vmatpush1.bf16.msra.mxu1 %v2678_v44 }
  0xbe   : > { %2236 = vmatpush1.bf16.msra.mxu0 %v2676_v43  ;;  %2356 = vmatprep.subr.bf16.mxu1 %v3343_v18 }
  0xbf   : > { %2315 = vmatprep.subr.bf16.mxu0 %v3329_v3 }
  0xc0   : > { %2702 = vmatmul.mubr.msk.bf16.vlgmr.msra.gmra.mxu1 %vm571_vm2, %v3101_v27 }
  0xc1   : > { %2701 = vmatmul.mubr.msk.bf16.vlgmr.msra.gmra.mxu0 %vm571_vm2, %v3101_v27  ;;  %2357 = vmatpush1.bf16.msra.mxu1 %v3335_v9 }
  0xc2   : > { %2316 = vmatpush1.bf16.msra.mxu0 %v3332_v4  ;;  %2358 = vmatprep.subr.bf16.mxu1 %v2683_v15 }
  0xc3   : > { %2317 = vmatprep.subr.bf16.mxu0 %v2681_v58  ;;  %2335 = vmatprep.mubr.bf16.mxu0 %v2776_v51 }
  0xc4   : > { %2376 = vmatprep.mubr.bf16.mxu1 %v2776_v51 }
  0xc5   : > { %2359 = vmatpush1.bf16.msra.mxu1 %v2682_v10 }
  0xc6   : > { %2318 = vmatpush1.bf16.msra.mxu0 %v2680_v17 }
  0xc8   : > { %2704 = vmatmul.mubr.msk.bf16.vlgmr.msra.gmra.mxu1 %vm571_vm2, %v3101_v27 }
  0xc9   : > { %2703 = vmatmul.mubr.msk.bf16.vlgmr.msra.gmra.mxu0 %vm571_vm2, %v3101_v27 }
 0x120   : > { %v3471_v4 = vpop.f32.mrf.mxu1 }
 0x121   : > { %v3469_v3 = vpop.f32.mrf.mxu0 }
 0x122   : > { %v3475_v18 = vpop.f32.mrf.mxu1 }
 0x123   : > { %v3473_v9 = vpop.f32.mrf.mxu0 }
 0x124   : > { %v700_v33 = vpop.f32.mrf.mxu1 }
 0x125   : > { %v659_v11 = vpop.f32.mrf.mxu0 }
 0x126   : > { %v701_v51 = vpop.f32.mrf.mxu1 }
 0x127   : > { %v660_v34 = vpop.f32.mrf.mxu0 }
 0x128   : > { %v3479_v50 = vpop.f32.mrf.mxu1 }
 0x129   : > { %v3477_v35 = vpop.f32.mrf.mxu0 }
 0x12a   : > { %v3483_v61 = vpop.f32.mrf.mxu1 }
 0x12b   : > { %v3481_v60 = vpop.f32.mrf.mxu0 }
 0x12c   : > { %v782_v62 = vpop.f32.mrf.mxu1 }
 0x12d   : > { %v741_v27 = vpop.f32.mrf.mxu0 }
 0x12e   : > { %v783_v2 = vpop.f32.mrf.mxu1 }
 0x12f   : > { %v742_v63 = vpop.f32.mrf.mxu0 }
 0x130   : > { %v3487_v14 = vpop.f32.mrf.mxu1 }
 0x131   : > { %v3485_v12 = vpop.f32.mrf.mxu0 }
 0x132   : > { %v3491_v1 = vpop.f32.mrf.mxu1 }
 0x133   : > { %v3489_v16 = vpop.f32.mrf.mxu0 }
 0x134   : > { %v864_v20 = vpop.f32.mrf.mxu1 }
 0x135   : > { %v823_v19 = vpop.f32.mrf.mxu0 }
 0x136   : > { %v865_v22 = vpop.f32.mrf.mxu1 }
 0x137   : > { %v824_v21 = vpop.f32.mrf.mxu0 }
 0x138   : > { %v1138_v24 = vpop.f32.mrf.mxu1 }
 0x139   : > { %v3493_v54 = vpop.f32.mrf.mxu0 }
 0x13a   : > { %v1140_v26 = vpop.f32.mrf.mxu1 }
 0x13b   : > { %v3495_v25 = vpop.f32.mrf.mxu0 }
 0x13c   : > { %v1142_v30 = vpop.f32.mrf.mxu1 }
 0x13d   : > { %v905_v28 = vpop.f32.mrf.mxu0 }
 0x13e   : > { %v1143_v48 = vpop.f32.mrf.mxu1 }
 0x13f   : > { %v906_v47 = vpop.f32.mrf.mxu0 }
 0x140   : > { %v3499_v52 = vpop.f32.mrf.mxu1  ;;  %v1391_v47 = vmax.f32 %v3469_v3, %v1138_v24 }
 0x141   : > { %v3497_v55 = vpop.f32.mrf.mxu0 }
 0x142   : > { %v3503_v53 = vpop.f32.mrf.mxu1 }
 0x143   : > { %v3501_v56 = vpop.f32.mrf.mxu0 }
 0x144   : > { %v1224_v57 = vpop.f32.mrf.mxu1 }
 0x145   : > { %v1183_v49 = vpop.f32.mrf.mxu0  ;;  %v1392_v57 = vmax.f32 %v3473_v9, %v1140_v26  ;;  %v1395_v26 = vmax.f32 %v3477_v35, %v3499_v52 }
 0x146   : > { %v1225_v5 = vpop.f32.mrf.mxu1 }
 0x147   : > { %v1184_v0 = vpop.f32.mrf.mxu0 }
 0x148   : > { %v3507_v32 = vpop.f32.mrf.mxu1 }
 0x149   : > { %v3505_v6 = vpop.f32.mrf.mxu0 }
 0x14a   : > { %v3511_v36 = vpop.f32.mrf.mxu1 }
 0x14b   : > { %v3509_v13 = vpop.f32.mrf.mxu0 }
 0x14c   : > { %v1306_v8 = vpop.f32.mrf.mxu1 }
 0x14d   : > { %v1265_v7 = vpop.f32.mrf.mxu0  ;;  %v3539_v8 = vpop.permute.xlu0 %2402 }
 0x14e   : > { %v1307_v40 = vpop.f32.mrf.mxu1 }
 0x14f   : > { %v1266_v39 = vpop.f32.mrf.mxu0 }
 0x150   : > { %v3515_v41 = vpop.f32.mrf.mxu1 }
 0x151   : > { %v3513_v29 = vpop.f32.mrf.mxu0 }
 0x152   : > { %v3519_v42 = vpop.f32.mrf.mxu1 }
 0x153   : > { %v3517_v37 = vpop.f32.mrf.mxu0 }
 0x154   : > { %v1388_v38 = vpop.f32.mrf.mxu1 }
 0x155   : > { %v1347_v31 = vpop.f32.mrf.mxu0 }
 0x156   : > { %v1389_v44 = vpop.f32.mrf.mxu1 }
 0x157   : > { %v1348_v43 = vpop.f32.mrf.mxu0  ;;  %v1393_v44 = vmax.f32 %v3471_v4, %v3497_v55 }
 0x158   : > { %v1676_v45 = vpop.f32.mrf.mxu1 }
 0x159   : > { %v1635_v23 = vpop.f32.mrf.mxu0 }
 0x15a   : > { %v1678_v46 = vpop.f32.mrf.mxu1  ;;  %v1888_v0 = vmax.f32 %v1391_v47, %v1635_v23  ;;  %v1397_v47 = vmax.f32 %v3479_v50, %v3505_v6  ;;  %v1400_v50 = vmax.f32 %v3489_v16, %v3511_v36 }
 0x15b   : > { %v1637_v59 = vpop.f32.mrf.mxu0 }
 0x15c   : > { %v1680_v15 = vpop.f32.mrf.mxu1  ;;  %v1889_v39 = vmax.f32 %v1392_v57, %v1637_v59 }
 0x15d   : > { %v1639_v58 = vpop.f32.mrf.mxu0  ;;  %v1890_v15 = vmax.f32 %v1393_v44, %v1676_v45 }
 0x15e   : > { %v1681_v10 = vpop.f32.mrf.mxu1  ;;  %v1394_v58 = vmax.f32 %v3475_v18, %v3501_v56 }
 0x15f   : > { %v1640_v17 = vpop.f32.mrf.mxu0  ;;  %v1396_v10 = vmax.f32 %v3481_v60, %v3503_v53 }
 0x160   : > { %v3521_v33 = vpop.f32.mrf.mxu1  ;;  %v1891_v55 = vmax.f32 %v1394_v58, %v1678_v46 }
 0x161   : > { %v1717_v11 = vpop.f32.mrf.mxu0 }
 0x162   : > { %v3523_v51 = vpop.f32.mrf.mxu1 }
 0x163   : > { %v1719_v34 = vpop.f32.mrf.mxu0 }
 0x164   : > { %v1762_v62 = vpop.f32.mrf.mxu1 }
 0x165   : > { %v1721_v27 = vpop.f32.mrf.mxu0 }
 0x166   : > { %v1763_v2 = vpop.f32.mrf.mxu1  ;;  %v1892_v27 = vmax.f32 %v1395_v26, %v1717_v11 }
 0x167   : > { %v1722_v63 = vpop.f32.mrf.mxu0  ;;  %v1893_v2 = vmax.f32 %v1396_v10, %v1719_v34  ;;  %v1399_v34 = vmax.f32 %v3485_v12, %v3507_v32 }
 0x168   : > { %v3527_v20 = vpop.f32.mrf.mxu1 }
 0x169   : > { %v3525_v19 = vpop.f32.mrf.mxu0 }
 0x16a   : > { %v3533_v22 = vpop.f32.mrf.mxu1  ;;  %v1896_v6 = vmax.f32 %v1399_v34, %v3525_v19 }
 0x16b   : > { %v3529_v21 = vpop.f32.mrf.mxu0 }
 0x16c   : > { %v1844_v30 = vpop.f32.mrf.mxu1 }
 0x16d   : > { %v1803_v28 = vpop.f32.mrf.mxu0 }
 0x16e   : > { %v1845_v49 = vpop.f32.mrf.mxu1 }
 0x16f   : > { %v1804_v48 = vpop.f32.mrf.mxu0 }
 0x170   : > { %v2132_v7 = vpop.f32.mrf.mxu1 }
 0x171   : > { %v3537_v5 = vpop.f32.mrf.mxu0  ;;  %v2385_v40 = vmax.f32 %v1888_v0, %v2132_v7  ;;  %v1398_v7 = vmax.f32 %v3483_v61, %v3509_v13  ;;  %v1897_v13 = vmax.f32 %v1400_v50, %v3529_v21  ;;  %v1403_v21 = vmax.f32 %v3493_v54, %v3515_v41 }
 0x172   : > { %v2134_v38 = vpop.f32.mrf.mxu1 }
 0x173   : > { %v3541_v31 = vpop.f32.mrf.mxu0  ;;  %v2386_v43 = vmax.f32 %v1889_v39, %v2134_v38  ;;  %v2405_v3 = vadd.f32 %v3539_v8, %v2385_v40  ;;  %v1894_v39 = vmax.f32 %v1397_v47, %v3521_v33 }
 0x174   : > { %v2136_v9 = vpop.f32.mrf.mxu1 }
 0x175   : > { %v1885_v24 = vpop.f32.mrf.mxu0  ;;  %v2406_v23 = vadd.f32 %v3539_v8, %v2386_v43  ;;  %v2419_v62 = vmax.f32 %v2405_v3, 0.0 }
 0x176   : > { %v2137_v17 = vpop.f32.mrf.mxu1  ;;  %v1895_v24 = vmax.f32 %v1398_v7, %v3523_v51  ;;  %v1401_v51 = vmax.f32 %v3487_v14, %v3513_v29  ;;  %v1404_v14 = vmax.f32 %v3495_v25, %v3519_v42  ;;  %v1900_v29 = vmax.f32 %v1403_v21, %v3537_v5 }
 0x177   : > { %v1886_v59 = vpop.f32.mrf.mxu0  ;;  %v2420_v63 = vmax.f32 %v2406_v23, 0.0 }
 0x178   : > { %v2214_v52 = vpop.f32.mrf.mxu1 }
 0x179   : > { %v2173_v4 = vpop.f32.mrf.mxu0  ;;  %v2715_v18 = vpack.c.bf16 %v2420_v63, %v2419_v62  ;;  %v2389_v56 = vmax.f32 %v1892_v27, %v2214_v52  ;;  %v1402_v63 = vmax.f32 %v3491_v1, %v3517_v37  ;;  %v1901_v37 = vmax.f32 %v1404_v14, %v3541_v31 }
 0x17a   : > { %v2387_v35 = vmax.f32 %v1890_v15, %v2173_v4  ;;  %v2216_v53 = vpop.f32.mrf.mxu1  ;;  %v1898_v4 = vmax.f32 %v1401_v51, %v3527_v20 }
 0x17b   : > { %v2175_v45 = vpop.f32.mrf.mxu0  ;;  %2489 = vst [vmem:[%s3556_s11] sm:$0xff] %v2715_v18  ;;  %v2409_v11 = vadd.f32 %v3539_v8, %v2389_v56  ;;  %v2390_v46 = vmax.f32 %v1893_v2, %v2216_v53  ;;  %v1899_v18 = vmax.f32 %v1402_v63, %v3533_v22 }
 0x17c   : > { %v2407_v28 = vadd.f32 %v3539_v8, %v2387_v35  ;;  %v2388_v60 = vmax.f32 %v1891_v55, %v2175_v45  ;;  %v2218_v49 = vpop.f32.mrf.mxu1 }
 0x17d   : > { %v2177_v30 = vpop.f32.mrf.mxu0  ;;  %v2410_v57 = vadd.f32 %v3539_v8, %v2390_v46  ;;  %v2423_v3 = vmax.f32 %v2409_v11, 0.0 }
 0x17e   : > { %v2408_v48 = vadd.f32 %v3539_v8, %v2388_v60  ;;  %v2421_v40 = vmax.f32 %v2407_v28, 0.0  ;;  %v2219_v43 = vpop.f32.mrf.mxu1 }
 0x17f   : > { %v2178_v0 = vpop.f32.mrf.mxu0  ;;  %v2424_v12 = vmax.f32 %v2410_v57, 0.0 }
 0x180   : > { %v2422_v38 = vmax.f32 %v2408_v48, 0.0  ;;  %v2296_v61 = vpop.f32.mrf.mxu1 }
 0x181   : > { %v2255_v32 = vpop.f32.mrf.mxu0  ;;  %v2717_v33 = vpack.c.bf16 %v2424_v12, %v2423_v3  ;;  %v2393_v26 = vmax.f32 %v1896_v6, %v2296_v61 }
 0x182   : > { %v2716_v44 = vpack.c.bf16 %v2422_v38, %v2421_v40  ;;  %v2391_v9 = vmax.f32 %v1894_v39, %v2255_v32  ;;  %v2298_v36 = vpop.f32.mrf.mxu1 }
 0x183   : > { %v2257_v23 = vpop.f32.mrf.mxu0  ;;  %2491 = vst [vmem:[%s3556_s11 + $0x10] sm:$0xff] %v2717_v33  ;;  %v2413_v19 = vadd.f32 %v3539_v8, %v2393_v26  ;;  %v2394_v58 = vmax.f32 %v1897_v13, %v2298_v36 }
 0x184   : > { %2490 = vst [vmem:[%s3556_s11 + $0x8] sm:$0xff] %v2716_v44  ;;  %v2411_v59 = vadd.f32 %v3539_v8, %v2391_v9  ;;  %v2392_v16 = vmax.f32 %v1895_v24, %v2257_v23  ;;  %v2300_v10 = vpop.f32.mrf.mxu1 }
 0x185   : > { %v2259_v15 = vpop.f32.mrf.mxu0  ;;  %v2414_v27 = vadd.f32 %v3539_v8, %v2394_v58  ;;  %v2427_v2 = vmax.f32 %v2413_v19, 0.0 }
 0x186   : > { %v2412_v17 = vadd.f32 %v3539_v8, %v2392_v16  ;;  %v2425_v55 = vmax.f32 %v2411_v59, 0.0  ;;  %v2301_v52 = vpop.f32.mrf.mxu1 }
 0x187   : > { %v2260_v62 = vpop.f32.mrf.mxu0  ;;  %v2428_v54 = vmax.f32 %v2414_v27, 0.0 }
 0x188   : > { %v2426_v35 = vmax.f32 %v2412_v17, 0.0  ;;  %v2378_v1 = vpop.f32.mrf.mxu1 }
 0x189   : > { %v2337_v41 = vpop.f32.mrf.mxu0  ;;  %v2719_v20 = vpack.c.bf16 %v2428_v54, %v2427_v2  ;;  %v2397_v28 = vmax.f32 %v1900_v29, %v2378_v1 }
 0x18a   : > { %v2718_v56 = vpack.c.bf16 %v2426_v35, %v2425_v55  ;;  %v2395_v45 = vmax.f32 %v1898_v4, %v2337_v41  ;;  %v2380_v42 = vpop.f32.mrf.mxu1 }
 0x18b   : > { %v2339_v60 = vpop.f32.mrf.mxu0  ;;  %2493 = vst [vmem:[%s3556_s11 + $0x20] sm:$0xff] %v2719_v20  ;;  %v2417_v5 = vadd.f32 %v3539_v8, %v2397_v28  ;;  %v2398_v11 = vmax.f32 %v1901_v37, %v2380_v42 }
 0x18c   : > { %2492 = vst [vmem:[%s3556_s11 + $0x18] sm:$0xff] %v2718_v56  ;;  %v2415_v53 = vadd.f32 %v3539_v8, %v2395_v45  ;;  %v2396_v25 = vmax.f32 %v1899_v18, %v2339_v60  ;;  %v2382_v30 = vpop.f32.mrf.mxu1 }
 0x18d   : > { %v2341_v22 = vpop.f32.mrf.mxu0  ;;  %v2418_v31 = vadd.f32 %v3539_v8, %v2398_v11  ;;  %v2431_v57 = vmax.f32 %v2417_v5, 0.0 }
 0x18e   : > { %v2416_v46 = vadd.f32 %v3539_v8, %v2396_v25  ;;  %v2429_v48 = vmax.f32 %v2415_v53, 0.0  ;;  %v2383_v34 = vpop.f32.mrf.mxu1 }
 0x18f   : > { %v2342_v47 = vpop.f32.mrf.mxu0  ;;  %v2432_v0 = vmax.f32 %v2418_v31, 0.0 }
 0x190   : > { %v2430_v49 = vmax.f32 %v2416_v46, 0.0 }
 0x191   : > { %v2721_v39 = vpack.c.bf16 %v2432_v0, %v2431_v57 }
 0x192   : > { %v2720_v7 = vpack.c.bf16 %v2430_v49, %v2429_v48 }
 0x193   : > { %2495 = vst [vmem:[%s3556_s11 + $0x30] sm:$0xff] %v2721_v39 }
 0x194   : > { %2494 = vst [vmem:[%s3556_s11 + $0x28] sm:$0xff] %v2720_v7 }
 0x195 PF: > { %p10_p9 = scmp.ge.s32.totalorder %s2814_s16, 4   ;;  %s3615_s12 = smov %s2769_s13 }
 0x196   : > { %s3616_s13 = smov %s2823_s19  ;;  %s3617_s14 = smov %s2814_s16 }
 0x197   :  { %12 = sbr.rel (!%p10_p9) target bundleno = 2 (0x2), region = 90 }

// kernel: critic_forward.3
= control target key start
LH: loop header
LB: loop body
LE: loop exit
PB: predicated region body
PF: predicated region fallthrough
CT: control target
= control target key end

     0   :  { %s18869_s0 = inlined_call_operand.vmem [shape: bf16[72,3072], index: 0, kind: input, shape index: {}]   ;;  %s18870_s1 = inlined_call_operand.vmem [shape: bf16[64,72], index: 1, kind: input, shape index: {}]   ;;  %s18871_s2 = inlined_call_operand.vmem [shape: f32[64,1], index: 2, kind: input, shape index: {}]   ;;  %s18872_s3 = inlined_call_operand.vmem [shape: bf16[32,24576], index: 3, kind: input, shape index: {}]   ;;  %s18873_s4 = inlined_call_operand.vmem [shape: f32[2,2], index: 4, kind: input, shape index: {}]   ;;  %s18874_s5 = inlined_call_operand.vmem [shape: f32[2,32], index: 5, kind: input, shape index: {}]   ;;  %s18875_s6 = inlined_call_operand.vmem [shape: f32[1,32], index: 6, kind: input, shape index: {}]   ;;  %s18876_s7 = inlined_call_operand.vmem [shape: f32[32,96], index: 7, kind: input, shape index: {}]   ;;  %s18877_s8 = inlined_call_operand.vmem [shape: f32[32,96], index: 8, kind: input, shape index: {}]   ;;  %s18878_s9 = inlined_call_operand.vmem [shape: f32[1,96], index: 9, kind: input, shape index: {}]   ;;  %s18879_s10 = inlined_call_operand.vmem [shape: f32[1,96], index: 10, kind: input, shape index: {}]   ;;  %s18880_s11 = inlined_call_operand.vmem [shape: f32[32,200], index: 11, kind: input, shape index: {}]   ;;  %s18881_s12 = inlined_call_operand.vmem [shape: f32[1,200], index: 12, kind: input, shape index: {}]   ;;  %s18882_s13 = inlined_call_operand.vmem [shape: f32[200,100], index: 13, kind: input, shape index: {}]   ;;  %s18883_s14 = inlined_call_operand.vmem [shape: f32[1,100], index: 14, kind: input, shape index: {}]   ;;  %s18884_s15 = inlined_call_operand.vmem [shape: f32[100,1], index: 15, kind: input, shape index: {}]   ;;  %s18885_s16 = inlined_call_operand.<no memory space> [shape: f32[1,1], index: 16, kind: input, shape index: {}]   ;;  %s18886_s17 = inlined_call_operand.vmem [shape: f32[2,1], index: 17, kind: output, shape index: {}]  }
   0x1   :  { %19308 = sst [smem:[#allocation408_spill]] %s18869_s0  ;;  %v22_v0 = vstv %s18885_s16  ;;  %v13917_v1 = vld [vmem:[%s18872_s3] sm:$0xff]  ;;  %v13922_v2 = vld [vmem:[%s18872_s3 + $0x8] sm:$0xff]  ;;  %v13927_v3 = vld [vmem:[%s18872_s3 + $0x10] sm:$0xff] }
   0x2   :  { %19309 = sst [smem:[#allocation409_spill]] %s18870_s1  ;;  %19310 = vst [vmem:[#allocation8_spill] sm:$0xff] %v13917_v1  ;;  %19311 = vst [vmem:[#allocation9_spill] sm:$0xff] %v13922_v2  ;;  %v13932_v4 = vld [vmem:[%s18872_s3 + $0x18] sm:$0xff]  ;;  %v13937_v5 = vld [vmem:[%s18872_s3 + $0x20] sm:$0xff] }
   0x3   :  { %19312 = vst [vmem:[#allocation10_spill] sm:$0xff] %v13927_v3  ;;  %23 = vst [vmem:[#allocation5] sm:$0x1] %v22_v0  ;;  %v13942_v6 = vld [vmem:[%s18872_s3 + $0x28] sm:$0xff]  ;;  %v13947_v7 = vld [vmem:[%s18872_s3 + $0x30] sm:$0xff] }
   0x4   :  { %19313 = vst [vmem:[#allocation11_spill] sm:$0xff] %v13932_v4  ;;  %19314 = vst [vmem:[#allocation12_spill] sm:$0xff] %v13937_v5  ;;  %v13952_v8 = vld [vmem:[%s18872_s3 + $0x38] sm:$0xff]  ;;  %v13957_v9 = vld [vmem:[%s18872_s3 + $0x40] sm:$0xff] }
   0x5   :  { %19315 = vst [vmem:[#allocation13_spill] sm:$0xff] %v13942_v6  ;;  %19316 = vst [vmem:[#allocation14_spill] sm:$0xff] %v13947_v7  ;;  %v13962_v10 = vld [vmem:[%s18872_s3 + $0x48] sm:$0xff]  ;;  %v13967_v11 = vld [vmem:[%s18872_s3 + $0x50] sm:$0xff] }
   0x6   :  { %19317 = vst [vmem:[#allocation15_spill] sm:$0xff] %v13952_v8  ;;  %19318 = vst [vmem:[#allocation16_spill] sm:$0xff] %v13957_v9  ;;  %v13972_v12 = vld [vmem:[%s18872_s3 + $0x58] sm:$0xff]  ;;  %v13977_v13 = vld [vmem:[%s18872_s3 + $0x60] sm:$0xff] }
   0x7   :  { %19319 = vst [vmem:[#allocation17_spill] sm:$0xff] %v13962_v10  ;;  %19320 = vst [vmem:[#allocation18_spill] sm:$0xff] %v13967_v11  ;;  %v13982_v14 = vld [vmem:[%s18872_s3 + $0x68] sm:$0xff]  ;;  %v13987_v15 = vld [vmem:[%s18872_s3 + $0x70] sm:$0xff] }
   0x8   :  { %19321 = vst [vmem:[#allocation19_spill] sm:$0xff] %v13972_v12  ;;  %19322 = vst [vmem:[#allocation20_spill] sm:$0xff] %v13977_v13  ;;  %v13992_v16 = vld [vmem:[%s18872_s3 + $0x78] sm:$0xff]  ;;  %v13997_v17 = vld [vmem:[%s18872_s3 + $0x80] sm:$0xff] }
   0x9   :  { %19323 = vst [vmem:[#allocation21_spill] sm:$0xff] %v13982_v14  ;;  %19324 = vst [vmem:[#allocation22_spill] sm:$0xff] %v13987_v15  ;;  %v14002_v18 = vld [vmem:[%s18872_s3 + $0x88] sm:$0xff]  ;;  %v14007_v19 = vld [vmem:[%s18872_s3 + $0x90] sm:$0xff] }
   0xa   :  { %19325 = vst [vmem:[#allocation23_spill] sm:$0xff] %v13992_v16  ;;  %19326 = vst [vmem:[#allocation24_spill] sm:$0xff] %v13997_v17  ;;  %v14012_v20 = vld [vmem:[%s18872_s3 + $0x98] sm:$0xff]  ;;  %v14017_v21 = vld [vmem:[%s18872_s3 + $0xa0] sm:$0xff] }
   0xb   :  { %19327 = vst [vmem:[#allocation25_spill] sm:$0xff] %v14002_v18  ;;  %19328 = vst [vmem:[#allocation26_spill] sm:$0xff] %v14007_v19  ;;  %v14022_v22 = vld [vmem:[%s18872_s3 + $0xa8] sm:$0xff]  ;;  %v14027_v23 = vld [vmem:[%s18872_s3 + $0xb0] sm:$0xff] }
   0xc   :  { %19329 = vst [vmem:[#allocation27_spill] sm:$0xff] %v14012_v20  ;;  %19330 = vst [vmem:[#allocation28_spill] sm:$0xff] %v14017_v21  ;;  %v14032_v24 = vld [vmem:[%s18872_s3 + $0xb8] sm:$0xff]  ;;  %v14037_v25 = vld [vmem:[%s18872_s3 + $0xc0] sm:$0xff] }
   0xd   :  { %19331 = vst [vmem:[#allocation29_spill] sm:$0xff] %v14022_v22  ;;  %19332 = vst [vmem:[#allocation30_spill] sm:$0xff] %v14027_v23  ;;  %v14042_v26 = vld [vmem:[%s18872_s3 + $0xc8] sm:$0xff]  ;;  %v14047_v27 = vld [vmem:[%s18872_s3 + $0xd0] sm:$0xff] }
   0xe   :  { %19333 = vst [vmem:[#allocation31_spill] sm:$0xff] %v14032_v24  ;;  %19334 = vst [vmem:[#allocation32_spill] sm:$0xff] %v14037_v25  ;;  %v14052_v28 = vld [vmem:[%s18872_s3 + $0xd8] sm:$0xff]  ;;  %v14057_v29 = vld [vmem:[%s18872_s3 + $0xe0] sm:$0xff] }
   0xf   :  { %19335 = vst [vmem:[#allocation33_spill] sm:$0xff] %v14042_v26  ;;  %19336 = vst [vmem:[#allocation34_spill] sm:$0xff] %v14047_v27  ;;  %v14062_v30 = vld [vmem:[%s18872_s3 + $0xe8] sm:$0xff]  ;;  %v14067_v31 = vld [vmem:[%s18872_s3 + $0xf0] sm:$0xff] }
  0x10   :  { %19337 = vst [vmem:[#allocation35_spill] sm:$0xff] %v14052_v28  ;;  %19338 = vst [vmem:[#allocation36_spill] sm:$0xff] %v14057_v29  ;;  %v14072_v32 = vld [vmem:[%s18872_s3 + $0xf8] sm:$0xff]  ;;  %v14077_v33 = vld [vmem:[%s18872_s3 + $0x100] sm:$0xff] }
  0x11   :  { %19339 = vst [vmem:[#allocation37_spill] sm:$0xff] %v14062_v30  ;;  %19340 = vst [vmem:[#allocation38_spill] sm:$0xff] %v14067_v31  ;;  %v14082_v34 = vld [vmem:[%s18872_s3 + $0x108] sm:$0xff]  ;;  %v14087_v35 = vld [vmem:[%s18872_s3 + $0x110] sm:$0xff] }
  0x12   :  { %19341 = vst [vmem:[#allocation39_spill] sm:$0xff] %v14072_v32  ;;  %19342 = vst [vmem:[#allocation40_spill] sm:$0xff] %v14077_v33  ;;  %v14092_v36 = vld [vmem:[%s18872_s3 + $0x118] sm:$0xff]  ;;  %v14097_v37 = vld [vmem:[%s18872_s3 + $0x120] sm:$0xff] }
  0x13   :  { %19343 = vst [vmem:[#allocation41_spill] sm:$0xff] %v14082_v34  ;;  %19344 = vst [vmem:[#allocation42_spill] sm:$0xff] %v14087_v35  ;;  %v14102_v38 = vld [vmem:[%s18872_s3 + $0x128] sm:$0xff]  ;;  %v14107_v39 = vld [vmem:[%s18872_s3 + $0x130] sm:$0xff] }
  0x14   :  { %19345 = vst [vmem:[#allocation43_spill] sm:$0xff] %v14092_v36  ;;  %19346 = vst [vmem:[#allocation44_spill] sm:$0xff] %v14097_v37  ;;  %v14112_v40 = vld [vmem:[%s18872_s3 + $0x138] sm:$0xff]  ;;  %v14117_v41 = vld [vmem:[%s18872_s3 + $0x140] sm:$0xff] }
  0x15   :  { %19347 = vst [vmem:[#allocation45_spill] sm:$0xff] %v14102_v38  ;;  %19348 = vst [vmem:[#allocation46_spill] sm:$0xff] %v14107_v39  ;;  %v14122_v42 = vld [vmem:[%s18872_s3 + $0x148] sm:$0xff]  ;;  %v14127_v43 = vld [vmem:[%s18872_s3 + $0x150] sm:$0xff] }
  0x16   :  { %19349 = vst [vmem:[#allocation47_spill] sm:$0xff] %v14112_v40  ;;  %19350 = vst [vmem:[#allocation48_spill] sm:$0xff] %v14117_v41  ;;  %v14132_v44 = vld [vmem:[%s18872_s3 + $0x158] sm:$0xff]  ;;  %v14137_v45 = vld [vmem:[%s18872_s3 + $0x160] sm:$0xff] }
  0x17   :  { %19351 = vst [vmem:[#allocation49_spill] sm:$0xff] %v14122_v42  ;;  %19352 = vst [vmem:[#allocation50_spill] sm:$0xff] %v14127_v43  ;;  %v14142_v46 = vld [vmem:[%s18872_s3 + $0x168] sm:$0xff]  ;;  %v14147_v47 = vld [vmem:[%s18872_s3 + $0x170] sm:$0xff] }
  0x18   :  { %19353 = vst [vmem:[#allocation51_spill] sm:$0xff] %v14132_v44  ;;  %19354 = vst [vmem:[#allocation52_spill] sm:$0xff] %v14137_v45  ;;  %v14152_v48 = vld [vmem:[%s18872_s3 + $0x178] sm:$0xff]  ;;  %v14157_v49 = vld [vmem:[%s18872_s3 + $0x180] sm:$0xff] }
  0x19   :  { %19355 = vst [vmem:[#allocation53_spill] sm:$0xff] %v14142_v46  ;;  %19356 = vst [vmem:[#allocation54_spill] sm:$0xff] %v14147_v47  ;;  %v14162_v50 = vld [vmem:[%s18872_s3 + $0x188] sm:$0xff]  ;;  %v14167_v51 = vld [vmem:[%s18872_s3 + $0x190] sm:$0xff] }
  0x1a   :  { %19357 = vst [vmem:[#allocation55_spill] sm:$0xff] %v14152_v48  ;;  %19358 = vst [vmem:[#allocation56_spill] sm:$0xff] %v14157_v49  ;;  %v14172_v52 = vld [vmem:[%s18872_s3 + $0x198] sm:$0xff]  ;;  %v14177_v53 = vld [vmem:[%s18872_s3 + $0x1a0] sm:$0xff] }
  0x1b   :  { %19359 = vst [vmem:[#allocation57_spill] sm:$0xff] %v14162_v50  ;;  %19360 = vst [vmem:[#allocation58_spill] sm:$0xff] %v14167_v51  ;;  %v14182_v54 = vld [vmem:[%s18872_s3 + $0x1a8] sm:$0xff]  ;;  %v14187_v55 = vld [vmem:[%s18872_s3 + $0x1b0] sm:$0xff] }
  0x1c   :  { %19361 = vst [vmem:[#allocation59_spill] sm:$0xff] %v14172_v52  ;;  %19362 = vst [vmem:[#allocation60_spill] sm:$0xff] %v14177_v53  ;;  %v14192_v56 = vld [vmem:[%s18872_s3 + $0x1b8] sm:$0xff]  ;;  %v14197_v57 = vld [vmem:[%s18872_s3 + $0x1c0] sm:$0xff] }
  0x1d   :  { %19363 = vst [vmem:[#allocation61_spill] sm:$0xff] %v14182_v54  ;;  %19364 = vst [vmem:[#allocation62_spill] sm:$0xff] %v14187_v55  ;;  %v14202_v58 = vld [vmem:[%s18872_s3 + $0x1c8] sm:$0xff]  ;;  %v14207_v59 = vld [vmem:[%s18872_s3 + $0x1d0] sm:$0xff] }
  0x1e   :  { %19365 = vst [vmem:[#allocation63_spill] sm:$0xff] %v14192_v56  ;;  %19366 = vst [vmem:[#allocation64_spill] sm:$0xff] %v14197_v57  ;;  %v14212_v60 = vld [vmem:[%s18872_s3 + $0x1d8] sm:$0xff]  ;;  %v14217_v61 = vld [vmem:[%s18872_s3 + $0x1e0] sm:$0xff] }
  0x1f   :  { %19367 = vst [vmem:[#allocation65_spill] sm:$0xff] %v14202_v58  ;;  %19368 = vst [vmem:[#allocation66_spill] sm:$0xff] %v14207_v59  ;;  %v14222_v62 = vld [vmem:[%s18872_s3 + $0x1e8] sm:$0xff]  ;;  %v14227_v63 = vld [vmem:[%s18872_s3 + $0x1f0] sm:$0xff] }
  0x20   :  { %19369 = vst [vmem:[#allocation67_spill] sm:$0xff] %v14212_v60  ;;  %19370 = vst [vmem:[#allocation68_spill] sm:$0xff] %v14217_v61  ;;  %v14232_v0 = vld [vmem:[%s18872_s3 + $0x1f8] sm:$0xff]  ;;  %v14237_v60 = vld [vmem:[%s18872_s3 + $0x200] sm:$0xff] }
  0x21   :  { %19371 = vst [vmem:[#allocation69_spill] sm:$0xff] %v14222_v62  ;;  %19372 = vst [vmem:[#allocation70_spill] sm:$0xff] %v14227_v63  ;;  %v14242_v61 = vld [vmem:[%s18872_s3 + $0x208] sm:$0xff]  ;;  %v14247_v62 = vld [vmem:[%s18872_s3 + $0x210] sm:$0xff] }
  0x22   :  { %19373 = vst [vmem:[#allocation71_spill] sm:$0xff] %v14232_v0  ;;  %19374 = vst [vmem:[#allocation72_spill] sm:$0xff] %v14237_v60  ;;  %v14252_v63 = vld [vmem:[%s18872_s3 + $0x218] sm:$0xff]  ;;  %v14257_v0 = vld [vmem:[%s18872_s3 + $0x220] sm:$0xff] }
  0x23   :  { %19375 = vst [vmem:[#allocation73_spill] sm:$0xff] %v14242_v61  ;;  %19376 = vst [vmem:[#allocation74_spill] sm:$0xff] %v14247_v62  ;;  %v14262_v60 = vld [vmem:[%s18872_s3 + $0x228] sm:$0xff]  ;;  %v14267_v61 = vld [vmem:[%s18872_s3 + $0x230] sm:$0xff] }
  0x24   :  { %19377 = vst [vmem:[#allocation75_spill] sm:$0xff] %v14252_v63  ;;  %19378 = vst [vmem:[#allocation76_spill] sm:$0xff] %v14257_v0  ;;  %v14272_v62 = vld [vmem:[%s18872_s3 + $0x238] sm:$0xff]  ;;  %v14277_v63 = vld [vmem:[%s18872_s3 + $0x240] sm:$0xff] }
  0x25   :  { %19379 = vst [vmem:[#allocation77_spill] sm:$0xff] %v14262_v60  ;;  %19380 = vst [vmem:[#allocation78_spill] sm:$0xff] %v14267_v61  ;;  %v14282_v0 = vld [vmem:[%s18872_s3 + $0x248] sm:$0xff]  ;;  %v14287_v60 = vld [vmem:[%s18872_s3 + $0x250] sm:$0xff] }
  0x26   :  { %19381 = vst [vmem:[#allocation79_spill] sm:$0xff] %v14272_v62  ;;  %19382 = vst [vmem:[#allocation80_spill] sm:$0xff] %v14277_v63  ;;  %v14292_v61 = vld [vmem:[%s18872_s3 + $0x258] sm:$0xff]  ;;  %v14297_v62 = vld [vmem:[%s18872_s3 + $0x260] sm:$0xff] }
  0x27   :  { %19383 = vst [vmem:[#allocation81_spill] sm:$0xff] %v14282_v0  ;;  %19384 = vst [vmem:[#allocation82_spill] sm:$0xff] %v14287_v60  ;;  %v14302_v63 = vld [vmem:[%s18872_s3 + $0x268] sm:$0xff]  ;;  %v14307_v0 = vld [vmem:[%s18872_s3 + $0x270] sm:$0xff] }
  0x28   :  { %19385 = vst [vmem:[#allocation83_spill] sm:$0xff] %v14292_v61  ;;  %19386 = vst [vmem:[#allocation84_spill] sm:$0xff] %v14297_v62  ;;  %v14312_v60 = vld [vmem:[%s18872_s3 + $0x278] sm:$0xff]  ;;  %v14317_v61 = vld [vmem:[%s18872_s3 + $0x280] sm:$0xff] }
  0x29   :  { %19387 = vst [vmem:[#allocation85_spill] sm:$0xff] %v14302_v63  ;;  %19388 = vst [vmem:[#allocation86_spill] sm:$0xff] %v14307_v0  ;;  %v14322_v62 = vld [vmem:[%s18872_s3 + $0x288] sm:$0xff]  ;;  %v14327_v63 = vld [vmem:[%s18872_s3 + $0x290] sm:$0xff] }
  0x2a   :  { %19389 = vst [vmem:[#allocation87_spill] sm:$0xff] %v14312_v60  ;;  %19390 = vst [vmem:[#allocation88_spill] sm:$0xff] %v14317_v61  ;;  %v14332_v0 = vld [vmem:[%s18872_s3 + $0x298] sm:$0xff]  ;;  %v14337_v60 = vld [vmem:[%s18872_s3 + $0x2a0] sm:$0xff] }
  0x2b   :  { %19391 = vst [vmem:[#allocation89_spill] sm:$0xff] %v14322_v62  ;;  %19392 = vst [vmem:[#allocation90_spill] sm:$0xff] %v14327_v63  ;;  %v14342_v61 = vld [vmem:[%s18872_s3 + $0x2a8] sm:$0xff]  ;;  %v14347_v62 = vld [vmem:[%s18872_s3 + $0x2b0] sm:$0xff] }
  0x2c   :  { %19393 = vst [vmem:[#allocation91_spill] sm:$0xff] %v14332_v0  ;;  %19394 = vst [vmem:[#allocation92_spill] sm:$0xff] %v14337_v60  ;;  %v14352_v63 = vld [vmem:[%s18872_s3 + $0x2b8] sm:$0xff]  ;;  %v14357_v0 = vld [vmem:[%s18872_s3 + $0x2c0] sm:$0xff] }
  0x2d   :  { %19395 = vst [vmem:[#allocation93_spill] sm:$0xff] %v14342_v61  ;;  %19396 = vst [vmem:[#allocation94_spill] sm:$0xff] %v14347_v62  ;;  %v14362_v60 = vld [vmem:[%s18872_s3 + $0x2c8] sm:$0xff]  ;;  %v14367_v61 = vld [vmem:[%s18872_s3 + $0x2d0] sm:$0xff] }
  0x2e   :  { %19397 = vst [vmem:[#allocation95_spill] sm:$0xff] %v14352_v63  ;;  %19398 = vst [vmem:[#allocation96_spill] sm:$0xff] %v14357_v0  ;;  %v14372_v62 = vld [vmem:[%s18872_s3 + $0x2d8] sm:$0xff]  ;;  %v14377_v63 = vld [vmem:[%s18872_s3 + $0x2e0] sm:$0xff] }
  0x2f   :  { %19399 = vst [vmem:[#allocation97_spill] sm:$0xff] %v14362_v60  ;;  %19400 = vst [vmem:[#allocation98_spill] sm:$0xff] %v14367_v61  ;;  %v14382_v0 = vld [vmem:[%s18872_s3 + $0x2e8] sm:$0xff]  ;;  %v14387_v60 = vld [vmem:[%s18872_s3 + $0x2f0] sm:$0xff] }
  0x30   :  { %19401 = vst [vmem:[#allocation99_spill] sm:$0xff] %v14372_v62  ;;  %19402 = vst [vmem:[#allocation100_spill] sm:$0xff] %v14377_v63  ;;  %v14392_v61 = vld [vmem:[%s18872_s3 + $0x2f8] sm:$0xff]  ;;  %v14397_v62 = vld [vmem:[%s18872_s3 + $0x300] sm:$0xff] }
  0x31   :  { %19403 = vst [vmem:[#allocation101_spill] sm:$0xff] %v14382_v0  ;;  %19404 = vst [vmem:[#allocation102_spill] sm:$0xff] %v14387_v60  ;;  %v14402_v63 = vld [vmem:[%s18872_s3 + $0x308] sm:$0xff]  ;;  %v14407_v0 = vld [vmem:[%s18872_s3 + $0x310] sm:$0xff] }
  0x32   :  { %19405 = vst [vmem:[#allocation103_spill] sm:$0xff] %v14392_v61  ;;  %19406 = vst [vmem:[#allocation104_spill] sm:$0xff] %v14397_v62  ;;  %v14412_v60 = vld [vmem:[%s18872_s3 + $0x318] sm:$0xff]  ;;  %v14417_v61 = vld [vmem:[%s18872_s3 + $0x320] sm:$0xff] }
  0x33   :  { %19407 = vst [vmem:[#allocation105_spill] sm:$0xff] %v14402_v63  ;;  %19408 = vst [vmem:[#allocation106_spill] sm:$0xff] %v14407_v0  ;;  %v14422_v59 = vld [vmem:[%s18872_s3 + $0x328] sm:$0xff]  ;;  %v14427_v58 = vld [vmem:[%s18872_s3 + $0x330] sm:$0xff] }
  0x34   :  { %19409 = vst [vmem:[#allocation107_spill] sm:$0xff] %v14412_v60  ;;  %19410 = vst [vmem:[#allocation108_spill] sm:$0xff] %v14417_v61  ;;  %v14432_v57 = vld [vmem:[%s18872_s3 + $0x338] sm:$0xff]  ;;  %v14437_v56 = vld [vmem:[%s18872_s3 + $0x340] sm:$0xff] }
  0x35   :  { %19411 = vst [vmem:[#allocation109_spill] sm:$0xff] %v14422_v59  ;;  %19412 = vst [vmem:[#allocation110_spill] sm:$0xff] %v14427_v58  ;;  %v14442_v55 = vld [vmem:[%s18872_s3 + $0x348] sm:$0xff]  ;;  %v14447_v54 = vld [vmem:[%s18872_s3 + $0x350] sm:$0xff] }
  0x36   :  { %19413 = vst [vmem:[#allocation111_spill] sm:$0xff] %v14432_v57  ;;  %19414 = vst [vmem:[#allocation112_spill] sm:$0xff] %v14437_v56  ;;  %v14452_v53 = vld [vmem:[%s18872_s3 + $0x358] sm:$0xff]  ;;  %v14457_v52 = vld [vmem:[%s18872_s3 + $0x360] sm:$0xff] }
  0x37   :  { %19415 = vst [vmem:[#allocation113_spill] sm:$0xff] %v14442_v55  ;;  %19416 = vst [vmem:[#allocation114_spill] sm:$0xff] %v14447_v54  ;;  %v14462_v51 = vld [vmem:[%s18872_s3 + $0x368] sm:$0xff]  ;;  %v14467_v50 = vld [vmem:[%s18872_s3 + $0x370] sm:$0xff] }
  0x38   :  { %19417 = vst [vmem:[#allocation115_spill] sm:$0xff] %v14452_v53  ;;  %19418 = vst [vmem:[#allocation116_spill] sm:$0xff] %v14457_v52  ;;  %v14472_v49 = vld [vmem:[%s18872_s3 + $0x378] sm:$0xff]  ;;  %v14477_v48 = vld [vmem:[%s18872_s3 + $0x380] sm:$0xff] }
  0x39   :  { %19419 = vst [vmem:[#allocation117_spill] sm:$0xff] %v14462_v51  ;;  %19420 = vst [vmem:[#allocation118_spill] sm:$0xff] %v14467_v50  ;;  %v14482_v47 = vld [vmem:[%s18872_s3 + $0x388] sm:$0xff]  ;;  %v14487_v46 = vld [vmem:[%s18872_s3 + $0x390] sm:$0xff] }
  0x3a   :  { %19421 = vst [vmem:[#allocation119_spill] sm:$0xff] %v14472_v49  ;;  %19422 = vst [vmem:[#allocation120_spill] sm:$0xff] %v14477_v48  ;;  %v14492_v45 = vld [vmem:[%s18872_s3 + $0x398] sm:$0xff]  ;;  %v14497_v44 = vld [vmem:[%s18872_s3 + $0x3a0] sm:$0xff] }
  0x3b   :  { %19423 = vst [vmem:[#allocation121_spill] sm:$0xff] %v14482_v47  ;;  %19424 = vst [vmem:[#allocation122_spill] sm:$0xff] %v14487_v46  ;;  %v14502_v43 = vld [vmem:[%s18872_s3 + $0x3a8] sm:$0xff]  ;;  %v14507_v42 = vld [vmem:[%s18872_s3 + $0x3b0] sm:$0xff] }
  0x3c   :  { %19425 = vst [vmem:[#allocation123_spill] sm:$0xff] %v14492_v45  ;;  %19426 = vst [vmem:[#allocation124_spill] sm:$0xff] %v14497_v44  ;;  %v14512_v41 = vld [vmem:[%s18872_s3 + $0x3b8] sm:$0xff]  ;;  %v14517_v40 = vld [vmem:[%s18872_s3 + $0x3c0] sm:$0xff] }
  0x3d   :  { %19427 = vst [vmem:[#allocation125_spill] sm:$0xff] %v14502_v43  ;;  %19428 = vst [vmem:[#allocation126_spill] sm:$0xff] %v14507_v42  ;;  %v14522_v39 = vld [vmem:[%s18872_s3 + $0x3c8] sm:$0xff]  ;;  %v14527_v38 = vld [vmem:[%s18872_s3 + $0x3d0] sm:$0xff] }
  0x3e   :  { %19429 = vst [vmem:[#allocation127_spill] sm:$0xff] %v14512_v41  ;;  %19430 = vst [vmem:[#allocation128_spill] sm:$0xff] %v14517_v40  ;;  %v14532_v37 = vld [vmem:[%s18872_s3 + $0x3d8] sm:$0xff]  ;;  %v14537_v36 = vld [vmem:[%s18872_s3 + $0x3e0] sm:$0xff] }
  0x3f   :  { %19431 = vst [vmem:[#allocation129_spill] sm:$0xff] %v14522_v39  ;;  %19432 = vst [vmem:[#allocation130_spill] sm:$0xff] %v14527_v38  ;;  %v14542_v35 = vld [vmem:[%s18872_s3 + $0x3e8] sm:$0xff]  ;;  %v14547_v34 = vld [vmem:[%s18872_s3 + $0x3f0] sm:$0xff] }
  0x40   :  { %19433 = vst [vmem:[#allocation131_spill] sm:$0xff] %v14532_v37  ;;  %19434 = vst [vmem:[#allocation132_spill] sm:$0xff] %v14537_v36  ;;  %v14552_v33 = vld [vmem:[%s18872_s3 + $0x3f8] sm:$0xff]  ;;  %v14557_v32 = vld [vmem:[%s18872_s3 + $0x400] sm:$0xff] }
  0x41   :  { %19435 = vst [vmem:[#allocation133_spill] sm:$0xff] %v14542_v35  ;;  %19436 = vst [vmem:[#allocation134_spill] sm:$0xff] %v14547_v34  ;;  %v14562_v31 = vld [vmem:[%s18872_s3 + $0x408] sm:$0xff]  ;;  %v14567_v30 = vld [vmem:[%s18872_s3 + $0x410] sm:$0xff] }
  0x42   :  { %19437 = vst [vmem:[#allocation135_spill] sm:$0xff] %v14552_v33  ;;  %19438 = vst [vmem:[#allocation136_spill] sm:$0xff] %v14557_v32  ;;  %v14572_v34 = vld [vmem:[%s18872_s3 + $0x418] sm:$0xff]  ;;  %v14577_v33 = vld [vmem:[%s18872_s3 + $0x420] sm:$0xff] }
  0x43   :  { %19439 = vst [vmem:[#allocation137_spill] sm:$0xff] %v14562_v31  ;;  %19440 = vst [vmem:[#allocation138_spill] sm:$0xff] %v14567_v30  ;;  %v14582_v32 = vld [vmem:[%s18872_s3 + $0x428] sm:$0xff]  ;;  %v14587_v31 = vld [vmem:[%s18872_s3 + $0x430] sm:$0xff] }
  0x44   :  { %19441 = vst [vmem:[#allocation139_spill] sm:$0xff] %v14572_v34  ;;  %19442 = vst [vmem:[#allocation140_spill] sm:$0xff] %v14577_v33  ;;  %v14592_v30 = vld [vmem:[%s18872_s3 + $0x438] sm:$0xff]  ;;  %v14597_v34 = vld [vmem:[%s18872_s3 + $0x440] sm:$0xff] }
  0x45   :  { %19443 = vst [vmem:[#allocation141_spill] sm:$0xff] %v14582_v32  ;;  %19444 = vst [vmem:[#allocation142_spill] sm:$0xff] %v14587_v31  ;;  %v14602_v33 = vld [vmem:[%s18872_s3 + $0x448] sm:$0xff]  ;;  %v14607_v32 = vld [vmem:[%s18872_s3 + $0x450] sm:$0xff] }
  0x46   :  { %19445 = vst [vmem:[#allocation143_spill] sm:$0xff] %v14592_v30  ;;  %19446 = vst [vmem:[#allocation144_spill] sm:$0xff] %v14597_v34  ;;  %v14612_v31 = vld [vmem:[%s18872_s3 + $0x458] sm:$0xff]  ;;  %v14617_v30 = vld [vmem:[%s18872_s3 + $0x460] sm:$0xff] }
  0x47   :  { %19447 = vst [vmem:[#allocation145_spill] sm:$0xff] %v14602_v33  ;;  %19448 = vst [vmem:[#allocation146_spill] sm:$0xff] %v14607_v32  ;;  %v14622_v34 = vld [vmem:[%s18872_s3 + $0x468] sm:$0xff]  ;;  %v14627_v33 = vld [vmem:[%s18872_s3 + $0x470] sm:$0xff] }
  0x48   :  { %19449 = vst [vmem:[#allocation147_spill] sm:$0xff] %v14612_v31  ;;  %19450 = vst [vmem:[#allocation148_spill] sm:$0xff] %v14617_v30  ;;  %v14632_v32 = vld [vmem:[%s18872_s3 + $0x478] sm:$0xff]  ;;  %v14637_v31 = vld [vmem:[%s18872_s3 + $0x480] sm:$0xff] }
  0x49   :  { %19451 = vst [vmem:[#allocation149_spill] sm:$0xff] %v14622_v34  ;;  %19452 = vst [vmem:[#allocation150_spill] sm:$0xff] %v14627_v33  ;;  %v14642_v30 = vld [vmem:[%s18872_s3 + $0x488] sm:$0xff]  ;;  %v14647_v34 = vld [vmem:[%s18872_s3 + $0x490] sm:$0xff] }
  0x4a   :  { %19453 = vst [vmem:[#allocation151_spill] sm:$0xff] %v14632_v32  ;;  %19454 = vst [vmem:[#allocation152_spill] sm:$0xff] %v14637_v31  ;;  %v14652_v33 = vld [vmem:[%s18872_s3 + $0x498] sm:$0xff]  ;;  %v14657_v32 = vld [vmem:[%s18872_s3 + $0x4a0] sm:$0xff] }
  0x4b   :  { %19455 = vst [vmem:[#allocation153_spill] sm:$0xff] %v14642_v30  ;;  %19456 = vst [vmem:[#allocation154_spill] sm:$0xff] %v14647_v34  ;;  %v14662_v31 = vld [vmem:[%s18872_s3 + $0x4a8] sm:$0xff]  ;;  %v14667_v30 = vld [vmem:[%s18872_s3 + $0x4b0] sm:$0xff] }
  0x4c   :  { %19457 = vst [vmem:[#allocation155_spill] sm:$0xff] %v14652_v33  ;;  %19458 = vst [vmem:[#allocation156_spill] sm:$0xff] %v14657_v32  ;;  %v14672_v34 = vld [vmem:[%s18872_s3 + $0x4b8] sm:$0xff]  ;;  %v14677_v33 = vld [vmem:[%s18872_s3 + $0x4c0] sm:$0xff] }
  0x4d   :  { %19459 = vst [vmem:[#allocation157_spill] sm:$0xff] %v14662_v31  ;;  %19460 = vst [vmem:[#allocation158_spill] sm:$0xff] %v14667_v30  ;;  %v14682_v32 = vld [vmem:[%s18872_s3 + $0x4c8] sm:$0xff]  ;;  %v14687_v31 = vld [vmem:[%s18872_s3 + $0x4d0] sm:$0xff] }
  0x4e   :  { %19461 = vst [vmem:[#allocation159_spill] sm:$0xff] %v14672_v34  ;;  %19462 = vst [vmem:[#allocation160_spill] sm:$0xff] %v14677_v33  ;;  %v14692_v30 = vld [vmem:[%s18872_s3 + $0x4d8] sm:$0xff]  ;;  %v14697_v34 = vld [vmem:[%s18872_s3 + $0x4e0] sm:$0xff] }
  0x4f   :  { %19463 = vst [vmem:[#allocation161_spill] sm:$0xff] %v14682_v32  ;;  %19464 = vst [vmem:[#allocation162_spill] sm:$0xff] %v14687_v31  ;;  %v14702_v33 = vld [vmem:[%s18872_s3 + $0x4e8] sm:$0xff]  ;;  %v14707_v32 = vld [vmem:[%s18872_s3 + $0x4f0] sm:$0xff] }
  0x50   :  { %19465 = vst [vmem:[#allocation163_spill] sm:$0xff] %v14692_v30  ;;  %19466 = vst [vmem:[#allocation164_spill] sm:$0xff] %v14697_v34  ;;  %v14712_v31 = vld [vmem:[%s18872_s3 + $0x4f8] sm:$0xff]  ;;  %v14717_v30 = vld [vmem:[%s18872_s3 + $0x500] sm:$0xff] }
  0x51   :  { %19467 = vst [vmem:[#allocation165_spill] sm:$0xff] %v14702_v33  ;;  %19468 = vst [vmem:[#allocation166_spill] sm:$0xff] %v14707_v32  ;;  %v14722_v34 = vld [vmem:[%s18872_s3 + $0x508] sm:$0xff]  ;;  %v14727_v33 = vld [vmem:[%s18872_s3 + $0x510] sm:$0xff] }
  0x52   :  { %19469 = vst [vmem:[#allocation167_spill] sm:$0xff] %v14712_v31  ;;  %19470 = vst [vmem:[#allocation168_spill] sm:$0xff] %v14717_v30  ;;  %v14732_v32 = vld [vmem:[%s18872_s3 + $0x518] sm:$0xff]  ;;  %v14737_v31 = vld [vmem:[%s18872_s3 + $0x520] sm:$0xff] }
  0x53   :  { %19471 = vst [vmem:[#allocation169_spill] sm:$0xff] %v14722_v34  ;;  %19472 = vst [vmem:[#allocation170_spill] sm:$0xff] %v14727_v33  ;;  %v14742_v30 = vld [vmem:[%s18872_s3 + $0x528] sm:$0xff]  ;;  %v14747_v34 = vld [vmem:[%s18872_s3 + $0x530] sm:$0xff] }
  0x54   :  { %19473 = vst [vmem:[#allocation171_spill] sm:$0xff] %v14732_v32  ;;  %19474 = vst [vmem:[#allocation172_spill] sm:$0xff] %v14737_v31  ;;  %v14752_v33 = vld [vmem:[%s18872_s3 + $0x538] sm:$0xff]  ;;  %v14757_v32 = vld [vmem:[%s18872_s3 + $0x540] sm:$0xff] }
  0x55   :  { %19475 = vst [vmem:[#allocation173_spill] sm:$0xff] %v14742_v30  ;;  %19476 = vst [vmem:[#allocation174_spill] sm:$0xff] %v14747_v34  ;;  %v14762_v31 = vld [vmem:[%s18872_s3 + $0x548] sm:$0xff]  ;;  %v14767_v30 = vld [vmem:[%s18872_s3 + $0x550] sm:$0xff] }
  0x56   :  { %19477 = vst [vmem:[#allocation175_spill] sm:$0xff] %v14752_v33  ;;  %19478 = vst [vmem:[#allocation176_spill] sm:$0xff] %v14757_v32  ;;  %v14772_v34 = vld [vmem:[%s18872_s3 + $0x558] sm:$0xff]  ;;  %v14777_v33 = vld [vmem:[%s18872_s3 + $0x560] sm:$0xff] }
  0x57   :  { %19479 = vst [vmem:[#allocation177_spill] sm:$0xff] %v14762_v31  ;;  %19480 = vst [vmem:[#allocation178_spill] sm:$0xff] %v14767_v30  ;;  %v14782_v32 = vld [vmem:[%s18872_s3 + $0x568] sm:$0xff]  ;;  %v14787_v31 = vld [vmem:[%s18872_s3 + $0x570] sm:$0xff] }
  0x58   :  { %19481 = vst [vmem:[#allocation179_spill] sm:$0xff] %v14772_v34  ;;  %19482 = vst [vmem:[#allocation180_spill] sm:$0xff] %v14777_v33  ;;  %v14792_v30 = vld [vmem:[%s18872_s3 + $0x578] sm:$0xff]  ;;  %v14797_v34 = vld [vmem:[%s18872_s3 + $0x580] sm:$0xff] }
  0x59   :  { %19483 = vst [vmem:[#allocation181_spill] sm:$0xff] %v14782_v32  ;;  %19484 = vst [vmem:[#allocation182_spill] sm:$0xff] %v14787_v31  ;;  %v14802_v33 = vld [vmem:[%s18872_s3 + $0x588] sm:$0xff]  ;;  %v14807_v32 = vld [vmem:[%s18872_s3 + $0x590] sm:$0xff] }
  0x5a   :  { %19485 = vst [vmem:[#allocation183_spill] sm:$0xff] %v14792_v30  ;;  %19486 = vst [vmem:[#allocation184_spill] sm:$0xff] %v14797_v34  ;;  %v14812_v31 = vld [vmem:[%s18872_s3 + $0x598] sm:$0xff]  ;;  %v14817_v30 = vld [vmem:[%s18872_s3 + $0x5a0] sm:$0xff] }
  0x5b   :  { %19487 = vst [vmem:[#allocation185_spill] sm:$0xff] %v14802_v33  ;;  %19488 = vst [vmem:[#allocation186_spill] sm:$0xff] %v14807_v32  ;;  %v14822_v34 = vld [vmem:[%s18872_s3 + $0x5a8] sm:$0xff]  ;;  %v14827_v33 = vld [vmem:[%s18872_s3 + $0x5b0] sm:$0xff] }
  0x5c   :  { %19489 = vst [vmem:[#allocation187_spill] sm:$0xff] %v14812_v31  ;;  %19490 = vst [vmem:[#allocation188_spill] sm:$0xff] %v14817_v30  ;;  %v14832_v32 = vld [vmem:[%s18872_s3 + $0x5b8] sm:$0xff]  ;;  %v14837_v31 = vld [vmem:[%s18872_s3 + $0x5c0] sm:$0xff] }
  0x5d   :  { %19491 = vst [vmem:[#allocation189_spill] sm:$0xff] %v14822_v34  ;;  %19492 = vst [vmem:[#allocation190_spill] sm:$0xff] %v14827_v33  ;;  %v14842_v30 = vld [vmem:[%s18872_s3 + $0x5c8] sm:$0xff]  ;;  %v14847_v34 = vld [vmem:[%s18872_s3 + $0x5d0] sm:$0xff] }
  0x5e   :  { %19493 = vst [vmem:[#allocation191_spill] sm:$0xff] %v14832_v32  ;;  %19494 = vst [vmem:[#allocation192_spill] sm:$0xff] %v14837_v31  ;;  %v14852_v33 = vld [vmem:[%s18872_s3 + $0x5d8] sm:$0xff]  ;;  %v14857_v32 = vld [vmem:[%s18872_s3 + $0x5e0] sm:$0xff] }
  0x5f   :  { %19495 = vst [vmem:[#allocation193_spill] sm:$0xff] %v14842_v30  ;;  %19496 = vst [vmem:[#allocation194_spill] sm:$0xff] %v14847_v34  ;;  %v14862_v31 = vld [vmem:[%s18872_s3 + $0x5e8] sm:$0xff]  ;;  %v14867_v30 = vld [vmem:[%s18872_s3 + $0x5f0] sm:$0xff] }
  0x60   :  { %19497 = vst [vmem:[#allocation195_spill] sm:$0xff] %v14852_v33  ;;  %19498 = vst [vmem:[#allocation196_spill] sm:$0xff] %v14857_v32  ;;  %v14872_v34 = vld [vmem:[%s18872_s3 + $0x5f8] sm:$0xff]  ;;  %v14877_v33 = vld [vmem:[%s18872_s3 + $0x600] sm:$0xff] }
  0x61   :  { %19499 = vst [vmem:[#allocation197_spill] sm:$0xff] %v14862_v31  ;;  %19500 = vst [vmem:[#allocation198_spill] sm:$0xff] %v14867_v30  ;;  %v14882_v32 = vld [vmem:[%s18872_s3 + $0x608] sm:$0xff]  ;;  %v14887_v31 = vld [vmem:[%s18872_s3 + $0x610] sm:$0xff] }
  0x62   :  { %19501 = vst [vmem:[#allocation199_spill] sm:$0xff] %v14872_v34  ;;  %19502 = vst [vmem:[#allocation200_spill] sm:$0xff] %v14877_v33  ;;  %v14892_v30 = vld [vmem:[%s18872_s3 + $0x618] sm:$0xff]  ;;  %v14897_v34 = vld [vmem:[%s18872_s3 + $0x620] sm:$0xff] }
  0x63   :  { %19503 = vst [vmem:[#allocation201_spill] sm:$0xff] %v14882_v32  ;;  %19504 = vst [vmem:[#allocation202_spill] sm:$0xff] %v14887_v31  ;;  %v14902_v35 = vld [vmem:[%s18872_s3 + $0x628] sm:$0xff]  ;;  %v14907_v29 = vld [vmem:[%s18872_s3 + $0x630] sm:$0xff] }
  0x64   :  { %19505 = vst [vmem:[#allocation203_spill] sm:$0xff] %v14892_v30  ;;  %19506 = vst [vmem:[#allocation204_spill] sm:$0xff] %v14897_v34  ;;  %v14912_v36 = vld [vmem:[%s18872_s3 + $0x638] sm:$0xff]  ;;  %v14917_v28 = vld [vmem:[%s18872_s3 + $0x640] sm:$0xff] }
  0x65   :  { %19507 = vst [vmem:[#allocation205_spill] sm:$0xff] %v14902_v35  ;;  %19508 = vst [vmem:[#allocation206_spill] sm:$0xff] %v14907_v29  ;;  %v14922_v37 = vld [vmem:[%s18872_s3 + $0x648] sm:$0xff]  ;;  %v14927_v27 = vld [vmem:[%s18872_s3 + $0x650] sm:$0xff] }
  0x66   :  { %19509 = vst [vmem:[#allocation207_spill] sm:$0xff] %v14912_v36  ;;  %19510 = vst [vmem:[#allocation208_spill] sm:$0xff] %v14917_v28  ;;  %v14932_v38 = vld [vmem:[%s18872_s3 + $0x658] sm:$0xff]  ;;  %v14937_v26 = vld [vmem:[%s18872_s3 + $0x660] sm:$0xff] }
  0x67   :  { %19511 = vst [vmem:[#allocation209_spill] sm:$0xff] %v14922_v37  ;;  %19512 = vst [vmem:[#allocation210_spill] sm:$0xff] %v14927_v27  ;;  %v14942_v39 = vld [vmem:[%s18872_s3 + $0x668] sm:$0xff]  ;;  %v14947_v25 = vld [vmem:[%s18872_s3 + $0x670] sm:$0xff] }
  0x68   :  { %19513 = vst [vmem:[#allocation211_spill] sm:$0xff] %v14932_v38  ;;  %19514 = vst [vmem:[#allocation212_spill] sm:$0xff] %v14937_v26  ;;  %v14952_v40 = vld [vmem:[%s18872_s3 + $0x678] sm:$0xff]  ;;  %v14957_v24 = vld [vmem:[%s18872_s3 + $0x680] sm:$0xff] }
  0x69   :  { %19515 = vst [vmem:[#allocation213_spill] sm:$0xff] %v14942_v39  ;;  %19516 = vst [vmem:[#allocation214_spill] sm:$0xff] %v14947_v25  ;;  %v14962_v41 = vld [vmem:[%s18872_s3 + $0x688] sm:$0xff]  ;;  %v14967_v23 = vld [vmem:[%s18872_s3 + $0x690] sm:$0xff] }
  0x6a   :  { %19517 = vst [vmem:[#allocation215_spill] sm:$0xff] %v14952_v40  ;;  %19518 = vst [vmem:[#allocation216_spill] sm:$0xff] %v14957_v24  ;;  %v14972_v42 = vld [vmem:[%s18872_s3 + $0x698] sm:$0xff]  ;;  %v14977_v22 = vld [vmem:[%s18872_s3 + $0x6a0] sm:$0xff] }
  0x6b   :  { %19519 = vst [vmem:[#allocation217_spill] sm:$0xff] %v14962_v41  ;;  %19520 = vst [vmem:[#allocation218_spill] sm:$0xff] %v14967_v23  ;;  %v14982_v43 = vld [vmem:[%s18872_s3 + $0x6a8] sm:$0xff]  ;;  %v14987_v21 = vld [vmem:[%s18872_s3 + $0x6b0] sm:$0xff] }
  0x6c   :  { %19521 = vst [vmem:[#allocation219_spill] sm:$0xff] %v14972_v42  ;;  %19522 = vst [vmem:[#allocation220_spill] sm:$0xff] %v14977_v22  ;;  %v14992_v44 = vld [vmem:[%s18872_s3 + $0x6b8] sm:$0xff]  ;;  %v14997_v20 = vld [vmem:[%s18872_s3 + $0x6c0] sm:$0xff] }
  0x6d   :  { %19523 = vst [vmem:[#allocation221_spill] sm:$0xff] %v14982_v43  ;;  %19524 = vst [vmem:[#allocation222_spill] sm:$0xff] %v14987_v21  ;;  %v15002_v22 = vld [vmem:[%s18872_s3 + $0x6c8] sm:$0xff]  ;;  %v15007_v43 = vld [vmem:[%s18872_s3 + $0x6d0] sm:$0xff] }
  0x6e   :  { %19525 = vst [vmem:[#allocation223_spill] sm:$0xff] %v14992_v44  ;;  %19526 = vst [vmem:[#allocation224_spill] sm:$0xff] %v14997_v20  ;;  %v15012_v21 = vld [vmem:[%s18872_s3 + $0x6d8] sm:$0xff]  ;;  %v15017_v44 = vld [vmem:[%s18872_s3 + $0x6e0] sm:$0xff] }
  0x6f   :  { %19527 = vst [vmem:[#allocation225_spill] sm:$0xff] %v15002_v22  ;;  %19528 = vst [vmem:[#allocation226_spill] sm:$0xff] %v15007_v43  ;;  %v15022_v20 = vld [vmem:[%s18872_s3 + $0x6e8] sm:$0xff]  ;;  %v15027_v22 = vld [vmem:[%s18872_s3 + $0x6f0] sm:$0xff] }
  0x70   :  { %19529 = vst [vmem:[#allocation227_spill] sm:$0xff] %v15012_v21  ;;  %19530 = vst [vmem:[#allocation228_spill] sm:$0xff] %v15017_v44  ;;  %v15032_v43 = vld [vmem:[%s18872_s3 + $0x6f8] sm:$0xff]  ;;  %v15037_v21 = vld [vmem:[%s18872_s3 + $0x700] sm:$0xff] }
  0x71   :  { %19531 = vst [vmem:[#allocation229_spill] sm:$0xff] %v15022_v20  ;;  %19532 = vst [vmem:[#allocation230_spill] sm:$0xff] %v15027_v22  ;;  %v15042_v44 = vld [vmem:[%s18872_s3 + $0x708] sm:$0xff]  ;;  %v15047_v20 = vld [vmem:[%s18872_s3 + $0x710] sm:$0xff] }
  0x72   :  { %19533 = vst [vmem:[#allocation231_spill] sm:$0xff] %v15032_v43  ;;  %19534 = vst [vmem:[#allocation232_spill] sm:$0xff] %v15037_v21  ;;  %v15052_v22 = vld [vmem:[%s18872_s3 + $0x718] sm:$0xff]  ;;  %v15057_v43 = vld [vmem:[%s18872_s3 + $0x720] sm:$0xff] }
  0x73   :  { %19535 = vst [vmem:[#allocation233_spill] sm:$0xff] %v15042_v44  ;;  %19536 = vst [vmem:[#allocation234_spill] sm:$0xff] %v15047_v20  ;;  %v15062_v21 = vld [vmem:[%s18872_s3 + $0x728] sm:$0xff]  ;;  %v15067_v44 = vld [vmem:[%s18872_s3 + $0x730] sm:$0xff] }
  0x74   :  { %19537 = vst [vmem:[#allocation235_spill] sm:$0xff] %v15052_v22  ;;  %19538 = vst [vmem:[#allocation236_spill] sm:$0xff] %v15057_v43  ;;  %v15072_v20 = vld [vmem:[%s18872_s3 + $0x738] sm:$0xff]  ;;  %v15077_v22 = vld [vmem:[%s18872_s3 + $0x740] sm:$0xff] }
  0x75   :  { %19539 = vst [vmem:[#allocation237_spill] sm:$0xff] %v15062_v21  ;;  %19540 = vst [vmem:[#allocation238_spill] sm:$0xff] %v15067_v44  ;;  %v15082_v43 = vld [vmem:[%s18872_s3 + $0x748] sm:$0xff]  ;;  %v15087_v21 = vld [vmem:[%s18872_s3 + $0x750] sm:$0xff] }
  0x76   :  { %19541 = vst [vmem:[#allocation239_spill] sm:$0xff] %v15072_v20  ;;  %19542 = vst [vmem:[#allocation240_spill] sm:$0xff] %v15077_v22  ;;  %v15092_v44 = vld [vmem:[%s18872_s3 + $0x758] sm:$0xff]  ;;  %v15097_v20 = vld [vmem:[%s18872_s3 + $0x760] sm:$0xff] }
  0x77   :  { %19543 = vst [vmem:[#allocation241_spill] sm:$0xff] %v15082_v43  ;;  %19544 = vst [vmem:[#allocation242_spill] sm:$0xff] %v15087_v21  ;;  %v15102_v22 = vld [vmem:[%s18872_s3 + $0x768] sm:$0xff]  ;;  %v15107_v43 = vld [vmem:[%s18872_s3 + $0x770] sm:$0xff] }
  0x78   :  { %19545 = vst [vmem:[#allocation243_spill] sm:$0xff] %v15092_v44  ;;  %19546 = vst [vmem:[#allocation244_spill] sm:$0xff] %v15097_v20  ;;  %v15112_v21 = vld [vmem:[%s18872_s3 + $0x778] sm:$0xff]  ;;  %v15117_v44 = vld [vmem:[%s18872_s3 + $0x780] sm:$0xff] }
  0x79   :  { %19547 = vst [vmem:[#allocation245_spill] sm:$0xff] %v15102_v22  ;;  %19548 = vst [vmem:[#allocation246_spill] sm:$0xff] %v15107_v43  ;;  %v15122_v20 = vld [vmem:[%s18872_s3 + $0x788] sm:$0xff]  ;;  %v15127_v22 = vld [vmem:[%s18872_s3 + $0x790] sm:$0xff] }
  0x7a   :  { %19549 = vst [vmem:[#allocation247_spill] sm:$0xff] %v15112_v21  ;;  %19550 = vst [vmem:[#allocation248_spill] sm:$0xff] %v15117_v44  ;;  %v15132_v43 = vld [vmem:[%s18872_s3 + $0x798] sm:$0xff]  ;;  %v15137_v21 = vld [vmem:[%s18872_s3 + $0x7a0] sm:$0xff] }
  0x7b   :  { %19551 = vst [vmem:[#allocation249_spill] sm:$0xff] %v15122_v20  ;;  %19552 = vst [vmem:[#allocation250_spill] sm:$0xff] %v15127_v22  ;;  %v15142_v44 = vld [vmem:[%s18872_s3 + $0x7a8] sm:$0xff]  ;;  %v15147_v20 = vld [vmem:[%s18872_s3 + $0x7b0] sm:$0xff] }
  0x7c   :  { %19553 = vst [vmem:[#allocation251_spill] sm:$0xff] %v15132_v43  ;;  %19554 = vst [vmem:[#allocation252_spill] sm:$0xff] %v15137_v21  ;;  %v15152_v22 = vld [vmem:[%s18872_s3 + $0x7b8] sm:$0xff]  ;;  %v15157_v43 = vld [vmem:[%s18872_s3 + $0x7c0] sm:$0xff] }
  0x7d   :  { %19555 = vst [vmem:[#allocation253_spill] sm:$0xff] %v15142_v44  ;;  %19556 = vst [vmem:[#allocation254_spill] sm:$0xff] %v15147_v20  ;;  %v15162_v21 = vld [vmem:[%s18872_s3 + $0x7c8] sm:$0xff]  ;;  %v15167_v44 = vld [vmem:[%s18872_s3 + $0x7d0] sm:$0xff] }
  0x7e   :  { %19557 = vst [vmem:[#allocation255_spill] sm:$0xff] %v15152_v22  ;;  %19558 = vst [vmem:[#allocation256_spill] sm:$0xff] %v15157_v43  ;;  %v15172_v20 = vld [vmem:[%s18872_s3 + $0x7d8] sm:$0xff]  ;;  %v15177_v22 = vld [vmem:[%s18872_s3 + $0x7e0] sm:$0xff] }
  0x7f   :  { %19559 = vst [vmem:[#allocation257_spill] sm:$0xff] %v15162_v21  ;;  %19560 = vst [vmem:[#allocation258_spill] sm:$0xff] %v15167_v44  ;;  %v15182_v43 = vld [vmem:[%s18872_s3 + $0x7e8] sm:$0xff]  ;;  %v15187_v21 = vld [vmem:[%s18872_s3 + $0x7f0] sm:$0xff] }
  0x80   :  { %19561 = vst [vmem:[#allocation259_spill] sm:$0xff] %v15172_v20  ;;  %19562 = vst [vmem:[#allocation260_spill] sm:$0xff] %v15177_v22  ;;  %v15192_v44 = vld [vmem:[%s18872_s3 + $0x7f8] sm:$0xff]  ;;  %v15197_v20 = vld [vmem:[%s18872_s3 + $0x800] sm:$0xff] }
  0x81   :  { %19563 = vst [vmem:[#allocation261_spill] sm:$0xff] %v15182_v43  ;;  %19564 = vst [vmem:[#allocation262_spill] sm:$0xff] %v15187_v21  ;;  %v15202_v22 = vld [vmem:[%s18872_s3 + $0x808] sm:$0xff]  ;;  %v15207_v43 = vld [vmem:[%s18872_s3 + $0x810] sm:$0xff] }
  0x82   :  { %19565 = vst [vmem:[#allocation263_spill] sm:$0xff] %v15192_v44  ;;  %19566 = vst [vmem:[#allocation264_spill] sm:$0xff] %v15197_v20  ;;  %v15212_v21 = vld [vmem:[%s18872_s3 + $0x818] sm:$0xff]  ;;  %v15217_v44 = vld [vmem:[%s18872_s3 + $0x820] sm:$0xff] }
  0x83   :  { %19567 = vst [vmem:[#allocation265_spill] sm:$0xff] %v15202_v22  ;;  %19568 = vst [vmem:[#allocation266_spill] sm:$0xff] %v15207_v43  ;;  %v15222_v20 = vld [vmem:[%s18872_s3 + $0x828] sm:$0xff]  ;;  %v15227_v22 = vld [vmem:[%s18872_s3 + $0x830] sm:$0xff] }
  0x84   :  { %19569 = vst [vmem:[#allocation267_spill] sm:$0xff] %v15212_v21  ;;  %19570 = vst [vmem:[#allocation268_spill] sm:$0xff] %v15217_v44  ;;  %v15232_v43 = vld [vmem:[%s18872_s3 + $0x838] sm:$0xff]  ;;  %v15237_v21 = vld [vmem:[%s18872_s3 + $0x840] sm:$0xff] }
  0x85   :  { %19571 = vst [vmem:[#allocation269_spill] sm:$0xff] %v15222_v20  ;;  %19572 = vst [vmem:[#allocation270_spill] sm:$0xff] %v15227_v22  ;;  %v15242_v44 = vld [vmem:[%s18872_s3 + $0x848] sm:$0xff]  ;;  %v15247_v20 = vld [vmem:[%s18872_s3 + $0x850] sm:$0xff] }
  0x86   :  { %19573 = vst [vmem:[#allocation271_spill] sm:$0xff] %v15232_v43  ;;  %19574 = vst [vmem:[#allocation272_spill] sm:$0xff] %v15237_v21  ;;  %v15252_v22 = vld [vmem:[%s18872_s3 + $0x858] sm:$0xff]  ;;  %v15257_v43 = vld [vmem:[%s18872_s3 + $0x860] sm:$0xff] }
  0x87   :  { %19575 = vst [vmem:[#allocation273_spill] sm:$0xff] %v15242_v44  ;;  %19576 = vst [vmem:[#allocation274_spill] sm:$0xff] %v15247_v20  ;;  %v15262_v21 = vld [vmem:[%s18872_s3 + $0x868] sm:$0xff]  ;;  %v15267_v44 = vld [vmem:[%s18872_s3 + $0x870] sm:$0xff] }
  0x88   :  { %19577 = vst [vmem:[#allocation275_spill] sm:$0xff] %v15252_v22  ;;  %19578 = vst [vmem:[#allocation276_spill] sm:$0xff] %v15257_v43  ;;  %v15272_v20 = vld [vmem:[%s18872_s3 + $0x878] sm:$0xff]  ;;  %v15277_v22 = vld [vmem:[%s18872_s3 + $0x880] sm:$0xff] }
  0x89   :  { %19579 = vst [vmem:[#allocation277_spill] sm:$0xff] %v15262_v21  ;;  %19580 = vst [vmem:[#allocation278_spill] sm:$0xff] %v15267_v44  ;;  %v15282_v43 = vld [vmem:[%s18872_s3 + $0x888] sm:$0xff]  ;;  %v15287_v21 = vld [vmem:[%s18872_s3 + $0x890] sm:$0xff] }
  0x8a   :  { %19581 = vst [vmem:[#allocation279_spill] sm:$0xff] %v15272_v20  ;;  %19582 = vst [vmem:[#allocation280_spill] sm:$0xff] %v15277_v22  ;;  %v15292_v44 = vld [vmem:[%s18872_s3 + $0x898] sm:$0xff]  ;;  %v15297_v20 = vld [vmem:[%s18872_s3 + $0x8a0] sm:$0xff] }
  0x8b   :  { %19583 = vst [vmem:[#allocation281_spill] sm:$0xff] %v15282_v43  ;;  %19584 = vst [vmem:[#allocation282_spill] sm:$0xff] %v15287_v21  ;;  %v15302_v22 = vld [vmem:[%s18872_s3 + $0x8a8] sm:$0xff]  ;;  %v15307_v43 = vld [vmem:[%s18872_s3 + $0x8b0] sm:$0xff] }
  0x8c   :  { %19585 = vst [vmem:[#allocation283_spill] sm:$0xff] %v15292_v44  ;;  %19586 = vst [vmem:[#allocation284_spill] sm:$0xff] %v15297_v20  ;;  %v15312_v21 = vld [vmem:[%s18872_s3 + $0x8b8] sm:$0xff]  ;;  %v15317_v44 = vld [vmem:[%s18872_s3 + $0x8c0] sm:$0xff] }
  0x8d   :  { %19587 = vst [vmem:[#allocation285_spill] sm:$0xff] %v15302_v22  ;;  %19588 = vst [vmem:[#allocation286_spill] sm:$0xff] %v15307_v43  ;;  %v15322_v20 = vld [vmem:[%s18872_s3 + $0x8c8] sm:$0xff]  ;;  %v15327_v22 = vld [vmem:[%s18872_s3 + $0x8d0] sm:$0xff] }
  0x8e   :  { %19589 = vst [vmem:[#allocation287_spill] sm:$0xff] %v15312_v21  ;;  %19590 = vst [vmem:[#allocation288_spill] sm:$0xff] %v15317_v44  ;;  %v15332_v43 = vld [vmem:[%s18872_s3 + $0x8d8] sm:$0xff]  ;;  %v15337_v21 = vld [vmem:[%s18872_s3 + $0x8e0] sm:$0xff] }
  0x8f   :  { %19591 = vst [vmem:[#allocation289_spill] sm:$0xff] %v15322_v20  ;;  %19592 = vst [vmem:[#allocation290_spill] sm:$0xff] %v15327_v22  ;;  %v15342_v44 = vld [vmem:[%s18872_s3 + $0x8e8] sm:$0xff]  ;;  %v15347_v20 = vld [vmem:[%s18872_s3 + $0x8f0] sm:$0xff] }
  0x90   :  { %19593 = vst [vmem:[#allocation291_spill] sm:$0xff] %v15332_v43  ;;  %19594 = vst [vmem:[#allocation292_spill] sm:$0xff] %v15337_v21  ;;  %v15352_v22 = vld [vmem:[%s18872_s3 + $0x8f8] sm:$0xff]  ;;  %v15357_v43 = vld [vmem:[%s18872_s3 + $0x900] sm:$0xff] }
  0x91   :  { %19595 = vst [vmem:[#allocation293_spill] sm:$0xff] %v15342_v44  ;;  %19596 = vst [vmem:[#allocation294_spill] sm:$0xff] %v15347_v20  ;;  %v15362_v21 = vld [vmem:[%s18872_s3 + $0x908] sm:$0xff]  ;;  %v15367_v44 = vld [vmem:[%s18872_s3 + $0x910] sm:$0xff] }
  0x92   :  { %19597 = vst [vmem:[#allocation295_spill] sm:$0xff] %v15352_v22  ;;  %19598 = vst [vmem:[#allocation296_spill] sm:$0xff] %v15357_v43  ;;  %v15372_v20 = vld [vmem:[%s18872_s3 + $0x918] sm:$0xff]  ;;  %v15377_v22 = vld [vmem:[%s18872_s3 + $0x920] sm:$0xff] }
  0x93   :  { %19599 = vst [vmem:[#allocation297_spill] sm:$0xff] %v15362_v21  ;;  %19600 = vst [vmem:[#allocation298_spill] sm:$0xff] %v15367_v44  ;;  %v15382_v45 = vld [vmem:[%s18872_s3 + $0x928] sm:$0xff]  ;;  %v15387_v19 = vld [vmem:[%s18872_s3 + $0x930] sm:$0xff] }
  0x94   :  { %19601 = vst [vmem:[#allocation299_spill] sm:$0xff] %v15372_v20  ;;  %19602 = vst [vmem:[#allocation300_spill] sm:$0xff] %v15377_v22  ;;  %v15392_v46 = vld [vmem:[%s18872_s3 + $0x938] sm:$0xff]  ;;  %v15397_v42 = vld [vmem:[%s18872_s3 + $0x940] sm:$0xff] }
  0x95   :  { %19603 = vst [vmem:[#allocation301_spill] sm:$0xff] %v15382_v45  ;;  %19604 = vst [vmem:[#allocation302_spill] sm:$0xff] %v15387_v19  ;;  %v15402_v23 = vld [vmem:[%s18872_s3 + $0x948] sm:$0xff]  ;;  %v15407_v18 = vld [vmem:[%s18872_s3 + $0x950] sm:$0xff] }
  0x96   :  { %19605 = vst [vmem:[#allocation303_spill] sm:$0xff] %v15392_v46  ;;  %19606 = vst [vmem:[#allocation304_spill] sm:$0xff] %v15397_v42  ;;  %v15412_v47 = vld [vmem:[%s18872_s3 + $0x958] sm:$0xff]  ;;  %v15417_v17 = vld [vmem:[%s18872_s3 + $0x960] sm:$0xff] }
  0x97   :  { %19607 = vst [vmem:[#allocation305_spill] sm:$0xff] %v15402_v23  ;;  %19608 = vst [vmem:[#allocation306_spill] sm:$0xff] %v15407_v18  ;;  %v15422_v48 = vld [vmem:[%s18872_s3 + $0x968] sm:$0xff]  ;;  %v15427_v41 = vld [vmem:[%s18872_s3 + $0x970] sm:$0xff] }
  0x98   :  { %19609 = vst [vmem:[#allocation307_spill] sm:$0xff] %v15412_v47  ;;  %19610 = vst [vmem:[#allocation308_spill] sm:$0xff] %v15417_v17  ;;  %v15432_v24 = vld [vmem:[%s18872_s3 + $0x978] sm:$0xff]  ;;  %v15437_v16 = vld [vmem:[%s18872_s3 + $0x980] sm:$0xff] }
  0x99   :  { %19611 = vst [vmem:[#allocation309_spill] sm:$0xff] %v15422_v48  ;;  %19612 = vst [vmem:[#allocation310_spill] sm:$0xff] %v15427_v41  ;;  %v15442_v49 = vld [vmem:[%s18872_s3 + $0x988] sm:$0xff]  ;;  %v15447_v15 = vld [vmem:[%s18872_s3 + $0x990] sm:$0xff] }
  0x9a   :  { %19613 = vst [vmem:[#allocation311_spill] sm:$0xff] %v15432_v24  ;;  %19614 = vst [vmem:[#allocation312_spill] sm:$0xff] %v15437_v16  ;;  %v15452_v50 = vld [vmem:[%s18872_s3 + $0x998] sm:$0xff]  ;;  %v15457_v40 = vld [vmem:[%s18872_s3 + $0x9a0] sm:$0xff] }
  0x9b   :  { %19615 = vst [vmem:[#allocation313_spill] sm:$0xff] %v15442_v49  ;;  %19616 = vst [vmem:[#allocation314_spill] sm:$0xff] %v15447_v15  ;;  %v15462_v16 = vld [vmem:[%s18872_s3 + $0x9a8] sm:$0xff]  ;;  %v15467_v49 = vld [vmem:[%s18872_s3 + $0x9b0] sm:$0xff] }
  0x9c   :  { %19617 = vst [vmem:[#allocation315_spill] sm:$0xff] %v15452_v50  ;;  %19618 = vst [vmem:[#allocation316_spill] sm:$0xff] %v15457_v40  ;;  %v15472_v15 = vld [vmem:[%s18872_s3 + $0x9b8] sm:$0xff]  ;;  %v15477_v50 = vld [vmem:[%s18872_s3 + $0x9c0] sm:$0xff] }
  0x9d   :  { %19619 = vst [vmem:[#allocation317_spill] sm:$0xff] %v15462_v16  ;;  %19620 = vst [vmem:[#allocation318_spill] sm:$0xff] %v15467_v49  ;;  %v15482_v40 = vld [vmem:[%s18872_s3 + $0x9c8] sm:$0xff]  ;;  %v15487_v16 = vld [vmem:[%s18872_s3 + $0x9d0] sm:$0xff] }
  0x9e   :  { %19621 = vst [vmem:[#allocation319_spill] sm:$0xff] %v15472_v15  ;;  %19622 = vst [vmem:[#allocation320_spill] sm:$0xff] %v15477_v50  ;;  %v15492_v49 = vld [vmem:[%s18872_s3 + $0x9d8] sm:$0xff]  ;;  %v15497_v15 = vld [vmem:[%s18872_s3 + $0x9e0] sm:$0xff] }
  0x9f   :  { %19623 = vst [vmem:[#allocation321_spill] sm:$0xff] %v15482_v40  ;;  %19624 = vst [vmem:[#allocation322_spill] sm:$0xff] %v15487_v16  ;;  %v15502_v50 = vld [vmem:[%s18872_s3 + $0x9e8] sm:$0xff]  ;;  %v15507_v40 = vld [vmem:[%s18872_s3 + $0x9f0] sm:$0xff] }
  0xa0   :  { %19625 = vst [vmem:[#allocation323_spill] sm:$0xff] %v15492_v49  ;;  %19626 = vst [vmem:[#allocation324_spill] sm:$0xff] %v15497_v15  ;;  %v15512_v16 = vld [vmem:[%s18872_s3 + $0x9f8] sm:$0xff]  ;;  %v15517_v49 = vld [vmem:[%s18872_s3 + $0xa00] sm:$0xff] }
  0xa1   :  { %19627 = vst [vmem:[#allocation325_spill] sm:$0xff] %v15502_v50  ;;  %19628 = vst [vmem:[#allocation326_spill] sm:$0xff] %v15507_v40  ;;  %v15522_v15 = vld [vmem:[%s18872_s3 + $0xa08] sm:$0xff]  ;;  %v15527_v50 = vld [vmem:[%s18872_s3 + $0xa10] sm:$0xff] }
  0xa2   :  { %19629 = vst [vmem:[#allocation327_spill] sm:$0xff] %v15512_v16  ;;  %19630 = vst [vmem:[#allocation328_spill] sm:$0xff] %v15517_v49  ;;  %v15532_v40 = vld [vmem:[%s18872_s3 + $0xa18] sm:$0xff]  ;;  %v15537_v16 = vld [vmem:[%s18872_s3 + $0xa20] sm:$0xff] }
  0xa3   :  { %19631 = vst [vmem:[#allocation329_spill] sm:$0xff] %v15522_v15  ;;  %19632 = vst [vmem:[#allocation330_spill] sm:$0xff] %v15527_v50  ;;  %v15542_v49 = vld [vmem:[%s18872_s3 + $0xa28] sm:$0xff]  ;;  %v15547_v15 = vld [vmem:[%s18872_s3 + $0xa30] sm:$0xff] }
  0xa4   :  { %19633 = vst [vmem:[#allocation331_spill] sm:$0xff] %v15532_v40  ;;  %19634 = vst [vmem:[#allocation332_spill] sm:$0xff] %v15537_v16  ;;  %v15552_v50 = vld [vmem:[%s18872_s3 + $0xa38] sm:$0xff]  ;;  %v15557_v40 = vld [vmem:[%s18872_s3 + $0xa40] sm:$0xff] }
  0xa5   :  { %19635 = vst [vmem:[#allocation333_spill] sm:$0xff] %v15542_v49  ;;  %19636 = vst [vmem:[#allocation334_spill] sm:$0xff] %v15547_v15  ;;  %v15562_v16 = vld [vmem:[%s18872_s3 + $0xa48] sm:$0xff]  ;;  %v15567_v49 = vld [vmem:[%s18872_s3 + $0xa50] sm:$0xff] }
  0xa6   :  { %19637 = vst [vmem:[#allocation335_spill] sm:$0xff] %v15552_v50  ;;  %19638 = vst [vmem:[#allocation336_spill] sm:$0xff] %v15557_v40  ;;  %v15572_v15 = vld [vmem:[%s18872_s3 + $0xa58] sm:$0xff]  ;;  %v15577_v50 = vld [vmem:[%s18872_s3 + $0xa60] sm:$0xff] }
  0xa7   :  { %19639 = vst [vmem:[#allocation337_spill] sm:$0xff] %v15562_v16  ;;  %19640 = vst [vmem:[#allocation338_spill] sm:$0xff] %v15567_v49  ;;  %v15582_v40 = vld [vmem:[%s18872_s3 + $0xa68] sm:$0xff]  ;;  %v15587_v16 = vld [vmem:[%s18872_s3 + $0xa70] sm:$0xff] }
  0xa8   :  { %19641 = vst [vmem:[#allocation339_spill] sm:$0xff] %v15572_v15  ;;  %19642 = vst [vmem:[#allocation340_spill] sm:$0xff] %v15577_v50  ;;  %v15592_v49 = vld [vmem:[%s18872_s3 + $0xa78] sm:$0xff]  ;;  %v15597_v15 = vld [vmem:[%s18872_s3 + $0xa80] sm:$0xff] }
  0xa9   :  { %19643 = vst [vmem:[#allocation341_spill] sm:$0xff] %v15582_v40  ;;  %19644 = vst [vmem:[#allocation342_spill] sm:$0xff] %v15587_v16  ;;  %v15602_v50 = vld [vmem:[%s18872_s3 + $0xa88] sm:$0xff]  ;;  %v15607_v40 = vld [vmem:[%s18872_s3 + $0xa90] sm:$0xff] }
  0xaa   :  { %19645 = vst [vmem:[#allocation343_spill] sm:$0xff] %v15592_v49  ;;  %19646 = vst [vmem:[#allocation344_spill] sm:$0xff] %v15597_v15  ;;  %v15612_v16 = vld [vmem:[%s18872_s3 + $0xa98] sm:$0xff]  ;;  %v15617_v49 = vld [vmem:[%s18872_s3 + $0xaa0] sm:$0xff] }
  0xab   :  { %19647 = vst [vmem:[#allocation345_spill] sm:$0xff] %v15602_v50  ;;  %19648 = vst [vmem:[#allocation346_spill] sm:$0xff] %v15607_v40  ;;  %v15622_v15 = vld [vmem:[%s18872_s3 + $0xaa8] sm:$0xff]  ;;  %v15627_v50 = vld [vmem:[%s18872_s3 + $0xab0] sm:$0xff] }
  0xac   :  { %19649 = vst [vmem:[#allocation347_spill] sm:$0xff] %v15612_v16  ;;  %19650 = vst [vmem:[#allocation348_spill] sm:$0xff] %v15617_v49  ;;  %v15632_v40 = vld [vmem:[%s18872_s3 + $0xab8] sm:$0xff]  ;;  %v15637_v16 = vld [vmem:[%s18872_s3 + $0xac0] sm:$0xff] }
  0xad   :  { %19651 = vst [vmem:[#allocation349_spill] sm:$0xff] %v15622_v15  ;;  %19652 = vst [vmem:[#allocation350_spill] sm:$0xff] %v15627_v50  ;;  %v15642_v49 = vld [vmem:[%s18872_s3 + $0xac8] sm:$0xff]  ;;  %v15647_v15 = vld [vmem:[%s18872_s3 + $0xad0] sm:$0xff] }
  0xae   :  { %19653 = vst [vmem:[#allocation351_spill] sm:$0xff] %v15632_v40  ;;  %19654 = vst [vmem:[#allocation352_spill] sm:$0xff] %v15637_v16  ;;  %v15652_v50 = vld [vmem:[%s18872_s3 + $0xad8] sm:$0xff]  ;;  %v15657_v40 = vld [vmem:[%s18872_s3 + $0xae0] sm:$0xff] }
  0xaf   :  { %19655 = vst [vmem:[#allocation353_spill] sm:$0xff] %v15642_v49  ;;  %19656 = vst [vmem:[#allocation354_spill] sm:$0xff] %v15647_v15  ;;  %v15662_v16 = vld [vmem:[%s18872_s3 + $0xae8] sm:$0xff]  ;;  %v15667_v49 = vld [vmem:[%s18872_s3 + $0xaf0] sm:$0xff] }
  0xb0   :  { %19657 = vst [vmem:[#allocation355_spill] sm:$0xff] %v15652_v50  ;;  %19658 = vst [vmem:[#allocation356_spill] sm:$0xff] %v15657_v40  ;;  %v15672_v15 = vld [vmem:[%s18872_s3 + $0xaf8] sm:$0xff]  ;;  %v15677_v50 = vld [vmem:[%s18872_s3 + $0xb00] sm:$0xff] }
  0xb1   :  { %19659 = vst [vmem:[#allocation357_spill] sm:$0xff] %v15662_v16  ;;  %19660 = vst [vmem:[#allocation358_spill] sm:$0xff] %v15667_v49  ;;  %v15682_v40 = vld [vmem:[%s18872_s3 + $0xb08] sm:$0xff]  ;;  %v15687_v16 = vld [vmem:[%s18872_s3 + $0xb10] sm:$0xff] }
  0xb2   :  { %19661 = vst [vmem:[#allocation359_spill] sm:$0xff] %v15672_v15  ;;  %19662 = vst [vmem:[#allocation360_spill] sm:$0xff] %v15677_v50  ;;  %v15692_v49 = vld [vmem:[%s18872_s3 + $0xb18] sm:$0xff]  ;;  %v15697_v15 = vld [vmem:[%s18872_s3 + $0xb20] sm:$0xff] }
  0xb3   :  { %19663 = vst [vmem:[#allocation361_spill] sm:$0xff] %v15682_v40  ;;  %19664 = vst [vmem:[#allocation362_spill] sm:$0xff] %v15687_v16  ;;  %v15702_v50 = vld [vmem:[%s18872_s3 + $0xb28] sm:$0xff]  ;;  %v15707_v40 = vld [vmem:[%s18872_s3 + $0xb30] sm:$0xff] }
  0xb4   :  { %19665 = vst [vmem:[#allocation363_spill] sm:$0xff] %v15692_v49  ;;  %19666 = vst [vmem:[#allocation364_spill] sm:$0xff] %v15697_v15  ;;  %v15712_v16 = vld [vmem:[%s18872_s3 + $0xb38] sm:$0xff]  ;;  %v15717_v49 = vld [vmem:[%s18872_s3 + $0xb40] sm:$0xff] }
  0xb5   :  { %19667 = vst [vmem:[#allocation365_spill] sm:$0xff] %v15702_v50  ;;  %19668 = vst [vmem:[#allocation366_spill] sm:$0xff] %v15707_v40  ;;  %v15722_v15 = vld [vmem:[%s18872_s3 + $0xb48] sm:$0xff]  ;;  %v15727_v50 = vld [vmem:[%s18872_s3 + $0xb50] sm:$0xff] }
  0xb6   :  { %19669 = vst [vmem:[#allocation367_spill] sm:$0xff] %v15712_v16  ;;  %19670 = vst [vmem:[#allocation368_spill] sm:$0xff] %v15717_v49  ;;  %v15732_v40 = vld [vmem:[%s18872_s3 + $0xb58] sm:$0xff]  ;;  %v15737_v16 = vld [vmem:[%s18872_s3 + $0xb60] sm:$0xff] }
  0xb7   :  { %19671 = vst [vmem:[#allocation369_spill] sm:$0xff] %v15722_v15  ;;  %19672 = vst [vmem:[#allocation370_spill] sm:$0xff] %v15727_v50  ;;  %v15742_v49 = vld [vmem:[%s18872_s3 + $0xb68] sm:$0xff]  ;;  %v15747_v15 = vld [vmem:[%s18872_s3 + $0xb70] sm:$0xff] }
  0xb8   :  { %19673 = vst [vmem:[#allocation371_spill] sm:$0xff] %v15732_v40  ;;  %19674 = vst [vmem:[#allocation372_spill] sm:$0xff] %v15737_v16  ;;  %v15752_v50 = vld [vmem:[%s18872_s3 + $0xb78] sm:$0xff]  ;;  %v15757_v40 = vld [vmem:[%s18872_s3 + $0xb80] sm:$0xff] }
  0xb9   :  { %19675 = vst [vmem:[#allocation373_spill] sm:$0xff] %v15742_v49  ;;  %19676 = vst [vmem:[#allocation374_spill] sm:$0xff] %v15747_v15  ;;  %v15762_v16 = vld [vmem:[%s18872_s3 + $0xb88] sm:$0xff]  ;;  %v15767_v49 = vld [vmem:[%s18872_s3 + $0xb90] sm:$0xff] }
  0xba   :  { %19677 = vst [vmem:[#allocation375_spill] sm:$0xff] %v15752_v50  ;;  %19678 = vst [vmem:[#allocation376_spill] sm:$0xff] %v15757_v40  ;;  %v15772_v15 = vld [vmem:[%s18872_s3 + $0xb98] sm:$0xff]  ;;  %v15777_v50 = vld [vmem:[%s18872_s3 + $0xba0] sm:$0xff] }
  0xbb   :  { %19679 = vst [vmem:[#allocation377_spill] sm:$0xff] %v15762_v16  ;;  %19680 = vst [vmem:[#allocation378_spill] sm:$0xff] %v15767_v49  ;;  %v15782_v40 = vld [vmem:[%s18872_s3 + $0xba8] sm:$0xff]  ;;  %v15787_v16 = vld [vmem:[%s18872_s3 + $0xbb0] sm:$0xff] }
  0xbc   :  { %19681 = vst [vmem:[#allocation379_spill] sm:$0xff] %v15772_v15  ;;  %19682 = vst [vmem:[#allocation380_spill] sm:$0xff] %v15777_v50  ;;  %v15792_v49 = vld [vmem:[%s18872_s3 + $0xbb8] sm:$0xff]  ;;  %v15797_v15 = vld [vmem:[%s18872_s3 + $0xbc0] sm:$0xff] }
  0xbd   :  { %19683 = vst [vmem:[#allocation381_spill] sm:$0xff] %v15782_v40  ;;  %19684 = vst [vmem:[#allocation382_spill] sm:$0xff] %v15787_v16  ;;  %v15802_v50 = vld [vmem:[%s18872_s3 + $0xbc8] sm:$0xff]  ;;  %v15807_v40 = vld [vmem:[%s18872_s3 + $0xbd0] sm:$0xff] }
  0xbe   :  { %19685 = vst [vmem:[#allocation383_spill] sm:$0xff] %v15792_v49  ;;  %19686 = vst [vmem:[#allocation384_spill] sm:$0xff] %v15797_v15  ;;  %v15812_v16 = vld [vmem:[%s18872_s3 + $0xbd8] sm:$0xff]  ;;  %v15817_v49 = vld [vmem:[%s18872_s3 + $0xbe0] sm:$0xff] }
  0xbf   :  { %19687 = vst [vmem:[#allocation385_spill] sm:$0xff] %v15802_v50  ;;  %19688 = vst [vmem:[#allocation386_spill] sm:$0xff] %v15807_v40  ;;  %v15822_v15 = vld [vmem:[%s18872_s3 + $0xbe8] sm:$0xff]  ;;  %v15827_v50 = vld [vmem:[%s18872_s3 + $0xbf0] sm:$0xff] }
  0xc0   :  { %19689 = vst [vmem:[#allocation387_spill] sm:$0xff] %v15812_v16  ;;  %19690 = vst [vmem:[#allocation388_spill] sm:$0xff] %v15817_v49  ;;  %v15832_v40 = vld [vmem:[%s18872_s3 + $0xbf8] sm:$0xff] }
  0xc1   :  { %19691 = vst [vmem:[#allocation389_spill] sm:$0xff] %v15822_v15  ;;  %19692 = vst [vmem:[#allocation390_spill] sm:$0xff] %v15827_v50 }
  0xc2   :  { %19693 = vst [vmem:[#allocation391_spill] sm:$0xff] %v15832_v40 }
  0xc3   :  { %865 = vsyncadd [#allocation4], 49152  ;;  %s19694_s28 = sld [smem:[#allocation408_spill]]  ;;  %vm997_vm0 = vcmask 1043456   ;;  %v19224_v51 = vmov 0   ;;  %vm984_vm1 = vcmask 588800  }
  0xc4   :  { %1039 = vmatprep.mubr.bf16.mxu0 %v19224_v51  ;;  %13721 = vset.pattern.permute.xlu0 %v19224_v51  ;;  %s19696_s24 = sld [smem:[#allocation409_spill]]  ;;  %v13815_v43 = vmov 1966171168  }
  0xc5   :  { %v2029_v3 = vunpack.c.l.s4 %v13815_v43 }
  0xc7   :  { %v2030_v0 = vunpack.c.0.s8 %v2029_v3 }
  0xc9   :  { %v890_v49 = vld [vmem:[%s19694_s28 + $0x300] sm:$0xff]  ;;  %v13724_v15 = vld [vmem:[%s19694_s28 + $0x308] ss:$0 sps:$4 sm:$0xff]   ;;  %v1416_v38 = vld [vmem:[%s19694_s28 + $0x1f8] sm:$0xff] }
  0xca   :  { %v12814_v16 = vcombine.high %v890_v49, %v890_v49  ;;  %v12813_v24 = vcombine.low %v890_v49, %v890_v49  ;;  %v886_v50 = vld [vmem:[%s19694_s28 + $0x240] sm:$0xff]  ;;  %v887_v41 = vld [vmem:[%s19694_s28 + $0x248] sm:$0xf]  ;;  %13706 = vmatprep.subr.msk.bf16.mxu1 %vm997_vm0, %v13724_v15  ;;  %v1005_v52 = vsel %vm997_vm0, %v13724_v15, 0  ;;  %v1408_v10 = vld [vmem:[%s19694_s28 + $0x78] sm:$0xff] }
  0xcb   :  { %v888_v40 = vld [vmem:[%s19694_s28 + $0x2a0] sm:$0xff]  ;;  %v889_v14 = vld [vmem:[%s19694_s28 + $0x2a8] sm:$0xf]  ;;  %13496 = vmatpush3.bf16.msra.mxu1 %v1005_v52 }
  0xcc   :  { %v12811_v25 = vcombine.high %v886_v50, %v888_v40  ;;  %v882_v49 = vld [vmem:[%s19694_s28 + $0x180] sm:$0xff]  ;;  %12816 = vmatprep.subr.msk.bf16.mxu0 %vm997_vm0, %v12814_v16  ;;  %v999_v13 = vsel %vm997_vm0, %v12813_v24, 0  ;;  %v12812_v39 = vcombine.low %v887_v41, %v889_v14  ;;  %v883_v26 = vld [vmem:[%s19694_s28 + $0x188] sm:$0xf]  ;;  %v12810_v51 = vcombine.low %v886_v50, %v888_v40 }
  0xcd   :  { %v884_v48 = vld [vmem:[%s19694_s28 + $0x1e0] sm:$0xff]  ;;  %1014 = vmatpush1.bf16.msra.mxu0 %v999_v13  ;;  %v885_v16 = vld [vmem:[%s19694_s28 + $0x1e8] sm:$0xf] }
  0xce   :  { %1015 = vmatprep.subr.bf16.mxu0 %v12811_v25  ;;  %13497 = vmatprep.subr.bf16.mxu1 %v12812_v39  ;;  %v12808_v24 = vcombine.high %v882_v49, %v884_v48  ;;  %v12809_v15 = vcombine.low %v883_v26, %v885_v16  ;;  %v878_v14 = vld [vmem:[%s19694_s28 + $0xc0] sm:$0xff]  ;;  %v879_v13 = vld [vmem:[%s19694_s28 + $0xc8] sm:$0xf]  ;;  %v19695_v25 = vmov 0   ;;  %v12807_v50 = vcombine.low %v882_v49, %v884_v48 }
  0xcf   :  { %v880_v41 = vld [vmem:[%s19694_s28 + $0x120] sm:$0xff]  ;;  %v881_v40 = vld [vmem:[%s19694_s28 + $0x128] sm:$0xf]  ;;  %13722 = vset.pattern.permute.xlu1 %v19695_v25  ;;  %13498 = vmatpush3.bf16.msra.mxu1 %v12812_v39 }
  0xd0   :  { %v15886_v26 = vld [vmem:[%s19696_s24] sm:$0xff]   ;;  %13499 = vmatprep.subr.bf16.mxu1 %v12809_v15  ;;  %v12805_v16 = vcombine.high %v878_v14, %v880_v41  ;;  %v12806_v17 = vcombine.low %v879_v13, %v881_v40  ;;  %v875_v53 = vld [vmem:[%s19694_s28 + $0x8] sm:$0xf]  ;;  %v12804_v48 = vcombine.low %v878_v14, %v880_v41  ;;  %v1157_v14 = vld [vmem:[%s19694_s28 + $0x24c] sm:$0xff] }
  0xd1   :  { %1016 = vmatpush1.bf16.msra.mxu0 %v12810_v51  ;;  %v874_v52 = vld [vmem:[%s19694_s28] sm:$0xff]  ;;  %v877_v39 = vld [vmem:[%s19694_s28 + $0x68] sm:$0xf]  ;;  %13505 = vmatprep.mubr.msk.bf16.mxu1 %vm984_vm1, %v15886_v26  ;;  %v1160_v41 = vld [vmem:[%s19694_s28 + $0x2b4] sm:$0xf] }
  0xd2   :  { %1017 = vmatprep.subr.bf16.mxu0 %v12808_v24  ;;  %v876_v12 = vld [vmem:[%s19694_s28 + $0x60] sm:$0xff]  ;;  %v12803_v49 = vcombine.low %v875_v53, %v877_v39  ;;  %v1161_v24 = vld [vmem:[%s19694_s28 + $0x30c] sm:$0xff] }
  0xd3   :  { %13500 = vmatpush3.bf16.msra.mxu1 %v12809_v15  ;;  %v12802_v51 = vcombine.high %v874_v52, %v876_v12  ;;  %v12801_v13 = vcombine.low %v874_v52, %v876_v12  ;;  %v12838_v40 = vcombine.high %v1161_v24, %v1161_v24  ;;  %v12837_v11 = vcombine.low %v1161_v24, %v1161_v24  ;;  %v13730_v15 = vld [vmem:[%s19694_s28 + $0x314] ss:$0 sps:$4 sm:$0xff]   ;;  %v1159_v53 = vld [vmem:[%s19694_s28 + $0x2ac] sm:$0xff] }
  0xd4   :  { %13501 = vmatprep.subr.bf16.mxu1 %v12806_v17  ;;  %v15917_v12 = vld [vmem:[%s19696_s24 + $0x8] sm:$0xff]   ;;  %v12835_v52 = vcombine.high %v1157_v14, %v1159_v53  ;;  %v15932_v39 = vld [vmem:[%s19696_s24 + $0x10] sm:$0xff]  }
  0xd5   :  { %1018 = vmatpush1.bf16.msra.mxu0 %v12807_v50  ;;  %v1236_v50 = vsel %vm997_vm0, %v12837_v11, 0  ;;  %v1154_v11 = vld [vmem:[%s19694_s28 + $0x194] sm:$0xf] }
  0xd6   :  { %1019 = vmatprep.subr.bf16.mxu0 %v12805_v16  ;;  %v1242_v16 = vsel %vm997_vm0, %v13730_v15, 0  ;;  %v1156_v24 = vld [vmem:[%s19694_s28 + $0x1f4] sm:$0xf] }
  0xd7   :  { %13502 = vmatpush3.bf16.msra.mxu1 %v12806_v17  ;;  %v1158_v17 = vld [vmem:[%s19694_s28 + $0x254] sm:$0xf] }
  0xd8   :  { %13503 = vmatprep.subr.bf16.mxu1 %v12803_v49 }
  0xd9   :  { %1020 = vmatpush1.bf16.msra.mxu0 %v12804_v48  ;;  %v1153_v48 = vld [vmem:[%s19694_s28 + $0x18c] sm:$0xff] }
  0xda   :  { %1021 = vmatprep.subr.bf16.mxu0 %v12802_v51  ;;  %v1155_v51 = vld [vmem:[%s19694_s28 + $0x1ec] sm:$0xff] }
  0xdb   :  { %13504 = vmatpush3.bf16.msra.mxu1 %v12803_v49  ;;  %v12836_v49 = vcombine.low %v1158_v17, %v1160_v41  ;;  %v1149_v17 = vld [vmem:[%s19694_s28 + $0xcc] sm:$0xff] }
  0xdc   :  { %12840 = vmatprep.subr.msk.bf16.mxu1 %vm997_vm0, %v12838_v40  ;;  %v12832_v40 = vcombine.high %v1153_v48, %v1155_v51  ;;  %v1151_v41 = vld [vmem:[%s19694_s28 + $0x12c] sm:$0xff] }
  0xdd   :  { %1022 = vmatpush1.bf16.msra.mxu0 %v12801_v13  ;;  %v12834_v13 = vcombine.low %v1157_v14, %v1159_v53  ;;  %v15962_v14 = vld [vmem:[%s19696_s24 + $0x18] sm:$0xff]   ;;  %v1150_v53 = vld [vmem:[%s19694_s28 + $0xd4] sm:$0xf] }
  0xde   :  { %13707 = vmatprep.subr.msk.bf16.mxu0 %vm997_vm0, %v13730_v15  ;;  %13506 = vmatmul.mubr.msk.bf16.vlgmr.msra.gmra.mxu1 %vm984_vm1, %v15917_v12  ;;  %v12833_v15 = vcombine.low %v1154_v11, %v1156_v24  ;;  %v1145_v11 = vld [vmem:[%s19694_s28 + $0xc] sm:$0xff] }
  0xdf   :  { %1251 = vmatpush1.bf16.msra.mxu1 %v1236_v50  ;;  %13509 = vmatprep.mubr.msk.bf16.mxu1 %vm984_vm1, %v15932_v39  ;;  %v1152_v50 = vld [vmem:[%s19694_s28 + $0x134] sm:$0xf]  ;;  %v1147_v24 = vld [vmem:[%s19694_s28 + $0x6c] sm:$0xff] }
  0xe0   :  { %12817 = vmatmul.mubr.msk.bf16.vlgmr.msra.gmra.mxu0 %vm984_vm1, %v15886_v26  ;;  %1252 = vmatprep.subr.bf16.mxu1 %v12835_v52  ;;  %v12831_v52 = vcombine.low %v1153_v48, %v1155_v51  ;;  %v12830_v54 = vcombine.low %v1150_v53, %v1152_v50  ;;  %v1146_v48 = vld [vmem:[%s19694_s28 + $0x14] sm:$0xf]  ;;  %v1422_v53 = vld [vmem:[%s19694_s28 + $0x318] sm:$0xff]  ;;  %v12825_v50 = vcombine.low %v1145_v11, %v1147_v24 }
  0xe1   :  { %13514 = vmatpush3.bf16.msra.mxu0 %v1242_v16  ;;  %1049 = vmatprep.mubr.bf16.mxu0 %v19695_v25  ;;  %v12829_v16 = vcombine.high %v1149_v17, %v1151_v41  ;;  %v1148_v51 = vld [vmem:[%s19694_s28 + $0x74] sm:$0xf] }
  0xe2   :  { %13515 = vmatprep.subr.bf16.mxu0 %v12836_v49 }
  0xe3   :  { %1253 = vmatpush1.bf16.msra.mxu1 %v12834_v13  ;;  %v12826_v13 = vcombine.high %v1145_v11, %v1147_v24  ;;  %v1415_v11 = vld [vmem:[%s19694_s28 + $0x1a0] sm:$0xf] }
  0xe4   :  { %1254 = vmatprep.subr.bf16.mxu1 %v12832_v40  ;;  %v12827_v40 = vcombine.low %v1146_v48, %v1148_v51  ;;  %v1417_v24 = vld [vmem:[%s19694_s28 + $0x200] sm:$0xf] }
  0xe5   :  { %13516 = vmatpush3.bf16.msra.mxu0 %v12836_v49  ;;  %v12828_v49 = vcombine.low %v1149_v17, %v1151_v41  ;;  %v13733_v17 = vld [vmem:[%s19694_s28 + $0x320] ss:$0 sps:$4 sm:$0xff]   ;;  %v12857_v48 = vcombine.low %v1415_v11, %v1417_v24 }
  0xe6   :  { %13517 = vmatprep.subr.bf16.mxu0 %v12833_v15  ;;  %13510 = vmatmul.mubr.msk.bf16.gmra.mxu1 %vm984_vm1, %v15962_v14  ;;  %v1421_v41 = vld [vmem:[%s19694_s28 + $0x2c0] sm:$0xf] }
  0xe7   :  { %1255 = vmatpush1.bf16.msra.mxu1 %v12831_v52  ;;  %1276 = vmatprep.mubr.bf16.mxu1 %v19695_v25  ;;  %v12862_v52 = vcombine.high %v1422_v53, %v1422_v53  ;;  %v1411_v51 = vld [vmem:[%s19694_s28 + $0xe0] sm:$0xf] }
  0xe8   :  { %12818 = vmatmul.mubr.msk.bf16.gmra.mxu0 %vm984_vm1, %v15917_v12  ;;  %1256 = vmatprep.subr.bf16.mxu1 %v12829_v16 }
  0xe9   :  { %1059 = vmatprep.mubr.bf16.mxu0 %v19695_v25  ;;  %13518 = vmatpush3.bf16.msra.mxu0 %v12833_v15  ;;  %v1419_v15 = vld [vmem:[%s19694_s28 + $0x260] sm:$0xf] }
  0xea   :  { %13519 = vmatprep.subr.bf16.mxu0 %v12830_v54  ;;  %v12860_v16 = vcombine.low %v1419_v15, %v1421_v41  ;;  %v16039_v15 = vld [vmem:[%s18871_s2 + $0x10] sm:$0xff]  ;;  %v1418_v41 = vld [vmem:[%s19694_s28 + $0x258] sm:$0xff] }
  0xeb   :  { %1257 = vmatpush1.bf16.msra.mxu1 %v12828_v49  ;;  %v1413_v49 = vld [vmem:[%s19694_s28 + $0x140] sm:$0xf]  ;;  %1948 = vperm.xlu1 %13722, %v16039_v15  }
  0xec   :  { %1258 = vmatprep.subr.bf16.mxu1 %v12826_v13  ;;  %v16024_v13 = vld [vmem:[%s18871_s2] sm:$0xff] }
  0xed   :  { %13520 = vmatpush3.bf16.msra.mxu0 %v12830_v54  ;;  %v1503_v54 = vsel %vm997_vm0, %v13733_v17, 0  ;;  %1938 = vperm.xlu0 %13721, %v16024_v13  }
  0xee   :  { %13521 = vmatprep.subr.bf16.mxu0 %v12827_v40 }
  0xef   :  { %1259 = vmatpush1.bf16.msra.mxu1 %v12825_v50  ;;  %v12861_v50 = vcombine.low %v1422_v53, %v1422_v53  ;;  %v1407_v53 = vld [vmem:[%s19694_s28 + $0x20] sm:$0xf] }
  0xf0   :  { %12819 = vmatmul.mubr.msk.bf16.gmra.mxu0 %vm984_vm1, %v15932_v39  ;;  %13708 = vmatprep.subr.msk.bf16.mxu1 %vm997_vm0, %v13733_v17  ;;  %v12854_v17 = vcombine.low %v1411_v51, %v1413_v49  ;;  %v16067_v51 = vld [vmem:[%s18871_s2 + $0x20] sm:$0xff]  ;;  %v1414_v49 = vld [vmem:[%s19694_s28 + $0x198] sm:$0xff] }
  0xf1   :  { %1069 = vmatprep.mubr.bf16.mxu0 %v19695_v25  ;;  %13522 = vmatpush3.bf16.msra.mxu0 %v12827_v40  ;;  %v16034_v40 = vld [vmem:[%s18871_s2 + $0x8] sm:$0xff]  ;;  %v1497_v11 = vsel %vm997_vm0, %v12861_v50, 0  ;;  %v12856_v27 = vcombine.high %v1414_v49, %v1416_v38 }
  0xf2   :  { %12864 = vmatprep.subr.msk.bf16.mxu0 %vm997_vm0, %v12862_v52  ;;  %12841 = vmatmul.mubr.msk.bf16.vlgmr.msra.gmra.mxu1 %vm984_vm1, %v15886_v26  ;;  %v1420_v52 = vld [vmem:[%s19694_s28 + $0x2b8] sm:$0xff]  ;;  %v1683_v50 = vld [vmem:[%s19694_s28 + $0x324] sm:$0xff] }
  0xf3   :  { %13532 = vmatpush3.bf16.msra.mxu1 %v1503_v54  ;;  %1286 = vmatprep.mubr.bf16.mxu1 %v19695_v25  ;;  %v1409_v54 = vld [vmem:[%s19694_s28 + $0x80] sm:$0xf]  ;;  %v12859_v24 = vcombine.high %v1418_v41, %v1420_v52  ;;  %v12858_v47 = vcombine.low %v1418_v41, %v1420_v52  ;;  %v12886_v18 = vcombine.high %v1683_v50, %v1683_v50  ;;  %v1933_v41 = vld [vmem:[%s18871_s2 + $0x28] sm:$0xff] }
  0xf4   :  { %13533 = vmatprep.subr.bf16.mxu1 %v12860_v16  ;;  %1943 = vperm.xlu0 %13721, %v16034_v40   ;;  %v12855_v52 = vcombine.low %v1414_v49, %v1416_v38  ;;  %v12885_v49 = vcombine.low %v1683_v50, %v1683_v50 }
  0xf6   :  { %v1758_v50 = vsel %vm997_vm0, %v12885_v49, 0 }
  0xf7   :  { %13534 = vmatpush3.bf16.msra.mxu1 %v12860_v16  ;;  %v16060_v16 = vld [vmem:[%s18871_s2 + $0x18] sm:$0xff] }
  0xf8   :  { %12820 = vmatmul.mubr.msk.bf16.gmra.mxu0 %vm984_vm1, %v15962_v14  ;;  %13535 = vmatprep.subr.bf16.mxu1 %v12857_v48 }
  0xf9   :  { %13523 = vmatprep.mubr.msk.bf16.mxu0 %vm984_vm1, %v15886_v26  ;;  %1953 = vperm.xlu1 %13722, %v16060_v16  }
  0xfa   :  { %12842 = vmatmul.mubr.msk.bf16.gmra.mxu1 %vm984_vm1, %v15917_v12  ;;  %1958 = vperm.xlu0 %13721, %v16067_v51  }
  0xfb   :  { %13536 = vmatpush3.bf16.msra.mxu1 %v12857_v48  ;;  %1296 = vmatprep.mubr.bf16.mxu1 %v19695_v25  ;;  %v12851_v48 = vcombine.low %v1407_v53, %v1409_v54  ;;  %v1410_v53 = vld [vmem:[%s19694_s28 + $0xd8] sm:$0xff] }
  0xfc   :  { %13537 = vmatprep.subr.bf16.mxu1 %v12854_v17  ;;  %v1412_v54 = vld [vmem:[%s19694_s28 + $0x138] sm:$0xff] }
  0xfd   :  { %1963 = vperm.xlu1 %13722, %v1933_v41   ;;  %v12852_v38 = vcombine.low %v1410_v53, %v1412_v54 }
  0xff   :  { %13538 = vmatpush3.bf16.msra.mxu1 %v12854_v17  ;;  %v16099_v17 = vld [vmem:[%s18871_s2 + $0x30] sm:$0xff] }
 0x100   :  { %13524 = vmatmul.mubr.msk.bf16.vlgmr.msra.gmra.mxu0 %vm984_vm1, %v15917_v12  ;;  %13539 = vmatprep.subr.bf16.mxu1 %v12851_v48 }
 0x101   :  { %1512 = vmatpush1.bf16.msra.mxu0 %v1497_v11  ;;  %13527 = vmatprep.mubr.msk.bf16.mxu0 %vm984_vm1, %v15932_v39  ;;  %v12853_v11 = vcombine.high %v1410_v53, %v1412_v54  ;;  %v1679_v53 = vld [vmem:[%s19694_s28 + $0x264] sm:$0xff] }
 0x102   :  { %1513 = vmatprep.subr.bf16.mxu0 %v12859_v24  ;;  %12843 = vmatmul.mubr.msk.bf16.gmra.mxu1 %vm984_vm1, %v15932_v39  ;;  %v1406_v24 = vld [vmem:[%s19694_s28 + $0x18] sm:$0xff]  ;;  %v1681_v54 = vld [vmem:[%s19694_s28 + $0x2c4] sm:$0xff] }
 0x103   :  { %1306 = vmatprep.mubr.bf16.mxu1 %v19695_v25  ;;  %13540 = vmatpush3.bf16.msra.mxu1 %v12851_v48  ;;  %v13738_v48 = vld [vmem:[%s19694_s28 + $0x32c] ss:$0 sps:$4 sm:$0xff]  }
 0x104   :  { %12888 = vmatprep.subr.msk.bf16.mxu1 %vm997_vm0, %v12886_v18  ;;  %1968 = vperm.xlu0 %13721, %v16099_v17   ;;  %v12849_v18 = vcombine.low %v1406_v24, %v1408_v10 }
 0x105   :  { %1514 = vmatpush1.bf16.msra.mxu0 %v12858_v47  ;;  %v12850_v47 = vcombine.high %v1406_v24, %v1408_v10  ;;  %v1680_v10 = vld [vmem:[%s19694_s28 + $0x26c] sm:$0xf]  ;;  %v1677_v24 = vld [vmem:[%s19694_s28 + $0x204] sm:$0xff] }
 0x106   :  { %1515 = vmatprep.subr.bf16.mxu0 %v12856_v27  ;;  %v16114_v27 = vld [vmem:[%s18871_s2 + $0x38] sm:$0xff] }
 0x107   :  { %1973 = vperm.xlu1 %13722, %v16114_v27  }
 0x108   :  { %13528 = vmatmul.mubr.msk.bf16.gmra.mxu0 %vm984_vm1, %v15962_v14  ;;  %3809 = vperm.xlu0 %13721, %v16024_v13   ;;  %v1682_v13 = vld [vmem:[%s19694_s28 + $0x2cc] sm:$0xf] }
 0x109   :  { %1516 = vmatpush1.bf16.msra.mxu0 %v12855_v52  ;;  %1537 = vmatprep.mubr.bf16.mxu0 %v19695_v25  ;;  %v12883_v52 = vcombine.high %v1679_v53, %v1681_v54 }
 0x10a   :  { %1517 = vmatprep.subr.bf16.mxu0 %v12853_v11  ;;  %12844 = vmatmul.mubr.msk.bf16.gmra.mxu1 %vm984_vm1, %v15962_v14  ;;  %v1764_v11 = vsel %vm997_vm0, %v13738_v48, 0 }
 0x10b   :  { %13541 = vmatprep.mubr.msk.bf16.mxu1 %vm984_vm1, %v15886_v26  ;;  %3814 = vperm.xlu1 %13722, %v16034_v40   ;;  %v1675_v40 = vld [vmem:[%s19694_s28 + $0x1a4] sm:$0xff] }
 0x10c   :  { %3819 = vperm.xlu0 %13721, %v16039_v15   ;;  %v1676_v15 = vld [vmem:[%s19694_s28 + $0x1ac] sm:$0xf]  ;;  %v12880_v49 = vcombine.high %v1675_v40, %v1677_v24 }
 0x10d   :  { %1518 = vmatpush1.bf16.msra.mxu0 %v12852_v38  ;;  %v12884_v38 = vcombine.low %v1680_v10, %v1682_v13  ;;  %v1673_v10 = vld [vmem:[%s19694_s28 + $0x144] sm:$0xff]  ;;  %v12879_v13 = vcombine.low %v1675_v40, %v1677_v24 }
 0x10e   :  { %1519 = vmatprep.subr.bf16.mxu0 %v12850_v47  ;;  %v1678_v47 = vld [vmem:[%s19694_s28 + $0x20c] sm:$0xf] }
 0x10f   :  { %3824 = vperm.xlu1 %13722, %v16060_v16   ;;  %v1671_v16 = vld [vmem:[%s19694_s28 + $0xe4] sm:$0xff] }
 0x110   :  { %3829 = vperm.xlu0 %13721, %v16067_v51   ;;  %v1668_v51 = vld [vmem:[%s19694_s28 + $0x2c] sm:$0xf]  ;;  %v12876_v40 = vcombine.low %v1671_v16, %v1673_v10 }
 0x111   :  { %1520 = vmatpush1.bf16.msra.mxu0 %v12849_v18  ;;  %v12882_v18 = vcombine.low %v1679_v53, %v1681_v54  ;;  %v1672_v53 = vld [vmem:[%s19694_s28 + $0xec] sm:$0xf] }
 0x112   :  { %13709 = vmatprep.subr.msk.bf16.mxu0 %vm997_vm0, %v13738_v48  ;;  %13542 = vmatmul.mubr.msk.bf16.vlgmr.msra.gmra.mxu1 %vm984_vm1, %v15917_v12  ;;  %v12881_v48 = vcombine.low %v1676_v15, %v1678_v47  ;;  %v1674_v54 = vld [vmem:[%s19694_s28 + $0x14c] sm:$0xf]  ;;  %v2795_v47 = vld [vmem:[%s19694_s28 + $0x330] sm:$0xff] }
 0x113   :  { %1773 = vmatpush1.bf16.msra.mxu1 %v1758_v50  ;;  %13545 = vmatprep.mubr.msk.bf16.mxu1 %vm984_vm1, %v15932_v39  ;;  %v12877_v50 = vcombine.high %v1671_v16, %v1673_v10  ;;  %v12878_v15 = vcombine.low %v1672_v53, %v1674_v54  ;;  %v2794_v16 = vld [vmem:[%s19694_s28 + $0x2d8] sm:$0xf] }
 0x114   :  { %12865 = vmatmul.mubr.msk.bf16.vlgmr.msra.gmra.mxu0 %vm984_vm1, %v15886_v26  ;;  %1774 = vmatprep.subr.bf16.mxu1 %v12883_v52  ;;  %v1667_v52 = vld [vmem:[%s19694_s28 + $0x24] sm:$0xff]  ;;  %v2788_v53 = vld [vmem:[%s19694_s28 + $0x1b8] sm:$0xf] }
 0x115   :  { %13550 = vmatpush3.bf16.msra.mxu0 %v1764_v11  ;;  %1547 = vmatprep.mubr.bf16.mxu0 %v19695_v25  ;;  %v1669_v11 = vld [vmem:[%s19694_s28 + $0x84] sm:$0xff]  ;;  %v2790_v54 = vld [vmem:[%s19694_s28 + $0x218] sm:$0xf] }
 0x116   :  { %13551 = vmatprep.subr.bf16.mxu0 %v12884_v38  ;;  %3834 = vperm.xlu1 %13722, %v1933_v41   ;;  %v1670_v41 = vld [vmem:[%s19694_s28 + $0x8c] sm:$0xf]  ;;  %v12874_v24 = vcombine.high %v1667_v52, %v1669_v11 }
 0x117   :  { %1775 = vmatpush1.bf16.msra.mxu1 %v12882_v18  ;;  %3839 = vperm.xlu0 %13721, %v16099_v17   ;;  %v12873_v18 = vcombine.low %v1667_v52, %v1669_v11  ;;  %v2786_v52 = vld [vmem:[%s19694_s28 + $0x158] sm:$0xf]  ;;  %v12909_v11 = vcombine.low %v2795_v47, %v2795_v47 }
 0x118   :  { %1776 = vmatprep.subr.bf16.mxu1 %v12880_v49  ;;  %v13739_v49 = vld [vmem:[%s19694_s28 + $0x338] ss:$0 sps:$4 sm:$0xff]  }
 0x119   :  { %13552 = vmatpush3.bf16.msra.mxu0 %v12884_v38  ;;  %v12875_v38 = vcombine.low %v1668_v51, %v1670_v41  ;;  %v2876_v17 = vsel %vm997_vm0, %v13739_v49, 0  ;;  %v2791_v51 = vld [vmem:[%s19694_s28 + $0x270] sm:$0xff] }
 0x11a   :  { %13553 = vmatprep.subr.bf16.mxu0 %v12881_v48  ;;  %13546 = vmatmul.mubr.msk.bf16.gmra.mxu1 %vm984_vm1, %v15962_v14  ;;  %v2793_v41 = vld [vmem:[%s19694_s28 + $0x2d0] sm:$0xff] }
 0x11b   :  { %1777 = vmatpush1.bf16.msra.mxu1 %v12879_v13  ;;  %1798 = vmatprep.mubr.bf16.mxu1 %v19695_v25  ;;  %v12905_v13 = vcombine.low %v2788_v53, %v2790_v54  ;;  %v2785_v53 = vld [vmem:[%s19694_s28 + $0x150] sm:$0xff] }
 0x11c   :  { %12866 = vmatmul.mubr.msk.bf16.gmra.mxu0 %vm984_vm1, %v15917_v12  ;;  %1778 = vmatprep.subr.bf16.mxu1 %v12877_v50  ;;  %v2784_v50 = vld [vmem:[%s19694_s28 + $0xf8] sm:$0xf] }
 0x11d   :  { %1557 = vmatprep.mubr.bf16.mxu0 %v19695_v25  ;;  %13554 = vmatpush3.bf16.msra.mxu0 %v12881_v48  ;;  %v2792_v48 = vld [vmem:[%s19694_s28 + $0x278] sm:$0xf] }
 0x11e   :  { %13555 = vmatprep.subr.bf16.mxu0 %v12878_v15  ;;  %3844 = vperm.xlu1 %13722, %v16114_v27   ;;  %v12910_v27 = vcombine.high %v2795_v47, %v2795_v47  ;;  %v12908_v10 = vcombine.low %v2792_v48, %v2794_v16  ;;  %v12907_v47 = vcombine.high %v2791_v51, %v2793_v41  ;;  %v3032_v16 = vld [vmem:[%s19694_s28 + $0x33c] sm:$0xff] }
 0x11f   :  { %1779 = vmatpush1.bf16.msra.mxu1 %v12876_v40  ;;  %v2780_v40 = vld [vmem:[%s19694_s28 + $0x38] sm:$0xf]  ;;  %v12934_v54 = vcombine.high %v3032_v16, %v3032_v16 }
 0x120   :  { %1780 = vmatprep.subr.bf16.mxu1 %v12874_v24  ;;  %v2782_v24 = vld [vmem:[%s19694_s28 + $0x98] sm:$0xf] }
 0x121   :  { %13556 = vmatpush3.bf16.msra.mxu0 %v12878_v15  ;;  %v12902_v15 = vcombine.low %v2784_v50, %v2786_v52  ;;  %v12899_v48 = vcombine.low %v2780_v40, %v2782_v24  ;;  %v2779_v52 = vld [vmem:[%s19694_s28 + $0x30] sm:$0xff]  ;;  %v12933_v40 = vcombine.low %v3032_v16, %v3032_v16  ;;  %v13744_v24 = vld [vmem:[%s19694_s28 + $0x344] ss:$0 sps:$4 sm:$0xff]  }
 0x122   :  { %13557 = vmatprep.subr.bf16.mxu0 %v12875_v38 }
 0x123   :  { %1781 = vmatpush1.bf16.msra.mxu1 %v12873_v18  ;;  %v2787_v18 = vld [vmem:[%s19694_s28 + $0x1b0] sm:$0xff] }
 0x124   :  { %12867 = vmatmul.mubr.msk.bf16.gmra.mxu0 %vm984_vm1, %v15932_v39  ;;  %13710 = vmatprep.subr.msk.bf16.mxu1 %vm997_vm0, %v13739_v49  ;;  %v2789_v49 = vld [vmem:[%s19694_s28 + $0x210] sm:$0xff] }
 0x125   :  { %1567 = vmatprep.mubr.bf16.mxu0 %v19695_v25  ;;  %13558 = vmatpush3.bf16.msra.mxu0 %v12875_v38  ;;  %v2870_v38 = vsel %vm997_vm0, %v12909_v11, 0  ;;  %v2781_v11 = vld [vmem:[%s19694_s28 + $0x90] sm:$0xff] }
 0x126   :  { %12912 = vmatprep.subr.msk.bf16.mxu0 %vm997_vm0, %v12910_v27  ;;  %12889 = vmatmul.mubr.msk.bf16.vlgmr.msra.gmra.mxu1 %vm984_vm1, %v15886_v26  ;;  %v12906_v27 = vcombine.low %v2791_v51, %v2793_v41  ;;  %v12898_v51 = vcombine.high %v2779_v52, %v2781_v11  ;;  %v12897_v41 = vcombine.low %v2779_v52, %v2781_v11 }
 0x127   :  { %13568 = vmatpush3.bf16.msra.mxu1 %v2876_v17  ;;  %1808 = vmatprep.mubr.bf16.mxu1 %v19695_v25  ;;  %v12904_v17 = vcombine.high %v2787_v18, %v2789_v49 }
 0x128   :  { %13569 = vmatprep.subr.bf16.mxu1 %v12908_v10 }
 0x12b   :  { %13570 = vmatpush3.bf16.msra.mxu1 %v12908_v10  ;;  %v2783_v10 = vld [vmem:[%s19694_s28 + $0xf0] sm:$0xff] }
 0x12c   :  { %12868 = vmatmul.mubr.msk.bf16.gmra.mxu0 %vm984_vm1, %v15962_v14  ;;  %13571 = vmatprep.subr.bf16.mxu1 %v12905_v13  ;;  %v12901_v50 = vcombine.high %v2783_v10, %v2785_v53 }
 0x12d   :  { %13559 = vmatprep.mubr.msk.bf16.mxu0 %vm984_vm1, %v15886_v26 }
 0x12e   :  { %12890 = vmatmul.mubr.msk.bf16.gmra.mxu1 %vm984_vm1, %v15917_v12 }
 0x12f   :  { %13572 = vmatpush3.bf16.msra.mxu1 %v12905_v13  ;;  %1818 = vmatprep.mubr.bf16.mxu1 %v19695_v25  ;;  %v12903_v13 = vcombine.low %v2787_v18, %v2789_v49  ;;  %v3029_v18 = vld [vmem:[%s19694_s28 + $0x284] sm:$0xf] }
 0x130   :  { %13573 = vmatprep.subr.bf16.mxu1 %v12902_v15  ;;  %v3031_v49 = vld [vmem:[%s19694_s28 + $0x2e4] sm:$0xf] }
 0x133   :  { %13574 = vmatpush3.bf16.msra.mxu1 %v12902_v15  ;;  %v12900_v15 = vcombine.low %v2783_v10, %v2785_v53  ;;  %v3026_v10 = vld [vmem:[%s19694_s28 + $0x21c] sm:$0xff]  ;;  %v12932_v53 = vcombine.low %v3029_v18, %v3031_v49 }
 0x134   :  { %13560 = vmatmul.mubr.msk.bf16.vlgmr.msra.gmra.mxu0 %vm984_vm1, %v15917_v12  ;;  %13575 = vmatprep.subr.bf16.mxu1 %v12899_v48  ;;  %v3018_v18 = vld [vmem:[%s19694_s28 + $0x9c] sm:$0xff] }
 0x135   :  { %2885 = vmatpush1.bf16.msra.mxu0 %v2870_v38  ;;  %13563 = vmatprep.mubr.msk.bf16.mxu0 %vm984_vm1, %v15932_v39  ;;  %v3028_v38 = vld [vmem:[%s19694_s28 + $0x27c] sm:$0xff] }
 0x136   :  { %2886 = vmatprep.subr.bf16.mxu0 %v12907_v47  ;;  %12891 = vmatmul.mubr.msk.bf16.gmra.mxu1 %vm984_vm1, %v15932_v39  ;;  %v3030_v47 = vld [vmem:[%s19694_s28 + $0x2dc] sm:$0xff] }
 0x137   :  { %1828 = vmatprep.mubr.bf16.mxu1 %v19695_v25  ;;  %13576 = vmatpush3.bf16.msra.mxu1 %v12899_v48  ;;  %v3107_v48 = vsel %vm997_vm0, %v12933_v40, 0  ;;  %v12931_v16 = vcombine.high %v3028_v38, %v3030_v47  ;;  %v3023_v40 = vld [vmem:[%s19694_s28 + $0x164] sm:$0xf] }
 0x138   :  { %12936 = vmatprep.subr.msk.bf16.mxu1 %vm997_vm0, %v12934_v54  ;;  %v3025_v54 = vld [vmem:[%s19694_s28 + $0x1c4] sm:$0xf] }
 0x139   :  { %2887 = vmatpush1.bf16.msra.mxu0 %v12906_v27  ;;  %v3113_v27 = vsel %vm997_vm0, %v13744_v24, 0 }
 0x13a   :  { %2888 = vmatprep.subr.bf16.mxu0 %v12904_v17  ;;  %v3024_v17 = vld [vmem:[%s19694_s28 + $0x1bc] sm:$0xff] }
 0x13b   :  { %v12928_v52 = vcombine.high %v3024_v17, %v3026_v10 }
 0x13c   :  { %13564 = vmatmul.mubr.msk.bf16.gmra.mxu0 %vm984_vm1, %v15962_v14 }
 0x13d   :  { %2889 = vmatpush1.bf16.msra.mxu0 %v12903_v13  ;;  %2910 = vmatprep.mubr.bf16.mxu0 %v19695_v25  ;;  %v3027_v13 = vld [vmem:[%s19694_s28 + $0x224] sm:$0xf] }
 0x13e   :  { %2890 = vmatprep.subr.bf16.mxu0 %v12901_v50  ;;  %12892 = vmatmul.mubr.msk.bf16.gmra.mxu1 %vm984_vm1, %v15962_v14  ;;  %v12930_v50 = vcombine.low %v3028_v38, %v3030_v47  ;;  %v12929_v11 = vcombine.low %v3025_v54, %v3027_v13  ;;  %v3016_v47 = vld [vmem:[%s19694_s28 + $0x3c] sm:$0xff]  ;;  %v13745_v13 = vld [vmem:[%s19694_s28 + $0x350] ss:$0 sps:$4 sm:$0xff]  }
 0x13f   :  { %13577 = vmatprep.mubr.msk.bf16.mxu1 %vm984_vm1, %v15886_v26  ;;  %v12921_v54 = vcombine.low %v3016_v47, %v3018_v18 }
 0x141   :  { %2891 = vmatpush1.bf16.msra.mxu0 %v12900_v15  ;;  %v3020_v15 = vld [vmem:[%s19694_s28 + $0xfc] sm:$0xff] }
 0x142   :  { %2892 = vmatprep.subr.bf16.mxu0 %v12898_v51  ;;  %v3022_v51 = vld [vmem:[%s19694_s28 + $0x15c] sm:$0xff] }
 0x143   :  { %v12925_v38 = vcombine.high %v3020_v15, %v3022_v51 }
 0x145   :  { %2893 = vmatpush1.bf16.msra.mxu0 %v12897_v41  ;;  %v3021_v41 = vld [vmem:[%s19694_s28 + $0x104] sm:$0xf] }
 0x146   :  { %13711 = vmatprep.subr.msk.bf16.mxu0 %vm997_vm0, %v13744_v24  ;;  %13578 = vmatmul.mubr.msk.bf16.vlgmr.msra.gmra.mxu1 %vm984_vm1, %v15917_v12  ;;  %v12927_v24 = vcombine.low %v3024_v17, %v3026_v10  ;;  %v12926_v49 = vcombine.low %v3021_v41, %v3023_v40  ;;  %v12922_v17 = vcombine.high %v3016_v47, %v3018_v18  ;;  %v3286_v41 = vld [vmem:[%s19694_s28 + $0x1d0] sm:$0xf] }
 0x147   :  { %3122 = vmatpush1.bf16.msra.mxu1 %v3107_v48  ;;  %13581 = vmatprep.mubr.msk.bf16.mxu1 %vm984_vm1, %v15932_v39  ;;  %v3017_v48 = vld [vmem:[%s19694_s28 + $0x44] sm:$0xf]  ;;  %v3288_v40 = vld [vmem:[%s19694_s28 + $0x230] sm:$0xf] }
 0x148   :  { %12913 = vmatmul.mubr.msk.bf16.vlgmr.msra.gmra.mxu0 %vm984_vm1, %v15886_v26  ;;  %3123 = vmatprep.subr.bf16.mxu1 %v12931_v16  ;;  %v3019_v16 = vld [vmem:[%s19694_s28 + $0xa4] sm:$0xf]  ;;  %v3284_v47 = vld [vmem:[%s19694_s28 + $0x170] sm:$0xf] }
 0x149   :  { %13586 = vmatpush3.bf16.msra.mxu0 %v3113_v27  ;;  %2920 = vmatprep.mubr.bf16.mxu0 %v19695_v25  ;;  %v12924_v27 = vcombine.low %v3020_v15, %v3022_v51  ;;  %v12923_v10 = vcombine.low %v3017_v48, %v3019_v16  ;;  %v3374_v15 = vsel %vm997_vm0, %v13745_v13, 0  ;;  %v3289_v48 = vld [vmem:[%s19694_s28 + $0x288] sm:$0xff] }
 0x14a   :  { %13587 = vmatprep.subr.bf16.mxu0 %v12932_v53  ;;  %v3291_v16 = vld [vmem:[%s19694_s28 + $0x2e8] sm:$0xff] }
 0x14b   :  { %3124 = vmatpush1.bf16.msra.mxu1 %v12930_v50  ;;  %v3290_v50 = vld [vmem:[%s19694_s28 + $0x290] sm:$0xf] }
 0x14c   :  { %3125 = vmatprep.subr.bf16.mxu1 %v12928_v52  ;;  %v3292_v52 = vld [vmem:[%s19694_s28 + $0x2f0] sm:$0xf] }
 0x14d   :  { %13588 = vmatpush3.bf16.msra.mxu0 %v12932_v53  ;;  %v3293_v53 = vld [vmem:[%s19694_s28 + $0x348] sm:$0xff]  ;;  %v12956_v51 = vcombine.low %v3290_v50, %v3292_v52  ;;  %v3554_v52 = vld [vmem:[%s19694_s28 + $0x354] sm:$0xff] }
 0x14e   :  { %13589 = vmatprep.subr.bf16.mxu0 %v12929_v11  ;;  %13582 = vmatmul.mubr.msk.bf16.gmra.mxu1 %vm984_vm1, %v15962_v14  ;;  %v12957_v18 = vcombine.low %v3293_v53, %v3293_v53 }
 0x14f   :  { %3126 = vmatpush1.bf16.msra.mxu1 %v12927_v24  ;;  %3147 = vmatprep.mubr.bf16.mxu1 %v19695_v25  ;;  %v12953_v24 = vcombine.low %v3286_v41, %v3288_v40  ;;  %v3283_v41 = vld [vmem:[%s19694_s28 + $0x168] sm:$0xff]  ;;  %v12982_v40 = vcombine.high %v3554_v52, %v3554_v52 }
 0x150   :  { %12914 = vmatmul.mubr.msk.bf16.gmra.mxu0 %vm984_vm1, %v15917_v12  ;;  %3127 = vmatprep.subr.bf16.mxu1 %v12925_v38  ;;  %v3282_v38 = vld [vmem:[%s19694_s28 + $0x110] sm:$0xf] }
 0x151   :  { %2930 = vmatprep.mubr.bf16.mxu0 %v19695_v25  ;;  %13590 = vmatpush3.bf16.msra.mxu0 %v12929_v11  ;;  %v12958_v11 = vcombine.high %v3293_v53, %v3293_v53  ;;  %v12955_v53 = vcombine.high %v3289_v48, %v3291_v16 }
 0x152   :  { %13591 = vmatprep.subr.bf16.mxu0 %v12926_v49 }
 0x153   :  { %3128 = vmatpush1.bf16.msra.mxu1 %v12924_v27  ;;  %v3278_v27 = vld [vmem:[%s19694_s28 + $0x50] sm:$0xf] }
 0x154   :  { %3129 = vmatprep.subr.bf16.mxu1 %v12922_v17  ;;  %v3280_v17 = vld [vmem:[%s19694_s28 + $0xb0] sm:$0xf] }
 0x155   :  { %13592 = vmatpush3.bf16.msra.mxu0 %v12926_v49  ;;  %v12950_v49 = vcombine.low %v3282_v38, %v3284_v47  ;;  %v12947_v50 = vcombine.low %v3278_v27, %v3280_v17  ;;  %v3277_v47 = vld [vmem:[%s19694_s28 + $0x48] sm:$0xff]  ;;  %v12981_v27 = vcombine.low %v3554_v52, %v3554_v52  ;;  %v13750_v17 = vld [vmem:[%s19694_s28 + $0x35c] ss:$0 sps:$4 sm:$0xff]  }
 0x156   :  { %13593 = vmatprep.subr.bf16.mxu0 %v12923_v10 }
 0x157   :  { %3130 = vmatpush1.bf16.msra.mxu1 %v12921_v54  ;;  %v3285_v54 = vld [vmem:[%s19694_s28 + $0x1c8] sm:$0xff] }
 0x158   :  { %12915 = vmatmul.mubr.msk.bf16.gmra.mxu0 %vm984_vm1, %v15932_v39  ;;  %13712 = vmatprep.subr.msk.bf16.mxu1 %vm997_vm0, %v13745_v13  ;;  %v3287_v13 = vld [vmem:[%s19694_s28 + $0x228] sm:$0xff] }
 0x159   :  { %2940 = vmatprep.mubr.bf16.mxu0 %v19695_v25  ;;  %13594 = vmatpush3.bf16.msra.mxu0 %v12923_v10  ;;  %v3368_v10 = vsel %vm997_vm0, %v12957_v18, 0  ;;  %v3279_v18 = vld [vmem:[%s19694_s28 + $0xa8] sm:$0xff] }
 0x15a   :  { %12960 = vmatprep.subr.msk.bf16.mxu0 %vm997_vm0, %v12958_v11  ;;  %12937 = vmatmul.mubr.msk.bf16.vlgmr.msra.gmra.mxu1 %vm984_vm1, %v15886_v26  ;;  %v12954_v11 = vcombine.low %v3289_v48, %v3291_v16  ;;  %v12946_v48 = vcombine.high %v3277_v47, %v3279_v18  ;;  %v12945_v16 = vcombine.low %v3277_v47, %v3279_v18 }
 0x15b   :  { %13604 = vmatpush3.bf16.msra.mxu1 %v3374_v15  ;;  %3157 = vmatprep.mubr.bf16.mxu1 %v19695_v25  ;;  %v12952_v15 = vcombine.high %v3285_v54, %v3287_v13 }
 0x15c   :  { %13605 = vmatprep.subr.bf16.mxu1 %v12956_v51 }
 0x15f   :  { %13606 = vmatpush3.bf16.msra.mxu1 %v12956_v51  ;;  %v3281_v51 = vld [vmem:[%s19694_s28 + $0x108] sm:$0xff] }
 0x160   :  { %12916 = vmatmul.mubr.msk.bf16.gmra.mxu0 %vm984_vm1, %v15962_v14  ;;  %13607 = vmatprep.subr.bf16.mxu1 %v12953_v24  ;;  %v12949_v38 = vcombine.high %v3281_v51, %v3283_v41 }
 0x161   :  { %13595 = vmatprep.mubr.msk.bf16.mxu0 %vm984_vm1, %v15886_v26 }
 0x162   :  { %12938 = vmatmul.mubr.msk.bf16.gmra.mxu1 %vm984_vm1, %v15917_v12 }
 0x163   :  { %13608 = vmatpush3.bf16.msra.mxu1 %v12953_v24  ;;  %3167 = vmatprep.mubr.bf16.mxu1 %v19695_v25  ;;  %v12951_v24 = vcombine.low %v3285_v54, %v3287_v13  ;;  %v3551_v54 = vld [vmem:[%s19694_s28 + $0x29c] sm:$0xf] }
 0x164   :  { %13609 = vmatprep.subr.bf16.mxu1 %v12950_v49  ;;  %v3553_v13 = vld [vmem:[%s19694_s28 + $0x2fc] sm:$0xf] }
 0x167   :  { %13610 = vmatpush3.bf16.msra.mxu1 %v12950_v49  ;;  %v12948_v49 = vcombine.low %v3281_v51, %v3283_v41  ;;  %v3548_v51 = vld [vmem:[%s19694_s28 + $0x234] sm:$0xff]  ;;  %v12980_v41 = vcombine.low %v3551_v54, %v3553_v13  ;;  %v3539_v13 = vld [vmem:[%s19694_s28 + $0x5c] sm:$0xf] }
 0x168   :  { %13596 = vmatmul.mubr.msk.bf16.vlgmr.msra.gmra.mxu0 %vm984_vm1, %v15917_v12  ;;  %13611 = vmatprep.subr.bf16.mxu1 %v12947_v50 }
 0x169   :  { %3383 = vmatpush1.bf16.msra.mxu0 %v3368_v10  ;;  %13599 = vmatprep.mubr.msk.bf16.mxu0 %vm984_vm1, %v15932_v39  ;;  %v3550_v10 = vld [vmem:[%s19694_s28 + $0x294] sm:$0xff] }
 0x16a   :  { %3384 = vmatprep.subr.bf16.mxu0 %v12955_v53  ;;  %12939 = vmatmul.mubr.msk.bf16.gmra.mxu1 %vm984_vm1, %v15932_v39  ;;  %v3552_v53 = vld [vmem:[%s19694_s28 + $0x2f4] sm:$0xff] }
 0x16b   :  { %3177 = vmatprep.mubr.bf16.mxu1 %v19695_v25  ;;  %13612 = vmatpush3.bf16.msra.mxu1 %v12947_v50  ;;  %v3629_v50 = vsel %vm997_vm0, %v12981_v27, 0  ;;  %v12979_v52 = vcombine.high %v3550_v10, %v3552_v53 }
 0x16c   :  { %12984 = vmatprep.subr.msk.bf16.mxu1 %vm997_vm0, %v12982_v40  ;;  %v3547_v40 = vld [vmem:[%s19694_s28 + $0x1dc] sm:$0xf] }
 0x16d   :  { %3385 = vmatpush1.bf16.msra.mxu0 %v12954_v11  ;;  %v3635_v11 = vsel %vm997_vm0, %v13750_v17, 0 }
 0x16e   :  { %3386 = vmatprep.subr.bf16.mxu0 %v12952_v15  ;;  %v3546_v15 = vld [vmem:[%s19694_s28 + $0x1d4] sm:$0xff] }
 0x16f   :  { %v12976_v47 = vcombine.high %v3546_v15, %v3548_v51  ;;  %v12975_v27 = vcombine.low %v3546_v15, %v3548_v51 }
 0x170   :  { %13600 = vmatmul.mubr.msk.bf16.gmra.mxu0 %vm984_vm1, %v15962_v14 }
 0x171   :  { %3387 = vmatpush1.bf16.msra.mxu0 %v12951_v24  ;;  %3408 = vmatprep.mubr.bf16.mxu0 %v19695_v25  ;;  %v3549_v24 = vld [vmem:[%s19694_s28 + $0x23c] sm:$0xf] }
 0x172   :  { %3388 = vmatprep.subr.bf16.mxu0 %v12949_v38  ;;  %12940 = vmatmul.mubr.msk.bf16.gmra.mxu1 %vm984_vm1, %v15962_v14  ;;  %v12978_v38 = vcombine.low %v3550_v10, %v3552_v53  ;;  %v12977_v18 = vcombine.low %v3547_v40, %v3549_v24  ;;  %v3538_v10 = vld [vmem:[%s19694_s28 + $0x54] sm:$0xff] }
 0x173   :  { %13613 = vmatprep.mubr.msk.bf16.mxu1 %vm984_vm1, %v15886_v26  ;;  %v3540_v53 = vld [vmem:[%s19694_s28 + $0xb4] sm:$0xff] }
 0x174   :  { %v12969_v51 = vcombine.low %v3538_v10, %v3540_v53 }
 0x175   :  { %3389 = vmatpush1.bf16.msra.mxu0 %v12948_v49  ;;  %v3542_v49 = vld [vmem:[%s19694_s28 + $0x114] sm:$0xff] }
 0x176   :  { %3390 = vmatprep.subr.bf16.mxu0 %v12946_v48  ;;  %v3543_v48 = vld [vmem:[%s19694_s28 + $0x11c] sm:$0xf] }
 0x179   :  { %3391 = vmatpush1.bf16.msra.mxu0 %v12945_v16  ;;  %v3545_v16 = vld [vmem:[%s19694_s28 + $0x17c] sm:$0xf] }
 0x17a   :  { %13713 = vmatprep.subr.msk.bf16.mxu0 %vm997_vm0, %v13750_v17  ;;  %13614 = vmatmul.mubr.msk.bf16.vlgmr.msra.gmra.mxu1 %vm984_vm1, %v15917_v12  ;;  %v12974_v54 = vcombine.low %v3543_v48, %v3545_v16 }
 0x17b   :  { %3644 = vmatpush1.bf16.msra.mxu1 %v3629_v50  ;;  %13617 = vmatprep.mubr.msk.bf16.mxu1 %vm984_vm1, %v15932_v39  ;;  %v3541_v50 = vld [vmem:[%s19694_s28 + $0xbc] sm:$0xf] }
 0x17c   :  { %12961 = vmatmul.mubr.msk.bf16.vlgmr.msra.gmra.mxu0 %vm984_vm1, %v15886_v26  ;;  %3645 = vmatprep.subr.bf16.mxu1 %v12979_v52  ;;  %v3544_v26 = vld [vmem:[%s19694_s28 + $0x174] sm:$0xff]  ;;  %v12971_v15 = vcombine.low %v3539_v13, %v3541_v50 }
 0x17d   :  { %13622 = vmatpush3.bf16.msra.mxu0 %v3635_v11  ;;  %3418 = vmatprep.mubr.bf16.mxu0 %v19695_v25  ;;  %v12973_v17 = vcombine.high %v3542_v49, %v3544_v26  ;;  %v12972_v52 = vcombine.low %v3542_v49, %v3544_v26  ;;  %v12970_v11 = vcombine.high %v3538_v10, %v3540_v53 }
 0x17e   :  { %13623 = vmatprep.subr.bf16.mxu0 %v12980_v41 }
 0x17f   :  { %3646 = vmatpush1.bf16.msra.mxu1 %v12978_v38 }
 0x180   :  { %3647 = vmatprep.subr.bf16.mxu1 %v12976_v47 }
 0x181   :  { %13624 = vmatpush3.bf16.msra.mxu0 %v12980_v41  ;;  %v13751_v41 = vld [vmem:[%s19696_s24] sm:$0xff]  }
 0x182   :  { %13625 = vmatprep.subr.bf16.mxu0 %v12977_v18  ;;  %13618 = vmatmul.mubr.msk.bf16.gmra.mxu1 %vm984_vm1, %v15962_v14 }
 0x183   :  { %3648 = vmatpush1.bf16.msra.mxu1 %v12975_v27  ;;  %3669 = vmatprep.mubr.bf16.mxu1 %v19695_v25 }
 0x184   :  { %12962 = vmatmul.mubr.msk.bf16.gmra.mxu0 %vm984_vm1, %v15917_v12  ;;  %3649 = vmatprep.subr.bf16.mxu1 %v12973_v17 }
 0x185   :  { %3428 = vmatprep.mubr.bf16.mxu0 %v19695_v25  ;;  %13626 = vmatpush3.bf16.msra.mxu0 %v12977_v18 }
 0x186   :  { %13627 = vmatprep.subr.bf16.mxu0 %v12974_v54 }
 0x187   :  { %3650 = vmatpush1.bf16.msra.mxu1 %v12972_v52 }
 0x188   :  { %3651 = vmatprep.subr.bf16.mxu1 %v12970_v11 }
 0x189   :  { %13628 = vmatpush3.bf16.msra.mxu0 %v12974_v54 }
 0x18a   :  { %13629 = vmatprep.subr.bf16.mxu0 %v12971_v15 }
 0x18b   :  { %3652 = vmatpush1.bf16.msra.mxu1 %v12969_v51 }
 0x18c   :  { %12963 = vmatmul.mubr.msk.bf16.gmra.mxu0 %vm984_vm1, %v15932_v39 }
 0x18d   :  { %3438 = vmatprep.mubr.bf16.mxu0 %v19695_v25  ;;  %13630 = vmatpush3.bf16.msra.mxu0 %v12971_v15 }
 0x18e   :  { %12985 = vmatmul.mubr.msk.bf16.vlgmr.msra.gmra.mxu1 %vm984_vm1, %v13751_v41 }
 0x18f   :  { %3679 = vmatprep.mubr.bf16.mxu1 %v19695_v25 }
 0x194   :  { %12964 = vmatmul.mubr.msk.bf16.gmra.mxu0 %vm984_vm1, %v15962_v14 }
 0x195   :  { %13631 = vmatprep.mubr.msk.bf16.mxu0 %vm984_vm1, %v13751_v41 }
 0x196   :  { %12986 = vmatmul.mubr.msk.bf16.gmra.mxu1 %vm984_vm1, %v15917_v12 }
 0x197   :  { %3689 = vmatprep.mubr.bf16.mxu1 %v19695_v25 }
 0x19c   :  { %13632 = vmatmul.mubr.msk.bf16.vlgmr.msra.gmra.mxu0 %vm984_vm1, %v15917_v12 }
 0x19d   :  { %13635 = vmatprep.mubr.msk.bf16.mxu0 %vm984_vm1, %v15932_v39 }
 0x19e   :  { %12987 = vmatmul.mubr.msk.bf16.gmra.mxu1 %vm984_vm1, %v15932_v39  ;;  %v16530_v24 = vpop.f32.mrf.mxu1 }
 0x19f   :  { %3699 = vmatprep.mubr.bf16.mxu1 %v19695_v25 }
 0x1a0   :  { %v16528_v40 = vpop.f32.mrf.mxu0  ;;  %v16535_v47 = vpop.f32.mrf.mxu1 }
 0x1a2   :  { %v16533_v38 = vpop.f32.mrf.mxu0  ;;  %v16541_v18 = vpop.f32.mrf.mxu1 }
 0x1a4   :  { %13636 = vmatmul.mubr.msk.bf16.gmra.mxu0 %vm984_vm1, %v15962_v14  ;;  %v16539_v12 = vpop.f32.mrf.mxu0  ;;  %v16545_v39 = vpop.f32.mrf.mxu1 }
 0x1a6   :  { %v16543_v49 = vpop.f32.mrf.mxu0  ;;  %12988 = vmatmul.mubr.msk.bf16.gmra.mxu1 %vm984_vm1, %v15962_v14  ;;  %v16551_v25 = vpop.f32.mrf.mxu1 }
 0x1a7   :  { %19697 = vst [vmem:[#allocation392_spill] sm:$0xff] %v16551_v25 }
 0x1a8   :  { %v16549_v26 = vpop.f32.mrf.mxu0  ;;  %v16555_v16 = vpop.f32.mrf.mxu1 }
 0x1aa   :  { %v16553_v48 = vpop.f32.mrf.mxu0  ;;  %v16559_v17 = vpop.f32.mrf.mxu1 }
 0x1ab   :  { %19698 = vst [vmem:[#allocation393_spill] sm:$0xff] %v16559_v17 }
 0x1ac   :  { %v16557_v27 = vpop.f32.mrf.mxu0  ;;  %v16565_v54 = vpop.f32.mrf.mxu1 }
 0x1ad   :  { %19699 = vst [vmem:[#allocation394_spill] sm:$0xff] %v16565_v54 }
 0x1ae   :  { %v16561_v10 = vpop.f32.mrf.mxu0 }
 0x1b0   :  { %v16563_v53 = vpop.f32.mrf.mxu0 }
 0x1b2   :  { %v16567_v13 = vpop.f32.mrf.mxu0  ;;  %v16571_v50 = vpop.f32.mrf.mxu1 }
 0x1b4   :  { %v16569_v14 = vpop.f32.mrf.mxu0  ;;  %v16575_v11 = vpop.f32.mrf.mxu1 }
 0x1b5   :  { %19700 = vst [vmem:[#allocation395_spill] sm:$0xff] %v16569_v14  ;;  %v1383_v54 = vmax.f32 %v16533_v38, %v16575_v11 }
 0x1b6   :  { %v16573_v52 = vpop.f32.mrf.mxu0  ;;  %v16579_v51 = vpop.f32.mrf.mxu1 }
 0x1b7   :  { %19701 = vst [vmem:[#allocation396_spill] sm:$0xff] %v16573_v52 }
 0x1b8   :  { %v16577_v15 = vpop.f32.mrf.mxu0  ;;  %v16585_v9 = vpop.f32.mrf.mxu1 }
 0x1ba   :  { %v16583_v55 = vpop.f32.mrf.mxu0  ;;  %v16591_v23 = vpop.f32.mrf.mxu1 }
 0x1bb   :  { %v1388_v43 = vmax.f32 %v16549_v26, %v16591_v23 }
 0x1bc   :  { %v16589_v37 = vpop.f32.mrf.mxu0  ;;  %v16595_v42 = vpop.f32.mrf.mxu1 }
 0x1bd   :  { %19702 = vst [vmem:[#allocation397_spill] sm:$0xff] %v16589_v37  ;;  %v1389_v3 = vmax.f32 %v16553_v48, %v16595_v42 }
 0x1be   :  { %v16593_v28 = vpop.f32.mrf.mxu0  ;;  %v16597_v8 = vpop.f32.mrf.mxu1 }
 0x1bf   :  { %19703 = vst [vmem:[#allocation398_spill] sm:$0xff] %v16593_v28  ;;  %v1382_v28 = vmax.f32 %v16528_v40, %v16571_v50  ;;  %v1391_v40 = vmax.f32 %v16557_v27, %v16597_v8 }
 0x1c0   :  { %v16599_v57 = vpop.f32.mrf.mxu0  ;;  %v16601_v41 = vpop.f32.mrf.mxu1 }
 0x1c1   :  { %v1390_v50 = vmax.f32 %v16530_v24, %v16599_v57 }
 0x1c2   :  { %v16603_v7 = vpop.f32.mrf.mxu0  ;;  %v16605_v58 = vpop.f32.mrf.mxu1 }
 0x1c3   :  { %v1384_v23 = vmax.f32 %v16535_v47, %v16603_v7 }
 0x1c4   :  { %v16607_v36 = vpop.f32.mrf.mxu0  ;;  %v16609_v56 = vpop.f32.mrf.mxu1 }
 0x1c5   :  { %v1393_v42 = vmax.f32 %v16541_v18, %v16607_v36  ;;  %v1395_v8 = vmax.f32 %v16567_v13, %v16609_v56  ;;  %v19714_v18 = vmax.f32 %v16543_v49, %v16585_v9  ;;  %v19715_v9 = vld [vmem:[#allocation392_spill] sm:$0xff] }
 0x1c6   :  { %v16611_v46 = vpop.f32.mrf.mxu0  ;;  %v16613_v29 = vpop.f32.mrf.mxu1 }
 0x1c7   :  { %19704 = vst [vmem:[#allocation399_spill] sm:$0xff] %v16613_v29  ;;  %v16652_v29 = vpop.permute.xlu0 %1938  ;;  %v1387_v7 = vmax.f32 %v16545_v39, %v16611_v46  ;;  %v1949_v46 = vpop.permute.xlu1 %1948 }
 0x1c8   :  { %v16615_v19 = vpop.f32.mrf.mxu0  ;;  %v16621_v5 = vpop.f32.mrf.mxu1 }
 0x1c9   :  { %19705 = vst [vmem:[#allocation400_spill] sm:$0xff] %v16615_v19  ;;  %19706 = vst [vmem:[#allocation401_spill] sm:$0xff] %v16621_v5 }
 0x1ca   :  { %v16623_v61 = vpop.f32.mrf.mxu0  ;;  %v16627_v45 = vpop.f32.mrf.mxu1 }
 0x1cb   :  { %v16681_v24 = vpop.permute.xlu0 %1943  ;;  %v1396_v36 = vmax.f32 %v16555_v16, %v16623_v61 }
 0x1cc   :  { %v16629_v34 = vpop.f32.mrf.mxu0  ;;  %v16633_v4 = vpop.f32.mrf.mxu1 }
 0x1cd   :  { %19707 = vst [vmem:[#allocation402_spill] sm:$0xff] %v16629_v34  ;;  %v1401_v56 = vmax.f32 %v16583_v55, %v16633_v4 }
 0x1ce   :  { %v16635_v6 = vpop.f32.mrf.mxu0  ;;  %v16639_v60 = vpop.f32.mrf.mxu1 }
 0x1cf   :  { %19708 = vst [vmem:[#allocation403_spill] sm:$0xff] %v16635_v6  ;;  %19709 = vst [vmem:[#allocation404_spill] sm:$0xff] %v16639_v60  ;;  %v19287_v60 = vlaneseq }
 0x1d0   :  { %v16643_v35 = vpop.f32.mrf.mxu1 }
 0x1d1   :  { %19710 = vst [vmem:[#allocation405_spill] sm:$0xff] %v16643_v35  ;;  %v16648_v35 = vshrl.u32 %v19287_v60, 7 }
 0x1d2   :  { %v13543_v20 = vpop.f32.mrf.mxu1 }
 0x1d3   :  { %19711 = vst [vmem:[#allocation406_spill] sm:$0xff] %v16648_v35  ;;  %v16661_v19 = vsub.s32 %v2030_v0, %v16648_v35 }
 0x1d4   :  { %v1539_v30 = vpop.f32.mrf.mxu0  ;;  %v1612_v31 = vpop.f32.mrf.mxu1 }
 0x1d5   :  { %v1643_v34 = vmax.f32 %v1382_v28, %v1539_v30  ;;  %19712 = vst [vmem:[#allocation407_spill] sm:$0xff] %v16661_v19  ;;  %v1392_v28 = vmax.f32 %v16561_v10, %v16601_v41  ;;  %v1394_v30 = vmax.f32 %v16563_v53, %v16605_v58  ;;  %v1400_v58 = vmax.f32 %v16577_v15, %v16627_v45 }
 0x1d6   :  { %v1541_v22 = vpop.f32.mrf.mxu0  ;;  %v13544_v2 = vpop.f32.mrf.mxu1  ;;  %v16695_v39 = vmax.f32 %v1384_v23, %v1612_v31 }
 0x1d7   :  { %v1644_v25 = vmax.f32 %v1383_v54, %v1541_v22  ;;  %v19713_v22 = vmax.f32 %v16539_v12, %v16579_v51  ;;  %v16697_v61 = vmax.f32 %v1393_v42, %v13544_v2  ;;  %v19718_v51 = vld [vmem:[#allocation393_spill] sm:$0xff] }
 0x1d8   :  { %v1543_v44 = vpop.f32.mrf.mxu0  ;;  %v1615_v32 = vpop.f32.mrf.mxu1 }
 0x1d9   :  { %v16699_v16 = vmax.f32 %v1387_v7, %v1615_v32 }
 0x1da   :  { %v1545_v63 = vpop.f32.mrf.mxu0  ;;  %v13547_v59 = vpop.f32.mrf.mxu1 }
 0x1dc   :  { %v1549_v21 = vpop.f32.mrf.mxu0  ;;  %v1628_v62 = vpop.f32.mrf.mxu1 }
 0x1dd   :  { %v1649_v45 = vmax.f32 %v1388_v43, %v1549_v21  ;;  %v16707_v31 = vmax.f32 %v1396_v36, %v1628_v62  ;;  %v19719_v21 = vld [vmem:[#allocation402_spill] sm:$0xff] }
 0x1de   :  { %v1551_v1 = vpop.f32.mrf.mxu0  ;;  %v13548_v37 = vpop.f32.mrf.mxu1  ;;  %v19720_v41 = vmax.f32 %v19718_v51, %v19719_v21  ;;  %v19736_v21 = vlaneseq }
 0x1df   :  { %v1650_v11 = vmax.f32 %v1389_v3, %v1551_v1 }
 0x1e0   :  { %v1553_v33 = vpop.f32.mrf.mxu0  ;;  %v1631_v14 = vpop.f32.mrf.mxu1  ;;  %v16712_v43 = vmax.f32 %v19720_v41, %v13548_v37  ;;  %vm16757_vm2 = vcmp.lt.s32.totalorder %v19736_v21, 384 }
 0x1e1   :  { %v1652_v2 = vmax.f32 %v1391_v40, %v1553_v33 }
 0x1e2   :  { %v1555_v5 = vpop.f32.mrf.mxu0 }
 0x1e3   :  { %v1653_v42 = vmax.f32 %v1392_v28, %v1555_v5  ;;  %v19727_v5 = vld [vmem:[#allocation396_spill] sm:$0xff]  ;;  %v19728_v28 = vld [vmem:[#allocation401_spill] sm:$0xff] }
 0x1e4   :  { %v1559_v52 = vpop.f32.mrf.mxu0 }
 0x1e5   :  { %v1655_v1 = vmax.f32 %v1394_v30, %v1559_v52 }
 0x1e6   :  { %v1561_v6 = vpop.f32.mrf.mxu0  ;;  %v1800_v60 = vpop.f32.mrf.mxu1 }
 0x1e7   :  { %v1904_v38 = vmax.f32 %v1643_v34, %v1800_v60  ;;  %v1646_v34 = vmax.f32 %v19713_v22, %v1543_v44  ;;  %v1651_v44 = vmax.f32 %v1390_v50, %v13543_v20  ;;  %v19722_v22 = vld [vmem:[#allocation403_spill] sm:$0xff]  ;;  %v16720_v40 = vmax.f32 %v1395_v8, %v1561_v6 }
 0x1e8   :  { %v1563_v17 = vpop.f32.mrf.mxu0  ;;  %v1802_v26 = vpop.f32.mrf.mxu1 }
 0x1e9   :  { %v1976_v57 = vadd.f32 %v16652_v29, %v1904_v38  ;;  %v1905_v60 = vmax.f32 %v1644_v25, %v1802_v26  ;;  %v1647_v25 = vmax.f32 %v19714_v18, %v1545_v63  ;;  %v19716_v63 = vld [vmem:[#allocation400_spill] sm:$0xff]  ;;  %v19721_v26 = vld [vmem:[#allocation394_spill] sm:$0xff]  ;;  %v1954_v18 = vpop.permute.xlu1 %1953 }
 0x1ea   :  { %v1565_v0 = vpop.f32.mrf.mxu0  ;;  %v1804_v12 = vpop.f32.mrf.mxu1  ;;  %v19717_v49 = vmax.f32 %v19715_v9, %v19716_v63 }
 0x1eb   :  { %v1977_v48 = vadd.f32 %v16652_v29, %v1905_v60  ;;  %v1907_v27 = vmax.f32 %v1646_v34, %v1804_v12  ;;  %v2000_v55 = vmax.f32 %v1976_v57, 0.0  ;;  %v19724_v57 = vld [vmem:[#allocation395_spill] sm:$0xff] }
 0x1ec   :  { %v1569_v47 = vpop.f32.mrf.mxu0  ;;  %v1806_v4 = vpop.f32.mrf.mxu1  ;;  %v16705_v13 = vmax.f32 %v19717_v49, %v13547_v59  ;;  %v19723_v59 = vmax.f32 %v19721_v26, %v19722_v22  ;;  %v19725_v60 = vld [vmem:[#allocation399_spill] sm:$0xff] }
 0x1ed   :  { %v2001_v53 = vmax.f32 %v1977_v48, 0.0  ;;  %v1979_v20 = vadd.f32 %v16681_v24, %v1907_v27  ;;  %v1908_v54 = vmax.f32 %v1647_v25, %v1806_v4  ;;  %v19726_v37 = vmax.f32 %v19724_v57, %v19725_v60 }
 0x1ee   :  { %v1571_v10 = vpop.f32.mrf.mxu0  ;;  %v1810_v32 = vpop.f32.mrf.mxu1  ;;  %v16718_v34 = vmax.f32 %v19723_v59, %v1631_v14  ;;  %v19729_v25 = vmax.f32 %v19727_v5, %v19728_v28  ;;  %v16732_v14 = vmax.f32 %v1400_v58, %v1569_v47 }
 0x1ef   :  { %v2027_v50 = vcombine.low %v2000_v55, %v2001_v53  ;;  %v2075_v38 = vcombine.high %v2000_v55, %v2001_v53  ;;  %v1980_v23 = vadd.f32 %v16681_v24, %v1908_v54  ;;  %v1910_v62 = vmax.f32 %v1649_v45, %v1810_v32  ;;  %v19734_v32 = vld [vmem:[#allocation405_spill] sm:$0xff] }
 0x1f0   :  { %v1573_v15 = vpop.f32.mrf.mxu0  ;;  %v1812_v3 = vpop.f32.mrf.mxu1  ;;  %v16725_v7 = vmax.f32 %v19726_v37, %v1563_v17  ;;  %v2003_v36 = vmax.f32 %v1979_v20, 0.0  ;;  %v16730_v48 = vmax.f32 %v19729_v25, %v1565_v0  ;;  %v16741_v53 = vmax.f32 %v1401_v56, %v1571_v10  ;;  %v19730_v20 = vld [vmem:[#allocation397_spill] sm:$0xff]  ;;  %v19731_v0 = vld [vmem:[#allocation404_spill] sm:$0xff] }
 0x1f1   :  { %v2004_v12 = vmax.f32 %v1980_v23, 0.0  ;;  %v1982_v52 = vadd.f32 %v1949_v46, %v1910_v62  ;;  %v1911_v30 = vmax.f32 %v1650_v11, %v1812_v3  ;;  %v16739_v55 = vrot.slane %v2027_v50, %v16661_v19  ;;  %v19733_v11 = vld [vmem:[#allocation398_spill] sm:$0xff] }
 0x1f2   :  { %v1575_v33 = vpop.f32.mrf.mxu0  ;;  %v1814_v27 = vpop.f32.mrf.mxu1  ;;  %v19732_v54 = vmax.f32 %v19730_v20, %v19731_v0  ;;  %v16749_v49 = vrot.slane %v2075_v38, %v16661_v19  ;;  %v19737_v56 = vmov 0 }
 0x1f3   :  { %v16734_v8 = vcombine.low %v2003_v36, %v2004_v12  ;;  %v16736_v45 = vcombine.high %v2003_v36, %v2004_v12  ;;  %v1913_v17 = vmax.f32 %v1652_v2, %v1814_v27  ;;  %v1983_v47 = vadd.f32 %v1949_v46, %v1911_v30 }
 0x1f4   :  { %v13561_v6 = vpop.f32.mrf.mxu0  ;;  %v16746_v58 = vmax.f32 %v19732_v54, %v1573_v15  ;;  %v1816_v9 = vpop.f32.mrf.mxu1  ;;  %v19735_v2 = vmax.f32 %v19733_v11, %v19734_v32  ;;  %v19738_v56 = vsel %vm16757_vm2, 4294967295, %v19737_v56  ;;  %v2006_v41 = vmax.f32 %v1982_v52, 0.0 }
 0x1f5   :  { %v1912_v4 = vmax.f32 %v1651_v44, %v13561_v6  ;;  %19739 = vst [vmem:[#allocation392_spill] sm:$0xff] %v19738_v56  ;;  %v1985_v10 = vadd.f32 %v1954_v18, %v1913_v17  ;;  %v16761_v15 = vpop.permute.xlu0 %1958  ;;  %v2007_v50 = vmax.f32 %v1983_v47, 0.0  ;;  %v1914_v23 = vmax.f32 %v1653_v42, %v1816_v9 }
 0x1f6   :  { %v1873_v63 = vpop.f32.mrf.mxu0  ;;  %v16754_v44 = vmax.f32 %v19735_v2, %v1575_v33  ;;  %v1820_v26 = vpop.f32.mrf.mxu1 }
 0x1f7   :  { %v1984_v51 = vadd.f32 %v1949_v46, %v1912_v4  ;;  %v1906_v38 = vmax.f32 %v16695_v39, %v1873_v63  ;;  %v2009_v62 = vmax.f32 %v1985_v10, 0.0  ;;  %v1916_v33 = vmax.f32 %v1655_v1, %v1820_v26 }
 0x1f8   :  { %v13562_v22 = vpop.f32.mrf.mxu0  ;;  %v2218_v3 = vcombine.low %v2006_v41, %v2007_v50  ;;  %v2263_v57 = vcombine.high %v2006_v41, %v2007_v50  ;;  %v1986_v60 = vadd.f32 %v1954_v18, %v1914_v23  ;;  %v16766_v36 = vpop.f32.mrf.mxu1 }
 0x1f9   :  { %v2008_v59 = vmax.f32 %v1984_v51, 0.0  ;;  %v1915_v46 = vmax.f32 %v16697_v61, %v13562_v22  ;;  %v1978_v37 = vadd.f32 %v16652_v29, %v1906_v38  ;;  %v16772_v28 = vadd.f32 %v16761_v15, %v1916_v33 }
 0x1fa   :  { %v16768_v12 = vpop.f32.mrf.mxu0  ;;  %v2225_v1 = vrot.slane %v2218_v3, %v16661_v19  ;;  %v2271_v61 = vrot.slane %v2263_v57, %v16661_v19  ;;  %v2010_v25 = vmax.f32 %v1986_v60, 0.0  ;;  %v16776_v30 = vpop.f32.mrf.mxu1 }
 0x1fb   :  { %v2232_v42 = vrot.slane %v2008_v59, %v16661_v19  ;;  %v2264_v5 = vcombine.high %v2008_v59, %v2008_v59  ;;  %v1987_v39 = vadd.f32 %v1954_v18, %v1915_v46  ;;  %v2002_v52 = vmax.f32 %v1978_v37, 0.0 }
 0x1fc   :  { %v16778_v29 = vpop.f32.mrf.mxu0  ;;  %v2012_v17 = vmax.f32 %v16772_v28, 0.0  ;;  %v1917_v18 = vmax.f32 %v16720_v40, %v16766_v36  ;;  %v2312_v0 = vcombine.low %v2009_v62, %v2010_v25  ;;  %v2357_v54 = vcombine.high %v2009_v62, %v2010_v25  ;;  %v16784_v47 = vpop.f32.mrf.mxu1 }
 0x1fd   :  { %v2278_v27 = vrot.slane %v2264_v5, %v16661_v19  ;;  %v2011_v6 = vmax.f32 %v1987_v39, 0.0  ;;  %v2233_v4 = vcombine.low %v2225_v1, %v2232_v42  ;;  %v2244_v20 = vcombine.high %v2225_v1, %v2232_v42 }
 0x1fe   :  { %v16786_v9 = vpop.f32.mrf.mxu0  ;;  %v2041_v32 = vrot.slane %v2002_v52, %v16661_v19  ;;  %v2076_v2 = vcombine.high %v2002_v52, %v2002_v52  ;;  %v2319_v10 = vrot.slane %v2312_v0, %v16661_v19  ;;  %v16793_v40 = vrot.slane %v2357_v54, %v16661_v19  ;;  %v16795_v41 = vpop.f32.mrf.mxu1 }
 0x1ff   :  { %v2279_v63 = vcombine.low %v2271_v61, %v2278_v27  ;;  %v2290_v11 = vcombine.high %v2271_v61, %v2278_v27  ;;  %v2240_v51 = vrot.slane %v2233_v4, %v16661_v19  ;;  %v2251_v21 = vrot.slane %v2244_v20, %v16661_v19 }
 0x200   :  { %v2042_v38 = vcombine.low %v16739_v55, %v2041_v32  ;;  %v2056_v26 = vcombine.high %v16739_v55, %v2041_v32  ;;  %v2090_v62 = vrot.slane %v2076_v2, %v16661_v19  ;;  %v2326_v33 = vrot.slane %v2011_v6, %v16661_v19  ;;  %v16807_v46 = vpop.f32.mrf.mxu0  ;;  %v16809_v3 = vpop.f32.mrf.mxu1 }
 0x201   :  { %v2286_v50 = vrot.slane %v2279_v63, %v16661_v19  ;;  %v2297_v23 = vrot.slane %v2290_v11, %v16661_v19  ;;  %2243 = vst.msk [vmem:[#allocation3 + $0x60] ss:$2 sm:$0x7] %vm16757_vm2, %v2240_v51  ;;  %2254 = vst.msk [vmem:[#allocation3 + $0x66] ss:$2 sm:$0x7] %vm16757_vm2, %v2251_v21  ;;  %v2255_v22 = vcombine.high %v2240_v51, %v2240_v51  ;;  %v16851_v2 = vpop.permute.xlu1 %1963 }
 0x202   :  { %v2259_v59 = vcombine.high %v2251_v21, %v2251_v21  ;;  %v2049_v60 = vrot.slane %v2042_v38, %v16661_v19  ;;  %v2063_v37 = vrot.slane %v2056_v26, %v16661_v19  ;;  %v2091_v36 = vcombine.low %v16749_v49, %v2090_v62  ;;  %v16823_v1 = vpop.f32.mrf.mxu1  ;;  %v16838_v54 = vpop.f32.mrf.mxu0 }
 0x203   :  { %2289 = vst.msk [vmem:[#allocation3 + $0x78] ss:$2 sm:$0x7] %vm16757_vm2, %v2286_v50  ;;  %2300 = vst.msk [vmem:[#allocation3 + $0x7e] ss:$2 sm:$0x7] %vm16757_vm2, %v2297_v23  ;;  %v2301_v55 = vcombine.high %v2286_v50, %v2286_v50  ;;  %v2305_v57 = vcombine.high %v2297_v23, %v2297_v23  ;;  %v2102_v42 = vcombine.high %v16749_v49, %v2090_v62  ;;  %v16871_v26 = vpop.permute.xlu0 %1968 }
 0x204   :  { %2258 = vst.msk [vmem:[#allocation3 + $0x6c] ss:$2 sm:$0x7] %vm16757_vm2, %v2255_v22  ;;  %2262 = vst.msk [vmem:[#allocation3 + $0x72] ss:$2 sm:$0x7] %vm16757_vm2, %v2259_v59  ;;  %v2327_v5 = vcombine.low %v2319_v10, %v2326_v33  ;;  %v2338_v39 = vcombine.high %v2319_v10, %v2326_v33  ;;  %v2067_v61 = vcombine.high %v2049_v60, %v2049_v60  ;;  %v16840_v63 = vpop.f32.mrf.mxu1 }
 0x205   :  { %2304 = vst.msk [vmem:[#allocation3 + $0x84] ss:$2 sm:$0x7] %vm16757_vm2, %v2301_v55  ;;  %2308 = vst.msk [vmem:[#allocation3 + $0x8a] ss:$2 sm:$0x7] %vm16757_vm2, %v2305_v57  ;;  %v2071_v25 = vcombine.high %v2063_v37, %v2063_v37  ;;  %v2358_v52 = vcombine.high %v2011_v6, %v2011_v6  ;;  %v1989_v49 = vadd.f32 %v16761_v15, %v1917_v18 }
 0x206   :  { %2055 = vst.msk [vmem:[#allocation3] ss:$2 sm:$0x7] %vm16757_vm2, %v2049_v60  ;;  %2066 = vst.msk [vmem:[#allocation3 + $0x6] ss:$2 sm:$0x7] %vm16757_vm2, %v2063_v37  ;;  %v2098_v27 = vrot.slane %v2091_v36, %v16661_v19  ;;  %v2109_v4 = vrot.slane %v2102_v42, %v16661_v19  ;;  %v2334_v20 = vrot.slane %v2327_v5, %v16661_v19 }
 0x207   :  { %v2345_v0 = vrot.slane %v2338_v39, %v16661_v19  ;;  %2070 = vst.msk [vmem:[#allocation3 + $0xc] ss:$2 sm:$0x7] %vm16757_vm2, %v2067_v61  ;;  %2074 = vst.msk [vmem:[#allocation3 + $0x12] ss:$2 sm:$0x7] %vm16757_vm2, %v2071_v25  ;;  %v2372_v6 = vrot.slane %v2358_v52, %v16661_v19  ;;  %v1909_v11 = vmax.f32 %v16699_v16, %v16768_v12 }
 0x208   :  { %v2013_v18 = vmax.f32 %v1989_v49, 0.0  ;;  %v1919_v32 = vmax.f32 %v16725_v7, %v16776_v30  ;;  %2101 = vst.msk [vmem:[#allocation3 + $0x18] ss:$2 sm:$0x7] %vm16757_vm2, %v2098_v27  ;;  %v2113_v51 = vcombine.high %v2098_v27, %v2098_v27  ;;  %v2117_v21 = vcombine.high %v2109_v4, %v2109_v4  ;;  %v16861_v10 = vpop.f32.mrf.mxu0  ;;  %v16863_v7 = vpop.f32.mrf.mxu1 }
 0x209   :  { %2112 = vst.msk [vmem:[#allocation3 + $0x1e] ss:$2 sm:$0x7] %vm16757_vm2, %v2109_v4  ;;  %2337 = vst.msk [vmem:[#allocation3 + $0x90] ss:$2 sm:$0x7] %vm16757_vm2, %v2334_v20  ;;  %v2349_v16 = vcombine.high %v2334_v20, %v2334_v20  ;;  %v2353_v12 = vcombine.high %v2345_v0, %v2345_v0  ;;  %v2373_v30 = vcombine.low %v16793_v40, %v2372_v6 }
 0x20a   :  { %2348 = vst.msk [vmem:[#allocation3 + $0x96] ss:$2 sm:$0x7] %vm16757_vm2, %v2345_v0  ;;  %v2384_v50 = vcombine.high %v16793_v40, %v2372_v6  ;;  %v2406_v23 = vcombine.low %v2012_v17, %v2013_v18  ;;  %v2451_v38 = vcombine.high %v2012_v17, %v2013_v18  ;;  %v2131_v22 = vrot.slane %v16734_v8, %v16661_v19  ;;  %v16888_v40 = vpop.f32.mrf.mxu0  ;;  %v16890_v59 = vpop.f32.mrf.mxu1 }
 0x20b   :  { %2116 = vst.msk [vmem:[#allocation3 + $0x24] ss:$2 sm:$0x7] %vm16757_vm2, %v2113_v51  ;;  %2120 = vst.msk [vmem:[#allocation3 + $0x2a] ss:$2 sm:$0x7] %vm16757_vm2, %v2117_v21  ;;  %v1981_v28 = vadd.f32 %v16681_v24, %v1909_v11  ;;  %v1924_v17 = vmax.f32 %v16705_v13, %v16778_v29  ;;  %v1920_v8 = vmax.f32 %v16730_v48, %v16784_v47 }
 0x20c   :  { %2352 = vst.msk [vmem:[#allocation3 + $0x9c] ss:$2 sm:$0x7] %vm16757_vm2, %v2349_v16  ;;  %2356 = vst.msk [vmem:[#allocation3 + $0xa2] ss:$2 sm:$0x7] %vm16757_vm2, %v2353_v12  ;;  %v2177_v62 = vrot.slane %v16736_v45, %v16661_v19  ;;  %v2380_v33 = vrot.slane %v2373_v30, %v16661_v19  ;;  %v2391_v55 = vrot.slane %v2384_v50, %v16661_v19  ;;  %v16902_v47 = vpop.f32.mrf.mxu0  ;;  %v16904_v60 = vpop.f32.mrf.mxu1 }
 0x20d   :  { %v1991_v57 = vadd.f32 %v16851_v2, %v1919_v32  ;;  %v16898_v24 = vrot.slane %v2406_v23, %v16661_v19  ;;  %v2005_v13 = vmax.f32 %v1981_v28, 0.0  ;;  %v1996_v29 = vadd.f32 %v16871_v26, %v1924_v17 }
 0x20e   :  { %v1992_v48 = vadd.f32 %v16851_v2, %v1920_v8  ;;  %2383 = vst.msk [vmem:[#allocation3 + $0xa8] ss:$2 sm:$0x7] %vm16757_vm2, %v2380_v33  ;;  %2394 = vst.msk [vmem:[#allocation3 + $0xae] ss:$2 sm:$0x7] %vm16757_vm2, %v2391_v55  ;;  %v2395_v45 = vcombine.high %v2380_v33, %v2380_v33  ;;  %v2399_v37 = vcombine.high %v2391_v55, %v2391_v55  ;;  %v16915_v52 = vpop.f32.mrf.mxu0  ;;  %v16917_v49 = vpop.f32.mrf.mxu1 }
 0x20f   :  { %v1918_v36 = vmax.f32 %v16707_v31, %v16786_v9  ;;  %v1922_v42 = vmax.f32 %v16732_v14, %v16795_v41  ;;  %v2138_v5 = vrot.slane %v2005_v13, %v16661_v19  ;;  %v2170_v39 = vcombine.high %v2005_v13, %v2005_v13 }
 0x210   :  { %v2020_v61 = vmax.f32 %v1996_v29, 0.0  ;;  %v2016_v25 = vmax.f32 %v1992_v48, 0.0  ;;  %2398 = vst.msk [vmem:[#allocation3 + $0xb4] ss:$2 sm:$0x7] %vm16757_vm2, %v2395_v45  ;;  %v2015_v27 = vmax.f32 %v1991_v57, 0.0  ;;  %v1927_v9 = vmax.f32 %v16712_v43, %v16807_v46  ;;  %v16932_v6 = vpop.f32.mrf.mxu0  ;;  %v16934_v18 = vpop.f32.mrf.mxu1 }
 0x211   :  { %2402 = vst.msk [vmem:[#allocation3 + $0xba] ss:$2 sm:$0x7] %vm16757_vm2, %v2399_v37  ;;  %v1990_v31 = vadd.f32 %v16761_v15, %v1918_v36  ;;  %v16925_v14 = vadd.f32 %v16871_v26, %v1922_v42  ;;  %v2139_v41 = vcombine.low %v2131_v22, %v2138_v5  ;;  %v2150_v4 = vcombine.high %v2131_v22, %v2138_v5  ;;  %v1974_v22 = vpop.permute.xlu1 %1973 }
 0x212   :  { %v2184_v20 = vrot.slane %v2170_v39, %v16661_v19  ;;  %v1923_v0 = vmax.f32 %v16741_v53, %v16809_v3  ;;  %v2640_v11 = vcombine.high %v2020_v61, %v2020_v61  ;;  %v2500_v32 = vcombine.low %v2015_v27, %v2016_v25  ;;  %v16938_v12 = vpop.f32.mrf.mxu0  ;;  %v16940_v30 = vpop.f32.mrf.mxu1 }
 0x213   :  { %v2545_v15 = vcombine.high %v2015_v27, %v2016_v25  ;;  %v2014_v51 = vmax.f32 %v1990_v31, 0.0  ;;  %v2146_v21 = vrot.slane %v2139_v41, %v16661_v19  ;;  %v2157_v16 = vrot.slane %v2150_v4, %v16661_v19 }
 0x214   :  { %v2185_v43 = vcombine.low %v2177_v62, %v2184_v20  ;;  %v2196_v46 = vcombine.high %v2177_v62, %v2184_v20  ;;  %v2459_v53 = vrot.slane %v2451_v38, %v16661_v19  ;;  %v16944_v3 = vrot.slane %v2020_v61, %v16661_v19  ;;  %v16956_v62 = vpop.f32.mrf.mxu0  ;;  %v16970_v37 = vpop.f32.mrf.mxu1 }
 0x215   :  { %v16947_v50 = vrot.slane %v2640_v11, %v16661_v19  ;;  %v2420_v23 = vrot.slane %v2014_v51, %v16661_v19  ;;  %2149 = vst.msk [vmem:[#allocation3 + $0x30] ss:$2 sm:$0x7] %vm16757_vm2, %v2146_v21  ;;  %2160 = vst.msk [vmem:[#allocation3 + $0x36] ss:$2 sm:$0x7] %vm16757_vm2, %v2157_v16  ;;  %v2161_v28 = vcombine.high %v2146_v21, %v2146_v21 }
 0x216   :  { %v2165_v17 = vcombine.high %v2157_v16, %v2157_v16  ;;  %v2192_v8 = vrot.slane %v2185_v43, %v16661_v19  ;;  %v2203_v38 = vrot.slane %v2196_v46, %v16661_v19  ;;  %v2452_v57 = vcombine.high %v2014_v51, %v2014_v51  ;;  %19740 = vst [vmem:[#allocation400_spill] sm:$0xff] %v16970_v37  ;;  %v16972_v36 = vpop.f32.mrf.mxu0  ;;  %v17187_v37 = vpop.permute.xlu0 %3809 }
 0x217   :  { %v2421_v33 = vcombine.low %v16898_v24, %v2420_v23  ;;  %v2432_v55 = vcombine.high %v16898_v24, %v2420_v23  ;;  %v2018_v13 = vmax.f32 %v16925_v14, 0.0  ;;  %2164 = vst.msk [vmem:[#allocation3 + $0x3c] ss:$2 sm:$0x7] %vm16757_vm2, %v2161_v28  ;;  %v1999_v45 = vadd.f32 %v1974_v22, %v1927_v9 }
 0x218   :  { %2168 = vst.msk [vmem:[#allocation3 + $0x42] ss:$2 sm:$0x7] %vm16757_vm2, %v2165_v17  ;;  %2195 = vst.msk [vmem:[#allocation3 + $0x48] ss:$2 sm:$0x7] %vm16757_vm2, %v2192_v8  ;;  %v2207_v29 = vcombine.high %v2192_v8, %v2192_v8  ;;  %v2211_v48 = vcombine.high %v2203_v38, %v2203_v38  ;;  %v1995_v24 = vadd.f32 %v16871_v26, %v1923_v0  ;;  %v16989_v14 = vpop.f32.mrf.mxu0 }
 0x219   :  { %2206 = vst.msk [vmem:[#allocation3 + $0x4e] ss:$2 sm:$0x7] %vm16757_vm2, %v2203_v38  ;;  %v2428_v42 = vrot.slane %v2421_v33, %v16661_v19  ;;  %v2439_v5 = vrot.slane %v2432_v55, %v16661_v19  ;;  %v2466_v39 = vrot.slane %v2452_v57, %v16661_v19  ;;  %v1921_v61 = vmax.f32 %v16718_v34, %v16838_v54 }
 0x21a   :  { %2210 = vst.msk [vmem:[#allocation3 + $0x54] ss:$2 sm:$0x7] %vm16757_vm2, %v2207_v29  ;;  %2214 = vst.msk [vmem:[#allocation3 + $0x5a] ss:$2 sm:$0x7] %vm16757_vm2, %v2211_v48  ;;  %v1925_v27 = vmax.f32 %v16746_v58, %v16823_v1  ;;  %v1926_v31 = vmax.f32 %v16754_v44, %v16840_v63  ;;  %v2507_v4 = vrot.slane %v2500_v32, %v16661_v19  ;;  %v16999_v44 = vpop.f32.mrf.mxu1  ;;  %v17001_v63 = vpop.f32.mrf.mxu0 }
 0x21b   :  { %v16983_v26 = vmax.f32 %v1999_v45, 0.0  ;;  %v2019_v25 = vmax.f32 %v1995_v24, 0.0  ;;  %2431 = vst.msk [vmem:[#allocation3 + $0xc0] ss:$2 sm:$0x7] %vm16757_vm2, %v2428_v42  ;;  %v2443_v34 = vcombine.high %v2428_v42, %v2428_v42  ;;  %v2447_v54 = vcombine.high %v2439_v5, %v2439_v5  ;;  %19741 = vst [vmem:[#allocation393_spill] sm:$0xff] %v16999_v44 }
 0x21c   :  { %2442 = vst.msk [vmem:[#allocation3 + $0xc6] ss:$2 sm:$0x7] %vm16757_vm2, %v2439_v5  ;;  %v2467_v9 = vcombine.low %v2459_v53, %v2466_v39  ;;  %v2478_v41 = vcombine.high %v2459_v53, %v2466_v39  ;;  %v16997_v20 = vrot.slane %v2545_v15, %v16661_v19  ;;  %v1993_v32 = vadd.f32 %v16851_v2, %v1921_v61  ;;  %v17016_v46 = vpop.f32.mrf.mxu0  ;;  %v17018_v53 = vpop.f32.mrf.mxu1 }
 0x21d   :  { %v2594_v58 = vcombine.low %v2018_v13, %v2019_v25  ;;  %v2639_v1 = vcombine.high %v2018_v13, %v2019_v25  ;;  %2446 = vst.msk [vmem:[#allocation3 + $0xcc] ss:$2 sm:$0x7] %vm16757_vm2, %v2443_v34  ;;  %2450 = vst.msk [vmem:[#allocation3 + $0xd2] ss:$2 sm:$0x7] %vm16757_vm2, %v2447_v54  ;;  %v1997_v15 = vadd.f32 %v1974_v22, %v1925_v27 }
 0x21e   :  { %v2474_v0 = vrot.slane %v2467_v9, %v16661_v19  ;;  %v2485_v11 = vrot.slane %v2478_v41, %v16661_v19  ;;  %v17012_v51 = vrot.slane %v16983_v26, %v16661_v19  ;;  %v1998_v43 = vadd.f32 %v1974_v22, %v1926_v31  ;;  %19742 = vst [vmem:[#allocation402_spill] sm:$0xff] %v17016_v46  ;;  %v17030_v55 = vpop.f32.mrf.mxu0  ;;  %v17032_v57 = vpop.f32.mrf.mxu1 }
 0x21f   :  { %v2601_v21 = vrot.slane %v2594_v58, %v16661_v19  ;;  %v2647_v16 = vrot.slane %v2639_v1, %v16661_v19  ;;  %v2734_v28 = vcombine.high %v16983_v26, %v16983_v26  ;;  %v2017_v17 = vmax.f32 %v1993_v32, 0.0  ;;  %19743 = vst [vmem:[#allocation394_spill] sm:$0xff] %v17030_v55 }
 0x220   :  { %2477 = vst.msk [vmem:[#allocation3 + $0xd8] ss:$2 sm:$0x7] %vm16757_vm2, %v2474_v0  ;;  %2488 = vst.msk [vmem:[#allocation3 + $0xde] ss:$2 sm:$0x7] %vm16757_vm2, %v2485_v11  ;;  %v2489_v2 = vcombine.high %v2474_v0, %v2474_v0  ;;  %v2493_v23 = vcombine.high %v2485_v11, %v2485_v11  ;;  %v17043_v5 = vpop.f32.mrf.mxu0  ;;  %v17045_v39 = vpop.f32.mrf.mxu1 }
 0x221   :  { %v2609_v8 = vcombine.low %v2601_v21, %v16944_v3  ;;  %v2620_v22 = vcombine.high %v2601_v21, %v16944_v3  ;;  %v2655_v38 = vcombine.low %v2647_v16, %v16947_v50  ;;  %v2666_v33 = vcombine.high %v2647_v16, %v16947_v50 }
 0x222   :  { %2492 = vst.msk [vmem:[#allocation3 + $0xe4] ss:$2 sm:$0x7] %vm16757_vm2, %v2489_v2  ;;  %2496 = vst.msk [vmem:[#allocation3 + $0xea] ss:$2 sm:$0x7] %vm16757_vm2, %v2493_v23  ;;  %v2514_v13 = vrot.slane %v2017_v17, %v16661_v19  ;;  %v2546_v29 = vcombine.high %v2017_v17, %v2017_v17  ;;  %v17056_v41 = vpop.f32.mrf.mxu0  ;;  %v2748_v32 = vrot.slane %v2734_v28, %v16661_v19 }
 0x223   :  { %v2021_v48 = vmax.f32 %v1997_v15, 0.0  ;;  %v2022_v45 = vmax.f32 %v1998_v43, 0.0  ;;  %v2616_v3 = vrot.slane %v2609_v8, %v16661_v19  ;;  %v2627_v24 = vrot.slane %v2620_v22, %v16661_v19 }
 0x224   :  { %v2662_v50 = vrot.slane %v2655_v38, %v16661_v19  ;;  %v2673_v42 = vrot.slane %v2666_v33, %v16661_v19  ;;  %v2515_v61 = vcombine.low %v2507_v4, %v2514_v13  ;;  %v2526_v26 = vcombine.high %v2507_v4, %v2514_v13  ;;  %v17058_v4 = vpop.f32.mrf.mxu1  ;;  %v17076_v16 = vpop.f32.mrf.mxu0 }
 0x225   :  { %v2560_v25 = vrot.slane %v2546_v29, %v16661_v19  ;;  %v2688_v27 = vcombine.low %v2021_v48, %v2022_v45  ;;  %2619 = vst.msk [vmem:[#allocation3 + $0x120] ss:$2 sm:$0x7] %vm16757_vm2, %v2616_v3  ;;  %2630 = vst.msk [vmem:[#allocation3 + $0x126] ss:$2 sm:$0x7] %vm16757_vm2, %v2627_v24  ;;  %v2631_v31 = vcombine.high %v2616_v3, %v2616_v3 }
 0x226   :  { %v2635_v34 = vcombine.high %v2627_v24, %v2627_v24  ;;  %2665 = vst.msk [vmem:[#allocation3 + $0x138] ss:$2 sm:$0x7] %vm16757_vm2, %v2662_v50  ;;  %2676 = vst.msk [vmem:[#allocation3 + $0x13e] ss:$2 sm:$0x7] %vm16757_vm2, %v2673_v42  ;;  %v2677_v54 = vcombine.high %v2662_v50, %v2662_v50  ;;  %v2681_v9 = vcombine.high %v2673_v42, %v2673_v42  ;;  %v17078_v43 = vpop.f32.mrf.mxu1  ;;  %v17091_v13 = vpop.f32.mrf.mxu0 }
 0x227   :  { %v2522_v58 = vrot.slane %v2515_v61, %v16661_v19  ;;  %v2533_v1 = vrot.slane %v2526_v26, %v16661_v19  ;;  %v2561_v0 = vcombine.low %v16997_v20, %v2560_v25  ;;  %v2572_v11 = vcombine.high %v16997_v20, %v2560_v25  ;;  %2634 = vst.msk [vmem:[#allocation3 + $0x12c] ss:$2 sm:$0x7] %vm16757_vm2, %v2631_v31 }
 0x228   :  { %2638 = vst.msk [vmem:[#allocation3 + $0x132] ss:$2 sm:$0x7] %vm16757_vm2, %v2635_v34  ;;  %2680 = vst.msk [vmem:[#allocation3 + $0x144] ss:$2 sm:$0x7] %vm16757_vm2, %v2677_v54  ;;  %v2695_v15 = vrot.slane %v2688_v27, %v16661_v19  ;;  %v2733_v21 = vcombine.high %v2021_v48, %v2022_v45  ;;  %v17093_v29 = vpop.f32.mrf.mxu1  ;;  %v17107_v61 = vpop.f32.mrf.mxu0  ;;  %v3259_v55 = vmax.f32 %v16932_v6, %v17078_v43 }
 0x229   :  { %2684 = vst.msk [vmem:[#allocation3 + $0x14a] ss:$2 sm:$0x7] %vm16757_vm2, %v2681_v9  ;;  %19744 = vst [vmem:[#allocation403_spill] sm:$0xff] %v17076_v16  ;;  %v2537_v2 = vcombine.high %v2522_v58, %v2522_v58  ;;  %v2541_v23 = vcombine.high %v2533_v1, %v2533_v1  ;;  %v2568_v28 = vrot.slane %v2561_v0, %v16661_v19 }
 0x22a   :  { %2525 = vst.msk [vmem:[#allocation3 + $0xf0] ss:$2 sm:$0x7] %vm16757_vm2, %v2522_v58  ;;  %2536 = vst.msk [vmem:[#allocation3 + $0xf6] ss:$2 sm:$0x7] %vm16757_vm2, %v2533_v1  ;;  %v2579_v17 = vrot.slane %v2572_v11, %v16661_v19  ;;  %v2703_v8 = vcombine.low %v2695_v15, %v17012_v51  ;;  %v2714_v22 = vcombine.high %v2695_v15, %v17012_v51  ;;  %v17105_v42 = vpop.f32.mrf.mxu1  ;;  %v17121_v54 = vpop.f32.mrf.mxu0 }
 0x22b   :  { %v2741_v38 = vrot.slane %v2733_v21, %v16661_v19  ;;  %19745 = vst [vmem:[#allocation395_spill] sm:$0xff] %v17091_v13  ;;  %2540 = vst.msk [vmem:[#allocation3 + $0xfc] ss:$2 sm:$0x7] %vm16757_vm2, %v2537_v2  ;;  %v2583_v51 = vcombine.high %v2568_v28, %v2568_v28  ;;  %v3253_v16 = vmax.f32 %v16861_v10, %v17018_v53 }
 0x22c   :  { %2544 = vst.msk [vmem:[#allocation3 + $0x102] ss:$2 sm:$0x7] %vm16757_vm2, %v2541_v23  ;;  %2571 = vst.msk [vmem:[#allocation3 + $0x108] ss:$2 sm:$0x7] %vm16757_vm2, %v2568_v28  ;;  %v2587_v48 = vcombine.high %v2579_v17, %v2579_v17  ;;  %v2710_v45 = vrot.slane %v2703_v8, %v16661_v19  ;;  %v2721_v3 = vrot.slane %v2714_v22, %v16661_v19  ;;  %v17119_v34 = vpop.f32.mrf.mxu1  ;;  %v17133_v0 = vpop.f32.mrf.mxu0 }
 0x22d   :  { %2582 = vst.msk [vmem:[#allocation3 + $0x10e] ss:$2 sm:$0x7] %vm16757_vm2, %v2579_v17  ;;  %v2749_v24 = vcombine.low %v2741_v38, %v2748_v32  ;;  %v2760_v50 = vcombine.high %v2741_v38, %v2748_v32  ;;  %2586 = vst.msk [vmem:[#allocation3 + $0x114] ss:$2 sm:$0x7] %vm16757_vm2, %v2583_v51  ;;  %v3254_v13 = vmax.f32 %v16888_v40, %v17032_v57 }
 0x22e   :  { %2590 = vst.msk [vmem:[#allocation3 + $0x11a] ss:$2 sm:$0x7] %vm16757_vm2, %v2587_v48  ;;  %2713 = vst.msk [vmem:[#allocation3 + $0x150] ss:$2 sm:$0x7] %vm16757_vm2, %v2710_v45  ;;  %v2725_v26 = vcombine.high %v2710_v45, %v2710_v45  ;;  %v2729_v25 = vcombine.high %v2721_v3, %v2721_v3  ;;  %v17131_v1 = vpop.f32.mrf.mxu1  ;;  %v17141_v32 = vpop.f32.mrf.mxu0  ;;  %v3262_v44 = vmax.f32 %v16956_v62, %v17105_v42 }
 0x22f   :  { %2724 = vst.msk [vmem:[#allocation3 + $0x156] ss:$2 sm:$0x7] %vm16757_vm2, %v2721_v3  ;;  %v2756_v27 = vrot.slane %v2749_v24, %v16661_v19  ;;  %v2767_v31 = vrot.slane %v2760_v50, %v16661_v19  ;;  %v3261_v53 = vmax.f32 %v16863_v7, %v17107_v61  ;;  %v3263_v40 = vmax.f32 %v16972_v36, %v17119_v34  ;;  %v17216_v34 = vpop.permute.xlu1 %3814 }
 0x230   :  { %2728 = vst.msk [vmem:[#allocation3 + $0x15c] ss:$2 sm:$0x7] %vm16757_vm2, %v2725_v26  ;;  %2732 = vst.msk [vmem:[#allocation3 + $0x162] ss:$2 sm:$0x7] %vm16757_vm2, %v2729_v25  ;;  %v17139_v11 = vpop.f32.mrf.mxu1  ;;  %v17145_v21 = vpop.f32.mrf.mxu0  ;;  %v3255_v6 = vmax.f32 %v16890_v59, %v17121_v54  ;;  %v3265_v57 = vmax.f32 %v16989_v14, %v17131_v1  ;;  %v3264_v62 = vmax.f32 %v16904_v60, %v17133_v0 }
 0x231   :  { %2759 = vst.msk [vmem:[#allocation3 + $0x168] ss:$2 sm:$0x7] %vm16757_vm2, %v2756_v27  ;;  %2770 = vst.msk [vmem:[#allocation3 + $0x16e] ss:$2 sm:$0x7] %vm16757_vm2, %v2767_v31  ;;  %v2771_v9 = vcombine.high %v2756_v27, %v2756_v27  ;;  %v2775_v58 = vcombine.high %v2767_v31, %v2767_v31  ;;  %v3266_v36 = vmax.f32 %v17001_v63, %v17139_v11 }
 0x232   :  { %v17143_v15 = vpop.f32.mrf.mxu1  ;;  %v17153_v17 = vpop.f32.mrf.mxu0  ;;  %v3258_v59 = vmax.f32 %v16917_v49, %v17141_v32 }
 0x233   :  { %2774 = vst.msk [vmem:[#allocation3 + $0x174] ss:$2 sm:$0x7] %vm16757_vm2, %v2771_v9  ;;  %2778 = vst.msk [vmem:[#allocation3 + $0x17a] ss:$2 sm:$0x7] %vm16757_vm2, %v2775_v58  ;;  %v3267_v14 = vmax.f32 %v16940_v30, %v17153_v17  ;;  %v19754_v17 = vmax.f32 %v16934_v18, %v17145_v21 }
 0x234   :  { %19746 = vst [vmem:[#allocation399_spill] sm:$0xff] %v17143_v15  ;;  %v17151_v28 = vpop.f32.mrf.mxu1  ;;  %v17159_v38 = vpop.f32.mrf.mxu0 }
 0x235   :  { %19747 = vst [vmem:[#allocation396_spill] sm:$0xff] %v17151_v28  ;;  %19748 = vst [vmem:[#allocation401_spill] sm:$0xff] %v17159_v38 }
 0x236   :  { %v17157_v22 = vpop.f32.mrf.mxu1  ;;  %v17165_v45 = vpop.f32.mrf.mxu0 }
 0x237   :  { %19749 = vst [vmem:[#allocation397_spill] sm:$0xff] %v17165_v45  ;;  %v3260_v45 = vmax.f32 %v16938_v12, %v17093_v29  ;;  %v3271_v29 = vmax.f32 %v17043_v5, %v17157_v22 }
 0x238   :  { %v17163_v48 = vpop.f32.mrf.mxu1 }
 0x23a   :  { %v17169_v24 = vpop.f32.mrf.mxu1 }
 0x23b   :  { %19750 = vst [vmem:[#allocation404_spill] sm:$0xff] %v17169_v24 }
 0x23c   :  { %v17173_v26 = vpop.f32.mrf.mxu1  ;;  %v3410_v27 = vpop.f32.mrf.mxu0 }
 0x23d   :  { %19751 = vst [vmem:[#allocation398_spill] sm:$0xff] %v17173_v26  ;;  %v3514_v28 = vmax.f32 %v3253_v16, %v3410_v27 }
 0x23e   :  { %v13615_v31 = vpop.f32.mrf.mxu1  ;;  %v3412_v9 = vpop.f32.mrf.mxu0  ;;  %v19759_v18 = vld [vmem:[#allocation397_spill] sm:$0xff] }
 0x23f   :  { %v3515_v38 = vmax.f32 %v3254_v13, %v3412_v9  ;;  %v3522_v54 = vmax.f32 %v3261_v53, %v13615_v31  ;;  %v19755_v9 = vld [vmem:[#allocation400_spill] sm:$0xff] }
 0x240   :  { %v3483_v58 = vpop.f32.mrf.mxu1  ;;  %v3414_v8 = vpop.f32.mrf.mxu0 }
 0x241   :  { %v17219_v1 = vmax.f32 %v3255_v6, %v3483_v58  ;;  %v19756_v58 = vld [vmem:[#allocation401_spill] sm:$0xff] }
 0x242   :  { %v13616_v2 = vpop.f32.mrf.mxu1  ;;  %v3416_v51 = vpop.f32.mrf.mxu0 }
 0x243   :  { %v17221_v30 = vmax.f32 %v3264_v62, %v13616_v2 }
 0x244   :  { %v3486_v23 = vpop.f32.mrf.mxu1  ;;  %v3420_v33 = vpop.f32.mrf.mxu0 }
 0x245   :  { %v17223_v5 = vmax.f32 %v3258_v59, %v3486_v23 }
 0x246   :  { %v13619_v3 = vpop.f32.mrf.mxu1  ;;  %v3422_v20 = vpop.f32.mrf.mxu0 }
 0x247   :  { %v3521_v22 = vmax.f32 %v3260_v45, %v3422_v20 }
 0x248   :  { %v3499_v35 = vpop.f32.mrf.mxu1  ;;  %v3424_v56 = vpop.f32.mrf.mxu0 }
 0x249   :  { %v3523_v23 = vmax.f32 %v3262_v44, %v3424_v56  ;;  %v3820_v44 = vpop.permute.xlu0 %3819 }
 0x24a   :  { %v13620_v19 = vpop.f32.mrf.mxu1  ;;  %v3426_v50 = vpop.f32.mrf.mxu0 }
 0x24c   :  { %v3430_v24 = vpop.f32.mrf.mxu0  ;;  %v3502_v25 = vpop.f32.mrf.mxu1 }
 0x24d   :  { %v3526_v56 = vmax.f32 %v3265_v57, %v3430_v24  ;;  %v3825_v24 = vpop.permute.xlu1 %3824 }
 0x24e   :  { %v3432_v26 = vpop.f32.mrf.mxu0  ;;  %v3671_v46 = vpop.f32.mrf.mxu1 }
 0x24f   :  { %v3775_v10 = vmax.f32 %v3514_v28, %v3671_v46  ;;  %v19752_v46 = vmax.f32 %v16902_v47, %v17045_v39  ;;  %v3272_v47 = vmax.f32 %v17056_v41, %v17163_v48  ;;  %v19753_v39 = vmax.f32 %v16915_v52, %v17058_v4 }
 0x250   :  { %v3434_v15 = vpop.f32.mrf.mxu0  ;;  %v3673_v16 = vpop.f32.mrf.mxu1  ;;  %v3520_v4 = vmax.f32 %v3259_v55, %v3420_v33  ;;  %v3524_v55 = vmax.f32 %v3263_v40, %v3426_v50  ;;  %v19758_v33 = vld [vmem:[#allocation393_spill] sm:$0xff]  ;;  %v17246_v6 = vmax.f32 %v3266_v36, %v3432_v26  ;;  %v19764_v50 = vld [vmem:[#allocation394_spill] sm:$0xff]  ;;  %v19765_v40 = vld [vmem:[#allocation396_spill] sm:$0xff] }
 0x251   :  { %v3517_v43 = vmax.f32 %v19752_v46, %v3414_v8  ;;  %v3847_v7 = vadd.f32 %v17187_v37, %v3775_v10  ;;  %v3776_v13 = vmax.f32 %v3515_v38, %v3673_v16  ;;  %v3518_v61 = vmax.f32 %v19753_v39, %v3416_v51  ;;  %v19761_v46 = vld [vmem:[#allocation402_spill] sm:$0xff] }
 0x252   :  { %v3436_v12 = vpop.f32.mrf.mxu0  ;;  %v3675_v42 = vpop.f32.mrf.mxu1  ;;  %v17229_v8 = vmax.f32 %v19754_v17, %v13619_v3  ;;  %v17231_v38 = vmax.f32 %v3267_v14, %v3499_v35  ;;  %v19757_v10 = vmax.f32 %v19755_v9, %v19756_v58  ;;  %v19760_v21 = vmax.f32 %v19758_v33, %v19759_v18 }
 0x253   :  { %v3848_v63 = vadd.f32 %v17187_v37, %v3776_v13  ;;  %v3778_v49 = vmax.f32 %v3517_v43, %v3675_v42  ;;  %v3871_v32 = vmax.f32 %v3847_v7, 0.0  ;;  %v19762_v43 = vld [vmem:[#allocation399_spill] sm:$0xff]  ;;  %v19766_v13 = vmax.f32 %v19764_v50, %v19765_v40  ;;  %v17277_v33 = vpop.permute.xlu0 %3829 }
 0x254   :  { %v3440_v60 = vpop.f32.mrf.mxu0  ;;  %v3677_v11 = vpop.f32.mrf.mxu1  ;;  %v17237_v53 = vmax.f32 %v19757_v10, %v13620_v19  ;;  %v17242_v3 = vmax.f32 %v19760_v21, %v3502_v25  ;;  %v19763_v19 = vmax.f32 %v19761_v46, %v19762_v43 }
 0x255   :  { %v3872_v41 = vmax.f32 %v3848_v63, 0.0  ;;  %v3850_v28 = vadd.f32 %v17216_v34, %v3778_v49  ;;  %v3779_v52 = vmax.f32 %v3518_v61, %v3677_v11  ;;  %v17256_v25 = vmax.f32 %v19766_v13, %v3436_v12  ;;  %v19767_v49 = vld [vmem:[#allocation403_spill] sm:$0xff]  ;;  %v19768_v11 = vld [vmem:[#allocation404_spill] sm:$0xff] }
 0x256   :  { %v3442_v0 = vpop.f32.mrf.mxu0  ;;  %v3681_v51 = vpop.f32.mrf.mxu1  ;;  %v17251_v7 = vmax.f32 %v19763_v19, %v3434_v15  ;;  %v17262_v63 = vmax.f32 %v3271_v29, %v3440_v60 }
 0x257   :  { %v3898_v48 = vcombine.low %v3871_v32, %v3872_v41  ;;  %v3943_v27 = vcombine.high %v3871_v32, %v3872_v41  ;;  %v3851_v31 = vadd.f32 %v17216_v34, %v3779_v52  ;;  %v3781_v35 = vmax.f32 %v3520_v4, %v3681_v51  ;;  %v19770_v4 = vld [vmem:[#allocation407_spill] sm:$0xff] }
 0x258   :  { %v3444_v2 = vpop.f32.mrf.mxu0  ;;  %v3683_v45 = vpop.f32.mrf.mxu1  ;;  %v3874_v16 = vmax.f32 %v3850_v28, 0.0  ;;  %v17264_v15 = vmax.f32 %v3272_v47, %v3442_v0  ;;  %v19769_v32 = vmax.f32 %v19767_v49, %v19768_v11 }
 0x259   :  { %v3875_v62 = vmax.f32 %v3851_v31, 0.0  ;;  %v3853_v59 = vadd.f32 %v3820_v44, %v3781_v35  ;;  %v3782_v14 = vmax.f32 %v3521_v22, %v3683_v45  ;;  %v3905_v17 = vrot.slane %v3898_v48, %v19770_v4 }
 0x25a   :  { %v17244_v20 = vpop.f32.mrf.mxu0  ;;  %v3685_v42 = vpop.f32.mrf.mxu1  ;;  %v17269_v12 = vmax.f32 %v19769_v32, %v3444_v2  ;;  %v17273_v22 = vrot.slane %v3943_v27, %v19770_v4 }
 0x25b   :  { %v17258_v57 = vcombine.low %v3874_v16, %v3875_v62  ;;  %v17260_v26 = vcombine.high %v3874_v16, %v3875_v62  ;;  %v3784_v36 = vmax.f32 %v3523_v23, %v3685_v42  ;;  %v3854_v41 = vadd.f32 %v3820_v44, %v3782_v14 }
 0x25c   :  { %v13633_v39 = vpop.f32.mrf.mxu0  ;;  %v3687_v28 = vpop.f32.mrf.mxu1 }
 0x25d   :  { %v3783_v61 = vmax.f32 %v3522_v54, %v13633_v39  ;;  %v3856_v51 = vadd.f32 %v3825_v24, %v3784_v36  ;;  %v3877_v54 = vmax.f32 %v3853_v59, 0.0  ;;  %v3878_v29 = vmax.f32 %v3854_v41, 0.0 }
 0x25e   :  { %v3744_v52 = vpop.f32.mrf.mxu0  ;;  %v3785_v60 = vmax.f32 %v3524_v55, %v3687_v28  ;;  %v3691_v0 = vpop.f32.mrf.mxu1 }
 0x25f   :  { %v3855_v23 = vadd.f32 %v3820_v44, %v3783_v61  ;;  %v3777_v47 = vmax.f32 %v17219_v1, %v3744_v52  ;;  %v3880_v9 = vmax.f32 %v3856_v51, 0.0  ;;  %v3787_v58 = vmax.f32 %v3526_v56, %v3691_v0 }
 0x260   :  { %v13634_v31 = vpop.f32.mrf.mxu0  ;;  %v4086_v48 = vcombine.low %v3877_v54, %v3878_v29  ;;  %v4131_v18 = vcombine.high %v3877_v54, %v3878_v29  ;;  %v3857_v27 = vadd.f32 %v3825_v24, %v3785_v60  ;;  %v3693_v35 = vpop.f32.mrf.mxu1 }
 0x261   :  { %v3879_v2 = vmax.f32 %v3855_v23, 0.0  ;;  %v3786_v10 = vmax.f32 %v17221_v30, %v13634_v31  ;;  %v3849_v21 = vadd.f32 %v17187_v37, %v3777_v47  ;;  %v17282_v1 = vadd.f32 %v17277_v33, %v3787_v58 }
 0x262   :  { %v4093_v16 = vrot.slane %v4086_v48, %v19770_v4  ;;  %v4139_v56 = vrot.slane %v4131_v18, %v19770_v4  ;;  %v3881_v30 = vmax.f32 %v3857_v27, 0.0  ;;  %v3788_v37 = vmax.f32 %v17246_v6, %v3693_v35  ;;  %v3747_v52 = vpop.f32.mrf.mxu0  ;;  %v17298_v51 = vpop.f32.mrf.mxu1 }
 0x263   :  { %v4100_v45 = vrot.slane %v3879_v2, %v19770_v4  ;;  %v4132_v55 = vcombine.high %v3879_v2, %v3879_v2  ;;  %v3858_v44 = vadd.f32 %v3825_v24, %v3786_v10  ;;  %v3873_v62 = vmax.f32 %v3849_v21, 0.0 }
 0x264   :  { %v3883_v43 = vmax.f32 %v17282_v1, 0.0  ;;  %v4180_v13 = vcombine.low %v3880_v9, %v3881_v30  ;;  %v4225_v59 = vcombine.high %v3880_v9, %v3881_v30  ;;  %v3860_v35 = vadd.f32 %v17277_v33, %v3788_v37 }
 0x265   :  { %v4146_v46 = vrot.slane %v4132_v55, %v19770_v4  ;;  %v3882_v19 = vmax.f32 %v3858_v44, 0.0  ;;  %v4101_v50 = vcombine.low %v4093_v16, %v4100_v45  ;;  %v4112_v40 = vcombine.high %v4093_v16, %v4100_v45  ;;  %v3697_v45 = vpop.f32.mrf.mxu1 }
 0x266   :  { %v3912_v39 = vrot.slane %v3873_v62, %v19770_v4  ;;  %v3944_v24 = vcombine.high %v3873_v62, %v3873_v62  ;;  %v4187_v49 = vrot.slane %v4180_v13, %v19770_v4  ;;  %v17294_v11 = vrot.slane %v4225_v59, %v19770_v4 }
 0x267   :  { %v4147_v14 = vcombine.low %v4139_v56, %v4146_v46  ;;  %v4158_v42 = vcombine.high %v4139_v56, %v4146_v46  ;;  %v4108_v36 = vrot.slane %v4101_v50, %v19770_v4  ;;  %v4119_v61 = vrot.slane %v4112_v40, %v19770_v4 }
 0x268   :  { %v3913_v41 = vcombine.low %v3905_v17, %v3912_v39  ;;  %v3924_v28 = vcombine.high %v3905_v17, %v3912_v39  ;;  %v3958_v60 = vrot.slane %v3944_v24, %v19770_v4  ;;  %v4194_v47 = vrot.slane %v3882_v19, %v19770_v4  ;;  %v3701_v39 = vpop.f32.mrf.mxu1  ;;  %v17353_v24 = vpop.permute.xlu1 %3834 }
 0x269   :  { %v4154_v6 = vrot.slane %v4147_v14, %v19770_v4  ;;  %v4165_v32 = vrot.slane %v4158_v42, %v19770_v4  ;;  %4111 = vst.msk [vmem:[#allocation3 + $0x61] ss:$2 sm:$0x7] %vm16757_vm2, %v4108_v36  ;;  %4122 = vst.msk [vmem:[#allocation3 + $0x67] ss:$2 sm:$0x7] %vm16757_vm2, %v4119_v61  ;;  %v4123_v54 = vcombine.high %v4108_v36, %v4108_v36 }
 0x26a   :  { %v4127_v29 = vcombine.high %v4119_v61, %v4119_v61  ;;  %v3920_v31 = vrot.slane %v3913_v41, %v19770_v4  ;;  %v3931_v9 = vrot.slane %v3924_v28, %v19770_v4  ;;  %v3959_v2 = vcombine.low %v17273_v22, %v3958_v60  ;;  %v19772_v36 = vld [vmem:[#allocation395_spill] sm:$0xff]  ;;  %v19773_v61 = vld [vmem:[#allocation398_spill] sm:$0xff] }
 0x26b   :  { %4157 = vst.msk [vmem:[#allocation3 + $0x79] ss:$2 sm:$0x7] %vm16757_vm2, %v4154_v6  ;;  %4168 = vst.msk [vmem:[#allocation3 + $0x7f] ss:$2 sm:$0x7] %vm16757_vm2, %v4165_v32  ;;  %v4169_v17 = vcombine.high %v4154_v6, %v4154_v6  ;;  %v4173_v0 = vcombine.high %v4165_v32, %v4165_v32  ;;  %v3970_v58 = vcombine.high %v17273_v22, %v3958_v60  ;;  %v13637_v22 = vpop.f32.mrf.mxu0 }
 0x26c   :  { %4126 = vst.msk [vmem:[#allocation3 + $0x6d] ss:$2 sm:$0x7] %vm16757_vm2, %v4123_v54  ;;  %4130 = vst.msk [vmem:[#allocation3 + $0x73] ss:$2 sm:$0x7] %vm16757_vm2, %v4127_v29  ;;  %v4195_v10 = vcombine.low %v4187_v49, %v4194_v47  ;;  %v4206_v48 = vcombine.high %v4187_v49, %v4194_v47  ;;  %v3935_v18 = vcombine.high %v3920_v31, %v3920_v31 }
 0x26d   :  { %4172 = vst.msk [vmem:[#allocation3 + $0x85] ss:$2 sm:$0x7] %vm16757_vm2, %v4169_v17  ;;  %4176 = vst.msk [vmem:[#allocation3 + $0x8b] ss:$2 sm:$0x7] %vm16757_vm2, %v4173_v0  ;;  %v3939_v27 = vcombine.high %v3931_v9, %v3931_v9  ;;  %v4226_v21 = vcombine.high %v3882_v19, %v3882_v19  ;;  %v3966_v55 = vrot.slane %v3959_v2, %v19770_v4  ;;  %v3760_v42 = vpop.f32.mrf.mxu0  ;;  %v3703_v17 = vpop.f32.mrf.mxu1 }
 0x26e   :  { %3923 = vst.msk [vmem:[#allocation3 + $0x1] ss:$2 sm:$0x7] %vm16757_vm2, %v3920_v31  ;;  %3934 = vst.msk [vmem:[#allocation3 + $0x7] ss:$2 sm:$0x7] %vm16757_vm2, %v3931_v9  ;;  %v3977_v44 = vrot.slane %v3970_v58, %v19770_v4  ;;  %v4202_v16 = vrot.slane %v4195_v10, %v19770_v4  ;;  %v4213_v56 = vrot.slane %v4206_v48, %v19770_v4 }
 0x26f   :  { %3938 = vst.msk [vmem:[#allocation3 + $0xd] ss:$2 sm:$0x7] %vm16757_vm2, %v3935_v18  ;;  %3942 = vst.msk [vmem:[#allocation3 + $0x13] ss:$2 sm:$0x7] %vm16757_vm2, %v3939_v27  ;;  %v4240_v30 = vrot.slane %v4226_v21, %v19770_v4  ;;  %v3780_v46 = vmax.f32 %v17223_v5, %v3747_v52  ;;  %v3790_v19 = vmax.f32 %v17251_v7, %v17298_v51  ;;  %v13638_v47 = vpop.f32.mrf.mxu0 }
 0x270   :  { %v3884_v62 = vmax.f32 %v3860_v35, 0.0  ;;  %3969 = vst.msk [vmem:[#allocation3 + $0x19] ss:$2 sm:$0x7] %vm16757_vm2, %v3966_v55  ;;  %v3981_v37 = vcombine.high %v3966_v55, %v3966_v55  ;;  %v3985_v50 = vcombine.high %v3977_v44, %v3977_v44  ;;  %v4217_v40 = vcombine.high %v4202_v16, %v4202_v16  ;;  %v3705_v55 = vpop.f32.mrf.mxu1 }
 0x271   :  { %3980 = vst.msk [vmem:[#allocation3 + $0x1f] ss:$2 sm:$0x7] %vm16757_vm2, %v3977_v44  ;;  %4205 = vst.msk [vmem:[#allocation3 + $0x91] ss:$2 sm:$0x7] %vm16757_vm2, %v4202_v16  ;;  %v4221_v13 = vcombine.high %v4213_v56, %v4213_v56  ;;  %v4241_v5 = vcombine.low %v17294_v11, %v4240_v30  ;;  %v4252_v7 = vcombine.high %v17294_v11, %v4240_v30 }
 0x272   :  { %4216 = vst.msk [vmem:[#allocation3 + $0x97] ss:$2 sm:$0x7] %vm16757_vm2, %v4213_v56  ;;  %v4274_v59 = vcombine.low %v3883_v43, %v3884_v62  ;;  %v4319_v14 = vcombine.high %v3883_v43, %v3884_v62  ;;  %v19774_v49 = vmax.f32 %v19772_v36, %v19773_v61  ;;  %3984 = vst.msk [vmem:[#allocation3 + $0x25] ss:$2 sm:$0x7] %vm16757_vm2, %v3981_v37 }
 0x273   :  { %3988 = vst.msk [vmem:[#allocation3 + $0x2b] ss:$2 sm:$0x7] %vm16757_vm2, %v3985_v50  ;;  %4220 = vst.msk [vmem:[#allocation3 + $0x9d] ss:$2 sm:$0x7] %vm16757_vm2, %v4217_v40  ;;  %v3852_v1 = vadd.f32 %v17216_v34, %v3780_v46  ;;  %v3795_v43 = vmax.f32 %v17229_v8, %v13637_v22  ;;  %v3791_v11 = vmax.f32 %v17256_v25, %v3697_v45  ;;  %v3763_v40 = vpop.f32.mrf.mxu0 }
 0x274   :  { %v17359_v6 = vmax.f32 %v19774_v49, %v17244_v20  ;;  %4224 = vst.msk [vmem:[#allocation3 + $0xa3] ss:$2 sm:$0x7] %vm16757_vm2, %v4221_v13  ;;  %v17372_v20 = vpop.permute.xlu0 %3839  ;;  %v3999_v32 = vrot.slane %v17258_v57, %v19770_v4  ;;  %v4248_v41 = vrot.slane %v4241_v5, %v19770_v4  ;;  %v4259_v28 = vrot.slane %v4252_v7, %v19770_v4  ;;  %v3845_v13 = vpop.permute.xlu1 %3844 }
 0x275   :  { %v3862_v52 = vadd.f32 %v17353_v24, %v3790_v19  ;;  %v4045_v51 = vrot.slane %v17260_v26, %v19770_v4  ;;  %v3876_v54 = vmax.f32 %v3852_v1, 0.0  ;;  %v3867_v34 = vadd.f32 %v17372_v20, %v3795_v43 }
 0x276   :  { %v3863_v8 = vadd.f32 %v17353_v24, %v3791_v11  ;;  %4251 = vst.msk [vmem:[#allocation3 + $0xa9] ss:$2 sm:$0x7] %vm16757_vm2, %v4248_v41  ;;  %4262 = vst.msk [vmem:[#allocation3 + $0xaf] ss:$2 sm:$0x7] %vm16757_vm2, %v4259_v28  ;;  %v4263_v25 = vcombine.high %v4248_v41, %v4248_v41  ;;  %v4267_v57 = vcombine.high %v4259_v28, %v4259_v28 }
 0x277   :  { %v3789_v29 = vmax.f32 %v17231_v38, %v3760_v42  ;;  %v3793_v60 = vmax.f32 %v17262_v63, %v3701_v39  ;;  %v4281_v26 = vrot.slane %v4274_v59, %v19770_v4  ;;  %v4006_v0 = vrot.slane %v3876_v54, %v19770_v4  ;;  %v3707_v42 = vpop.f32.mrf.mxu1 }
 0x278   :  { %v4038_v31 = vcombine.high %v3876_v54, %v3876_v54  ;;  %v3887_v9 = vmax.f32 %v3863_v8, 0.0  ;;  %4266 = vst.msk [vmem:[#allocation3 + $0xb5] ss:$2 sm:$0x7] %vm16757_vm2, %v4263_v25  ;;  %v3886_v2 = vmax.f32 %v3862_v52, 0.0  ;;  %v3891_v58 = vmax.f32 %v3867_v34, 0.0 }
 0x279   :  { %4270 = vst.msk [vmem:[#allocation3 + $0xbb] ss:$2 sm:$0x7] %vm16757_vm2, %v4267_v57  ;;  %v3861_v38 = vadd.f32 %v17277_v33, %v3789_v29  ;;  %v3865_v63 = vadd.f32 %v17372_v20, %v3793_v60  ;;  %v4007_v10 = vcombine.low %v3999_v32, %v4006_v0  ;;  %v4018_v48 = vcombine.high %v3999_v32, %v4006_v0 }
 0x27a   :  { %v4052_v18 = vrot.slane %v4038_v31, %v19770_v4  ;;  %v3798_v27 = vmax.f32 %v17237_v53, %v13638_v47  ;;  %v4368_v21 = vcombine.low %v3886_v2, %v3887_v9  ;;  %v4413_v35 = vcombine.high %v3886_v2, %v3887_v9 }
 0x27b   :  { %v3885_v22 = vmax.f32 %v3861_v38, 0.0  ;;  %v3794_v45 = vmax.f32 %v17264_v15, %v3703_v17  ;;  %v4014_v44 = vrot.slane %v4007_v10, %v19770_v4  ;;  %v4025_v16 = vrot.slane %v4018_v48, %v19770_v4 }
 0x27c   :  { %v4053_v56 = vcombine.low %v4045_v51, %v4052_v18  ;;  %v4064_v33 = vcombine.high %v4045_v51, %v4052_v18  ;;  %v4327_v30 = vrot.slane %v4319_v14, %v19770_v4  ;;  %v17404_v62 = vrot.slane %v3891_v58, %v19770_v4 }
 0x27d   :  { %v4508_v46 = vcombine.high %v3891_v58, %v3891_v58  ;;  %v4288_v53 = vrot.slane %v3885_v22, %v19770_v4  ;;  %4017 = vst.msk [vmem:[#allocation3 + $0x31] ss:$2 sm:$0x7] %vm16757_vm2, %v4014_v44  ;;  %4028 = vst.msk [vmem:[#allocation3 + $0x37] ss:$2 sm:$0x7] %vm16757_vm2, %v4025_v16  ;;  %v4029_v15 = vcombine.high %v4014_v44, %v4014_v44 }
 0x27e   :  { %v4033_v19 = vcombine.high %v4025_v16, %v4025_v16  ;;  %v4060_v37 = vrot.slane %v4053_v56, %v19770_v4  ;;  %v4071_v50 = vrot.slane %v4064_v33, %v19770_v4  ;;  %v4320_v59 = vcombine.high %v3885_v22, %v3885_v22 }
 0x27f   :  { %v4289_v5 = vcombine.low %v4281_v26, %v4288_v53  ;;  %v4300_v7 = vcombine.high %v4281_v26, %v4288_v53  ;;  %v3889_v14 = vmax.f32 %v3865_v63, 0.0  ;;  %4032 = vst.msk [vmem:[#allocation3 + $0x3d] ss:$2 sm:$0x7] %vm16757_vm2, %v4029_v15  ;;  %v3870_v61 = vadd.f32 %v3845_v13, %v3798_v27 }
 0x280   :  { %4036 = vst.msk [vmem:[#allocation3 + $0x43] ss:$2 sm:$0x7] %vm16757_vm2, %v4033_v19  ;;  %4063 = vst.msk [vmem:[#allocation3 + $0x49] ss:$2 sm:$0x7] %vm16757_vm2, %v4060_v37  ;;  %v4075_v39 = vcombine.high %v4060_v37, %v4060_v37  ;;  %v4079_v36 = vcombine.high %v4071_v50, %v4071_v50  ;;  %v3866_v49 = vadd.f32 %v17372_v20, %v3794_v45 }
 0x281   :  { %4074 = vst.msk [vmem:[#allocation3 + $0x4f] ss:$2 sm:$0x7] %vm16757_vm2, %v4071_v50  ;;  %v4296_v1 = vrot.slane %v4289_v5, %v19770_v4  ;;  %v4307_v43 = vrot.slane %v4300_v7, %v19770_v4  ;;  %v4334_v11 = vrot.slane %v4320_v59, %v19770_v4  ;;  %v3792_v32 = vmax.f32 %v17242_v3, %v3763_v40 }
 0x282   :  { %4078 = vst.msk [vmem:[#allocation3 + $0x55] ss:$2 sm:$0x7] %vm16757_vm2, %v4075_v39  ;;  %4082 = vst.msk [vmem:[#allocation3 + $0x5b] ss:$2 sm:$0x7] %vm16757_vm2, %v4079_v36  ;;  %v3796_v52 = vmax.f32 %v17269_v12, %v3705_v55  ;;  %v3797_v20 = vmax.f32 %v17359_v6, %v3707_v42  ;;  %v4522_v8 = vrot.slane %v4508_v46, %v19770_v4 }
 0x283   :  { %v17430_v41 = vmax.f32 %v3870_v61, 0.0  ;;  %v3890_v28 = vmax.f32 %v3866_v49, 0.0  ;;  %4299 = vst.msk [vmem:[#allocation3 + $0xc1] ss:$2 sm:$0x7] %vm16757_vm2, %v4296_v1  ;;  %v4311_v3 = vcombine.high %v4296_v1, %v4296_v1  ;;  %v4315_v51 = vcombine.high %v4307_v43, %v4307_v43 }
 0x284   :  { %4310 = vst.msk [vmem:[#allocation3 + $0xc7] ss:$2 sm:$0x7] %vm16757_vm2, %v4307_v43  ;;  %v4335_v54 = vcombine.low %v4327_v30, %v4334_v11  ;;  %v4346_v34 = vcombine.high %v4327_v30, %v4334_v11  ;;  %v4375_v25 = vrot.slane %v4368_v21, %v19770_v4  ;;  %v3864_v60 = vadd.f32 %v17353_v24, %v3792_v32 }
 0x285   :  { %v4462_v57 = vcombine.low %v3889_v14, %v3890_v28  ;;  %v4507_v29 = vcombine.high %v3889_v14, %v3890_v28  ;;  %4314 = vst.msk [vmem:[#allocation3 + $0xcd] ss:$2 sm:$0x7] %vm16757_vm2, %v4311_v3  ;;  %4318 = vst.msk [vmem:[#allocation3 + $0xd3] ss:$2 sm:$0x7] %vm16757_vm2, %v4315_v51  ;;  %v3868_v47 = vadd.f32 %v3845_v13, %v3796_v52 }
 0x286   :  { %v4342_v12 = vrot.slane %v4335_v54, %v19770_v4  ;;  %v4353_v6 = vrot.slane %v4346_v34, %v19770_v4  ;;  %v4421_v17 = vrot.slane %v4413_v35, %v19770_v4  ;;  %v3869_v31 = vadd.f32 %v3845_v13, %v3797_v20 }
 0x287   :  { %v4469_v26 = vrot.slane %v4462_v57, %v19770_v4  ;;  %v4515_v0 = vrot.slane %v4507_v29, %v19770_v4  ;;  %v4602_v58 = vcombine.high %v17430_v41, %v17430_v41  ;;  %v3888_v24 = vmax.f32 %v3864_v60, 0.0 }
 0x288   :  { %4345 = vst.msk [vmem:[#allocation3 + $0xd9] ss:$2 sm:$0x7] %vm16757_vm2, %v4342_v12  ;;  %4356 = vst.msk [vmem:[#allocation3 + $0xdf] ss:$2 sm:$0x7] %vm16757_vm2, %v4353_v6  ;;  %v4357_v9 = vcombine.high %v4342_v12, %v4342_v12  ;;  %v4361_v2 = vcombine.high %v4353_v6, %v4353_v6  ;;  %v4570_v13 = vrot.slane %v17430_v41, %v19770_v4 }
 0x289   :  { %v4477_v38 = vcombine.low %v4469_v26, %v17404_v62  ;;  %v4488_v63 = vcombine.high %v4469_v26, %v17404_v62  ;;  %v4523_v10 = vcombine.low %v4515_v0, %v4522_v8  ;;  %v4534_v48 = vcombine.high %v4515_v0, %v4522_v8 }
 0x28a   :  { %4360 = vst.msk [vmem:[#allocation3 + $0xe5] ss:$2 sm:$0x7] %vm16757_vm2, %v4357_v9  ;;  %4364 = vst.msk [vmem:[#allocation3 + $0xeb] ss:$2 sm:$0x7] %vm16757_vm2, %v4361_v2  ;;  %v4382_v18 = vrot.slane %v3888_v24, %v19770_v4  ;;  %v4414_v27 = vcombine.high %v3888_v24, %v3888_v24  ;;  %v4616_v36 = vrot.slane %v4602_v58, %v19770_v4 }
 0x28b   :  { %v3892_v21 = vmax.f32 %v3868_v47, 0.0  ;;  %v3893_v35 = vmax.f32 %v3869_v31, 0.0  ;;  %v4484_v22 = vrot.slane %v4477_v38, %v19770_v4  ;;  %v4495_v45 = vrot.slane %v4488_v63, %v19770_v4 }
 0x28c   :  { %v4530_v55 = vrot.slane %v4523_v10, %v19770_v4  ;;  %v4541_v44 = vrot.slane %v4534_v48, %v19770_v4  ;;  %v4383_v16 = vcombine.low %v4375_v25, %v4382_v18  ;;  %v4394_v56 = vcombine.high %v4375_v25, %v4382_v18 }
 0x28d   :  { %v4428_v33 = vrot.slane %v4414_v27, %v19770_v4  ;;  %v4556_v30 = vcombine.low %v3892_v21, %v3893_v35  ;;  %4487 = vst.msk [vmem:[#allocation3 + $0x121] ss:$2 sm:$0x7] %vm16757_vm2, %v4484_v22  ;;  %4498 = vst.msk [vmem:[#allocation3 + $0x127] ss:$2 sm:$0x7] %vm16757_vm2, %v4495_v45  ;;  %v4499_v62 = vcombine.high %v4484_v22, %v4484_v22 }
 0x28e   :  { %v4503_v46 = vcombine.high %v4495_v45, %v4495_v45  ;;  %4533 = vst.msk [vmem:[#allocation3 + $0x139] ss:$2 sm:$0x7] %vm16757_vm2, %v4530_v55  ;;  %4544 = vst.msk [vmem:[#allocation3 + $0x13f] ss:$2 sm:$0x7] %vm16757_vm2, %v4541_v44  ;;  %v4545_v53 = vcombine.high %v4530_v55, %v4530_v55  ;;  %v4549_v15 = vcombine.high %v4541_v44, %v4541_v44 }
 0x28f   :  { %v4390_v19 = vrot.slane %v4383_v16, %v19770_v4  ;;  %v4401_v37 = vrot.slane %v4394_v56, %v19770_v4  ;;  %v4429_v50 = vcombine.low %v4421_v17, %v4428_v33  ;;  %v4440_v40 = vcombine.high %v4421_v17, %v4428_v33  ;;  %4502 = vst.msk [vmem:[#allocation3 + $0x12d] ss:$2 sm:$0x7] %vm16757_vm2, %v4499_v62 }
 0x290   :  { %4506 = vst.msk [vmem:[#allocation3 + $0x133] ss:$2 sm:$0x7] %vm16757_vm2, %v4503_v46  ;;  %4548 = vst.msk [vmem:[#allocation3 + $0x145] ss:$2 sm:$0x7] %vm16757_vm2, %v4545_v53  ;;  %v4563_v5 = vrot.slane %v4556_v30, %v19770_v4  ;;  %v4601_v7 = vcombine.high %v3892_v21, %v3893_v35 }
 0x291   :  { %4552 = vst.msk [vmem:[#allocation3 + $0x14b] ss:$2 sm:$0x7] %vm16757_vm2, %v4549_v15  ;;  %4393 = vst.msk [vmem:[#allocation3 + $0xf1] ss:$2 sm:$0x7] %vm16757_vm2, %v4390_v19  ;;  %v4405_v59 = vcombine.high %v4390_v19, %v4390_v19  ;;  %v4409_v14 = vcombine.high %v4401_v37, %v4401_v37  ;;  %v4436_v42 = vrot.slane %v4429_v50, %v19770_v4 }
 0x292   :  { %4404 = vst.msk [vmem:[#allocation3 + $0xf7] ss:$2 sm:$0x7] %vm16757_vm2, %v4401_v37  ;;  %v4447_v39 = vrot.slane %v4440_v40, %v19770_v4  ;;  %v4571_v61 = vcombine.low %v4563_v5, %v4570_v13  ;;  %v4582_v49 = vcombine.high %v4563_v5, %v4570_v13  ;;  %v4609_v1 = vrot.slane %v4601_v7, %v19770_v4 }
 0x293   :  { %4408 = vst.msk [vmem:[#allocation3 + $0xfd] ss:$2 sm:$0x7] %vm16757_vm2, %v4405_v59  ;;  %4412 = vst.msk [vmem:[#allocation3 + $0x103] ss:$2 sm:$0x7] %vm16757_vm2, %v4409_v14  ;;  %v4451_v43 = vcombine.high %v4436_v42, %v4436_v42 }
 0x294   :  { %4439 = vst.msk [vmem:[#allocation3 + $0x109] ss:$2 sm:$0x7] %vm16757_vm2, %v4436_v42  ;;  %4450 = vst.msk [vmem:[#allocation3 + $0x10f] ss:$2 sm:$0x7] %vm16757_vm2, %v4447_v39  ;;  %v4455_v11 = vcombine.high %v4447_v39, %v4447_v39  ;;  %v4578_v32 = vrot.slane %v4571_v61, %v19770_v4  ;;  %v4589_v41 = vrot.slane %v4582_v49, %v19770_v4 }
 0x295   :  { %v4617_v28 = vcombine.low %v4609_v1, %v4616_v36  ;;  %v4628_v52 = vcombine.high %v4609_v1, %v4616_v36  ;;  %4454 = vst.msk [vmem:[#allocation3 + $0x115] ss:$2 sm:$0x7] %vm16757_vm2, %v4451_v43 }
 0x296   :  { %4458 = vst.msk [vmem:[#allocation3 + $0x11b] ss:$2 sm:$0x7] %vm16757_vm2, %v4455_v11  ;;  %4581 = vst.msk [vmem:[#allocation3 + $0x151] ss:$2 sm:$0x7] %vm16757_vm2, %v4578_v32  ;;  %v4593_v20 = vcombine.high %v4578_v32, %v4578_v32  ;;  %v4597_v3 = vcombine.high %v4589_v41, %v4589_v41 }
 0x297   :  { %4592 = vst.msk [vmem:[#allocation3 + $0x157] ss:$2 sm:$0x7] %vm16757_vm2, %v4589_v41  ;;  %v4624_v51 = vrot.slane %v4617_v28, %v19770_v4  ;;  %v4635_v54 = vrot.slane %v4628_v52, %v19770_v4 }
 0x298   :  { %4596 = vst.msk [vmem:[#allocation3 + $0x15d] ss:$2 sm:$0x7] %vm16757_vm2, %v4593_v20  ;;  %4600 = vst.msk [vmem:[#allocation3 + $0x163] ss:$2 sm:$0x7] %vm16757_vm2, %v4597_v3 }
 0x299   :  { %4627 = vst.msk [vmem:[#allocation3 + $0x169] ss:$2 sm:$0x7] %vm16757_vm2, %v4624_v51  ;;  %4638 = vst.msk [vmem:[#allocation3 + $0x16f] ss:$2 sm:$0x7] %vm16757_vm2, %v4635_v54  ;;  %v4639_v34 = vcombine.high %v4624_v51, %v4624_v51  ;;  %v4643_v8 = vcombine.high %v4635_v54, %v4635_v54 }
 0x29b   :  { %4642 = vst.msk [vmem:[#allocation3 + $0x175] ss:$2 sm:$0x7] %vm16757_vm2, %v4639_v34  ;;  %4646 = vst.msk [vmem:[#allocation3 + $0x17b] ss:$2 sm:$0x7] %vm16757_vm2, %v4643_v8 }
 0x29c   :  { %13812 = dma.done.wait [#allocation4], 49152 }
 0x29d   :  { %13813 = vsyncadd [#allocation4], 4294918144  ;;  %v19775_v4 = vld [vmem:[#allocation296_spill] sm:$0xff]  ;;  %v13816_v12 = vmov 0.0   ;;  %vm13817_vm3 = vmmov 0   ;;  %vm6337_vm4 = vcmask 1041408  }
 0x29e   :  { %v19776_v25 = vld [vmem:[#allocation200_spill] sm:$0xff]  ;;  %13639 = vmatprep.subr.mxu0 %v13816_v12  ;;  %13641 = vmatprep.mubr.msk.f32.mxu0 %vm13817_vm3, %v13816_v12  ;;  %v13818_v23 = vmov 1983009808   ;;  %v19779_v26 = vld [vmem:[#allocation297_spill] sm:$0xff]  ;;  %vm6333_vm5 = vcmask 15360   ;;  %v19781_v10 = vld [vmem:[#allocation406_spill] sm:$0xff] }
 0x29f   :  { %v13188_v57 = vcombine.high %v19776_v25, %v19775_v4  ;;  %v13187_v29 = vcombine.low %v19776_v25, %v19775_v4  ;;  %v19777_v6 = vld [vmem:[#allocation104_spill] sm:$0xff]  ;;  %v4749_v17 = vunpack.c.l.s4 %v13818_v23  ;;  %v19780_v0 = vld [vmem:[#allocation201_spill] sm:$0xff]  ;;  %v19784_v22 = vld [vmem:[#allocation298_spill] sm:$0xff]  ;;  %vm12191_vm6 = vcmask 261120   ;;  %s13819_s26 = smov 64  }
 0x2a0   :  { %v19778_v60 = vld [vmem:[#allocation8_spill] sm:$0xff]  ;;  %v13190_v31 = vcombine.high %v19780_v0, %v19779_v26  ;;  %v13189_v2 = vcombine.low %v19780_v0, %v19779_v26  ;;  %v19782_v18 = vld [vmem:[#allocation105_spill] sm:$0xff]  ;;  %v19785_v45 = vld [vmem:[#allocation202_spill] sm:$0xff]  ;;  %vm12474_vm7 = vcmask 1040384   ;;  %vm12700_vm8 = vcmask 818176  }
 0x2a1   :  { %v12996_v47 = vcombine.high %v19778_v60, %v19777_v6  ;;  %8343 = vmatprep.subr.bf16.mxu1 %v13188_v57  ;;  %v4750_v9 = vunpack.c.0.s8 %v4749_v17  ;;  %v6332_v58 = vld [vmem:[%s18874_s5] sm:$0x3]  ;;  %v12995_v38 = vcombine.low %v19778_v60, %v19777_v6  ;;  %v19783_v27 = vld [vmem:[#allocation9_spill] sm:$0xff]  ;;  %v13192_v55 = vcombine.high %v19785_v45, %v19784_v22  ;;  %v19788_v14 = vld [vmem:[#allocation106_spill] sm:$0xff] }
 0x2a2   :  { %8344 = vmatpush1.bf16.xpose.msra.mxu1 %v13187_v29  ;;  %v6331_v24 = vld [vmem:[%s18873_s4] sm:$0x3]  ;;  %v12998_v21 = vcombine.high %v19783_v27, %v19782_v18  ;;  %13640 = vmatpush3.msk.msra.mxu0 %vm6337_vm4, %v6332_v58  ;;  %v4652_v44 = vld [vmem:[#allocation3 + $0x8] sm:$0xff]  ;;  %v12997_v37 = vcombine.low %v19783_v27, %v19782_v18  ;;  %v13191_v13 = vcombine.low %v19785_v45, %v19784_v22  ;;  %v19789_v42 = vld [vmem:[#allocation10_spill] sm:$0xff]  ;;  %vm12777_vm9 = vcmask 1024  }
 0x2a3   :  { %8345 = vmatprep.subr.bf16.mxu1 %v12996_v47  ;;  %v4651_v63 = vld [vmem:[#allocation3] sm:$0xff]  ;;  %v17551_v48 = vsub.s32 %v4750_v9, %v19781_v10  ;;  %13642 = vmatmul.mubr.msk.f32.vlgmr.msra.gmra.mxu0 %vm6333_vm5, %v6331_v24  ;;  %v4764_v30 = vcombine.high %v4652_v44, %v4652_v44  ;;  %v13000_v39 = vcombine.high %v19789_v42, %v19788_v14  ;;  %v4653_v1 = vld [vmem:[#allocation3 + $0x10] sm:$0xff] }
 0x2a4   :  { %v4747_v35 = vcombine.high %v4651_v63, %v4651_v63  ;;  %8383 = vmatprep.subr.bf16.mxu0 %v13190_v31  ;;  %v19786_v5 = vld [vmem:[#allocation299_spill] sm:$0xff]  ;;  %v12999_v32 = vcombine.low %v19789_v42, %v19788_v14  ;;  %v19792_v20 = vld [vmem:[#allocation300_spill] sm:$0xff]  ;;  %v4781_v34 = vcombine.high %v4653_v1, %v4653_v1  ;;  %v19794_v6 = vld [vmem:[#allocation301_spill] sm:$0xff] }
 0x2a5   :  { %v4754_v16 = vrot.slane %v4651_v63, %v17551_v48  ;;  %v4771_v56 = vrot.slane %v4652_v44, %v17551_v48  ;;  %8384 = vmatpush1.bf16.xpose.msra.mxu0 %v13189_v2  ;;  %v4778_v40 = vrot.slane %v4764_v30, %v17551_v48  ;;  %v19787_v7 = vld [vmem:[#allocation203_spill] sm:$0xff]  ;;  %v19793_v3 = vld [vmem:[#allocation204_spill] sm:$0xff]  ;;  %v4788_v54 = vrot.slane %v4653_v1, %v17551_v48  ;;  %v19795_v60 = vld [vmem:[#allocation205_spill] sm:$0xff] }
 0x2a6   :  { %v4761_v33 = vrot.slane %v4747_v35, %v17551_v48  ;;  %8385 = vmatprep.subr.bf16.mxu0 %v12998_v21  ;;  %v13194_v59 = vcombine.high %v19787_v7, %v19786_v5  ;;  %v13193_v43 = vcombine.low %v19787_v7, %v19786_v5  ;;  %v19790_v41 = vld [vmem:[#allocation107_spill] sm:$0xff]  ;;  %v13196_v51 = vcombine.high %v19793_v3, %v19792_v20  ;;  %v19796_v23 = vld [vmem:[#allocation108_spill] sm:$0xff]  ;;  %v19798_v63 = vld [vmem:[#allocation109_spill] sm:$0xff] }
 0x2a7   :  { %v4762_v62 = vcombine.high %v4754_v16, %v4754_v16  ;;  %v4779_v53 = vcombine.high %v4771_v56, %v4771_v56  ;;  %v5755_v19 = vpack.c.bf16 %v4754_v16, %v4754_v16  ;;  %v4780_v61 = vcombine.high %v4778_v40, %v4778_v40  ;;  %v19791_v28 = vld [vmem:[#allocation11_spill] sm:$0xff]  ;;  %v19797_v17 = vld [vmem:[#allocation12_spill] sm:$0xff]  ;;  %v19799_v18 = vld [vmem:[#allocation13_spill] sm:$0xff] }
 0x2a8   :  { %v4763_v46 = vcombine.high %v4761_v33, %v4761_v33  ;;  %v5757_v49 = vpack.c.bf16 %v4761_v33, %v4761_v33  ;;  %v13002_v52 = vcombine.high %v19791_v28, %v19790_v41  ;;  %v4796_v8 = vcombine.high %v4788_v54, %v4788_v54  ;;  %v4654_v2 = vld [vmem:[#allocation3 + $0x18] sm:$0xff]  ;;  %v4655_v5 = vld [vmem:[#allocation3 + $0x20] sm:$0xff] }
 0x2a9   :  { %v5756_v15 = vpack.c.bf16 %v4762_v62, %v4762_v62  ;;  %v5760_v36 = vpack.c.bf16 %v4779_v53, %v4779_v53  ;;  %v5762_v11 = vpack.c.bf16 %v4780_v61, %v4780_v61  ;;  %v5759_v4 = vpack.c.bf16 %v4771_v56, %v4771_v56  ;;  %v19800_v21 = vld [vmem:[#allocation302_spill] sm:$0xff]  ;;  %v19802_v62 = vld [vmem:[#allocation303_spill] sm:$0xff]  ;;  %v19808_v61 = vld [vmem:[#allocation304_spill] sm:$0xff] }
 0x2aa   :  { %8346 = vmatpush1.bf16.xpose.msra.mxu1 %v12995_v38  ;;  %v5758_v50 = vpack.c.bf16 %v4763_v46, %v4763_v46  ;;  %v13001_v25 = vcombine.low %v19791_v28, %v19790_v41  ;;  %v4795_v57 = vrot.slane %v4781_v34, %v17551_v48  ;;  %v13195_v29 = vcombine.low %v19793_v3, %v19792_v20  ;;  %v19801_v35 = vld [vmem:[#allocation206_spill] sm:$0xff]  ;;  %v19803_v46 = vld [vmem:[#allocation207_spill] sm:$0xff]  ;;  %v19810_v3 = vld [vmem:[#allocation305_spill] sm:$0xff] }
 0x2ab   :  { %8423 = vmatprep.subr.bf16.mxu1 %v13192_v55  ;;  %8363 = vmatprep.mubr.bf16.mxu1 %v5756_v15  ;;  %v13198_v47 = vcombine.high %v19795_v60, %v19794_v6  ;;  %v13004_v26 = vcombine.high %v19797_v17, %v19796_v23  ;;  %v5764_v0 = vpack.c.bf16 %v4796_v8, %v4796_v8  ;;  %v19804_v15 = vld [vmem:[#allocation110_spill] sm:$0xff]  ;;  %v19806_v42 = vld [vmem:[#allocation111_spill] sm:$0xff]  ;;  %v19812_v34 = vld [vmem:[#allocation112_spill] sm:$0xff] }
 0x2ac   :  { %8403 = vmatprep.mubr.bf16.mxu0 %v5758_v50  ;;  %v4797_v31 = vcombine.high %v4795_v57, %v4795_v57  ;;  %v5761_v9 = vpack.c.bf16 %v4778_v40, %v4778_v40  ;;  %v13197_v58 = vcombine.low %v19795_v60, %v19794_v6  ;;  %v13003_v38 = vcombine.low %v19797_v17, %v19796_v23  ;;  %v19813_v8 = vld [vmem:[#allocation16_spill] sm:$0xff]  ;;  %v19814_v17 = vld [vmem:[#allocation113_spill] sm:$0xff] }
 0x2ad   :  { %8386 = vmatpush1.bf16.xpose.msra.mxu0 %v12997_v37  ;;  %v13006_v27 = vcombine.high %v19799_v18, %v19798_v63  ;;  %v13200_v22 = vcombine.high %v19801_v35, %v19800_v21  ;;  %v4805_v45 = vrot.slane %v4654_v2, %v17551_v48  ;;  %v4798_v55 = vcombine.high %v4654_v2, %v4654_v2  ;;  %v4656_v6 = vld [vmem:[#allocation3 + $0x28] sm:$0xff] }
 0x2ae   :  { %8463 = vmatprep.subr.bf16.mxu0 %v13194_v59  ;;  %v5766_v24 = vpack.c.bf16 %v4797_v31, %v4797_v31  ;;  %v5763_v16 = vpack.c.bf16 %v4788_v54, %v4788_v54  ;;  %v13005_v56 = vcombine.low %v19799_v18, %v19798_v63  ;;  %v13199_v30 = vcombine.low %v19801_v35, %v19800_v21  ;;  %v19816_v31 = vld [vmem:[#allocation306_spill] sm:$0xff]  ;;  %v19818_v35 = vld [vmem:[#allocation307_spill] sm:$0xff] }
 0x2af   :  { %v4813_v44 = vcombine.high %v4805_v45, %v4805_v45  ;;  %v4812_v33 = vrot.slane %v4798_v55, %v17551_v48  ;;  %v13202_v53 = vcombine.high %v19803_v46, %v19802_v62  ;;  %v13201_v7 = vcombine.low %v19803_v46, %v19802_v62  ;;  %v19820_v55 = vld [vmem:[#allocation114_spill] sm:$0xff] }
 0x2b0   :  { %v5767_v41 = vpack.c.bf16 %v4805_v45, %v4805_v45  ;;  %v13011_v23 = vcombine.low %v19813_v8, %v19812_v34  ;;  %v4657_v62 = vld [vmem:[#allocation3 + $0x30] sm:$0xff] }
 0x2b1   :  { %8364 = vmatmul.mubr.bf16.vlgmr.msra.gmra.mxu1 %v5755_v19  ;;  %v19805_v19 = vld [vmem:[#allocation14_spill] sm:$0xff]  ;;  %v5768_v50 = vpack.c.bf16 %v4813_v44, %v4813_v44  ;;  %v4814_v40 = vcombine.high %v4812_v33, %v4812_v33 }
 0x2b2   :  { %8424 = vmatpush1.bf16.xpose.msra.mxu1 %v13191_v13  ;;  %8443 = vmatprep.mubr.bf16.mxu1 %v5760_v36  ;;  %v13008_v37 = vcombine.high %v19805_v19, %v19804_v15  ;;  %v5765_v13 = vpack.c.bf16 %v4795_v57, %v4795_v57  ;;  %v13007_v14 = vcombine.low %v19805_v19, %v19804_v15  ;;  %v19821_v44 = vld [vmem:[#allocation18_spill] sm:$0xff]  ;;  %v19822_v19 = vld [vmem:[#allocation115_spill] sm:$0xff] }
 0x2b3   :  { %8425 = vmatprep.subr.bf16.mxu1 %v13000_v39  ;;  %v5770_v59 = vpack.c.bf16 %v4814_v40, %v4814_v40  ;;  %v19807_v39 = vld [vmem:[#allocation15_spill] sm:$0xff]  ;;  %v13015_v15 = vcombine.low %v19821_v44, %v19820_v55  ;;  %v19824_v40 = vld [vmem:[#allocation308_spill] sm:$0xff] }
 0x2b4   :  { %8404 = vmatmul.mubr.bf16.vlgmr.msra.gmra.mxu0 %v5757_v49  ;;  %v13010_v36 = vcombine.high %v19807_v39, %v19806_v42  ;;  %v19809_v49 = vld [vmem:[#allocation208_spill] sm:$0xff]  ;;  %v13009_v28 = vcombine.low %v19807_v39, %v19806_v42 }
 0x2b5   :  { %8464 = vmatpush1.bf16.xpose.msra.mxu0 %v13193_v43  ;;  %8483 = vmatprep.mubr.bf16.mxu0 %v5762_v11  ;;  %v13204_v1 = vcombine.high %v19809_v49, %v19808_v61  ;;  %v4822_v43 = vrot.slane %v4655_v5, %v17551_v48  ;;  %v4815_v11 = vcombine.high %v4655_v5, %v4655_v5 }
 0x2b6   :  { %8465 = vmatprep.subr.bf16.mxu0 %v13002_v52  ;;  %v13203_v20 = vcombine.low %v19809_v49, %v19808_v61  ;;  %v19826_v49 = vld [vmem:[#allocation309_spill] sm:$0xff] }
 0x2b7   :  { %v4829_v52 = vrot.slane %v4815_v11, %v17551_v48  ;;  %v5771_v63 = vpack.c.bf16 %v4822_v43, %v4822_v43  ;;  %v19828_v11 = vld [vmem:[#allocation116_spill] sm:$0xff] }
 0x2b9   :  { %v4831_v57 = vcombine.high %v4829_v52, %v4829_v52 }
 0x2ba   :  { %8426 = vmatpush1.bf16.xpose.msra.mxu1 %v12999_v32  ;;  %v4830_v32 = vcombine.high %v4822_v43, %v4822_v43 }
 0x2bb   :  { %8503 = vmatprep.subr.bf16.mxu1 %v13196_v51  ;;  %v19811_v51 = vld [vmem:[#allocation209_spill] sm:$0xff] }
 0x2bc   :  { %v13206_v54 = vcombine.high %v19811_v51, %v19810_v3  ;;  %v13205_v60 = vcombine.low %v19811_v51, %v19810_v3  ;;  %v4658_v3 = vld [vmem:[#allocation3 + $0x38] sm:$0xff] }
 0x2bd   :  { %8466 = vmatpush1.bf16.xpose.msra.mxu0 %v13001_v25  ;;  %v5772_v25 = vpack.c.bf16 %v4830_v32, %v4830_v32  ;;  %v19829_v32 = vld [vmem:[#allocation20_spill] sm:$0xff] }
 0x2be   :  { %8543 = vmatprep.subr.bf16.mxu0 %v13198_v47  ;;  %v5774_v47 = vpack.c.bf16 %v4831_v57, %v4831_v57  ;;  %v19832_v57 = vld [vmem:[#allocation310_spill] sm:$0xff] }
 0x2c1   :  { %8444 = vmatmul.mubr.bf16.vlgmr.msra.gmra.mxu1 %v5759_v4  ;;  %v13012_v4 = vcombine.high %v19813_v8, %v19812_v34  ;;  %v13019_v34 = vcombine.low %v19829_v32, %v19828_v11  ;;  %v19830_v8 = vld [vmem:[#allocation117_spill] sm:$0xff] }
 0x2c2   :  { %8504 = vmatpush1.bf16.xpose.msra.mxu1 %v13195_v29  ;;  %8523 = vmatprep.mubr.bf16.mxu1 %v5764_v0  ;;  %v5769_v29 = vpack.c.bf16 %v4812_v33, %v4812_v33 }
 0x2c3   :  { %8505 = vmatprep.subr.bf16.mxu1 %v13004_v26  ;;  %v19815_v26 = vld [vmem:[#allocation17_spill] sm:$0xff] }
 0x2c4   :  { %8484 = vmatmul.mubr.bf16.vlgmr.msra.gmra.mxu0 %v5761_v9  ;;  %v13014_v0 = vcombine.high %v19815_v26, %v19814_v17  ;;  %v19817_v9 = vld [vmem:[#allocation210_spill] sm:$0xff]  ;;  %v13013_v18 = vcombine.low %v19815_v26, %v19814_v17 }
 0x2c5   :  { %8544 = vmatpush1.bf16.xpose.msra.mxu0 %v13197_v58  ;;  %8563 = vmatprep.mubr.bf16.mxu0 %v5766_v24  ;;  %v13208_v2 = vcombine.high %v19817_v9, %v19816_v31  ;;  %v4839_v58 = vrot.slane %v4656_v6, %v17551_v48  ;;  %v4832_v24 = vcombine.high %v4656_v6, %v4656_v6 }
 0x2c6   :  { %8545 = vmatprep.subr.bf16.mxu0 %v13006_v27  ;;  %v13207_v21 = vcombine.low %v19817_v9, %v19816_v31  ;;  %v19834_v9 = vld [vmem:[#allocation311_spill] sm:$0xff] }
 0x2c7   :  { %v4846_v27 = vrot.slane %v4832_v24, %v17551_v48  ;;  %v5775_v42 = vpack.c.bf16 %v4839_v58, %v4839_v58  ;;  %v19836_v24 = vld [vmem:[#allocation118_spill] sm:$0xff] }
 0x2c9   :  { %v4848_v33 = vcombine.high %v4846_v27, %v4846_v27 }
 0x2ca   :  { %8506 = vmatpush1.bf16.xpose.msra.mxu1 %v13003_v38  ;;  %v4847_v38 = vcombine.high %v4839_v58, %v4839_v58 }
 0x2cb   :  { %8583 = vmatprep.subr.bf16.mxu1 %v13200_v22  ;;  %v19819_v22 = vld [vmem:[#allocation211_spill] sm:$0xff] }
 0x2cc   :  { %v13210_v45 = vcombine.high %v19819_v22, %v19818_v35  ;;  %v13209_v46 = vcombine.low %v19819_v22, %v19818_v35  ;;  %v4659_v35 = vld [vmem:[#allocation3 + $0x40] sm:$0xff] }
 0x2cd   :  { %8546 = vmatpush1.bf16.xpose.msra.mxu0 %v13005_v56  ;;  %v5776_v56 = vpack.c.bf16 %v4847_v38, %v4847_v38  ;;  %v19837_v38 = vld [vmem:[#allocation22_spill] sm:$0xff] }
 0x2ce   :  { %8623 = vmatprep.subr.bf16.mxu0 %v13202_v53  ;;  %v5778_v53 = vpack.c.bf16 %v4848_v33, %v4848_v33  ;;  %v19840_v33 = vld [vmem:[#allocation312_spill] sm:$0xff] }
 0x2d1   :  { %8524 = vmatmul.mubr.bf16.vlgmr.msra.gmra.mxu1 %v5763_v16  ;;  %v13016_v16 = vcombine.high %v19821_v44, %v19820_v55  ;;  %v13023_v55 = vcombine.low %v19837_v38, %v19836_v24  ;;  %v19838_v44 = vld [vmem:[#allocation119_spill] sm:$0xff] }
 0x2d2   :  { %8584 = vmatpush1.bf16.xpose.msra.mxu1 %v13199_v30  ;;  %8603 = vmatprep.mubr.bf16.mxu1 %v5768_v50  ;;  %v5773_v30 = vpack.c.bf16 %v4829_v52, %v4829_v52 }
 0x2d3   :  { %8585 = vmatprep.subr.bf16.mxu1 %v13008_v37  ;;  %v19823_v37 = vld [vmem:[#allocation19_spill] sm:$0xff] }
 0x2d4   :  { %8564 = vmatmul.mubr.bf16.vlgmr.msra.gmra.mxu0 %v5765_v13  ;;  %v13018_v50 = vcombine.high %v19823_v37, %v19822_v19  ;;  %v19825_v13 = vld [vmem:[#allocation212_spill] sm:$0xff]  ;;  %v13017_v39 = vcombine.low %v19823_v37, %v19822_v19 }
 0x2d5   :  { %8624 = vmatpush1.bf16.xpose.msra.mxu0 %v13201_v7  ;;  %8643 = vmatprep.mubr.bf16.mxu0 %v5770_v59  ;;  %v13212_v5 = vcombine.high %v19825_v13, %v19824_v40  ;;  %v4856_v7 = vrot.slane %v4657_v62, %v17551_v48  ;;  %v4849_v59 = vcombine.high %v4657_v62, %v4657_v62 }
 0x2d6   :  { %8625 = vmatprep.subr.bf16.mxu0 %v13010_v36  ;;  %v13211_v61 = vcombine.low %v19825_v13, %v19824_v40  ;;  %v19842_v13 = vld [vmem:[#allocation313_spill] sm:$0xff] }
 0x2d7   :  { %v4863_v36 = vrot.slane %v4849_v59, %v17551_v48  ;;  %v5779_v17 = vpack.c.bf16 %v4856_v7, %v4856_v7  ;;  %v19844_v59 = vld [vmem:[#allocation120_spill] sm:$0xff] }
 0x2d9   :  { %v4865_v52 = vcombine.high %v4863_v36, %v4863_v36 }
 0x2da   :  { %8586 = vmatpush1.bf16.xpose.msra.mxu1 %v13007_v14  ;;  %v4864_v14 = vcombine.high %v4856_v7, %v4856_v7 }
 0x2db   :  { %8663 = vmatprep.subr.bf16.mxu1 %v13204_v1  ;;  %v19827_v1 = vld [vmem:[#allocation213_spill] sm:$0xff] }
 0x2dc   :  { %v13214_v43 = vcombine.high %v19827_v1, %v19826_v49  ;;  %v13213_v51 = vcombine.low %v19827_v1, %v19826_v49  ;;  %v4660_v49 = vld [vmem:[#allocation3 + $0x48] sm:$0xff] }
 0x2dd   :  { %8626 = vmatpush1.bf16.xpose.msra.mxu0 %v13009_v28  ;;  %v5780_v28 = vpack.c.bf16 %v4864_v14, %v4864_v14  ;;  %v19845_v14 = vld [vmem:[#allocation24_spill] sm:$0xff] }
 0x2de   :  { %8703 = vmatprep.subr.bf16.mxu0 %v13206_v54  ;;  %v5782_v54 = vpack.c.bf16 %v4865_v52, %v4865_v52  ;;  %v19848_v52 = vld [vmem:[#allocation314_spill] sm:$0xff] }
 0x2e1   :  { %8604 = vmatmul.mubr.bf16.vlgmr.msra.gmra.mxu1 %v5767_v41  ;;  %v13020_v41 = vcombine.high %v19829_v32, %v19828_v11  ;;  %v13027_v11 = vcombine.low %v19845_v14, %v19844_v59  ;;  %v19846_v32 = vld [vmem:[#allocation121_spill] sm:$0xff] }
 0x2e2   :  { %8664 = vmatpush1.bf16.xpose.msra.mxu1 %v13203_v20  ;;  %8683 = vmatprep.mubr.bf16.mxu1 %v5772_v25  ;;  %v5777_v20 = vpack.c.bf16 %v4846_v27, %v4846_v27 }
 0x2e3   :  { %8665 = vmatprep.subr.bf16.mxu1 %v13012_v4  ;;  %v19831_v4 = vld [vmem:[#allocation21_spill] sm:$0xff] }
 0x2e4   :  { %8644 = vmatmul.mubr.bf16.vlgmr.msra.gmra.mxu0 %v5769_v29  ;;  %v13022_v25 = vcombine.high %v19831_v4, %v19830_v8  ;;  %v19833_v29 = vld [vmem:[#allocation214_spill] sm:$0xff]  ;;  %v13021_v26 = vcombine.low %v19831_v4, %v19830_v8 }
 0x2e5   :  { %8704 = vmatpush1.bf16.xpose.msra.mxu0 %v13205_v60  ;;  %8723 = vmatprep.mubr.bf16.mxu0 %v5774_v47  ;;  %v13216_v6 = vcombine.high %v19833_v29, %v19832_v57  ;;  %v4873_v60 = vrot.slane %v4658_v3, %v17551_v48  ;;  %v4866_v47 = vcombine.high %v4658_v3, %v4658_v3 }
 0x2e6   :  { %8705 = vmatprep.subr.bf16.mxu0 %v13014_v0  ;;  %v13215_v31 = vcombine.low %v19833_v29, %v19832_v57  ;;  %v19850_v29 = vld [vmem:[#allocation315_spill] sm:$0xff] }
 0x2e7   :  { %v4880_v0 = vrot.slane %v4866_v47, %v17551_v48  ;;  %v5783_v19 = vpack.c.bf16 %v4873_v60, %v4873_v60  ;;  %v19852_v47 = vld [vmem:[#allocation122_spill] sm:$0xff] }
 0x2e9   :  { %v4882_v27 = vcombine.high %v4880_v0, %v4880_v0 }
 0x2ea   :  { %8666 = vmatpush1.bf16.xpose.msra.mxu1 %v13011_v23  ;;  %v4881_v23 = vcombine.high %v4873_v60, %v4873_v60 }
 0x2eb   :  { %8743 = vmatprep.subr.bf16.mxu1 %v13208_v2  ;;  %v19835_v2 = vld [vmem:[#allocation215_spill] sm:$0xff] }
 0x2ec   :  { %v13218_v58 = vcombine.high %v19835_v2, %v19834_v9  ;;  %v13217_v22 = vcombine.low %v19835_v2, %v19834_v9  ;;  %v4661_v9 = vld [vmem:[#allocation3 + $0x50] sm:$0xff] }
 0x2ed   :  { %8706 = vmatpush1.bf16.xpose.msra.mxu0 %v13013_v18  ;;  %v5784_v18 = vpack.c.bf16 %v4881_v23, %v4881_v23  ;;  %v19853_v23 = vld [vmem:[#allocation26_spill] sm:$0xff] }
 0x2ee   :  { %8783 = vmatprep.subr.bf16.mxu0 %v13210_v45  ;;  %v5786_v45 = vpack.c.bf16 %v4882_v27, %v4882_v27  ;;  %v19856_v27 = vld [vmem:[#allocation316_spill] sm:$0xff] }
 0x2f1   :  { %8684 = vmatmul.mubr.bf16.vlgmr.msra.gmra.mxu1 %v5771_v63  ;;  %v13024_v63 = vcombine.high %v19837_v38, %v19836_v24  ;;  %v13031_v24 = vcombine.low %v19853_v23, %v19852_v47  ;;  %v19854_v38 = vld [vmem:[#allocation123_spill] sm:$0xff] }
 0x2f2   :  { %8744 = vmatpush1.bf16.xpose.msra.mxu1 %v13207_v21  ;;  %8763 = vmatprep.mubr.bf16.mxu1 %v5776_v56  ;;  %v5781_v21 = vpack.c.bf16 %v4863_v36, %v4863_v36 }
 0x2f3   :  { %8745 = vmatprep.subr.bf16.mxu1 %v13016_v16  ;;  %v19839_v16 = vld [vmem:[#allocation23_spill] sm:$0xff] }
 0x2f4   :  { %8724 = vmatmul.mubr.bf16.vlgmr.msra.gmra.mxu0 %v5773_v30  ;;  %v13026_v56 = vcombine.high %v19839_v16, %v19838_v44  ;;  %v19841_v30 = vld [vmem:[#allocation216_spill] sm:$0xff]  ;;  %v13025_v37 = vcombine.low %v19839_v16, %v19838_v44 }
 0x2f5   :  { %8784 = vmatpush1.bf16.xpose.msra.mxu0 %v13209_v46  ;;  %8803 = vmatprep.mubr.bf16.mxu0 %v5778_v53  ;;  %v13220_v62 = vcombine.high %v19841_v30, %v19840_v33  ;;  %v4890_v46 = vrot.slane %v4659_v35, %v17551_v48  ;;  %v4883_v53 = vcombine.high %v4659_v35, %v4659_v35 }
 0x2f6   :  { %8785 = vmatprep.subr.bf16.mxu0 %v13018_v50  ;;  %v13219_v40 = vcombine.low %v19841_v30, %v19840_v33  ;;  %v19858_v30 = vld [vmem:[#allocation317_spill] sm:$0xff] }
 0x2f7   :  { %v4897_v50 = vrot.slane %v4883_v53, %v17551_v48  ;;  %v5787_v8 = vpack.c.bf16 %v4890_v46, %v4890_v46  ;;  %v19860_v53 = vld [vmem:[#allocation124_spill] sm:$0xff] }
 0x2f9   :  { %v4899_v36 = vcombine.high %v4897_v50, %v4897_v50 }
 0x2fa   :  { %8746 = vmatpush1.bf16.xpose.msra.mxu1 %v13015_v15  ;;  %v4898_v15 = vcombine.high %v4890_v46, %v4890_v46 }
 0x2fb   :  { %8823 = vmatprep.subr.bf16.mxu1 %v13212_v5  ;;  %v19843_v5 = vld [vmem:[#allocation217_spill] sm:$0xff] }
 0x2fc   :  { %v13222_v7 = vcombine.high %v19843_v5, %v19842_v13  ;;  %v13221_v1 = vcombine.low %v19843_v5, %v19842_v13  ;;  %v4662_v13 = vld [vmem:[#allocation3 + $0x58] sm:$0xff] }
 0x2fd   :  { %8786 = vmatpush1.bf16.xpose.msra.mxu0 %v13017_v39  ;;  %v5788_v39 = vpack.c.bf16 %v4898_v15, %v4898_v15  ;;  %v19861_v15 = vld [vmem:[#allocation28_spill] sm:$0xff] }
 0x2fe   :  { %8863 = vmatprep.subr.bf16.mxu0 %v13214_v43  ;;  %v5790_v43 = vpack.c.bf16 %v4899_v36, %v4899_v36  ;;  %v19864_v36 = vld [vmem:[#allocation318_spill] sm:$0xff] }
 0x301   :  { %8764 = vmatmul.mubr.bf16.vlgmr.msra.gmra.mxu1 %v5775_v42  ;;  %v13028_v42 = vcombine.high %v19845_v14, %v19844_v59  ;;  %v13035_v59 = vcombine.low %v19861_v15, %v19860_v53  ;;  %v19862_v14 = vld [vmem:[#allocation125_spill] sm:$0xff] }
 0x302   :  { %8824 = vmatpush1.bf16.xpose.msra.mxu1 %v13211_v61  ;;  %8843 = vmatprep.mubr.bf16.mxu1 %v5780_v28  ;;  %v5785_v61 = vpack.c.bf16 %v4880_v0, %v4880_v0 }
 0x303   :  { %8825 = vmatprep.subr.bf16.mxu1 %v13020_v41  ;;  %v19847_v41 = vld [vmem:[#allocation25_spill] sm:$0xff] }
 0x304   :  { %8804 = vmatmul.mubr.bf16.vlgmr.msra.gmra.mxu0 %v5777_v20  ;;  %v13030_v28 = vcombine.high %v19847_v41, %v19846_v32  ;;  %v19849_v20 = vld [vmem:[#allocation218_spill] sm:$0xff]  ;;  %v13029_v4 = vcombine.low %v19847_v41, %v19846_v32 }
 0x305   :  { %8864 = vmatpush1.bf16.xpose.msra.mxu0 %v13213_v51  ;;  %8883 = vmatprep.mubr.bf16.mxu0 %v5782_v54  ;;  %v13224_v3 = vcombine.high %v19849_v20, %v19848_v52  ;;  %v4907_v51 = vrot.slane %v4660_v49, %v17551_v48  ;;  %v4900_v54 = vcombine.high %v4660_v49, %v4660_v49 }
 0x306   :  { %8865 = vmatprep.subr.bf16.mxu0 %v13022_v25  ;;  %v13223_v57 = vcombine.low %v19849_v20, %v19848_v52  ;;  %v19866_v20 = vld [vmem:[#allocation319_spill] sm:$0xff] }
 0x307   :  { %v4914_v25 = vrot.slane %v4900_v54, %v17551_v48  ;;  %v5791_v44 = vpack.c.bf16 %v4907_v51, %v4907_v51  ;;  %v19868_v54 = vld [vmem:[#allocation126_spill] sm:$0xff] }
 0x309   :  { %v4916_v0 = vcombine.high %v4914_v25, %v4914_v25 }
 0x30a   :  { %8826 = vmatpush1.bf16.xpose.msra.mxu1 %v13019_v34  ;;  %v4915_v34 = vcombine.high %v4907_v51, %v4907_v51 }
 0x30b   :  { %8903 = vmatprep.subr.bf16.mxu1 %v13216_v6  ;;  %v19851_v6 = vld [vmem:[#allocation219_spill] sm:$0xff] }
 0x30c   :  { %v13226_v60 = vcombine.high %v19851_v6, %v19850_v29  ;;  %v13225_v2 = vcombine.low %v19851_v6, %v19850_v29  ;;  %v4663_v29 = vld [vmem:[#allocation3 + $0x60] sm:$0xff] }
 0x30d   :  { %8866 = vmatpush1.bf16.xpose.msra.mxu0 %v13021_v26  ;;  %v5792_v26 = vpack.c.bf16 %v4915_v34, %v4915_v34  ;;  %v19869_v34 = vld [vmem:[#allocation30_spill] sm:$0xff] }
 0x30e   :  { %8943 = vmatprep.subr.bf16.mxu0 %v13218_v58  ;;  %v5794_v58 = vpack.c.bf16 %v4916_v0, %v4916_v0  ;;  %v19872_v0 = vld [vmem:[#allocation320_spill] sm:$0xff] }
 0x311   :  { %8844 = vmatmul.mubr.bf16.vlgmr.msra.gmra.mxu1 %v5779_v17  ;;  %v13032_v17 = vcombine.high %v19853_v23, %v19852_v47  ;;  %v13039_v47 = vcombine.low %v19869_v34, %v19868_v54  ;;  %v19870_v23 = vld [vmem:[#allocation127_spill] sm:$0xff] }
 0x312   :  { %8904 = vmatpush1.bf16.xpose.msra.mxu1 %v13215_v31  ;;  %8923 = vmatprep.mubr.bf16.mxu1 %v5784_v18  ;;  %v5789_v31 = vpack.c.bf16 %v4897_v50, %v4897_v50 }
 0x313   :  { %8905 = vmatprep.subr.bf16.mxu1 %v13024_v63  ;;  %v19855_v63 = vld [vmem:[#allocation27_spill] sm:$0xff] }
 0x314   :  { %8884 = vmatmul.mubr.bf16.vlgmr.msra.gmra.mxu0 %v5781_v21  ;;  %v13034_v18 = vcombine.high %v19855_v63, %v19854_v38  ;;  %v19857_v21 = vld [vmem:[#allocation220_spill] sm:$0xff]  ;;  %v13033_v16 = vcombine.low %v19855_v63, %v19854_v38 }
 0x315   :  { %8944 = vmatpush1.bf16.xpose.msra.mxu0 %v13217_v22  ;;  %8963 = vmatprep.mubr.bf16.mxu0 %v5786_v45  ;;  %v13228_v35 = vcombine.high %v19857_v21, %v19856_v27  ;;  %v4924_v22 = vrot.slane %v4661_v9, %v17551_v48  ;;  %v4917_v45 = vcombine.high %v4661_v9, %v4661_v9 }
 0x316   :  { %8945 = vmatprep.subr.bf16.mxu0 %v13026_v56  ;;  %v13227_v33 = vcombine.low %v19857_v21, %v19856_v27  ;;  %v19874_v21 = vld [vmem:[#allocation321_spill] sm:$0xff] }
 0x317   :  { %v4931_v56 = vrot.slane %v4917_v45, %v17551_v48  ;;  %v5795_v32 = vpack.c.bf16 %v4924_v22, %v4924_v22  ;;  %v19876_v45 = vld [vmem:[#allocation128_spill] sm:$0xff] }
 0x319   :  { %v4933_v50 = vcombine.high %v4931_v56, %v4931_v56 }
 0x31a   :  { %8906 = vmatpush1.bf16.xpose.msra.mxu1 %v13023_v55  ;;  %v4932_v55 = vcombine.high %v4924_v22, %v4924_v22 }
 0x31b   :  { %8983 = vmatprep.subr.bf16.mxu1 %v13220_v62  ;;  %v19859_v62 = vld [vmem:[#allocation221_spill] sm:$0xff] }
 0x31c   :  { %v13230_v46 = vcombine.high %v19859_v62, %v19858_v30  ;;  %v13229_v5 = vcombine.low %v19859_v62, %v19858_v30  ;;  %v4664_v30 = vld [vmem:[#allocation3 + $0x68] sm:$0xff] }
 0x31d   :  { %8946 = vmatpush1.bf16.xpose.msra.mxu0 %v13025_v37  ;;  %v5796_v37 = vpack.c.bf16 %v4932_v55, %v4932_v55  ;;  %v19877_v55 = vld [vmem:[#allocation32_spill] sm:$0xff] }
 0x31e   :  { %9023 = vmatprep.subr.bf16.mxu0 %v13222_v7  ;;  %v5798_v7 = vpack.c.bf16 %v4933_v50, %v4933_v50  ;;  %v19880_v50 = vld [vmem:[#allocation322_spill] sm:$0xff] }
 0x321   :  { %8924 = vmatmul.mubr.bf16.vlgmr.msra.gmra.mxu1 %v5783_v19  ;;  %v13036_v19 = vcombine.high %v19861_v15, %v19860_v53  ;;  %v13043_v53 = vcombine.low %v19877_v55, %v19876_v45  ;;  %v19878_v15 = vld [vmem:[#allocation129_spill] sm:$0xff] }
 0x322   :  { %8984 = vmatpush1.bf16.xpose.msra.mxu1 %v13219_v40  ;;  %9003 = vmatprep.mubr.bf16.mxu1 %v5788_v39  ;;  %v5793_v40 = vpack.c.bf16 %v4914_v25, %v4914_v25 }
 0x323   :  { %8985 = vmatprep.subr.bf16.mxu1 %v13028_v42  ;;  %v19863_v42 = vld [vmem:[#allocation29_spill] sm:$0xff] }
 0x324   :  { %8964 = vmatmul.mubr.bf16.vlgmr.msra.gmra.mxu0 %v5785_v61  ;;  %v13038_v39 = vcombine.high %v19863_v42, %v19862_v14  ;;  %v19865_v61 = vld [vmem:[#allocation222_spill] sm:$0xff]  ;;  %v13037_v41 = vcombine.low %v19863_v42, %v19862_v14 }
 0x325   :  { %9024 = vmatpush1.bf16.xpose.msra.mxu0 %v13221_v1  ;;  %9043 = vmatprep.mubr.bf16.mxu0 %v5790_v43  ;;  %v13232_v49 = vcombine.high %v19865_v61, %v19864_v36  ;;  %v4941_v1 = vrot.slane %v4662_v13, %v17551_v48  ;;  %v4934_v43 = vcombine.high %v4662_v13, %v4662_v13 }
 0x326   :  { %9025 = vmatprep.subr.bf16.mxu0 %v13030_v28  ;;  %v13231_v52 = vcombine.low %v19865_v61, %v19864_v36 }
 0x327   :  { %v4948_v28 = vrot.slane %v4934_v43, %v17551_v48  ;;  %v5799_v38 = vpack.c.bf16 %v4941_v1, %v4941_v1  ;;  %v19883_v43 = vld [vmem:[#allocation227_spill] sm:$0xff] }
 0x329   :  { %v4950_v25 = vcombine.high %v4948_v28, %v4948_v28 }
 0x32a   :  { %8986 = vmatpush1.bf16.xpose.msra.mxu1 %v13027_v11  ;;  %v4949_v11 = vcombine.high %v4941_v1, %v4941_v1  ;;  %v19882_v1 = vld [vmem:[#allocation323_spill] sm:$0xff] }
 0x32b   :  { %9063 = vmatprep.subr.bf16.mxu1 %v13224_v3  ;;  %v19867_v3 = vld [vmem:[#allocation223_spill] sm:$0xff] }
 0x32c   :  { %v13234_v51 = vcombine.high %v19867_v3, %v19866_v20  ;;  %v13233_v6 = vcombine.low %v19867_v3, %v19866_v20 }
 0x32d   :  { %9026 = vmatpush1.bf16.xpose.msra.mxu0 %v13029_v4  ;;  %v5800_v4 = vpack.c.bf16 %v4949_v11, %v4949_v11  ;;  %v13242_v11 = vcombine.high %v19883_v43, %v19882_v1 }
 0x32e   :  { %9103 = vmatprep.subr.bf16.mxu0 %v13226_v60  ;;  %v5802_v60 = vpack.c.bf16 %v4950_v25, %v4950_v25  ;;  %v13241_v25 = vcombine.low %v19883_v43, %v19882_v1 }
 0x331   :  { %9004 = vmatmul.mubr.bf16.vlgmr.msra.gmra.mxu1 %v5787_v8  ;;  %v13040_v8 = vcombine.high %v19869_v34, %v19868_v54 }
 0x332   :  { %9064 = vmatpush1.bf16.xpose.msra.mxu1 %v13223_v57  ;;  %9083 = vmatprep.mubr.bf16.mxu1 %v5792_v26  ;;  %v5797_v57 = vpack.c.bf16 %v4931_v56, %v4931_v56 }
 0x333   :  { %9065 = vmatprep.subr.bf16.mxu1 %v13032_v17  ;;  %v19871_v17 = vld [vmem:[#allocation31_spill] sm:$0xff] }
 0x334   :  { %9044 = vmatmul.mubr.bf16.vlgmr.msra.gmra.mxu0 %v5789_v31  ;;  %v13042_v26 = vcombine.high %v19871_v17, %v19870_v23  ;;  %v19873_v31 = vld [vmem:[#allocation224_spill] sm:$0xff]  ;;  %v13041_v63 = vcombine.low %v19871_v17, %v19870_v23 }
 0x335   :  { %9104 = vmatpush1.bf16.xpose.msra.mxu0 %v13225_v2  ;;  %9123 = vmatprep.mubr.bf16.mxu0 %v5794_v58  ;;  %v13236_v9 = vcombine.high %v19873_v31, %v19872_v0  ;;  %v4958_v2 = vrot.slane %v4663_v29, %v17551_v48  ;;  %v4951_v58 = vcombine.high %v4663_v29, %v4663_v29  ;;  %v19888_v17 = vld [vmem:[#allocation324_spill] sm:$0xff] }
 0x336   :  { %9105 = vmatprep.subr.bf16.mxu0 %v13034_v18  ;;  %v13235_v27 = vcombine.low %v19873_v31, %v19872_v0 }
 0x337   :  { %v4965_v18 = vrot.slane %v4951_v58, %v17551_v48 }
 0x339   :  { %v4967_v56 = vcombine.high %v4965_v18, %v4965_v18  ;;  %v5805_v34 = vpack.c.bf16 %v4965_v18, %v4965_v18 }
 0x33a   :  { %9066 = vmatpush1.bf16.xpose.msra.mxu1 %v13031_v24  ;;  %v4966_v24 = vcombine.high %v4958_v2, %v4958_v2 }
 0x33b   :  { %9143 = vmatprep.subr.bf16.mxu1 %v13228_v35  ;;  %v19875_v35 = vld [vmem:[#allocation225_spill] sm:$0xff] }
 0x33c   :  { %v13238_v22 = vcombine.high %v19875_v35, %v19874_v21  ;;  %v13237_v62 = vcombine.low %v19875_v35, %v19874_v21 }
 0x33d   :  { %9106 = vmatpush1.bf16.xpose.msra.mxu0 %v13033_v16  ;;  %v5804_v16 = vpack.c.bf16 %v4966_v24, %v4966_v24 }
 0x33e   :  { %9183 = vmatprep.subr.bf16.mxu0 %v13230_v46  ;;  %v5806_v46 = vpack.c.bf16 %v4967_v56, %v4967_v56  ;;  %v19893_v56 = vld [vmem:[#allocation36_spill] sm:$0xff] }
 0x341   :  { %9084 = vmatmul.mubr.bf16.vlgmr.msra.gmra.mxu1 %v5791_v44  ;;  %v13044_v44 = vcombine.high %v19877_v55, %v19876_v45  ;;  %v19890_v45 = vld [vmem:[#allocation325_spill] sm:$0xff] }
 0x342   :  { %9144 = vmatpush1.bf16.xpose.msra.mxu1 %v13227_v33  ;;  %9163 = vmatprep.mubr.bf16.mxu1 %v5796_v37  ;;  %v5801_v33 = vpack.c.bf16 %v4948_v28, %v4948_v28  ;;  %v19891_v55 = vld [vmem:[#allocation229_spill] sm:$0xff] }
 0x343   :  { %9145 = vmatprep.subr.bf16.mxu1 %v13036_v19  ;;  %v19879_v19 = vld [vmem:[#allocation33_spill] sm:$0xff] }
 0x344   :  { %9124 = vmatmul.mubr.bf16.vlgmr.msra.gmra.mxu0 %v5793_v40  ;;  %v13046_v37 = vcombine.high %v19879_v19, %v19878_v15  ;;  %v19881_v40 = vld [vmem:[#allocation226_spill] sm:$0xff]  ;;  %v13045_v36 = vcombine.low %v19879_v19, %v19878_v15 }
 0x345   :  { %9184 = vmatpush1.bf16.xpose.msra.mxu0 %v13229_v5  ;;  %9203 = vmatprep.mubr.bf16.mxu0 %v5798_v7  ;;  %v13240_v13 = vcombine.high %v19881_v40, %v19880_v50  ;;  %v4975_v5 = vrot.slane %v4664_v30, %v17551_v48 }
 0x346   :  { %9185 = vmatprep.subr.bf16.mxu0 %v13038_v39  ;;  %v5803_v39 = vpack.c.bf16 %v4958_v2, %v4958_v2 }
 0x347   :  { %v4983_v42 = vcombine.high %v4975_v5, %v4975_v5  ;;  %v5807_v18 = vpack.c.bf16 %v4975_v5, %v4975_v5 }
 0x34a   :  { %9146 = vmatpush1.bf16.xpose.msra.mxu1 %v13035_v59  ;;  %v4968_v59 = vcombine.high %v4664_v30, %v4664_v30 }
 0x34b   :  { %9223 = vmatprep.subr.bf16.mxu1 %v13232_v49  ;;  %v13239_v49 = vcombine.low %v19881_v40, %v19880_v50  ;;  %v13245_v40 = vcombine.low %v19891_v55, %v19890_v45 }
 0x34c   :  { %v17779_v61 = vrot.slane %v4968_v59, %v17551_v48  ;;  %v19895_v59 = vld [vmem:[#allocation37_spill] sm:$0xff] }
 0x34d   :  { %9186 = vmatpush1.bf16.xpose.msra.mxu0 %v13037_v41  ;;  %v19885_v41 = vld [vmem:[#allocation34_spill] sm:$0xff] }
 0x34e   :  { %9263 = vmatprep.subr.bf16.mxu0 %v13234_v51  ;;  %v4984_v3 = vcombine.high %v17779_v61, %v17779_v61  ;;  %v5809_v19 = vpack.c.bf16 %v17779_v61, %v17779_v61 }
 0x351   :  { %9164 = vmatmul.mubr.bf16.vlgmr.msra.gmra.mxu1 %v5795_v32  ;;  %v19884_v32 = vld [vmem:[#allocation130_spill] sm:$0xff] }
 0x352   :  { %9224 = vmatpush1.bf16.xpose.msra.mxu1 %v13231_v52  ;;  %9243 = vmatprep.mubr.bf16.mxu1 %v5800_v4  ;;  %v13048_v28 = vcombine.high %v19885_v41, %v19884_v32  ;;  %v5808_v52 = vpack.c.bf16 %v4983_v42, %v4983_v42  ;;  %v13047_v29 = vcombine.low %v19885_v41, %v19884_v32 }
 0x353   :  { %9225 = vmatprep.subr.bf16.mxu1 %v13040_v8  ;;  %v4665_v8 = vld [vmem:[#allocation3 + $0x70] sm:$0xff] }
 0x354   :  { %9204 = vmatmul.mubr.bf16.vlgmr.msra.gmra.mxu0 %v5797_v57  ;;  %v5810_v57 = vpack.c.bf16 %v4984_v3, %v4984_v3  ;;  %v4992_v31 = vrot.slane %v4665_v8, %v17551_v48  ;;  %v4985_v58 = vcombine.high %v4665_v8, %v4665_v8  ;;  %v19899_v8 = vld [vmem:[#allocation231_spill] sm:$0xff] }
 0x355   :  { %9264 = vmatpush1.bf16.xpose.msra.mxu0 %v13233_v6  ;;  %9283 = vmatprep.mubr.bf16.mxu0 %v5802_v60  ;;  %v19886_v6 = vld [vmem:[#allocation131_spill] sm:$0xff] }
 0x356   :  { %9265 = vmatprep.subr.bf16.mxu0 %v13042_v26  ;;  %v19887_v60 = vld [vmem:[#allocation35_spill] sm:$0xff]  ;;  %v19889_v26 = vld [vmem:[#allocation228_spill] sm:$0xff]  ;;  %v17801_v21 = vrot.slane %v4985_v58, %v17551_v48 }
 0x357   :  { %v13244_v0 = vcombine.high %v19889_v26, %v19888_v17 }
 0x35a   :  { %9226 = vmatpush1.bf16.xpose.msra.mxu1 %v13039_v47  ;;  %v13050_v47 = vcombine.high %v19887_v60, %v19886_v6 }
 0x35b   :  { %9303 = vmatprep.subr.bf16.mxu1 %v13236_v9 }
 0x35d   :  { %9266 = vmatpush1.bf16.xpose.msra.mxu0 %v13041_v63 }
 0x35e   :  { %9343 = vmatprep.subr.bf16.mxu0 %v13238_v22  ;;  %v13243_v22 = vcombine.low %v19889_v26, %v19888_v17  ;;  %v5813_v26 = vpack.c.bf16 %v17801_v21, %v17801_v21 }
 0x361   :  { %9244 = vmatmul.mubr.bf16.vlgmr.msra.gmra.mxu1 %v5799_v38  ;;  %v5000_v38 = vcombine.high %v4992_v31, %v4992_v31 }
 0x362   :  { %9304 = vmatpush1.bf16.xpose.msra.mxu1 %v13235_v27  ;;  %9323 = vmatprep.mubr.bf16.mxu1 %v5804_v16  ;;  %v13049_v27 = vcombine.low %v19887_v60, %v19886_v6  ;;  %v19892_v16 = vld [vmem:[#allocation132_spill] sm:$0xff] }
 0x363   :  { %9305 = vmatprep.subr.bf16.mxu1 %v13044_v44  ;;  %v6407_v7 = vpop.f32.mrf.mxu0  ;;  %v13246_v44 = vcombine.high %v19891_v55, %v19890_v45  ;;  %v5812_v30 = vpack.c.bf16 %v5000_v38, %v5000_v38  ;;  %v13051_v5 = vcombine.low %v19893_v56, %v19892_v16  ;;  %v19903_v38 = vld [vmem:[#allocation39_spill] sm:$0xff] }
 0x364   :  { %9284 = vmatmul.mubr.bf16.vlgmr.msra.gmra.mxu0 %v5801_v33  ;;  %v13052_v33 = vcombine.high %v19893_v56, %v19892_v16 }
 0x365   :  { %9344 = vmatpush1.bf16.xpose.msra.mxu0 %v13237_v62  ;;  %9363 = vmatprep.mubr.bf16.mxu0 %v5806_v46  ;;  %v13643_v14 = vpop.f32.mrf.mxu0  ;;  %v5001_v46 = vcombine.high %v17801_v21, %v17801_v21 }
 0x366   :  { %9345 = vmatprep.subr.bf16.mxu0 %v13046_v37  ;;  %v4666_v37 = vld [vmem:[#allocation3 + $0x78] sm:$0xff] }
 0x367   :  { %v5009_v1 = vrot.slane %v4666_v37, %v17551_v48 }
 0x369   :  { %v5017_v41 = vcombine.high %v5009_v1, %v5009_v1 }
 0x36a   :  { %9306 = vmatpush1.bf16.xpose.msra.mxu1 %v13043_v53 }
 0x36b   :  { %9383 = vmatprep.subr.bf16.mxu1 %v13240_v13  ;;  %v5814_v13 = vpack.c.bf16 %v5001_v46, %v5001_v46  ;;  %v5816_v6 = vpack.c.bf16 %v5017_v41, %v5017_v41  ;;  %v19911_v41 = vld [vmem:[#allocation41_spill] sm:$0xff] }
 0x36d   :  { %9346 = vmatpush1.bf16.xpose.msra.mxu0 %v13045_v36  ;;  %v19897_v36 = vld [vmem:[#allocation230_spill] sm:$0xff] }
 0x36e   :  { %9423 = vmatprep.subr.bf16.mxu0 %v13242_v11  ;;  %v5002_v11 = vcombine.high %v4666_v37, %v4666_v37  ;;  %v19907_v37 = vld [vmem:[#allocation233_spill] sm:$0xff] }
 0x370   :  { %v17825_v3 = vrot.slane %v5002_v11, %v17551_v48 }
 0x371   :  { %v8365_v20 = vpop.f32.mrf.mxu1  ;;  %9324 = vmatmul.mubr.bf16.vlgmr.msra.gmra.mxu1 %v5803_v39  ;;  %v19896_v39 = vld [vmem:[#allocation326_spill] sm:$0xff] }
 0x372   :  { %v8366_v51 = vadd.f32 %v8365_v20, %v6407_v7  ;;  %9384 = vmatpush1.bf16.xpose.msra.mxu1 %v13239_v49  ;;  %9403 = vmatprep.mubr.bf16.mxu1 %v5808_v52  ;;  %v19894_v7 = vld [vmem:[#allocation133_spill] sm:$0xff]  ;;  %v13248_v49 = vcombine.high %v19897_v36, %v19896_v39  ;;  %v5811_v52 = vpack.c.bf16 %v4992_v31, %v4992_v31 }
 0x373   :  { %v8367_v54 = vpop.f32.mrf.mxu1  ;;  %9385 = vmatprep.subr.bf16.mxu1 %v13048_v28  ;;  %v13054_v14 = vcombine.high %v19895_v59, %v19894_v7  ;;  %v13053_v20 = vcombine.low %v19895_v59, %v19894_v7 }
 0x374   :  { %v8405_v9 = vpop.f32.mrf.mxu0  ;;  %9364 = vmatmul.mubr.bf16.vlgmr.msra.gmra.mxu0 %v5805_v34  ;;  %v13247_v54 = vcombine.low %v19897_v36, %v19896_v39  ;;  %v19898_v34 = vld [vmem:[#allocation327_spill] sm:$0xff]  ;;  %v5817_v36 = vpack.c.bf16 %v17825_v3, %v17825_v3 }
 0x375   :  { %v8368_v4 = vpop.f32.mrf.mxu1  ;;  %v8406_v2 = vadd.f32 %v8405_v9, %v8366_v51  ;;  %9424 = vmatpush1.bf16.xpose.msra.mxu0 %v13241_v25  ;;  %9443 = vmatprep.mubr.bf16.mxu0 %v5810_v57  ;;  %v19900_v25 = vld [vmem:[#allocation134_spill] sm:$0xff]  ;;  %v13249_v9 = vcombine.low %v19899_v8, %v19898_v34 }
 0x376   :  { %v8407_v24 = vpop.f32.mrf.mxu0  ;;  %9425 = vmatprep.subr.bf16.mxu0 %v13050_v47  ;;  %v13250_v4 = vcombine.high %v19899_v8, %v19898_v34  ;;  %v19901_v57 = vld [vmem:[#allocation38_spill] sm:$0xff]  ;;  %v5018_v47 = vcombine.high %v17825_v3, %v17825_v3 }
 0x377   :  { %v8369_v23 = vpop.f32.mrf.mxu1  ;;  %v13055_v58 = vcombine.low %v19901_v57, %v19900_v25  ;;  %v19902_v24 = vld [vmem:[#allocation135_spill] sm:$0xff] }
 0x378   :  { %v8408_v63 = vpop.f32.mrf.mxu0 }
 0x379   :  { %v13058_v63 = vcombine.high %v19903_v38, %v19902_v24 }
 0x37a   :  { %9386 = vmatpush1.bf16.xpose.msra.mxu1 %v13047_v29  ;;  %v8409_v35 = vpop.f32.mrf.mxu0  ;;  %v13056_v29 = vcombine.high %v19901_v57, %v19900_v25 }
 0x37b   :  { %9463 = vmatprep.subr.bf16.mxu1 %v13244_v0  ;;  %v4667_v0 = vld [vmem:[#allocation3 + $0x80] sm:$0xff] }
 0x37c   :  { %v19905_v35 = vld [vmem:[#allocation232_spill] sm:$0xff]  ;;  %v5026_v45 = vrot.slane %v4667_v0, %v17551_v48 }
 0x37d   :  { %9426 = vmatpush1.bf16.xpose.msra.mxu0 %v13049_v27  ;;  %v19904_v27 = vld [vmem:[#allocation328_spill] sm:$0xff] }
 0x37e   :  { %9503 = vmatprep.subr.bf16.mxu0 %v13246_v44  ;;  %v5019_v44 = vcombine.high %v4667_v0, %v4667_v0  ;;  %v5034_v56 = vcombine.high %v5026_v45, %v5026_v45  ;;  %v19915_v0 = vld [vmem:[#allocation235_spill] sm:$0xff] }
 0x380   :  { %v17849_v46 = vrot.slane %v5019_v44, %v17551_v48  ;;  %v5820_v7 = vpack.c.bf16 %v5034_v56, %v5034_v56  ;;  %v19919_v56 = vld [vmem:[#allocation43_spill] sm:$0xff] }
 0x381   :  { %v8445_v62 = vpop.f32.mrf.mxu1  ;;  %9404 = vmatmul.mubr.bf16.vlgmr.msra.gmra.mxu1 %v5807_v18 }
 0x382   :  { %v8446_v53 = vadd.f32 %v8445_v62, %v8406_v2  ;;  %9464 = vmatpush1.bf16.xpose.msra.mxu1 %v13243_v22  ;;  %9483 = vmatprep.mubr.bf16.mxu1 %v5812_v30  ;;  %v5818_v2 = vpack.c.bf16 %v5018_v47, %v5018_v47  ;;  %v13252_v22 = vcombine.high %v19905_v35, %v19904_v27 }
 0x383   :  { %v8447_v15 = vpop.f32.mrf.mxu1  ;;  %9465 = vmatprep.subr.bf16.mxu1 %v13052_v33  ;;  %v5815_v30 = vpack.c.bf16 %v5009_v1, %v5009_v1  ;;  %v13057_v62 = vcombine.low %v19903_v38, %v19902_v24 }
 0x384   :  { %v8485_v43 = vpop.f32.mrf.mxu0  ;;  %9444 = vmatmul.mubr.bf16.vlgmr.msra.gmra.mxu0 %v5809_v19  ;;  %v13251_v15 = vcombine.low %v19905_v35, %v19904_v27  ;;  %v19906_v19 = vld [vmem:[#allocation329_spill] sm:$0xff]  ;;  %v5821_v35 = vpack.c.bf16 %v17849_v46, %v17849_v46 }
 0x385   :  { %v8448_v50 = vpop.f32.mrf.mxu1  ;;  %v8486_v61 = vadd.f32 %v8485_v43, %v8446_v53  ;;  %9504 = vmatpush1.bf16.xpose.msra.mxu0 %v13245_v40  ;;  %9523 = vmatprep.mubr.bf16.mxu0 %v5814_v13  ;;  %v19908_v40 = vld [vmem:[#allocation136_spill] sm:$0xff]  ;;  %v13253_v43 = vcombine.low %v19907_v37, %v19906_v19 }
 0x386   :  { %v8487_v32 = vpop.f32.mrf.mxu0  ;;  %9505 = vmatprep.subr.bf16.mxu0 %v13054_v14  ;;  %v13254_v50 = vcombine.high %v19907_v37, %v19906_v19  ;;  %v19909_v13 = vld [vmem:[#allocation40_spill] sm:$0xff]  ;;  %v5035_v14 = vcombine.high %v17849_v46, %v17849_v46 }
 0x387   :  { %v8449_v42 = vpop.f32.mrf.mxu1  ;;  %v13059_v11 = vcombine.low %v19909_v13, %v19908_v40  ;;  %v19910_v32 = vld [vmem:[#allocation137_spill] sm:$0xff] }
 0x388   :  { %v8488_v28 = vpop.f32.mrf.mxu0 }
 0x389   :  { %v13062_v28 = vcombine.high %v19911_v41, %v19910_v32 }
 0x38a   :  { %9466 = vmatpush1.bf16.xpose.msra.mxu1 %v13051_v5  ;;  %v8489_v51 = vpop.f32.mrf.mxu0  ;;  %v13060_v5 = vcombine.high %v19909_v13, %v19908_v40 }
 0x38b   :  { %9543 = vmatprep.subr.bf16.mxu1 %v13248_v49  ;;  %v4668_v49 = vld [vmem:[#allocation3 + $0x88] sm:$0xff]  ;;  %v19913_v51 = vld [vmem:[#allocation234_spill] sm:$0xff] }
 0x38c   :  { %v5043_v34 = vrot.slane %v4668_v49, %v17551_v48 }
 0x38d   :  { %9506 = vmatpush1.bf16.xpose.msra.mxu0 %v13053_v20  ;;  %v19912_v20 = vld [vmem:[#allocation330_spill] sm:$0xff] }
 0x38e   :  { %9583 = vmatprep.subr.bf16.mxu0 %v13250_v4  ;;  %v5036_v4 = vcombine.high %v4668_v49, %v4668_v49  ;;  %v5051_v57 = vcombine.high %v5043_v34, %v5043_v34  ;;  %v19923_v49 = vld [vmem:[#allocation237_spill] sm:$0xff] }
 0x390   :  { %v17873_v47 = vrot.slane %v5036_v4, %v17551_v48  ;;  %v5824_v24 = vpack.c.bf16 %v5051_v57, %v5051_v57  ;;  %v19927_v57 = vld [vmem:[#allocation45_spill] sm:$0xff] }
 0x391   :  { %v8525_v60 = vpop.f32.mrf.mxu1  ;;  %9484 = vmatmul.mubr.bf16.vlgmr.msra.gmra.mxu1 %v5811_v52 }
 0x392   :  { %v8526_v23 = vadd.f32 %v8525_v60, %v8486_v61  ;;  %9544 = vmatpush1.bf16.xpose.msra.mxu1 %v13247_v54  ;;  %9563 = vmatprep.mubr.bf16.mxu1 %v5816_v6  ;;  %v5822_v61 = vpack.c.bf16 %v5035_v14, %v5035_v14  ;;  %v13256_v54 = vcombine.high %v19913_v51, %v19912_v20 }
 0x393   :  { %v8527_v17 = vpop.f32.mrf.mxu1  ;;  %9545 = vmatprep.subr.bf16.mxu1 %v13056_v29  ;;  %v5819_v6 = vpack.c.bf16 %v5026_v45, %v5026_v45  ;;  %v13061_v60 = vcombine.low %v19911_v41, %v19910_v32 }
 0x394   :  { %v8565_v55 = vpop.f32.mrf.mxu0  ;;  %9524 = vmatmul.mubr.bf16.vlgmr.msra.gmra.mxu0 %v5813_v26  ;;  %v13255_v17 = vcombine.low %v19913_v51, %v19912_v20  ;;  %v19914_v26 = vld [vmem:[#allocation331_spill] sm:$0xff]  ;;  %v5825_v51 = vpack.c.bf16 %v17873_v47, %v17873_v47 }
 0x395   :  { %v8528_v31 = vpop.f32.mrf.mxu1  ;;  %v8566_v21 = vadd.f32 %v8565_v55, %v8526_v23  ;;  %9584 = vmatpush1.bf16.xpose.msra.mxu0 %v13249_v9  ;;  %9603 = vmatprep.mubr.bf16.mxu0 %v5818_v2  ;;  %v19916_v9 = vld [vmem:[#allocation138_spill] sm:$0xff]  ;;  %v13257_v55 = vcombine.low %v19915_v0, %v19914_v26 }
 0x396   :  { %v8567_v16 = vpop.f32.mrf.mxu0  ;;  %9585 = vmatprep.subr.bf16.mxu0 %v13058_v63  ;;  %v13258_v31 = vcombine.high %v19915_v0, %v19914_v26  ;;  %v19917_v2 = vld [vmem:[#allocation42_spill] sm:$0xff]  ;;  %v5052_v63 = vcombine.high %v17873_v47, %v17873_v47 }
 0x397   :  { %v8529_v18 = vpop.f32.mrf.mxu1  ;;  %v13063_v44 = vcombine.low %v19917_v2, %v19916_v9  ;;  %v19918_v16 = vld [vmem:[#allocation139_spill] sm:$0xff] }
 0x398   :  { %v8568_v33 = vpop.f32.mrf.mxu0 }
 0x399   :  { %v13066_v33 = vcombine.high %v19919_v56, %v19918_v16 }
 0x39a   :  { %9546 = vmatpush1.bf16.xpose.msra.mxu1 %v13055_v58  ;;  %v8569_v53 = vpop.f32.mrf.mxu0  ;;  %v13064_v58 = vcombine.high %v19917_v2, %v19916_v9 }
 0x39b   :  { %9623 = vmatprep.subr.bf16.mxu1 %v13252_v22  ;;  %v4669_v22 = vld [vmem:[#allocation3 + $0x90] sm:$0xff]  ;;  %v19921_v53 = vld [vmem:[#allocation236_spill] sm:$0xff] }
 0x39c   :  { %v5060_v19 = vrot.slane %v4669_v22, %v17551_v48 }
 0x39d   :  { %9586 = vmatpush1.bf16.xpose.msra.mxu0 %v13057_v62  ;;  %v19920_v62 = vld [vmem:[#allocation332_spill] sm:$0xff] }
 0x39e   :  { %9663 = vmatprep.subr.bf16.mxu0 %v13254_v50  ;;  %v5053_v50 = vcombine.high %v4669_v22, %v4669_v22  ;;  %v5068_v13 = vcombine.high %v5060_v19, %v5060_v19  ;;  %v19931_v22 = vld [vmem:[#allocation239_spill] sm:$0xff] }
 0x3a0   :  { %v17897_v14 = vrot.slane %v5053_v50, %v17551_v48  ;;  %v5828_v32 = vpack.c.bf16 %v5068_v13, %v5068_v13  ;;  %v19935_v13 = vld [vmem:[#allocation47_spill] sm:$0xff] }
 0x3a1   :  { %v8605_v59 = vpop.f32.mrf.mxu1  ;;  %9564 = vmatmul.mubr.bf16.vlgmr.msra.gmra.mxu1 %v5815_v30 }
 0x3a2   :  { %v8606_v42 = vadd.f32 %v8605_v59, %v8566_v21  ;;  %9624 = vmatpush1.bf16.xpose.msra.mxu1 %v13251_v15  ;;  %9643 = vmatprep.mubr.bf16.mxu1 %v5820_v7  ;;  %v5826_v21 = vpack.c.bf16 %v5052_v63, %v5052_v63  ;;  %v13260_v15 = vcombine.high %v19921_v53, %v19920_v62 }
 0x3a3   :  { %v8607_v39 = vpop.f32.mrf.mxu1  ;;  %9625 = vmatprep.subr.bf16.mxu1 %v13060_v5  ;;  %v5823_v7 = vpack.c.bf16 %v5043_v34, %v5043_v34  ;;  %v13065_v59 = vcombine.low %v19919_v56, %v19918_v16 }
 0x3a4   :  { %v8645_v8 = vpop.f32.mrf.mxu0  ;;  %9604 = vmatmul.mubr.bf16.vlgmr.msra.gmra.mxu0 %v5817_v36  ;;  %v13259_v39 = vcombine.low %v19921_v53, %v19920_v62  ;;  %v19922_v36 = vld [vmem:[#allocation333_spill] sm:$0xff]  ;;  %v5829_v53 = vpack.c.bf16 %v17897_v14, %v17897_v14 }
 0x3a5   :  { %v8608_v1 = vpop.f32.mrf.mxu1  ;;  %v8646_v3 = vadd.f32 %v8645_v8, %v8606_v42  ;;  %9664 = vmatpush1.bf16.xpose.msra.mxu0 %v13253_v43  ;;  %9683 = vmatprep.mubr.bf16.mxu0 %v5822_v61  ;;  %v19924_v43 = vld [vmem:[#allocation140_spill] sm:$0xff]  ;;  %v13261_v8 = vcombine.low %v19923_v49, %v19922_v36 }
 0x3a6   :  { %v8647_v25 = vpop.f32.mrf.mxu0  ;;  %9665 = vmatprep.subr.bf16.mxu0 %v13062_v28  ;;  %v13262_v1 = vcombine.high %v19923_v49, %v19922_v36  ;;  %v19925_v61 = vld [vmem:[#allocation44_spill] sm:$0xff]  ;;  %v5069_v28 = vcombine.high %v17897_v14, %v17897_v14 }
 0x3a7   :  { %v8609_v52 = vpop.f32.mrf.mxu1  ;;  %v13067_v4 = vcombine.low %v19925_v61, %v19924_v43  ;;  %v19926_v25 = vld [vmem:[#allocation141_spill] sm:$0xff] }
 0x3a8   :  { %v8648_v29 = vpop.f32.mrf.mxu0 }
 0x3a9   :  { %v13070_v29 = vcombine.high %v19927_v57, %v19926_v25 }
 0x3aa   :  { %9626 = vmatpush1.bf16.xpose.msra.mxu1 %v13059_v11  ;;  %v8649_v23 = vpop.f32.mrf.mxu0  ;;  %v13068_v11 = vcombine.high %v19925_v61, %v19924_v43 }
 0x3ab   :  { %9703 = vmatprep.subr.bf16.mxu1 %v13256_v54  ;;  %v4670_v54 = vld [vmem:[#allocation3 + $0x98] sm:$0xff] }
 0x3ac   :  { %v19929_v23 = vld [vmem:[#allocation238_spill] sm:$0xff]  ;;  %v5077_v26 = vrot.slane %v4670_v54, %v17551_v48 }
 0x3ad   :  { %9666 = vmatpush1.bf16.xpose.msra.mxu0 %v13061_v60  ;;  %v19928_v60 = vld [vmem:[#allocation334_spill] sm:$0xff] }
 0x3ae   :  { %9743 = vmatprep.subr.bf16.mxu0 %v13258_v31  ;;  %v5070_v31 = vcombine.high %v4670_v54, %v4670_v54  ;;  %v5085_v2 = vcombine.high %v5077_v26, %v5077_v26  ;;  %v19939_v54 = vld [vmem:[#allocation241_spill] sm:$0xff] }
 0x3b0   :  { %v17921_v63 = vrot.slane %v5070_v31, %v17551_v48  ;;  %v5832_v16 = vpack.c.bf16 %v5085_v2, %v5085_v2  ;;  %v19943_v2 = vld [vmem:[#allocation49_spill] sm:$0xff] }
 0x3b1   :  { %v8685_v38 = vpop.f32.mrf.mxu1  ;;  %9644 = vmatmul.mubr.bf16.vlgmr.msra.gmra.mxu1 %v5819_v6 }
 0x3b2   :  { %v8686_v18 = vadd.f32 %v8685_v38, %v8646_v3  ;;  %9704 = vmatpush1.bf16.xpose.msra.mxu1 %v13255_v17  ;;  %9723 = vmatprep.mubr.bf16.mxu1 %v5824_v24  ;;  %v5830_v3 = vpack.c.bf16 %v5069_v28, %v5069_v28  ;;  %v13264_v17 = vcombine.high %v19929_v23, %v19928_v60 }
 0x3b3   :  { %v8687_v27 = vpop.f32.mrf.mxu1  ;;  %9705 = vmatprep.subr.bf16.mxu1 %v13064_v58  ;;  %v5827_v24 = vpack.c.bf16 %v5060_v19, %v5060_v19  ;;  %v13069_v38 = vcombine.low %v19927_v57, %v19926_v25 }
 0x3b4   :  { %v8725_v37 = vpop.f32.mrf.mxu0  ;;  %9684 = vmatmul.mubr.bf16.vlgmr.msra.gmra.mxu0 %v5821_v35  ;;  %v13263_v27 = vcombine.low %v19929_v23, %v19928_v60  ;;  %v19930_v35 = vld [vmem:[#allocation335_spill] sm:$0xff]  ;;  %v5833_v23 = vpack.c.bf16 %v17921_v63, %v17921_v63 }
 0x3b5   :  { %v8688_v45 = vpop.f32.mrf.mxu1  ;;  %v8726_v46 = vadd.f32 %v8725_v37, %v8686_v18  ;;  %9744 = vmatpush1.bf16.xpose.msra.mxu0 %v13257_v55  ;;  %9763 = vmatprep.mubr.bf16.mxu0 %v5826_v21  ;;  %v19932_v55 = vld [vmem:[#allocation142_spill] sm:$0xff]  ;;  %v13265_v37 = vcombine.low %v19931_v22, %v19930_v35 }
 0x3b6   :  { %v8727_v40 = vpop.f32.mrf.mxu0  ;;  %9745 = vmatprep.subr.bf16.mxu0 %v13066_v33  ;;  %v13266_v45 = vcombine.high %v19931_v22, %v19930_v35  ;;  %v19933_v21 = vld [vmem:[#allocation46_spill] sm:$0xff]  ;;  %v5086_v33 = vcombine.high %v17921_v63, %v17921_v63 }
 0x3b7   :  { %v8689_v30 = vpop.f32.mrf.mxu1  ;;  %v13071_v50 = vcombine.low %v19933_v21, %v19932_v55  ;;  %v19934_v40 = vld [vmem:[#allocation143_spill] sm:$0xff] }
 0x3b8   :  { %v8728_v5 = vpop.f32.mrf.mxu0 }
 0x3b9   :  { %v13074_v5 = vcombine.high %v19935_v13, %v19934_v40 }
 0x3ba   :  { %9706 = vmatpush1.bf16.xpose.msra.mxu1 %v13063_v44  ;;  %v8729_v42 = vpop.f32.mrf.mxu0  ;;  %v13072_v44 = vcombine.high %v19933_v21, %v19932_v55 }
 0x3bb   :  { %9783 = vmatprep.subr.bf16.mxu1 %v13260_v15  ;;  %v4671_v15 = vld [vmem:[#allocation3 + $0xa0] sm:$0xff] }
 0x3bc   :  { %v19937_v42 = vld [vmem:[#allocation240_spill] sm:$0xff]  ;;  %v5094_v36 = vrot.slane %v4671_v15, %v17551_v48 }
 0x3bd   :  { %9746 = vmatpush1.bf16.xpose.msra.mxu0 %v13065_v59  ;;  %v19936_v59 = vld [vmem:[#allocation336_spill] sm:$0xff] }
 0x3be   :  { %9823 = vmatprep.subr.bf16.mxu0 %v13262_v1  ;;  %v5087_v1 = vcombine.high %v4671_v15, %v4671_v15  ;;  %v5102_v61 = vcombine.high %v5094_v36, %v5094_v36  ;;  %v19947_v15 = vld [vmem:[#allocation243_spill] sm:$0xff] }
 0x3c0   :  { %v17945_v28 = vrot.slane %v5087_v1, %v17551_v48  ;;  %v5836_v25 = vpack.c.bf16 %v5102_v61, %v5102_v61  ;;  %v19951_v61 = vld [vmem:[#allocation51_spill] sm:$0xff] }
 0x3c1   :  { %v8765_v41 = vpop.f32.mrf.mxu1  ;;  %9724 = vmatmul.mubr.bf16.vlgmr.msra.gmra.mxu1 %v5823_v7 }
 0x3c2   :  { %v8766_v52 = vadd.f32 %v8765_v41, %v8726_v46  ;;  %9784 = vmatpush1.bf16.xpose.msra.mxu1 %v13259_v39  ;;  %9803 = vmatprep.mubr.bf16.mxu1 %v5828_v32  ;;  %v5834_v46 = vpack.c.bf16 %v5086_v33, %v5086_v33  ;;  %v13268_v39 = vcombine.high %v19937_v42, %v19936_v59 }
 0x3c3   :  { %v8767_v20 = vpop.f32.mrf.mxu1  ;;  %9785 = vmatprep.subr.bf16.mxu1 %v13068_v11  ;;  %v5831_v32 = vpack.c.bf16 %v5077_v26, %v5077_v26  ;;  %v13073_v41 = vcombine.low %v19935_v13, %v19934_v40 }
 0x3c4   :  { %v8805_v0 = vpop.f32.mrf.mxu0  ;;  %9764 = vmatmul.mubr.bf16.vlgmr.msra.gmra.mxu0 %v5825_v51  ;;  %v13267_v20 = vcombine.low %v19937_v42, %v19936_v59  ;;  %v19938_v51 = vld [vmem:[#allocation337_spill] sm:$0xff]  ;;  %v5837_v42 = vpack.c.bf16 %v17945_v28, %v17945_v28 }
 0x3c5   :  { %v8768_v34 = vpop.f32.mrf.mxu1  ;;  %v8806_v47 = vadd.f32 %v8805_v0, %v8766_v52  ;;  %9824 = vmatpush1.bf16.xpose.msra.mxu0 %v13261_v8  ;;  %9843 = vmatprep.mubr.bf16.mxu0 %v5830_v3  ;;  %v19940_v8 = vld [vmem:[#allocation144_spill] sm:$0xff]  ;;  %v13269_v0 = vcombine.low %v19939_v54, %v19938_v51 }
 0x3c6   :  { %v8807_v9 = vpop.f32.mrf.mxu0  ;;  %9825 = vmatprep.subr.bf16.mxu0 %v13070_v29  ;;  %v13270_v34 = vcombine.high %v19939_v54, %v19938_v51  ;;  %v19941_v3 = vld [vmem:[#allocation48_spill] sm:$0xff]  ;;  %v5103_v29 = vcombine.high %v17945_v28, %v17945_v28 }
 0x3c7   :  { %v8769_v6 = vpop.f32.mrf.mxu1  ;;  %v13075_v31 = vcombine.low %v19941_v3, %v19940_v8  ;;  %v19942_v9 = vld [vmem:[#allocation145_spill] sm:$0xff] }
 0x3c8   :  { %v8808_v58 = vpop.f32.mrf.mxu0 }
 0x3c9   :  { %v13078_v58 = vcombine.high %v19943_v2, %v19942_v9 }
 0x3ca   :  { %9786 = vmatpush1.bf16.xpose.msra.mxu1 %v13067_v4  ;;  %v8809_v18 = vpop.f32.mrf.mxu0  ;;  %v13076_v4 = vcombine.high %v19941_v3, %v19940_v8 }
 0x3cb   :  { %9863 = vmatprep.subr.bf16.mxu1 %v13264_v17  ;;  %v4672_v17 = vld [vmem:[#allocation3 + $0xa8] sm:$0xff]  ;;  %v19945_v18 = vld [vmem:[#allocation242_spill] sm:$0xff] }
 0x3cc   :  { %v5111_v35 = vrot.slane %v4672_v17, %v17551_v48 }
 0x3cd   :  { %9826 = vmatpush1.bf16.xpose.msra.mxu0 %v13069_v38  ;;  %v19944_v38 = vld [vmem:[#allocation338_spill] sm:$0xff] }
 0x3ce   :  { %9903 = vmatprep.subr.bf16.mxu0 %v13266_v45  ;;  %v5104_v45 = vcombine.high %v4672_v17, %v4672_v17  ;;  %v5119_v21 = vcombine.high %v5111_v35, %v5111_v35  ;;  %v19955_v17 = vld [vmem:[#allocation245_spill] sm:$0xff] }
 0x3d0   :  { %v17969_v33 = vrot.slane %v5104_v45, %v17551_v48  ;;  %v5840_v40 = vpack.c.bf16 %v5119_v21, %v5119_v21  ;;  %v19959_v21 = vld [vmem:[#allocation53_spill] sm:$0xff] }
 0x3d1   :  { %v8845_v56 = vpop.f32.mrf.mxu1  ;;  %9804 = vmatmul.mubr.bf16.vlgmr.msra.gmra.mxu1 %v5827_v24 }
 0x3d2   :  { %v8846_v30 = vadd.f32 %v8845_v56, %v8806_v47  ;;  %9864 = vmatpush1.bf16.xpose.msra.mxu1 %v13263_v27  ;;  %9883 = vmatprep.mubr.bf16.mxu1 %v5832_v16  ;;  %v5838_v47 = vpack.c.bf16 %v5103_v29, %v5103_v29  ;;  %v13272_v27 = vcombine.high %v19945_v18, %v19944_v38 }
 0x3d3   :  { %v8847_v62 = vpop.f32.mrf.mxu1  ;;  %9865 = vmatprep.subr.bf16.mxu1 %v13072_v44  ;;  %v5835_v16 = vpack.c.bf16 %v5094_v36, %v5094_v36  ;;  %v13077_v56 = vcombine.low %v19943_v2, %v19942_v9 }
 0x3d4   :  { %v8885_v49 = vpop.f32.mrf.mxu0  ;;  %9844 = vmatmul.mubr.bf16.vlgmr.msra.gmra.mxu0 %v5829_v53  ;;  %v13271_v62 = vcombine.low %v19945_v18, %v19944_v38  ;;  %v19946_v53 = vld [vmem:[#allocation339_spill] sm:$0xff]  ;;  %v5841_v18 = vpack.c.bf16 %v17969_v33, %v17969_v33 }
 0x3d5   :  { %v8848_v19 = vpop.f32.mrf.mxu1  ;;  %v8886_v14 = vadd.f32 %v8885_v49, %v8846_v30  ;;  %9904 = vmatpush1.bf16.xpose.msra.mxu0 %v13265_v37  ;;  %9923 = vmatprep.mubr.bf16.mxu0 %v5834_v46  ;;  %v19948_v37 = vld [vmem:[#allocation146_spill] sm:$0xff]  ;;  %v13273_v49 = vcombine.low %v19947_v15, %v19946_v53 }
 0x3d6   :  { %v8887_v43 = vpop.f32.mrf.mxu0  ;;  %9905 = vmatprep.subr.bf16.mxu0 %v13074_v5  ;;  %v13274_v19 = vcombine.high %v19947_v15, %v19946_v53  ;;  %v19949_v46 = vld [vmem:[#allocation50_spill] sm:$0xff]  ;;  %v5120_v5 = vcombine.high %v17969_v33, %v17969_v33 }
 0x3d7   :  { %v8849_v7 = vpop.f32.mrf.mxu1  ;;  %v13079_v1 = vcombine.low %v19949_v46, %v19948_v37  ;;  %v19950_v43 = vld [vmem:[#allocation147_spill] sm:$0xff] }
 0x3d8   :  { %v8888_v11 = vpop.f32.mrf.mxu0 }
 0x3d9   :  { %v13082_v11 = vcombine.high %v19951_v61, %v19950_v43 }
 0x3da   :  { %9866 = vmatpush1.bf16.xpose.msra.mxu1 %v13071_v50  ;;  %v8889_v52 = vpop.f32.mrf.mxu0  ;;  %v13080_v50 = vcombine.high %v19949_v46, %v19948_v37 }
 0x3db   :  { %9943 = vmatprep.subr.bf16.mxu1 %v13268_v39  ;;  %v4673_v39 = vld [vmem:[#allocation3 + $0xb0] sm:$0xff]  ;;  %v19953_v52 = vld [vmem:[#allocation244_spill] sm:$0xff] }
 0x3dc   :  { %v5128_v51 = vrot.slane %v4673_v39, %v17551_v48 }
 0x3dd   :  { %9906 = vmatpush1.bf16.xpose.msra.mxu0 %v13073_v41  ;;  %v19952_v41 = vld [vmem:[#allocation340_spill] sm:$0xff] }
 0x3de   :  { %9983 = vmatprep.subr.bf16.mxu0 %v13270_v34  ;;  %v5121_v34 = vcombine.high %v4673_v39, %v4673_v39  ;;  %v5136_v3 = vcombine.high %v5128_v51, %v5128_v51  ;;  %v19963_v39 = vld [vmem:[#allocation247_spill] sm:$0xff] }
 0x3e0   :  { %v17993_v29 = vrot.slane %v5121_v34, %v17551_v48  ;;  %v5844_v9 = vpack.c.bf16 %v5136_v3, %v5136_v3  ;;  %v19967_v3 = vld [vmem:[#allocation55_spill] sm:$0xff] }
 0x3e1   :  { %v8925_v57 = vpop.f32.mrf.mxu1  ;;  %9884 = vmatmul.mubr.bf16.vlgmr.msra.gmra.mxu1 %v5831_v32 }
 0x3e2   :  { %v8926_v6 = vadd.f32 %v8925_v57, %v8886_v14  ;;  %9944 = vmatpush1.bf16.xpose.msra.mxu1 %v13267_v20  ;;  %9963 = vmatprep.mubr.bf16.mxu1 %v5836_v25  ;;  %v5842_v14 = vpack.c.bf16 %v5120_v5, %v5120_v5  ;;  %v13276_v20 = vcombine.high %v19953_v52, %v19952_v41 }
 0x3e3   :  { %v8927_v60 = vpop.f32.mrf.mxu1  ;;  %9945 = vmatprep.subr.bf16.mxu1 %v13076_v4  ;;  %v5839_v25 = vpack.c.bf16 %v5111_v35, %v5111_v35  ;;  %v13081_v57 = vcombine.low %v19951_v61, %v19950_v43 }
 0x3e4   :  { %v8965_v22 = vpop.f32.mrf.mxu0  ;;  %9924 = vmatmul.mubr.bf16.vlgmr.msra.gmra.mxu0 %v5833_v23  ;;  %v13275_v60 = vcombine.low %v19953_v52, %v19952_v41  ;;  %v19954_v23 = vld [vmem:[#allocation341_spill] sm:$0xff]  ;;  %v5845_v52 = vpack.c.bf16 %v17993_v29, %v17993_v29 }
 0x3e5   :  { %v8928_v26 = vpop.f32.mrf.mxu1  ;;  %v8966_v63 = vadd.f32 %v8965_v22, %v8926_v6  ;;  %9984 = vmatpush1.bf16.xpose.msra.mxu0 %v13269_v0  ;;  %10003 = vmatprep.mubr.bf16.mxu0 %v5838_v47  ;;  %v19956_v0 = vld [vmem:[#allocation148_spill] sm:$0xff]  ;;  %v13277_v22 = vcombine.low %v19955_v17, %v19954_v23 }
 0x3e6   :  { %v8967_v55 = vpop.f32.mrf.mxu0  ;;  %9985 = vmatprep.subr.bf16.mxu0 %v13078_v58  ;;  %v13278_v26 = vcombine.high %v19955_v17, %v19954_v23  ;;  %v19957_v47 = vld [vmem:[#allocation52_spill] sm:$0xff]  ;;  %v5137_v58 = vcombine.high %v17993_v29, %v17993_v29 }
 0x3e7   :  { %v8929_v24 = vpop.f32.mrf.mxu1  ;;  %v13083_v45 = vcombine.low %v19957_v47, %v19956_v0  ;;  %v19958_v55 = vld [vmem:[#allocation149_spill] sm:$0xff] }
 0x3e8   :  { %v8968_v44 = vpop.f32.mrf.mxu0 }
 0x3e9   :  { %v13086_v44 = vcombine.high %v19959_v21, %v19958_v55 }
 0x3ea   :  { %9946 = vmatpush1.bf16.xpose.msra.mxu1 %v13075_v31  ;;  %v8969_v30 = vpop.f32.mrf.mxu0  ;;  %v13084_v31 = vcombine.high %v19957_v47, %v19956_v0 }
 0x3eb   :  { %10023 = vmatprep.subr.bf16.mxu1 %v13272_v27  ;;  %v4674_v27 = vld [vmem:[#allocation3 + $0xb8] sm:$0xff] }
 0x3ec   :  { %v19961_v30 = vld [vmem:[#allocation246_spill] sm:$0xff]  ;;  %v5145_v53 = vrot.slane %v4674_v27, %v17551_v48 }
 0x3ed   :  { %9986 = vmatpush1.bf16.xpose.msra.mxu0 %v13077_v56  ;;  %v19960_v56 = vld [vmem:[#allocation342_spill] sm:$0xff] }
 0x3ee   :  { %10063 = vmatprep.subr.bf16.mxu0 %v13274_v19  ;;  %v5138_v19 = vcombine.high %v4674_v27, %v4674_v27  ;;  %v5153_v46 = vcombine.high %v5145_v53, %v5145_v53  ;;  %v19971_v27 = vld [vmem:[#allocation249_spill] sm:$0xff] }
 0x3f0   :  { %v18017_v5 = vrot.slane %v5138_v19, %v17551_v48  ;;  %v5848_v43 = vpack.c.bf16 %v5153_v46, %v5153_v46  ;;  %v19975_v46 = vld [vmem:[#allocation57_spill] sm:$0xff] }
 0x3f1   :  { %v9005_v13 = vpop.f32.mrf.mxu1  ;;  %9964 = vmatmul.mubr.bf16.vlgmr.msra.gmra.mxu1 %v5835_v16 }
 0x3f2   :  { %v9006_v7 = vadd.f32 %v9005_v13, %v8966_v63  ;;  %10024 = vmatpush1.bf16.xpose.msra.mxu1 %v13271_v62  ;;  %10043 = vmatprep.mubr.bf16.mxu1 %v5840_v40  ;;  %v5846_v63 = vpack.c.bf16 %v5137_v58, %v5137_v58  ;;  %v13280_v62 = vcombine.high %v19961_v30, %v19960_v56 }
 0x3f3   :  { %v9007_v59 = vpop.f32.mrf.mxu1  ;;  %10025 = vmatprep.subr.bf16.mxu1 %v13080_v50  ;;  %v5843_v40 = vpack.c.bf16 %v5128_v51, %v5128_v51  ;;  %v13085_v13 = vcombine.low %v19959_v21, %v19958_v55 }
 0x3f4   :  { %v9045_v54 = vpop.f32.mrf.mxu0  ;;  %10004 = vmatmul.mubr.bf16.vlgmr.msra.gmra.mxu0 %v5837_v42  ;;  %v13279_v59 = vcombine.low %v19961_v30, %v19960_v56  ;;  %v19962_v42 = vld [vmem:[#allocation343_spill] sm:$0xff]  ;;  %v5849_v30 = vpack.c.bf16 %v18017_v5, %v18017_v5 }
 0x3f5   :  { %v9008_v36 = vpop.f32.mrf.mxu1  ;;  %v9046_v28 = vadd.f32 %v9045_v54, %v9006_v7  ;;  %10064 = vmatpush1.bf16.xpose.msra.mxu0 %v13273_v49  ;;  %10083 = vmatprep.mubr.bf16.mxu0 %v5842_v14  ;;  %v19964_v49 = vld [vmem:[#allocation150_spill] sm:$0xff]  ;;  %v13281_v54 = vcombine.low %v19963_v39, %v19962_v42 }
 0x3f6   :  { %v9047_v8 = vpop.f32.mrf.mxu0  ;;  %10065 = vmatprep.subr.bf16.mxu0 %v13082_v11  ;;  %v13282_v36 = vcombine.high %v19963_v39, %v19962_v42  ;;  %v19965_v14 = vld [vmem:[#allocation54_spill] sm:$0xff]  ;;  %v5154_v11 = vcombine.high %v18017_v5, %v18017_v5 }
 0x3f7   :  { %v9009_v32 = vpop.f32.mrf.mxu1  ;;  %v13087_v34 = vcombine.low %v19965_v14, %v19964_v49  ;;  %v19966_v8 = vld [vmem:[#allocation151_spill] sm:$0xff] }
 0x3f8   :  { %v9048_v4 = vpop.f32.mrf.mxu0 }
 0x3f9   :  { %v13090_v4 = vcombine.high %v19967_v3, %v19966_v8 }
 0x3fa   :  { %10026 = vmatpush1.bf16.xpose.msra.mxu1 %v13079_v1  ;;  %v9049_v6 = vpop.f32.mrf.mxu0  ;;  %v13088_v1 = vcombine.high %v19965_v14, %v19964_v49 }
 0x3fb   :  { %10103 = vmatprep.subr.bf16.mxu1 %v13276_v20  ;;  %v4675_v20 = vld [vmem:[#allocation3 + $0xc0] sm:$0xff] }
 0x3fc   :  { %v19969_v6 = vld [vmem:[#allocation248_spill] sm:$0xff]  ;;  %v5162_v23 = vrot.slane %v4675_v20, %v17551_v48 }
 0x3fd   :  { %10066 = vmatpush1.bf16.xpose.msra.mxu0 %v13081_v57  ;;  %v19968_v57 = vld [vmem:[#allocation344_spill] sm:$0xff] }
 0x3fe   :  { %10143 = vmatprep.subr.bf16.mxu0 %v13278_v26  ;;  %v5155_v26 = vcombine.high %v4675_v20, %v4675_v20  ;;  %v5170_v47 = vcombine.high %v5162_v23, %v5162_v23  ;;  %v19979_v20 = vld [vmem:[#allocation251_spill] sm:$0xff] }
 0x400   :  { %v18041_v58 = vrot.slane %v5155_v26, %v17551_v48  ;;  %v5852_v55 = vpack.c.bf16 %v5170_v47, %v5170_v47  ;;  %v19983_v47 = vld [vmem:[#allocation59_spill] sm:$0xff] }
 0x401   :  { %v9085_v2 = vpop.f32.mrf.mxu1  ;;  %10044 = vmatmul.mubr.bf16.vlgmr.msra.gmra.mxu1 %v5839_v25 }
 0x402   :  { %v9086_v24 = vadd.f32 %v9085_v2, %v9046_v28  ;;  %10104 = vmatpush1.bf16.xpose.msra.mxu1 %v13275_v60  ;;  %10123 = vmatprep.mubr.bf16.mxu1 %v5844_v9  ;;  %v5850_v28 = vpack.c.bf16 %v5154_v11, %v5154_v11  ;;  %v13284_v60 = vcombine.high %v19969_v6, %v19968_v57 }
 0x403   :  { %v9087_v38 = vpop.f32.mrf.mxu1  ;;  %10105 = vmatprep.subr.bf16.mxu1 %v13084_v31  ;;  %v5847_v9 = vpack.c.bf16 %v5145_v53, %v5145_v53  ;;  %v13089_v2 = vcombine.low %v19967_v3, %v19966_v8 }
 0x404   :  { %v9125_v15 = vpop.f32.mrf.mxu0  ;;  %10084 = vmatmul.mubr.bf16.vlgmr.msra.gmra.mxu0 %v5841_v18  ;;  %v13283_v38 = vcombine.low %v19969_v6, %v19968_v57  ;;  %v19970_v18 = vld [vmem:[#allocation345_spill] sm:$0xff]  ;;  %v5853_v6 = vpack.c.bf16 %v18041_v58, %v18041_v58 }
 0x405   :  { %v9088_v35 = vpop.f32.mrf.mxu1  ;;  %v9126_v33 = vadd.f32 %v9125_v15, %v9086_v24  ;;  %10144 = vmatpush1.bf16.xpose.msra.mxu0 %v13277_v22  ;;  %10163 = vmatprep.mubr.bf16.mxu0 %v5846_v63  ;;  %v19972_v22 = vld [vmem:[#allocation152_spill] sm:$0xff]  ;;  %v13285_v15 = vcombine.low %v19971_v27, %v19970_v18 }
 0x406   :  { %v9127_v37 = vpop.f32.mrf.mxu0  ;;  %10145 = vmatprep.subr.bf16.mxu0 %v13086_v44  ;;  %v13286_v35 = vcombine.high %v19971_v27, %v19970_v18  ;;  %v19973_v63 = vld [vmem:[#allocation56_spill] sm:$0xff]  ;;  %v5171_v44 = vcombine.high %v18041_v58, %v18041_v58 }
 0x407   :  { %v9089_v16 = vpop.f32.mrf.mxu1  ;;  %v13091_v19 = vcombine.low %v19973_v63, %v19972_v22  ;;  %v19974_v37 = vld [vmem:[#allocation153_spill] sm:$0xff] }
 0x408   :  { %v9128_v50 = vpop.f32.mrf.mxu0 }
 0x409   :  { %v13094_v50 = vcombine.high %v19975_v46, %v19974_v37 }
 0x40a   :  { %10106 = vmatpush1.bf16.xpose.msra.mxu1 %v13083_v45  ;;  %v9129_v7 = vpop.f32.mrf.mxu0  ;;  %v13092_v45 = vcombine.high %v19973_v63, %v19972_v22 }
 0x40b   :  { %10183 = vmatprep.subr.bf16.mxu1 %v13280_v62  ;;  %v4676_v62 = vld [vmem:[#allocation3 + $0xc8] sm:$0xff]  ;;  %v19977_v7 = vld [vmem:[#allocation250_spill] sm:$0xff] }
 0x40c   :  { %v5179_v42 = vrot.slane %v4676_v62, %v17551_v48 }
 0x40d   :  { %10146 = vmatpush1.bf16.xpose.msra.mxu0 %v13085_v13  ;;  %v19976_v13 = vld [vmem:[#allocation346_spill] sm:$0xff] }
 0x40e   :  { %10223 = vmatprep.subr.bf16.mxu0 %v13282_v36  ;;  %v5172_v36 = vcombine.high %v4676_v62, %v4676_v62  ;;  %v5187_v14 = vcombine.high %v5179_v42, %v5179_v42  ;;  %v19987_v62 = vld [vmem:[#allocation253_spill] sm:$0xff] }
 0x410   :  { %v18065_v11 = vrot.slane %v5172_v36, %v17551_v48  ;;  %v5856_v8 = vpack.c.bf16 %v5187_v14, %v5187_v14  ;;  %v19991_v14 = vld [vmem:[#allocation61_spill] sm:$0xff] }
 0x411   :  { %v9165_v61 = vpop.f32.mrf.mxu1  ;;  %10124 = vmatmul.mubr.bf16.vlgmr.msra.gmra.mxu1 %v5843_v40 }
 0x412   :  { %v9166_v32 = vadd.f32 %v9165_v61, %v9126_v33  ;;  %10184 = vmatpush1.bf16.xpose.msra.mxu1 %v13279_v59  ;;  %10203 = vmatprep.mubr.bf16.mxu1 %v5848_v43  ;;  %v5854_v33 = vpack.c.bf16 %v5171_v44, %v5171_v44  ;;  %v13288_v59 = vcombine.high %v19977_v7, %v19976_v13 }
 0x413   :  { %v9167_v41 = vpop.f32.mrf.mxu1  ;;  %10185 = vmatprep.subr.bf16.mxu1 %v13088_v1  ;;  %v5851_v43 = vpack.c.bf16 %v5162_v23, %v5162_v23  ;;  %v13093_v61 = vcombine.low %v19975_v46, %v19974_v37 }
 0x414   :  { %v9205_v17 = vpop.f32.mrf.mxu0  ;;  %10164 = vmatmul.mubr.bf16.vlgmr.msra.gmra.mxu0 %v5845_v52  ;;  %v13287_v41 = vcombine.low %v19977_v7, %v19976_v13  ;;  %v19978_v52 = vld [vmem:[#allocation347_spill] sm:$0xff]  ;;  %v5857_v7 = vpack.c.bf16 %v18065_v11, %v18065_v11 }
 0x415   :  { %v9168_v51 = vpop.f32.mrf.mxu1  ;;  %v9206_v29 = vadd.f32 %v9205_v17, %v9166_v32  ;;  %10224 = vmatpush1.bf16.xpose.msra.mxu0 %v13281_v54  ;;  %10243 = vmatprep.mubr.bf16.mxu0 %v5850_v28  ;;  %v19980_v54 = vld [vmem:[#allocation154_spill] sm:$0xff]  ;;  %v13289_v17 = vcombine.low %v19979_v20, %v19978_v52 }
 0x416   :  { %v9207_v0 = vpop.f32.mrf.mxu0  ;;  %10225 = vmatprep.subr.bf16.mxu0 %v13090_v4  ;;  %v13290_v51 = vcombine.high %v19979_v20, %v19978_v52  ;;  %v19981_v28 = vld [vmem:[#allocation58_spill] sm:$0xff]  ;;  %v5188_v4 = vcombine.high %v18065_v11, %v18065_v11 }
 0x417   :  { %v9169_v25 = vpop.f32.mrf.mxu1  ;;  %v13095_v26 = vcombine.low %v19981_v28, %v19980_v54  ;;  %v19982_v0 = vld [vmem:[#allocation155_spill] sm:$0xff] }
 0x418   :  { %v9208_v31 = vpop.f32.mrf.mxu0 }
 0x419   :  { %v13098_v31 = vcombine.high %v19983_v47, %v19982_v0 }
 0x41a   :  { %10186 = vmatpush1.bf16.xpose.msra.mxu1 %v13087_v34  ;;  %v9209_v24 = vpop.f32.mrf.mxu0  ;;  %v13096_v34 = vcombine.high %v19981_v28, %v19980_v54 }
 0x41b   :  { %10263 = vmatprep.subr.bf16.mxu1 %v13284_v60  ;;  %v4677_v60 = vld [vmem:[#allocation3 + $0xd0] sm:$0xff]  ;;  %v19985_v24 = vld [vmem:[#allocation252_spill] sm:$0xff] }
 0x41c   :  { %v5196_v18 = vrot.slane %v4677_v60, %v17551_v48 }
 0x41d   :  { %10226 = vmatpush1.bf16.xpose.msra.mxu0 %v13089_v2  ;;  %v19984_v2 = vld [vmem:[#allocation348_spill] sm:$0xff] }
 0x41e   :  { %10303 = vmatprep.subr.bf16.mxu0 %v13286_v35  ;;  %v5189_v35 = vcombine.high %v4677_v60, %v4677_v60  ;;  %v5204_v63 = vcombine.high %v5196_v18, %v5196_v18  ;;  %v19995_v60 = vld [vmem:[#allocation255_spill] sm:$0xff] }
 0x420   :  { %v18089_v44 = vrot.slane %v5189_v35, %v17551_v48  ;;  %v5860_v37 = vpack.c.bf16 %v5204_v63, %v5204_v63  ;;  %v19999_v63 = vld [vmem:[#allocation63_spill] sm:$0xff] }
 0x421   :  { %v9245_v21 = vpop.f32.mrf.mxu1  ;;  %10204 = vmatmul.mubr.bf16.vlgmr.msra.gmra.mxu1 %v5847_v9 }
 0x422   :  { %v9246_v16 = vadd.f32 %v9245_v21, %v9206_v29  ;;  %10264 = vmatpush1.bf16.xpose.msra.mxu1 %v13283_v38  ;;  %10283 = vmatprep.mubr.bf16.mxu1 %v5852_v55  ;;  %v5858_v29 = vpack.c.bf16 %v5188_v4, %v5188_v4  ;;  %v13292_v38 = vcombine.high %v19985_v24, %v19984_v2 }
 0x423   :  { %v9247_v56 = vpop.f32.mrf.mxu1  ;;  %10265 = vmatprep.subr.bf16.mxu1 %v13092_v45  ;;  %v5855_v55 = vpack.c.bf16 %v5179_v42, %v5179_v42  ;;  %v13097_v21 = vcombine.low %v19983_v47, %v19982_v0 }
 0x424   :  { %v9285_v39 = vpop.f32.mrf.mxu0  ;;  %10244 = vmatmul.mubr.bf16.vlgmr.msra.gmra.mxu0 %v5849_v30  ;;  %v13291_v56 = vcombine.low %v19985_v24, %v19984_v2  ;;  %v19986_v30 = vld [vmem:[#allocation349_spill] sm:$0xff]  ;;  %v5861_v24 = vpack.c.bf16 %v18089_v44, %v18089_v44 }
 0x425   :  { %v9248_v53 = vpop.f32.mrf.mxu1  ;;  %v9286_v5 = vadd.f32 %v9285_v39, %v9246_v16  ;;  %10304 = vmatpush1.bf16.xpose.msra.mxu0 %v13285_v15  ;;  %10323 = vmatprep.mubr.bf16.mxu0 %v5854_v33  ;;  %v19988_v15 = vld [vmem:[#allocation156_spill] sm:$0xff]  ;;  %v13293_v39 = vcombine.low %v19987_v62, %v19986_v30 }
 0x426   :  { %v9287_v49 = vpop.f32.mrf.mxu0  ;;  %10305 = vmatprep.subr.bf16.mxu0 %v13094_v50  ;;  %v13294_v53 = vcombine.high %v19987_v62, %v19986_v30  ;;  %v19989_v33 = vld [vmem:[#allocation60_spill] sm:$0xff]  ;;  %v5205_v50 = vcombine.high %v18089_v44, %v18089_v44 }
 0x427   :  { %v9249_v40 = vpop.f32.mrf.mxu1  ;;  %v13099_v36 = vcombine.low %v19989_v33, %v19988_v15  ;;  %v19990_v49 = vld [vmem:[#allocation157_spill] sm:$0xff] }
 0x428   :  { %v9288_v1 = vpop.f32.mrf.mxu0 }
 0x429   :  { %v13102_v1 = vcombine.high %v19991_v14, %v19990_v49 }
 0x42a   :  { %10266 = vmatpush1.bf16.xpose.msra.mxu1 %v13091_v19  ;;  %v9289_v32 = vpop.f32.mrf.mxu0  ;;  %v13100_v19 = vcombine.high %v19989_v33, %v19988_v15 }
 0x42b   :  { %10343 = vmatprep.subr.bf16.mxu1 %v13288_v59  ;;  %v4678_v59 = vld [vmem:[#allocation3 + $0xd8] sm:$0xff] }
 0x42c   :  { %v19993_v32 = vld [vmem:[#allocation254_spill] sm:$0xff]  ;;  %v5213_v52 = vrot.slane %v4678_v59, %v17551_v48 }
 0x42d   :  { %10306 = vmatpush1.bf16.xpose.msra.mxu0 %v13093_v61  ;;  %v19992_v61 = vld [vmem:[#allocation350_spill] sm:$0xff] }
 0x42e   :  { %10383 = vmatprep.subr.bf16.mxu0 %v13290_v51  ;;  %v5206_v51 = vcombine.high %v4678_v59, %v4678_v59  ;;  %v5221_v28 = vcombine.high %v5213_v52, %v5213_v52  ;;  %v20003_v59 = vld [vmem:[#allocation257_spill] sm:$0xff] }
 0x430   :  { %v18113_v4 = vrot.slane %v5206_v51, %v17551_v48  ;;  %v5864_v0 = vpack.c.bf16 %v5221_v28, %v5221_v28  ;;  %v20007_v28 = vld [vmem:[#allocation65_spill] sm:$0xff] }
 0x431   :  { %v9325_v3 = vpop.f32.mrf.mxu1  ;;  %10284 = vmatmul.mubr.bf16.vlgmr.msra.gmra.mxu1 %v5851_v43 }
 0x432   :  { %v9326_v25 = vadd.f32 %v9325_v3, %v9286_v5  ;;  %10344 = vmatpush1.bf16.xpose.msra.mxu1 %v13287_v41  ;;  %10363 = vmatprep.mubr.bf16.mxu1 %v5856_v8  ;;  %v5862_v5 = vpack.c.bf16 %v5205_v50, %v5205_v50  ;;  %v13296_v41 = vcombine.high %v19993_v32, %v19992_v61 }
 0x433   :  { %v9327_v57 = vpop.f32.mrf.mxu1  ;;  %10345 = vmatprep.subr.bf16.mxu1 %v13096_v34  ;;  %v5859_v8 = vpack.c.bf16 %v5196_v18, %v5196_v18  ;;  %v13101_v3 = vcombine.low %v19991_v14, %v19990_v49 }
 0x434   :  { %v9365_v27 = vpop.f32.mrf.mxu0  ;;  %10324 = vmatmul.mubr.bf16.vlgmr.msra.gmra.mxu0 %v5853_v6  ;;  %v13295_v57 = vcombine.low %v19993_v32, %v19992_v61  ;;  %v19994_v6 = vld [vmem:[#allocation351_spill] sm:$0xff]  ;;  %v5865_v32 = vpack.c.bf16 %v18113_v4, %v18113_v4 }
 0x435   :  { %v9328_v23 = vpop.f32.mrf.mxu1  ;;  %v9366_v58 = vadd.f32 %v9365_v27, %v9326_v25  ;;  %10384 = vmatpush1.bf16.xpose.msra.mxu0 %v13289_v17  ;;  %10403 = vmatprep.mubr.bf16.mxu0 %v5858_v29  ;;  %v19996_v17 = vld [vmem:[#allocation158_spill] sm:$0xff]  ;;  %v13297_v27 = vcombine.low %v19995_v60, %v19994_v6 }
 0x436   :  { %v9367_v22 = vpop.f32.mrf.mxu0  ;;  %10385 = vmatprep.subr.bf16.mxu0 %v13098_v31  ;;  %v13298_v23 = vcombine.high %v19995_v60, %v19994_v6  ;;  %v19997_v29 = vld [vmem:[#allocation62_spill] sm:$0xff]  ;;  %v5222_v31 = vcombine.high %v18113_v4, %v18113_v4 }
 0x437   :  { %v9329_v9 = vpop.f32.mrf.mxu1  ;;  %v13103_v35 = vcombine.low %v19997_v29, %v19996_v17  ;;  %v19998_v22 = vld [vmem:[#allocation159_spill] sm:$0xff] }
 0x438   :  { %v9368_v45 = vpop.f32.mrf.mxu0 }
 0x439   :  { %v13106_v45 = vcombine.high %v19999_v63, %v19998_v22 }
 0x43a   :  { %10346 = vmatpush1.bf16.xpose.msra.mxu1 %v13095_v26  ;;  %v9369_v16 = vpop.f32.mrf.mxu0  ;;  %v13104_v26 = vcombine.high %v19997_v29, %v19996_v17 }
 0x43b   :  { %10423 = vmatprep.subr.bf16.mxu1 %v13292_v38  ;;  %v4679_v38 = vld [vmem:[#allocation3 + $0xe0] sm:$0xff] }
 0x43c   :  { %v20001_v16 = vld [vmem:[#allocation256_spill] sm:$0xff]  ;;  %v5230_v30 = vrot.slane %v4679_v38, %v17551_v48 }
 0x43d   :  { %10386 = vmatpush1.bf16.xpose.msra.mxu0 %v13097_v21  ;;  %v20000_v21 = vld [vmem:[#allocation352_spill] sm:$0xff] }
 0x43e   :  { %10463 = vmatprep.subr.bf16.mxu0 %v13294_v53  ;;  %v5223_v53 = vcombine.high %v4679_v38, %v4679_v38  ;;  %v5238_v33 = vcombine.high %v5230_v30, %v5230_v30  ;;  %v20011_v38 = vld [vmem:[#allocation259_spill] sm:$0xff] }
 0x440   :  { %v18137_v50 = vrot.slane %v5223_v53, %v17551_v48  ;;  %v5868_v49 = vpack.c.bf16 %v5238_v33, %v5238_v33  ;;  %v20015_v33 = vld [vmem:[#allocation67_spill] sm:$0xff] }
 0x441   :  { %v9405_v46 = vpop.f32.mrf.mxu1  ;;  %10364 = vmatmul.mubr.bf16.vlgmr.msra.gmra.mxu1 %v5855_v55 }
 0x442   :  { %v9406_v40 = vadd.f32 %v9405_v46, %v9366_v58  ;;  %10424 = vmatpush1.bf16.xpose.msra.mxu1 %v13291_v56  ;;  %10443 = vmatprep.mubr.bf16.mxu1 %v5860_v37  ;;  %v5866_v58 = vpack.c.bf16 %v5222_v31, %v5222_v31  ;;  %v13300_v56 = vcombine.high %v20001_v16, %v20000_v21 }
 0x443   :  { %v9407_v13 = vpop.f32.mrf.mxu1  ;;  %10425 = vmatprep.subr.bf16.mxu1 %v13100_v19  ;;  %v5863_v37 = vpack.c.bf16 %v5213_v52, %v5213_v52  ;;  %v13105_v46 = vcombine.low %v19999_v63, %v19998_v22 }
 0x444   :  { %v9445_v20 = vpop.f32.mrf.mxu0  ;;  %10404 = vmatmul.mubr.bf16.vlgmr.msra.gmra.mxu0 %v5857_v7  ;;  %v13299_v13 = vcombine.low %v20001_v16, %v20000_v21  ;;  %v20002_v7 = vld [vmem:[#allocation353_spill] sm:$0xff]  ;;  %v5869_v16 = vpack.c.bf16 %v18137_v50, %v18137_v50 }
 0x445   :  { %v9408_v42 = vpop.f32.mrf.mxu1  ;;  %v9446_v11 = vadd.f32 %v9445_v20, %v9406_v40  ;;  %10464 = vmatpush1.bf16.xpose.msra.mxu0 %v13293_v39  ;;  %10483 = vmatprep.mubr.bf16.mxu0 %v5862_v5  ;;  %v20004_v39 = vld [vmem:[#allocation160_spill] sm:$0xff]  ;;  %v13301_v20 = vcombine.low %v20003_v59, %v20002_v7 }
 0x446   :  { %v9447_v54 = vpop.f32.mrf.mxu0  ;;  %10465 = vmatprep.subr.bf16.mxu0 %v13102_v1  ;;  %v13302_v42 = vcombine.high %v20003_v59, %v20002_v7  ;;  %v20005_v5 = vld [vmem:[#allocation64_spill] sm:$0xff]  ;;  %v5239_v1 = vcombine.high %v18137_v50, %v18137_v50 }
 0x447   :  { %v9409_v43 = vpop.f32.mrf.mxu1  ;;  %v13107_v51 = vcombine.low %v20005_v5, %v20004_v39  ;;  %v20006_v54 = vld [vmem:[#allocation161_spill] sm:$0xff] }
 0x448   :  { %v9448_v34 = vpop.f32.mrf.mxu0 }
 0x449   :  { %v13110_v34 = vcombine.high %v20007_v28, %v20006_v54 }
 0x44a   :  { %10426 = vmatpush1.bf16.xpose.msra.mxu1 %v13099_v36  ;;  %v9449_v25 = vpop.f32.mrf.mxu0  ;;  %v13108_v36 = vcombine.high %v20005_v5, %v20004_v39 }
 0x44b   :  { %10503 = vmatprep.subr.bf16.mxu1 %v13296_v41  ;;  %v4680_v41 = vld [vmem:[#allocation3 + $0xe8] sm:$0xff]  ;;  %v20009_v25 = vld [vmem:[#allocation258_spill] sm:$0xff] }
 0x44c   :  { %v5247_v6 = vrot.slane %v4680_v41, %v17551_v48 }
 0x44d   :  { %10466 = vmatpush1.bf16.xpose.msra.mxu0 %v13101_v3  ;;  %v20008_v3 = vld [vmem:[#allocation354_spill] sm:$0xff] }
 0x44e   :  { %10543 = vmatprep.subr.bf16.mxu0 %v13298_v23  ;;  %v5240_v23 = vcombine.high %v4680_v41, %v4680_v41  ;;  %v5255_v29 = vcombine.high %v5247_v6, %v5247_v6  ;;  %v20019_v41 = vld [vmem:[#allocation261_spill] sm:$0xff] }
 0x450   :  { %v18161_v31 = vrot.slane %v5240_v23, %v17551_v48  ;;  %v5872_v22 = vpack.c.bf16 %v5255_v29, %v5255_v29  ;;  %v20023_v29 = vld [vmem:[#allocation69_spill] sm:$0xff] }
 0x451   :  { %v9485_v47 = vpop.f32.mrf.mxu1  ;;  %10444 = vmatmul.mubr.bf16.vlgmr.msra.gmra.mxu1 %v5859_v8 }
 0x452   :  { %v9486_v9 = vadd.f32 %v9485_v47, %v9446_v11  ;;  %10504 = vmatpush1.bf16.xpose.msra.mxu1 %v13295_v57  ;;  %10523 = vmatprep.mubr.bf16.mxu1 %v5864_v0  ;;  %v5870_v11 = vpack.c.bf16 %v5239_v1, %v5239_v1  ;;  %v13304_v57 = vcombine.high %v20009_v25, %v20008_v3 }
 0x453   :  { %v9487_v2 = vpop.f32.mrf.mxu1  ;;  %10505 = vmatprep.subr.bf16.mxu1 %v13104_v26  ;;  %v5867_v0 = vpack.c.bf16 %v5230_v30, %v5230_v30  ;;  %v13109_v47 = vcombine.low %v20007_v28, %v20006_v54 }
 0x454   :  { %v9525_v62 = vpop.f32.mrf.mxu0  ;;  %10484 = vmatmul.mubr.bf16.vlgmr.msra.gmra.mxu0 %v5861_v24  ;;  %v13303_v2 = vcombine.low %v20009_v25, %v20008_v3  ;;  %v20010_v24 = vld [vmem:[#allocation355_spill] sm:$0xff]  ;;  %v5873_v25 = vpack.c.bf16 %v18161_v31, %v18161_v31 }
 0x455   :  { %v9488_v18 = vpop.f32.mrf.mxu1  ;;  %v9526_v44 = vadd.f32 %v9525_v62, %v9486_v9  ;;  %10544 = vmatpush1.bf16.xpose.msra.mxu0 %v13297_v27  ;;  %10563 = vmatprep.mubr.bf16.mxu0 %v5866_v58  ;;  %v20012_v27 = vld [vmem:[#allocation162_spill] sm:$0xff]  ;;  %v13305_v62 = vcombine.low %v20011_v38, %v20010_v24 }
 0x456   :  { %v9527_v15 = vpop.f32.mrf.mxu0  ;;  %10545 = vmatprep.subr.bf16.mxu0 %v13106_v45  ;;  %v13306_v18 = vcombine.high %v20011_v38, %v20010_v24  ;;  %v20013_v58 = vld [vmem:[#allocation66_spill] sm:$0xff]  ;;  %v5256_v45 = vcombine.high %v18161_v31, %v18161_v31 }
 0x457   :  { %v9489_v55 = vpop.f32.mrf.mxu1  ;;  %v13111_v53 = vcombine.low %v20013_v58, %v20012_v27  ;;  %v20014_v15 = vld [vmem:[#allocation163_spill] sm:$0xff] }
 0x458   :  { %v9528_v19 = vpop.f32.mrf.mxu0 }
 0x459   :  { %v13114_v19 = vcombine.high %v20015_v33, %v20014_v15 }
 0x45a   :  { %10506 = vmatpush1.bf16.xpose.msra.mxu1 %v13103_v35  ;;  %v9529_v40 = vpop.f32.mrf.mxu0  ;;  %v13112_v35 = vcombine.high %v20013_v58, %v20012_v27 }
 0x45b   :  { %10583 = vmatprep.subr.bf16.mxu1 %v13300_v56  ;;  %v4681_v56 = vld [vmem:[#allocation3 + $0xf0] sm:$0xff]  ;;  %v20017_v40 = vld [vmem:[#allocation260_spill] sm:$0xff] }
 0x45c   :  { %v5264_v7 = vrot.slane %v4681_v56, %v17551_v48 }
 0x45d   :  { %10546 = vmatpush1.bf16.xpose.msra.mxu0 %v13105_v46  ;;  %v20016_v46 = vld [vmem:[#allocation356_spill] sm:$0xff] }
 0x45e   :  { %10623 = vmatprep.subr.bf16.mxu0 %v13302_v42  ;;  %v5257_v42 = vcombine.high %v4681_v56, %v4681_v56  ;;  %v5272_v5 = vcombine.high %v5264_v7, %v5264_v7  ;;  %v20027_v56 = vld [vmem:[#allocation263_spill] sm:$0xff] }
 0x460   :  { %v18185_v1 = vrot.slane %v5257_v42, %v17551_v48  ;;  %v5876_v54 = vpack.c.bf16 %v5272_v5, %v5272_v5  ;;  %v20031_v5 = vld [vmem:[#allocation71_spill] sm:$0xff] }
 0x461   :  { %v9565_v14 = vpop.f32.mrf.mxu1  ;;  %10524 = vmatmul.mubr.bf16.vlgmr.msra.gmra.mxu1 %v5863_v37 }
 0x462   :  { %v9566_v43 = vadd.f32 %v9565_v14, %v9526_v44  ;;  %10584 = vmatpush1.bf16.xpose.msra.mxu1 %v13299_v13  ;;  %10603 = vmatprep.mubr.bf16.mxu1 %v5868_v49  ;;  %v5874_v44 = vpack.c.bf16 %v5256_v45, %v5256_v45  ;;  %v13308_v13 = vcombine.high %v20017_v40, %v20016_v46 }
 0x463   :  { %v9567_v61 = vpop.f32.mrf.mxu1  ;;  %10585 = vmatprep.subr.bf16.mxu1 %v13108_v36  ;;  %v5871_v49 = vpack.c.bf16 %v5247_v6, %v5247_v6  ;;  %v13113_v14 = vcombine.low %v20015_v33, %v20014_v15 }
 0x464   :  { %v9605_v60 = vpop.f32.mrf.mxu0  ;;  %10564 = vmatmul.mubr.bf16.vlgmr.msra.gmra.mxu0 %v5865_v32  ;;  %v13307_v61 = vcombine.low %v20017_v40, %v20016_v46  ;;  %v20018_v32 = vld [vmem:[#allocation357_spill] sm:$0xff]  ;;  %v5877_v40 = vpack.c.bf16 %v18185_v1, %v18185_v1 }
 0x465   :  { %v9568_v52 = vpop.f32.mrf.mxu1  ;;  %v9606_v4 = vadd.f32 %v9605_v60, %v9566_v43  ;;  %10624 = vmatpush1.bf16.xpose.msra.mxu0 %v13301_v20  ;;  %10643 = vmatprep.mubr.bf16.mxu0 %v5870_v11  ;;  %v20020_v20 = vld [vmem:[#allocation164_spill] sm:$0xff]  ;;  %v13309_v60 = vcombine.low %v20019_v41, %v20018_v32 }
 0x466   :  { %v9607_v17 = vpop.f32.mrf.mxu0  ;;  %10625 = vmatprep.subr.bf16.mxu0 %v13110_v34  ;;  %v13310_v52 = vcombine.high %v20019_v41, %v20018_v32  ;;  %v20021_v11 = vld [vmem:[#allocation68_spill] sm:$0xff]  ;;  %v5273_v34 = vcombine.high %v18185_v1, %v18185_v1 }
 0x467   :  { %v9569_v8 = vpop.f32.mrf.mxu1  ;;  %v13115_v23 = vcombine.low %v20021_v11, %v20020_v20  ;;  %v20022_v17 = vld [vmem:[#allocation165_spill] sm:$0xff] }
 0x468   :  { %v9608_v26 = vpop.f32.mrf.mxu0 }
 0x469   :  { %v13118_v26 = vcombine.high %v20023_v29, %v20022_v17 }
 0x46a   :  { %10586 = vmatpush1.bf16.xpose.msra.mxu1 %v13107_v51  ;;  %v9609_v9 = vpop.f32.mrf.mxu0  ;;  %v13116_v51 = vcombine.high %v20021_v11, %v20020_v20 }
 0x46b   :  { %10663 = vmatprep.subr.bf16.mxu1 %v13304_v57  ;;  %v4682_v57 = vld [vmem:[#allocation3 + $0xf8] sm:$0xff] }
 0x46c   :  { %v20025_v9 = vld [vmem:[#allocation262_spill] sm:$0xff]  ;;  %v5281_v24 = vrot.slane %v4682_v57, %v17551_v48 }
 0x46d   :  { %10626 = vmatpush1.bf16.xpose.msra.mxu0 %v13109_v47  ;;  %v20024_v47 = vld [vmem:[#allocation358_spill] sm:$0xff] }
 0x46e   :  { %10703 = vmatprep.subr.bf16.mxu0 %v13306_v18  ;;  %v5274_v18 = vcombine.high %v4682_v57, %v4682_v57  ;;  %v5289_v58 = vcombine.high %v5281_v24, %v5281_v24  ;;  %v20035_v57 = vld [vmem:[#allocation265_spill] sm:$0xff] }
 0x470   :  { %v18209_v45 = vrot.slane %v5274_v18, %v17551_v48  ;;  %v5880_v15 = vpack.c.bf16 %v5289_v58, %v5289_v58  ;;  %v20039_v58 = vld [vmem:[#allocation73_spill] sm:$0xff] }
 0x471   :  { %v9645_v63 = vpop.f32.mrf.mxu1  ;;  %10604 = vmatmul.mubr.bf16.vlgmr.msra.gmra.mxu1 %v5867_v0 }
 0x472   :  { %v9646_v55 = vadd.f32 %v9645_v63, %v9606_v4  ;;  %10664 = vmatpush1.bf16.xpose.msra.mxu1 %v13303_v2  ;;  %10683 = vmatprep.mubr.bf16.mxu1 %v5872_v22  ;;  %v5878_v4 = vpack.c.bf16 %v5273_v34, %v5273_v34  ;;  %v13312_v2 = vcombine.high %v20025_v9, %v20024_v47 }
 0x473   :  { %v9647_v21 = vpop.f32.mrf.mxu1  ;;  %10665 = vmatprep.subr.bf16.mxu1 %v13112_v35  ;;  %v5875_v22 = vpack.c.bf16 %v5264_v7, %v5264_v7  ;;  %v13117_v63 = vcombine.low %v20023_v29, %v20022_v17 }
 0x474   :  { %v9685_v59 = vpop.f32.mrf.mxu0  ;;  %10644 = vmatmul.mubr.bf16.vlgmr.msra.gmra.mxu0 %v5869_v16  ;;  %v13311_v21 = vcombine.low %v20025_v9, %v20024_v47  ;;  %v20026_v16 = vld [vmem:[#allocation359_spill] sm:$0xff]  ;;  %v5881_v9 = vpack.c.bf16 %v18209_v45, %v18209_v45 }
 0x475   :  { %v9648_v30 = vpop.f32.mrf.mxu1  ;;  %v9686_v50 = vadd.f32 %v9685_v59, %v9646_v55  ;;  %10704 = vmatpush1.bf16.xpose.msra.mxu0 %v13305_v62  ;;  %10723 = vmatprep.mubr.bf16.mxu0 %v5874_v44  ;;  %v20028_v62 = vld [vmem:[#allocation166_spill] sm:$0xff]  ;;  %v13313_v59 = vcombine.low %v20027_v56, %v20026_v16 }
 0x476   :  { %v9687_v39 = vpop.f32.mrf.mxu0  ;;  %10705 = vmatprep.subr.bf16.mxu0 %v13114_v19  ;;  %v13314_v30 = vcombine.high %v20027_v56, %v20026_v16  ;;  %v20029_v44 = vld [vmem:[#allocation70_spill] sm:$0xff]  ;;  %v5290_v19 = vcombine.high %v18209_v45, %v18209_v45 }
 0x477   :  { %v9649_v37 = vpop.f32.mrf.mxu1  ;;  %v13119_v42 = vcombine.low %v20029_v44, %v20028_v62  ;;  %v20030_v39 = vld [vmem:[#allocation167_spill] sm:$0xff] }
 0x478   :  { %v9688_v36 = vpop.f32.mrf.mxu0 }
 0x479   :  { %v13122_v36 = vcombine.high %v20031_v5, %v20030_v39 }
 0x47a   :  { %10666 = vmatpush1.bf16.xpose.msra.mxu1 %v13111_v53  ;;  %v9689_v43 = vpop.f32.mrf.mxu0  ;;  %v13120_v53 = vcombine.high %v20029_v44, %v20028_v62 }
 0x47b   :  { %10743 = vmatprep.subr.bf16.mxu1 %v13308_v13  ;;  %v4683_v13 = vld [vmem:[#allocation3 + $0x100] sm:$0xff] }
 0x47c   :  { %v20033_v43 = vld [vmem:[#allocation264_spill] sm:$0xff]  ;;  %v5298_v32 = vrot.slane %v4683_v13, %v17551_v48 }
 0x47d   :  { %10706 = vmatpush1.bf16.xpose.msra.mxu0 %v13113_v14  ;;  %v20032_v14 = vld [vmem:[#allocation360_spill] sm:$0xff] }
 0x47e   :  { %10783 = vmatprep.subr.bf16.mxu0 %v13310_v52  ;;  %v5291_v52 = vcombine.high %v4683_v13, %v4683_v13  ;;  %v5306_v11 = vcombine.high %v5298_v32, %v5298_v32  ;;  %v20043_v13 = vld [vmem:[#allocation267_spill] sm:$0xff] }
 0x480   :  { %v18233_v34 = vrot.slane %v5291_v52, %v17551_v48  ;;  %v5884_v17 = vpack.c.bf16 %v5306_v11, %v5306_v11  ;;  %v20047_v11 = vld [vmem:[#allocation75_spill] sm:$0xff] }
 0x481   :  { %v9725_v28 = vpop.f32.mrf.mxu1  ;;  %10684 = vmatmul.mubr.bf16.vlgmr.msra.gmra.mxu1 %v5871_v49 }
 0x482   :  { %v9726_v8 = vadd.f32 %v9725_v28, %v9686_v50  ;;  %10744 = vmatpush1.bf16.xpose.msra.mxu1 %v13307_v61  ;;  %10763 = vmatprep.mubr.bf16.mxu1 %v5876_v54  ;;  %v5882_v50 = vpack.c.bf16 %v5290_v19, %v5290_v19  ;;  %v13316_v61 = vcombine.high %v20033_v43, %v20032_v14 }
 0x483   :  { %v9727_v3 = vpop.f32.mrf.mxu1  ;;  %10745 = vmatprep.subr.bf16.mxu1 %v13116_v51  ;;  %v5879_v54 = vpack.c.bf16 %v5281_v24, %v5281_v24  ;;  %v13121_v28 = vcombine.low %v20031_v5, %v20030_v39 }
 0x484   :  { %v9765_v38 = vpop.f32.mrf.mxu0  ;;  %10724 = vmatmul.mubr.bf16.vlgmr.msra.gmra.mxu0 %v5873_v25  ;;  %v13315_v3 = vcombine.low %v20033_v43, %v20032_v14  ;;  %v20034_v25 = vld [vmem:[#allocation361_spill] sm:$0xff]  ;;  %v5885_v43 = vpack.c.bf16 %v18233_v34, %v18233_v34 }
 0x485   :  { %v9728_v6 = vpop.f32.mrf.mxu1  ;;  %v9766_v31 = vadd.f32 %v9765_v38, %v9726_v8  ;;  %10784 = vmatpush1.bf16.xpose.msra.mxu0 %v13309_v60  ;;  %10803 = vmatprep.mubr.bf16.mxu0 %v5878_v4  ;;  %v20036_v60 = vld [vmem:[#allocation168_spill] sm:$0xff]  ;;  %v13317_v38 = vcombine.low %v20035_v57, %v20034_v25 }
 0x486   :  { %v9767_v27 = vpop.f32.mrf.mxu0  ;;  %10785 = vmatprep.subr.bf16.mxu0 %v13118_v26  ;;  %v13318_v6 = vcombine.high %v20035_v57, %v20034_v25  ;;  %v20037_v4 = vld [vmem:[#allocation72_spill] sm:$0xff]  ;;  %v5307_v26 = vcombine.high %v18233_v34, %v18233_v34 }
 0x487   :  { %v9729_v0 = vpop.f32.mrf.mxu1  ;;  %v13123_v18 = vcombine.low %v20037_v4, %v20036_v60  ;;  %v20038_v27 = vld [vmem:[#allocation169_spill] sm:$0xff] }
 0x488   :  { %v9768_v35 = vpop.f32.mrf.mxu0 }
 0x489   :  { %v13126_v35 = vcombine.high %v20039_v58, %v20038_v27 }
 0x48a   :  { %10746 = vmatpush1.bf16.xpose.msra.mxu1 %v13115_v23  ;;  %v9769_v55 = vpop.f32.mrf.mxu0  ;;  %v13124_v23 = vcombine.high %v20037_v4, %v20036_v60 }
 0x48b   :  { %10823 = vmatprep.subr.bf16.mxu1 %v13312_v2  ;;  %v4684_v2 = vld [vmem:[#allocation3 + $0x108] sm:$0xff]  ;;  %v20041_v55 = vld [vmem:[#allocation266_spill] sm:$0xff] }
 0x48c   :  { %v5315_v16 = vrot.slane %v4684_v2, %v17551_v48 }
 0x48d   :  { %10786 = vmatpush1.bf16.xpose.msra.mxu0 %v13117_v63  ;;  %v20040_v63 = vld [vmem:[#allocation362_spill] sm:$0xff] }
 0x48e   :  { %10863 = vmatprep.subr.bf16.mxu0 %v13314_v30  ;;  %v5308_v30 = vcombine.high %v4684_v2, %v4684_v2  ;;  %v5323_v44 = vcombine.high %v5315_v16, %v5315_v16  ;;  %v20051_v2 = vld [vmem:[#allocation269_spill] sm:$0xff] }
 0x490   :  { %v18257_v19 = vrot.slane %v5308_v30, %v17551_v48  ;;  %v5888_v39 = vpack.c.bf16 %v5323_v44, %v5323_v44  ;;  %v20055_v44 = vld [vmem:[#allocation77_spill] sm:$0xff] }
 0x491   :  { %v9805_v33 = vpop.f32.mrf.mxu1  ;;  %10764 = vmatmul.mubr.bf16.vlgmr.msra.gmra.mxu1 %v5875_v22 }
 0x492   :  { %v9806_v37 = vadd.f32 %v9805_v33, %v9766_v31  ;;  %10824 = vmatpush1.bf16.xpose.msra.mxu1 %v13311_v21  ;;  %10843 = vmatprep.mubr.bf16.mxu1 %v5880_v15  ;;  %v5886_v31 = vpack.c.bf16 %v5307_v26, %v5307_v26  ;;  %v13320_v21 = vcombine.high %v20041_v55, %v20040_v63 }
 0x493   :  { %v9807_v46 = vpop.f32.mrf.mxu1  ;;  %10825 = vmatprep.subr.bf16.mxu1 %v13120_v53  ;;  %v5883_v15 = vpack.c.bf16 %v5298_v32, %v5298_v32  ;;  %v13125_v33 = vcombine.low %v20039_v58, %v20038_v27 }
 0x494   :  { %v9845_v41 = vpop.f32.mrf.mxu0  ;;  %10804 = vmatmul.mubr.bf16.vlgmr.msra.gmra.mxu0 %v5877_v40  ;;  %v13319_v46 = vcombine.low %v20041_v55, %v20040_v63  ;;  %v20042_v40 = vld [vmem:[#allocation363_spill] sm:$0xff]  ;;  %v5889_v55 = vpack.c.bf16 %v18257_v19, %v18257_v19 }
 0x495   :  { %v9808_v7 = vpop.f32.mrf.mxu1  ;;  %v9846_v1 = vadd.f32 %v9845_v41, %v9806_v37  ;;  %10864 = vmatpush1.bf16.xpose.msra.mxu0 %v13313_v59  ;;  %10883 = vmatprep.mubr.bf16.mxu0 %v5882_v50  ;;  %v20044_v59 = vld [vmem:[#allocation170_spill] sm:$0xff]  ;;  %v13321_v41 = vcombine.low %v20043_v13, %v20042_v40 }
 0x496   :  { %v9847_v20 = vpop.f32.mrf.mxu0  ;;  %10865 = vmatprep.subr.bf16.mxu0 %v13122_v36  ;;  %v13322_v7 = vcombine.high %v20043_v13, %v20042_v40  ;;  %v20045_v50 = vld [vmem:[#allocation74_spill] sm:$0xff]  ;;  %v5324_v36 = vcombine.high %v18257_v19, %v18257_v19 }
 0x497   :  { %v9809_v49 = vpop.f32.mrf.mxu1  ;;  %v13127_v52 = vcombine.low %v20045_v50, %v20044_v59  ;;  %v20046_v20 = vld [vmem:[#allocation171_spill] sm:$0xff] }
 0x498   :  { %v9848_v51 = vpop.f32.mrf.mxu0 }
 0x499   :  { %v13130_v51 = vcombine.high %v20047_v11, %v20046_v20 }
 0x49a   :  { %10826 = vmatpush1.bf16.xpose.msra.mxu1 %v13119_v42  ;;  %v9849_v8 = vpop.f32.mrf.mxu0  ;;  %v13128_v42 = vcombine.high %v20045_v50, %v20044_v59 }
 0x49b   :  { %10903 = vmatprep.subr.bf16.mxu1 %v13316_v61  ;;  %v4685_v61 = vld [vmem:[#allocation3 + $0x110] sm:$0xff]  ;;  %v20049_v8 = vld [vmem:[#allocation268_spill] sm:$0xff] }
 0x49c   :  { %v5332_v25 = vrot.slane %v4685_v61, %v17551_v48 }
 0x49d   :  { %10866 = vmatpush1.bf16.xpose.msra.mxu0 %v13121_v28  ;;  %v20048_v28 = vld [vmem:[#allocation364_spill] sm:$0xff] }
 0x49e   :  { %10943 = vmatprep.subr.bf16.mxu0 %v13318_v6  ;;  %v5325_v6 = vcombine.high %v4685_v61, %v4685_v61  ;;  %v5340_v4 = vcombine.high %v5332_v25, %v5332_v25  ;;  %v20059_v61 = vld [vmem:[#allocation271_spill] sm:$0xff] }
 0x4a0   :  { %v18281_v26 = vrot.slane %v5325_v6, %v17551_v48  ;;  %v5892_v27 = vpack.c.bf16 %v5340_v4, %v5340_v4  ;;  %v20063_v4 = vld [vmem:[#allocation79_spill] sm:$0xff] }
 0x4a1   :  { %v9885_v29 = vpop.f32.mrf.mxu1  ;;  %10844 = vmatmul.mubr.bf16.vlgmr.msra.gmra.mxu1 %v5879_v54 }
 0x4a2   :  { %v9886_v0 = vadd.f32 %v9885_v29, %v9846_v1  ;;  %10904 = vmatpush1.bf16.xpose.msra.mxu1 %v13315_v3  ;;  %10923 = vmatprep.mubr.bf16.mxu1 %v5884_v17  ;;  %v5890_v1 = vpack.c.bf16 %v5324_v36, %v5324_v36  ;;  %v13324_v3 = vcombine.high %v20049_v8, %v20048_v28 }
 0x4a3   :  { %v9887_v47 = vpop.f32.mrf.mxu1  ;;  %10905 = vmatprep.subr.bf16.mxu1 %v13124_v23  ;;  %v5887_v17 = vpack.c.bf16 %v5315_v16, %v5315_v16  ;;  %v13129_v29 = vcombine.low %v20047_v11, %v20046_v20 }
 0x4a4   :  { %v9925_v56 = vpop.f32.mrf.mxu0  ;;  %10884 = vmatmul.mubr.bf16.vlgmr.msra.gmra.mxu0 %v5881_v9  ;;  %v13323_v47 = vcombine.low %v20049_v8, %v20048_v28  ;;  %v20050_v9 = vld [vmem:[#allocation365_spill] sm:$0xff]  ;;  %v5893_v8 = vpack.c.bf16 %v18281_v26, %v18281_v26 }
 0x4a5   :  { %v9888_v24 = vpop.f32.mrf.mxu1  ;;  %v9926_v45 = vadd.f32 %v9925_v56, %v9886_v0  ;;  %10944 = vmatpush1.bf16.xpose.msra.mxu0 %v13317_v38  ;;  %10963 = vmatprep.mubr.bf16.mxu0 %v5886_v31  ;;  %v20052_v38 = vld [vmem:[#allocation172_spill] sm:$0xff]  ;;  %v13325_v56 = vcombine.low %v20051_v2, %v20050_v9 }
 0x4a6   :  { %v9927_v62 = vpop.f32.mrf.mxu0  ;;  %10945 = vmatprep.subr.bf16.mxu0 %v13126_v35  ;;  %v13326_v24 = vcombine.high %v20051_v2, %v20050_v9  ;;  %v20053_v31 = vld [vmem:[#allocation76_spill] sm:$0xff]  ;;  %v5341_v35 = vcombine.high %v18281_v26, %v18281_v26 }
 0x4a7   :  { %v9889_v22 = vpop.f32.mrf.mxu1  ;;  %v13131_v30 = vcombine.low %v20053_v31, %v20052_v38  ;;  %v20054_v62 = vld [vmem:[#allocation173_spill] sm:$0xff] }
 0x4a8   :  { %v9928_v53 = vpop.f32.mrf.mxu0 }
 0x4a9   :  { %v13134_v53 = vcombine.high %v20055_v44, %v20054_v62 }
 0x4aa   :  { %10906 = vmatpush1.bf16.xpose.msra.mxu1 %v13123_v18  ;;  %v9929_v37 = vpop.f32.mrf.mxu0  ;;  %v13132_v18 = vcombine.high %v20053_v31, %v20052_v38 }
 0x4ab   :  { %10983 = vmatprep.subr.bf16.mxu1 %v13320_v21  ;;  %v4686_v21 = vld [vmem:[#allocation3 + $0x118] sm:$0xff] }
 0x4ac   :  { %v20057_v37 = vld [vmem:[#allocation270_spill] sm:$0xff]  ;;  %v5349_v40 = vrot.slane %v4686_v21, %v17551_v48 }
 0x4ad   :  { %10946 = vmatpush1.bf16.xpose.msra.mxu0 %v13125_v33  ;;  %v20056_v33 = vld [vmem:[#allocation366_spill] sm:$0xff] }
 0x4ae   :  { %11023 = vmatprep.subr.bf16.mxu0 %v13322_v7  ;;  %v5342_v7 = vcombine.high %v4686_v21, %v4686_v21  ;;  %v5357_v50 = vcombine.high %v5349_v40, %v5349_v40  ;;  %v20067_v21 = vld [vmem:[#allocation273_spill] sm:$0xff] }
 0x4b0   :  { %v18305_v36 = vrot.slane %v5342_v7, %v17551_v48  ;;  %v5896_v20 = vpack.c.bf16 %v5357_v50, %v5357_v50  ;;  %v20071_v50 = vld [vmem:[#allocation81_spill] sm:$0xff] }
 0x4b1   :  { %v9965_v5 = vpop.f32.mrf.mxu1  ;;  %10924 = vmatmul.mubr.bf16.vlgmr.msra.gmra.mxu1 %v5883_v15 }
 0x4b2   :  { %v9966_v49 = vadd.f32 %v9965_v5, %v9926_v45  ;;  %10984 = vmatpush1.bf16.xpose.msra.mxu1 %v13319_v46  ;;  %11003 = vmatprep.mubr.bf16.mxu1 %v5888_v39  ;;  %v5894_v45 = vpack.c.bf16 %v5341_v35, %v5341_v35  ;;  %v13328_v46 = vcombine.high %v20057_v37, %v20056_v33 }
 0x4b3   :  { %v9967_v14 = vpop.f32.mrf.mxu1  ;;  %10985 = vmatprep.subr.bf16.mxu1 %v13128_v42  ;;  %v5891_v39 = vpack.c.bf16 %v5332_v25, %v5332_v25  ;;  %v13133_v5 = vcombine.low %v20055_v44, %v20054_v62 }
 0x4b4   :  { %v10005_v57 = vpop.f32.mrf.mxu0  ;;  %10964 = vmatmul.mubr.bf16.vlgmr.msra.gmra.mxu0 %v5885_v43  ;;  %v13327_v14 = vcombine.low %v20057_v37, %v20056_v33  ;;  %v20058_v43 = vld [vmem:[#allocation367_spill] sm:$0xff]  ;;  %v5897_v37 = vpack.c.bf16 %v18305_v36, %v18305_v36 }
 0x4b5   :  { %v9968_v32 = vpop.f32.mrf.mxu1  ;;  %v10006_v34 = vadd.f32 %v10005_v57, %v9966_v49  ;;  %11024 = vmatpush1.bf16.xpose.msra.mxu0 %v13321_v41  ;;  %11043 = vmatprep.mubr.bf16.mxu0 %v5890_v1  ;;  %v20060_v41 = vld [vmem:[#allocation174_spill] sm:$0xff]  ;;  %v13329_v57 = vcombine.low %v20059_v61, %v20058_v43 }
 0x4b6   :  { %v10007_v60 = vpop.f32.mrf.mxu0  ;;  %11025 = vmatprep.subr.bf16.mxu0 %v13130_v51  ;;  %v13330_v32 = vcombine.high %v20059_v61, %v20058_v43  ;;  %v20061_v1 = vld [vmem:[#allocation78_spill] sm:$0xff]  ;;  %v5358_v51 = vcombine.high %v18305_v36, %v18305_v36 }
 0x4b7   :  { %v9969_v54 = vpop.f32.mrf.mxu1  ;;  %v13135_v6 = vcombine.low %v20061_v1, %v20060_v41  ;;  %v20062_v60 = vld [vmem:[#allocation175_spill] sm:$0xff] }
 0x4b8   :  { %v10008_v23 = vpop.f32.mrf.mxu0 }
 0x4b9   :  { %v13138_v23 = vcombine.high %v20063_v4, %v20062_v60 }
 0x4ba   :  { %10986 = vmatpush1.bf16.xpose.msra.mxu1 %v13127_v52  ;;  %v10009_v0 = vpop.f32.mrf.mxu0  ;;  %v13136_v52 = vcombine.high %v20061_v1, %v20060_v41 }
 0x4bb   :  { %11063 = vmatprep.subr.bf16.mxu1 %v13324_v3  ;;  %v4687_v3 = vld [vmem:[#allocation3 + $0x120] sm:$0xff] }
 0x4bc   :  { %v20065_v0 = vld [vmem:[#allocation272_spill] sm:$0xff]  ;;  %v5366_v9 = vrot.slane %v4687_v3, %v17551_v48 }
 0x4bd   :  { %11026 = vmatpush1.bf16.xpose.msra.mxu0 %v13129_v29  ;;  %v20064_v29 = vld [vmem:[#allocation368_spill] sm:$0xff] }
 0x4be   :  { %11103 = vmatprep.subr.bf16.mxu0 %v13326_v24  ;;  %v5359_v24 = vcombine.high %v4687_v3, %v4687_v3  ;;  %v5374_v31 = vcombine.high %v5366_v9, %v5366_v9  ;;  %v20075_v3 = vld [vmem:[#allocation275_spill] sm:$0xff] }
 0x4c0   :  { %v18329_v35 = vrot.slane %v5359_v24, %v17551_v48  ;;  %v5900_v62 = vpack.c.bf16 %v5374_v31, %v5374_v31  ;;  %v20079_v31 = vld [vmem:[#allocation83_spill] sm:$0xff] }
 0x4c1   :  { %v10045_v58 = vpop.f32.mrf.mxu1  ;;  %11004 = vmatmul.mubr.bf16.vlgmr.msra.gmra.mxu1 %v5887_v17 }
 0x4c2   :  { %v10046_v22 = vadd.f32 %v10045_v58, %v10006_v34  ;;  %11064 = vmatpush1.bf16.xpose.msra.mxu1 %v13323_v47  ;;  %11083 = vmatprep.mubr.bf16.mxu1 %v5892_v27  ;;  %v5898_v34 = vpack.c.bf16 %v5358_v51, %v5358_v51  ;;  %v13332_v47 = vcombine.high %v20065_v0, %v20064_v29 }
 0x4c3   :  { %v10047_v63 = vpop.f32.mrf.mxu1  ;;  %11065 = vmatprep.subr.bf16.mxu1 %v13132_v18  ;;  %v5895_v27 = vpack.c.bf16 %v5349_v40, %v5349_v40  ;;  %v13137_v58 = vcombine.low %v20063_v4, %v20062_v60 }
 0x4c4   :  { %v10085_v13 = vpop.f32.mrf.mxu0  ;;  %11044 = vmatmul.mubr.bf16.vlgmr.msra.gmra.mxu0 %v5889_v55  ;;  %v13331_v63 = vcombine.low %v20065_v0, %v20064_v29  ;;  %v20066_v55 = vld [vmem:[#allocation369_spill] sm:$0xff]  ;;  %v5901_v0 = vpack.c.bf16 %v18329_v35, %v18329_v35 }
 0x4c5   :  { %v10048_v16 = vpop.f32.mrf.mxu1  ;;  %v10086_v19 = vadd.f32 %v10085_v13, %v10046_v22  ;;  %11104 = vmatpush1.bf16.xpose.msra.mxu0 %v13325_v56  ;;  %11123 = vmatprep.mubr.bf16.mxu0 %v5894_v45  ;;  %v20068_v56 = vld [vmem:[#allocation176_spill] sm:$0xff]  ;;  %v13333_v13 = vcombine.low %v20067_v21, %v20066_v55 }
 0x4c6   :  { %v10087_v59 = vpop.f32.mrf.mxu0  ;;  %11105 = vmatprep.subr.bf16.mxu0 %v13134_v53  ;;  %v13334_v16 = vcombine.high %v20067_v21, %v20066_v55  ;;  %v20069_v45 = vld [vmem:[#allocation80_spill] sm:$0xff]  ;;  %v5375_v53 = vcombine.high %v18329_v35, %v18329_v35 }
 0x4c7   :  { %v10049_v15 = vpop.f32.mrf.mxu1  ;;  %v13139_v7 = vcombine.low %v20069_v45, %v20068_v56  ;;  %v20070_v59 = vld [vmem:[#allocation177_spill] sm:$0xff] }
 0x4c8   :  { %v10088_v42 = vpop.f32.mrf.mxu0 }
 0x4c9   :  { %v13142_v42 = vcombine.high %v20071_v50, %v20070_v59 }
 0x4ca   :  { %11066 = vmatpush1.bf16.xpose.msra.mxu1 %v13131_v30  ;;  %v10089_v49 = vpop.f32.mrf.mxu0  ;;  %v13140_v30 = vcombine.high %v20069_v45, %v20068_v56 }
 0x4cb   :  { %11143 = vmatprep.subr.bf16.mxu1 %v13328_v46  ;;  %v4688_v46 = vld [vmem:[#allocation3 + $0x128] sm:$0xff]  ;;  %v20073_v49 = vld [vmem:[#allocation274_spill] sm:$0xff] }
 0x4cc   :  { %v5383_v43 = vrot.slane %v4688_v46, %v17551_v48 }
 0x4cd   :  { %11106 = vmatpush1.bf16.xpose.msra.mxu0 %v13133_v5  ;;  %v20072_v5 = vld [vmem:[#allocation370_spill] sm:$0xff] }
 0x4ce   :  { %11183 = vmatprep.subr.bf16.mxu0 %v13330_v32  ;;  %v5376_v32 = vcombine.high %v4688_v46, %v4688_v46  ;;  %v5391_v1 = vcombine.high %v5383_v43, %v5383_v43  ;;  %v20083_v46 = vld [vmem:[#allocation277_spill] sm:$0xff] }
 0x4d0   :  { %v18353_v51 = vrot.slane %v5376_v32, %v17551_v48  ;;  %v5904_v60 = vpack.c.bf16 %v5391_v1, %v5391_v1  ;;  %v20087_v1 = vld [vmem:[#allocation85_spill] sm:$0xff] }
 0x4d1   :  { %v10125_v11 = vpop.f32.mrf.mxu1  ;;  %11084 = vmatmul.mubr.bf16.vlgmr.msra.gmra.mxu1 %v5891_v39 }
 0x4d2   :  { %v10126_v54 = vadd.f32 %v10125_v11, %v10086_v19  ;;  %11144 = vmatpush1.bf16.xpose.msra.mxu1 %v13327_v14  ;;  %11163 = vmatprep.mubr.bf16.mxu1 %v5896_v20  ;;  %v5902_v19 = vpack.c.bf16 %v5375_v53, %v5375_v53  ;;  %v13336_v14 = vcombine.high %v20073_v49, %v20072_v5 }
 0x4d3   :  { %v10127_v28 = vpop.f32.mrf.mxu1  ;;  %11145 = vmatprep.subr.bf16.mxu1 %v13136_v52  ;;  %v5899_v20 = vpack.c.bf16 %v5366_v9, %v5366_v9  ;;  %v13141_v11 = vcombine.low %v20071_v50, %v20070_v59 }
 0x4d4   :  { %v10165_v2 = vpop.f32.mrf.mxu0  ;;  %11124 = vmatmul.mubr.bf16.vlgmr.msra.gmra.mxu0 %v5893_v8  ;;  %v13335_v28 = vcombine.low %v20073_v49, %v20072_v5  ;;  %v20074_v8 = vld [vmem:[#allocation371_spill] sm:$0xff]  ;;  %v5905_v49 = vpack.c.bf16 %v18353_v51, %v18353_v51 }
 0x4d5   :  { %v10128_v25 = vpop.f32.mrf.mxu1  ;;  %v10166_v26 = vadd.f32 %v10165_v2, %v10126_v54  ;;  %11184 = vmatpush1.bf16.xpose.msra.mxu0 %v13329_v57  ;;  %11203 = vmatprep.mubr.bf16.mxu0 %v5898_v34  ;;  %v20076_v57 = vld [vmem:[#allocation178_spill] sm:$0xff]  ;;  %v13337_v2 = vcombine.low %v20075_v3, %v20074_v8 }
 0x4d6   :  { %v10167_v38 = vpop.f32.mrf.mxu0  ;;  %11185 = vmatprep.subr.bf16.mxu0 %v13138_v23  ;;  %v13338_v25 = vcombine.high %v20075_v3, %v20074_v8  ;;  %v20077_v34 = vld [vmem:[#allocation82_spill] sm:$0xff]  ;;  %v5392_v23 = vcombine.high %v18353_v51, %v18353_v51 }
 0x4d7   :  { %v10129_v17 = vpop.f32.mrf.mxu1  ;;  %v13143_v24 = vcombine.low %v20077_v34, %v20076_v57  ;;  %v20078_v38 = vld [vmem:[#allocation179_spill] sm:$0xff] }
 0x4d8   :  { %v10168_v18 = vpop.f32.mrf.mxu0 }
 0x4d9   :  { %v13146_v18 = vcombine.high %v20079_v31, %v20078_v38 }
 0x4da   :  { %11146 = vmatpush1.bf16.xpose.msra.mxu1 %v13135_v6  ;;  %v10169_v22 = vpop.f32.mrf.mxu0  ;;  %v13144_v6 = vcombine.high %v20077_v34, %v20076_v57 }
 0x4db   :  { %11223 = vmatprep.subr.bf16.mxu1 %v13332_v47  ;;  %v4689_v47 = vld [vmem:[#allocation3 + $0x130] sm:$0xff]  ;;  %v20081_v22 = vld [vmem:[#allocation276_spill] sm:$0xff] }
 0x4dc   :  { %v5400_v55 = vrot.slane %v4689_v47, %v17551_v48 }
 0x4dd   :  { %11186 = vmatpush1.bf16.xpose.msra.mxu0 %v13137_v58  ;;  %v20080_v58 = vld [vmem:[#allocation372_spill] sm:$0xff] }
 0x4de   :  { %11263 = vmatprep.subr.bf16.mxu0 %v13334_v16  ;;  %v5393_v16 = vcombine.high %v4689_v47, %v4689_v47  ;;  %v5408_v45 = vcombine.high %v5400_v55, %v5400_v55  ;;  %v20091_v47 = vld [vmem:[#allocation279_spill] sm:$0xff] }
 0x4e0   :  { %v18377_v53 = vrot.slane %v5393_v16, %v17551_v48  ;;  %v5908_v59 = vpack.c.bf16 %v5408_v45, %v5408_v45  ;;  %v20095_v45 = vld [vmem:[#allocation87_spill] sm:$0xff] }
 0x4e1   :  { %v10205_v44 = vpop.f32.mrf.mxu1  ;;  %11164 = vmatmul.mubr.bf16.vlgmr.msra.gmra.mxu1 %v5895_v27 }
 0x4e2   :  { %v10206_v15 = vadd.f32 %v10205_v44, %v10166_v26  ;;  %11224 = vmatpush1.bf16.xpose.msra.mxu1 %v13331_v63  ;;  %11243 = vmatprep.mubr.bf16.mxu1 %v5900_v62  ;;  %v5906_v26 = vpack.c.bf16 %v5392_v23, %v5392_v23  ;;  %v13340_v63 = vcombine.high %v20081_v22, %v20080_v58 }
 0x4e3   :  { %v10207_v33 = vpop.f32.mrf.mxu1  ;;  %11225 = vmatprep.subr.bf16.mxu1 %v13140_v30  ;;  %v5903_v62 = vpack.c.bf16 %v5383_v43, %v5383_v43  ;;  %v13145_v44 = vcombine.low %v20079_v31, %v20078_v38 }
 0x4e4   :  { %v10245_v61 = vpop.f32.mrf.mxu0  ;;  %11204 = vmatmul.mubr.bf16.vlgmr.msra.gmra.mxu0 %v5897_v37  ;;  %v13339_v33 = vcombine.low %v20081_v22, %v20080_v58  ;;  %v20082_v37 = vld [vmem:[#allocation373_spill] sm:$0xff]  ;;  %v5909_v22 = vpack.c.bf16 %v18377_v53, %v18377_v53 }
 0x4e5   :  { %v10208_v40 = vpop.f32.mrf.mxu1  ;;  %v10246_v36 = vadd.f32 %v10245_v61, %v10206_v15  ;;  %11264 = vmatpush1.bf16.xpose.msra.mxu0 %v13333_v13  ;;  %11283 = vmatprep.mubr.bf16.mxu0 %v5902_v19  ;;  %v20084_v13 = vld [vmem:[#allocation180_spill] sm:$0xff]  ;;  %v13341_v61 = vcombine.low %v20083_v46, %v20082_v37 }
 0x4e6   :  { %v10247_v41 = vpop.f32.mrf.mxu0  ;;  %11265 = vmatprep.subr.bf16.mxu0 %v13142_v42  ;;  %v13342_v40 = vcombine.high %v20083_v46, %v20082_v37  ;;  %v20085_v19 = vld [vmem:[#allocation84_spill] sm:$0xff]  ;;  %v5409_v42 = vcombine.high %v18377_v53, %v18377_v53 }
 0x4e7   :  { %v10209_v39 = vpop.f32.mrf.mxu1  ;;  %v13147_v32 = vcombine.low %v20085_v19, %v20084_v13  ;;  %v20086_v41 = vld [vmem:[#allocation181_spill] sm:$0xff] }
 0x4e8   :  { %v10248_v52 = vpop.f32.mrf.mxu0 }
 0x4e9   :  { %v13150_v52 = vcombine.high %v20087_v1, %v20086_v41 }
 0x4ea   :  { %11226 = vmatpush1.bf16.xpose.msra.mxu1 %v13139_v7  ;;  %v10249_v54 = vpop.f32.mrf.mxu0  ;;  %v13148_v7 = vcombine.high %v20085_v19, %v20084_v13 }
 0x4eb   :  { %11303 = vmatprep.subr.bf16.mxu1 %v13336_v14  ;;  %v4690_v14 = vld [vmem:[#allocation3 + $0x138] sm:$0xff] }
 0x4ec   :  { %v20089_v54 = vld [vmem:[#allocation278_spill] sm:$0xff]  ;;  %v5417_v8 = vrot.slane %v4690_v14, %v17551_v48 }
 0x4ed   :  { %11266 = vmatpush1.bf16.xpose.msra.mxu0 %v13141_v11  ;;  %v20088_v11 = vld [vmem:[#allocation374_spill] sm:$0xff] }
 0x4ee   :  { %11343 = vmatprep.subr.bf16.mxu0 %v13338_v25  ;;  %v5410_v25 = vcombine.high %v4690_v14, %v4690_v14  ;;  %v5425_v34 = vcombine.high %v5417_v8, %v5417_v8  ;;  %v20099_v14 = vld [vmem:[#allocation281_spill] sm:$0xff] }
 0x4f0   :  { %v18401_v23 = vrot.slane %v5410_v25, %v17551_v48  ;;  %v5912_v38 = vpack.c.bf16 %v5425_v34, %v5425_v34  ;;  %v20103_v34 = vld [vmem:[#allocation89_spill] sm:$0xff] }
 0x4f1   :  { %v10285_v4 = vpop.f32.mrf.mxu1  ;;  %11244 = vmatmul.mubr.bf16.vlgmr.msra.gmra.mxu1 %v5899_v20 }
 0x4f2   :  { %v10286_v17 = vadd.f32 %v10285_v4, %v10246_v36  ;;  %11304 = vmatpush1.bf16.xpose.msra.mxu1 %v13335_v28  ;;  %11323 = vmatprep.mubr.bf16.mxu1 %v5904_v60  ;;  %v5910_v36 = vpack.c.bf16 %v5409_v42, %v5409_v42  ;;  %v13344_v28 = vcombine.high %v20089_v54, %v20088_v11 }
 0x4f3   :  { %v10287_v29 = vpop.f32.mrf.mxu1  ;;  %11305 = vmatprep.subr.bf16.mxu1 %v13144_v6  ;;  %v5907_v60 = vpack.c.bf16 %v5400_v55, %v5400_v55  ;;  %v13149_v4 = vcombine.low %v20087_v1, %v20086_v41 }
 0x4f4   :  { %v10325_v21 = vpop.f32.mrf.mxu0  ;;  %11284 = vmatmul.mubr.bf16.vlgmr.msra.gmra.mxu0 %v5901_v0  ;;  %v13343_v29 = vcombine.low %v20089_v54, %v20088_v11  ;;  %v20090_v0 = vld [vmem:[#allocation375_spill] sm:$0xff]  ;;  %v5913_v54 = vpack.c.bf16 %v18401_v23, %v18401_v23 }
 0x4f5   :  { %v10288_v9 = vpop.f32.mrf.mxu1  ;;  %v10326_v35 = vadd.f32 %v10325_v21, %v10286_v17  ;;  %11344 = vmatpush1.bf16.xpose.msra.mxu0 %v13337_v2  ;;  %11363 = vmatprep.mubr.bf16.mxu0 %v5906_v26  ;;  %v20092_v2 = vld [vmem:[#allocation182_spill] sm:$0xff]  ;;  %v13345_v21 = vcombine.low %v20091_v47, %v20090_v0 }
 0x4f6   :  { %v10327_v56 = vpop.f32.mrf.mxu0  ;;  %11345 = vmatprep.subr.bf16.mxu0 %v13146_v18  ;;  %v13346_v9 = vcombine.high %v20091_v47, %v20090_v0  ;;  %v20093_v26 = vld [vmem:[#allocation86_spill] sm:$0xff]  ;;  %v5426_v18 = vcombine.high %v18401_v23, %v18401_v23 }
 0x4f7   :  { %v10289_v27 = vpop.f32.mrf.mxu1  ;;  %v13151_v16 = vcombine.low %v20093_v26, %v20092_v2  ;;  %v20094_v56 = vld [vmem:[#allocation183_spill] sm:$0xff] }
 0x4f8   :  { %v10328_v30 = vpop.f32.mrf.mxu0 }
 0x4f9   :  { %v13154_v30 = vcombine.high %v20095_v45, %v20094_v56 }
 0x4fa   :  { %11306 = vmatpush1.bf16.xpose.msra.mxu1 %v13143_v24  ;;  %v10329_v15 = vpop.f32.mrf.mxu0  ;;  %v13152_v24 = vcombine.high %v20093_v26, %v20092_v2 }
 0x4fb   :  { %11383 = vmatprep.subr.bf16.mxu1 %v13340_v63  ;;  %v4691_v63 = vld [vmem:[#allocation3 + $0x140] sm:$0xff] }
 0x4fc   :  { %v20097_v15 = vld [vmem:[#allocation280_spill] sm:$0xff]  ;;  %v5434_v37 = vrot.slane %v4691_v63, %v17551_v48 }
 0x4fd   :  { %11346 = vmatpush1.bf16.xpose.msra.mxu0 %v13145_v44  ;;  %v20096_v44 = vld [vmem:[#allocation376_spill] sm:$0xff] }
 0x4fe   :  { %11423 = vmatprep.subr.bf16.mxu0 %v13342_v40  ;;  %v5427_v40 = vcombine.high %v4691_v63, %v4691_v63  ;;  %v5442_v19 = vcombine.high %v5434_v37, %v5434_v37  ;;  %v20107_v63 = vld [vmem:[#allocation283_spill] sm:$0xff] }
 0x500   :  { %v18425_v42 = vrot.slane %v5427_v40, %v17551_v48  ;;  %v5916_v41 = vpack.c.bf16 %v5442_v19, %v5442_v19  ;;  %v20111_v19 = vld [vmem:[#allocation91_spill] sm:$0xff] }
 0x501   :  { %v10365_v50 = vpop.f32.mrf.mxu1  ;;  %11324 = vmatmul.mubr.bf16.vlgmr.msra.gmra.mxu1 %v5903_v62 }
 0x502   :  { %v10366_v39 = vadd.f32 %v10365_v50, %v10326_v35  ;;  %11384 = vmatpush1.bf16.xpose.msra.mxu1 %v13339_v33  ;;  %11403 = vmatprep.mubr.bf16.mxu1 %v5908_v59  ;;  %v5914_v35 = vpack.c.bf16 %v5426_v18, %v5426_v18  ;;  %v13348_v33 = vcombine.high %v20097_v15, %v20096_v44 }
 0x503   :  { %v10367_v5 = vpop.f32.mrf.mxu1  ;;  %11385 = vmatprep.subr.bf16.mxu1 %v13148_v7  ;;  %v5911_v59 = vpack.c.bf16 %v5417_v8, %v5417_v8  ;;  %v13153_v50 = vcombine.low %v20095_v45, %v20094_v56 }
 0x504   :  { %v10405_v3 = vpop.f32.mrf.mxu0  ;;  %11364 = vmatmul.mubr.bf16.vlgmr.msra.gmra.mxu0 %v5905_v49  ;;  %v13347_v5 = vcombine.low %v20097_v15, %v20096_v44  ;;  %v20098_v49 = vld [vmem:[#allocation377_spill] sm:$0xff]  ;;  %v5917_v15 = vpack.c.bf16 %v18425_v42, %v18425_v42 }
 0x505   :  { %v10368_v43 = vpop.f32.mrf.mxu1  ;;  %v10406_v51 = vadd.f32 %v10405_v3, %v10366_v39  ;;  %11424 = vmatpush1.bf16.xpose.msra.mxu0 %v13341_v61  ;;  %11443 = vmatprep.mubr.bf16.mxu0 %v5910_v36  ;;  %v20100_v61 = vld [vmem:[#allocation184_spill] sm:$0xff]  ;;  %v13349_v3 = vcombine.low %v20099_v14, %v20098_v49 }
 0x506   :  { %v10407_v57 = vpop.f32.mrf.mxu0  ;;  %11425 = vmatprep.subr.bf16.mxu0 %v13150_v52  ;;  %v13350_v43 = vcombine.high %v20099_v14, %v20098_v49  ;;  %v20101_v36 = vld [vmem:[#allocation88_spill] sm:$0xff]  ;;  %v5443_v52 = vcombine.high %v18425_v42, %v18425_v42 }
 0x507   :  { %v10369_v20 = vpop.f32.mrf.mxu1  ;;  %v13155_v25 = vcombine.low %v20101_v36, %v20100_v61  ;;  %v20102_v57 = vld [vmem:[#allocation185_spill] sm:$0xff] }
 0x508   :  { %v10408_v6 = vpop.f32.mrf.mxu0 }
 0x509   :  { %v13158_v6 = vcombine.high %v20103_v34, %v20102_v57 }
 0x50a   :  { %11386 = vmatpush1.bf16.xpose.msra.mxu1 %v13147_v32  ;;  %v10409_v17 = vpop.f32.mrf.mxu0  ;;  %v13156_v32 = vcombine.high %v20101_v36, %v20100_v61 }
 0x50b   :  { %11463 = vmatprep.subr.bf16.mxu1 %v13344_v28  ;;  %v4692_v28 = vld [vmem:[#allocation3 + $0x148] sm:$0xff]  ;;  %v20105_v17 = vld [vmem:[#allocation282_spill] sm:$0xff] }
 0x50c   :  { %v5451_v0 = vrot.slane %v4692_v28, %v17551_v48 }
 0x50d   :  { %11426 = vmatpush1.bf16.xpose.msra.mxu0 %v13149_v4  ;;  %v20104_v4 = vld [vmem:[#allocation378_spill] sm:$0xff] }
 0x50e   :  { %11503 = vmatprep.subr.bf16.mxu0 %v13346_v9  ;;  %v5444_v9 = vcombine.high %v4692_v28, %v4692_v28  ;;  %v5459_v26 = vcombine.high %v5451_v0, %v5451_v0  ;;  %v20115_v28 = vld [vmem:[#allocation285_spill] sm:$0xff] }
 0x510   :  { %v18449_v18 = vrot.slane %v5444_v9, %v17551_v48  ;;  %v5920_v56 = vpack.c.bf16 %v5459_v26, %v5459_v26  ;;  %v20119_v26 = vld [vmem:[#allocation93_spill] sm:$0xff] }
 0x511   :  { %v10445_v31 = vpop.f32.mrf.mxu1  ;;  %11404 = vmatmul.mubr.bf16.vlgmr.msra.gmra.mxu1 %v5907_v60 }
 0x512   :  { %v10446_v27 = vadd.f32 %v10445_v31, %v10406_v51  ;;  %11464 = vmatpush1.bf16.xpose.msra.mxu1 %v13343_v29  ;;  %11483 = vmatprep.mubr.bf16.mxu1 %v5912_v38  ;;  %v5918_v51 = vpack.c.bf16 %v5443_v52, %v5443_v52  ;;  %v13352_v29 = vcombine.high %v20105_v17, %v20104_v4 }
 0x513   :  { %v10447_v58 = vpop.f32.mrf.mxu1  ;;  %11465 = vmatprep.subr.bf16.mxu1 %v13152_v24  ;;  %v5915_v38 = vpack.c.bf16 %v5434_v37, %v5434_v37  ;;  %v13157_v31 = vcombine.low %v20103_v34, %v20102_v57 }
 0x514   :  { %v10485_v46 = vpop.f32.mrf.mxu0  ;;  %11444 = vmatmul.mubr.bf16.vlgmr.msra.gmra.mxu0 %v5909_v22  ;;  %v13351_v58 = vcombine.low %v20105_v17, %v20104_v4  ;;  %v20106_v22 = vld [vmem:[#allocation379_spill] sm:$0xff]  ;;  %v5921_v17 = vpack.c.bf16 %v18449_v18, %v18449_v18 }
 0x515   :  { %v10448_v55 = vpop.f32.mrf.mxu1  ;;  %v10486_v53 = vadd.f32 %v10485_v46, %v10446_v27  ;;  %11504 = vmatpush1.bf16.xpose.msra.mxu0 %v13345_v21  ;;  %11523 = vmatprep.mubr.bf16.mxu0 %v5914_v35  ;;  %v20108_v21 = vld [vmem:[#allocation186_spill] sm:$0xff]  ;;  %v13353_v46 = vcombine.low %v20107_v63, %v20106_v22 }
 0x516   :  { %v10487_v13 = vpop.f32.mrf.mxu0  ;;  %11505 = vmatprep.subr.bf16.mxu0 %v13154_v30  ;;  %v13354_v55 = vcombine.high %v20107_v63, %v20106_v22  ;;  %v20109_v35 = vld [vmem:[#allocation90_spill] sm:$0xff]  ;;  %v5460_v30 = vcombine.high %v18449_v18, %v18449_v18 }
 0x517   :  { %v10449_v62 = vpop.f32.mrf.mxu1  ;;  %v13159_v40 = vcombine.low %v20109_v35, %v20108_v21  ;;  %v20110_v13 = vld [vmem:[#allocation187_spill] sm:$0xff] }
 0x518   :  { %v10488_v7 = vpop.f32.mrf.mxu0 }
 0x519   :  { %v13162_v7 = vcombine.high %v20111_v19, %v20110_v13 }
 0x51a   :  { %11466 = vmatpush1.bf16.xpose.msra.mxu1 %v13151_v16  ;;  %v10489_v39 = vpop.f32.mrf.mxu0  ;;  %v13160_v16 = vcombine.high %v20109_v35, %v20108_v21 }
 0x51b   :  { %11543 = vmatprep.subr.bf16.mxu1 %v13348_v33  ;;  %v4693_v33 = vld [vmem:[#allocation3 + $0x150] sm:$0xff]  ;;  %v20113_v39 = vld [vmem:[#allocation284_spill] sm:$0xff] }
 0x51c   :  { %v5468_v49 = vrot.slane %v4693_v33, %v17551_v48 }
 0x51d   :  { %11506 = vmatpush1.bf16.xpose.msra.mxu0 %v13153_v50  ;;  %v20112_v50 = vld [vmem:[#allocation380_spill] sm:$0xff] }
 0x51e   :  { %11583 = vmatprep.subr.bf16.mxu0 %v13350_v43  ;;  %v5461_v43 = vcombine.high %v4693_v33, %v4693_v33  ;;  %v5476_v36 = vcombine.high %v5468_v49, %v5468_v49  ;;  %v20123_v33 = vld [vmem:[#allocation287_spill] sm:$0xff] }
 0x520   :  { %v18473_v52 = vrot.slane %v5461_v43, %v17551_v48  ;;  %v5924_v57 = vpack.c.bf16 %v5476_v36, %v5476_v36  ;;  %v20127_v36 = vld [vmem:[#allocation95_spill] sm:$0xff] }
 0x521   :  { %v10525_v1 = vpop.f32.mrf.mxu1  ;;  %11484 = vmatmul.mubr.bf16.vlgmr.msra.gmra.mxu1 %v5911_v59 }
 0x522   :  { %v10526_v20 = vadd.f32 %v10525_v1, %v10486_v53  ;;  %11544 = vmatpush1.bf16.xpose.msra.mxu1 %v13347_v5  ;;  %11563 = vmatprep.mubr.bf16.mxu1 %v5916_v41  ;;  %v5922_v53 = vpack.c.bf16 %v5460_v30, %v5460_v30  ;;  %v13356_v5 = vcombine.high %v20113_v39, %v20112_v50 }
 0x523   :  { %v10527_v11 = vpop.f32.mrf.mxu1  ;;  %11545 = vmatprep.subr.bf16.mxu1 %v13156_v32  ;;  %v5919_v41 = vpack.c.bf16 %v5451_v0, %v5451_v0  ;;  %v13161_v1 = vcombine.low %v20111_v19, %v20110_v13 }
 0x524   :  { %v10565_v47 = vpop.f32.mrf.mxu0  ;;  %11524 = vmatmul.mubr.bf16.vlgmr.msra.gmra.mxu0 %v5913_v54  ;;  %v13355_v11 = vcombine.low %v20113_v39, %v20112_v50  ;;  %v20114_v54 = vld [vmem:[#allocation381_spill] sm:$0xff]  ;;  %v5925_v39 = vpack.c.bf16 %v18473_v52, %v18473_v52 }
 0x525   :  { %v10528_v8 = vpop.f32.mrf.mxu1  ;;  %v10566_v23 = vadd.f32 %v10565_v47, %v10526_v20  ;;  %11584 = vmatpush1.bf16.xpose.msra.mxu0 %v13349_v3  ;;  %11603 = vmatprep.mubr.bf16.mxu0 %v5918_v51  ;;  %v20116_v3 = vld [vmem:[#allocation188_spill] sm:$0xff]  ;;  %v13357_v47 = vcombine.low %v20115_v28, %v20114_v54 }
 0x526   :  { %v10567_v2 = vpop.f32.mrf.mxu0  ;;  %11585 = vmatprep.subr.bf16.mxu0 %v13158_v6  ;;  %v13358_v8 = vcombine.high %v20115_v28, %v20114_v54  ;;  %v20117_v51 = vld [vmem:[#allocation92_spill] sm:$0xff]  ;;  %v5477_v6 = vcombine.high %v18473_v52, %v18473_v52 }
 0x527   :  { %v10529_v60 = vpop.f32.mrf.mxu1  ;;  %v13163_v9 = vcombine.low %v20117_v51, %v20116_v3  ;;  %v20118_v2 = vld [vmem:[#allocation189_spill] sm:$0xff] }
 0x528   :  { %v10568_v24 = vpop.f32.mrf.mxu0 }
 0x529   :  { %v13166_v24 = vcombine.high %v20119_v26, %v20118_v2 }
 0x52a   :  { %11546 = vmatpush1.bf16.xpose.msra.mxu1 %v13155_v25  ;;  %v10569_v27 = vpop.f32.mrf.mxu0  ;;  %v13164_v25 = vcombine.high %v20117_v51, %v20116_v3 }
 0x52b   :  { %11623 = vmatprep.subr.bf16.mxu1 %v13352_v29  ;;  %v4694_v29 = vld [vmem:[#allocation3 + $0x158] sm:$0xff] }
 0x52c   :  { %v20121_v27 = vld [vmem:[#allocation286_spill] sm:$0xff]  ;;  %v5485_v22 = vrot.slane %v4694_v29, %v17551_v48 }
 0x52d   :  { %11586 = vmatpush1.bf16.xpose.msra.mxu0 %v13157_v31  ;;  %v20120_v31 = vld [vmem:[#allocation382_spill] sm:$0xff] }
 0x52e   :  { %11663 = vmatprep.subr.bf16.mxu0 %v13354_v55  ;;  %v5478_v55 = vcombine.high %v4694_v29, %v4694_v29  ;;  %v5493_v35 = vcombine.high %v5485_v22, %v5485_v22  ;;  %v20131_v29 = vld [vmem:[#allocation289_spill] sm:$0xff] }
 0x530   :  { %v18497_v30 = vrot.slane %v5478_v55, %v17551_v48  ;;  %v5928_v13 = vpack.c.bf16 %v5493_v35, %v5493_v35  ;;  %v20135_v35 = vld [vmem:[#allocation97_spill] sm:$0xff] }
 0x531   :  { %v10605_v45 = vpop.f32.mrf.mxu1  ;;  %11564 = vmatmul.mubr.bf16.vlgmr.msra.gmra.mxu1 %v5915_v38 }
 0x532   :  { %v10606_v62 = vadd.f32 %v10605_v45, %v10566_v23  ;;  %11624 = vmatpush1.bf16.xpose.msra.mxu1 %v13351_v58  ;;  %11643 = vmatprep.mubr.bf16.mxu1 %v5920_v56  ;;  %v5926_v23 = vpack.c.bf16 %v5477_v6, %v5477_v6  ;;  %v13360_v58 = vcombine.high %v20121_v27, %v20120_v31 }
 0x533   :  { %v10607_v44 = vpop.f32.mrf.mxu1  ;;  %11625 = vmatprep.subr.bf16.mxu1 %v13160_v16  ;;  %v5923_v56 = vpack.c.bf16 %v5468_v49, %v5468_v49  ;;  %v13165_v45 = vcombine.low %v20119_v26, %v20118_v2 }
 0x534   :  { %v10645_v14 = vpop.f32.mrf.mxu0  ;;  %11604 = vmatmul.mubr.bf16.vlgmr.msra.gmra.mxu0 %v5917_v15  ;;  %v13359_v44 = vcombine.low %v20121_v27, %v20120_v31  ;;  %v20122_v15 = vld [vmem:[#allocation383_spill] sm:$0xff]  ;;  %v5929_v27 = vpack.c.bf16 %v18497_v30, %v18497_v30 }
 0x535   :  { %v10608_v37 = vpop.f32.mrf.mxu1  ;;  %v10646_v42 = vadd.f32 %v10645_v14, %v10606_v62  ;;  %11664 = vmatpush1.bf16.xpose.msra.mxu0 %v13353_v46  ;;  %11683 = vmatprep.mubr.bf16.mxu0 %v5922_v53  ;;  %v20124_v46 = vld [vmem:[#allocation190_spill] sm:$0xff]  ;;  %v13361_v14 = vcombine.low %v20123_v33, %v20122_v15 }
 0x536   :  { %v10647_v61 = vpop.f32.mrf.mxu0  ;;  %11665 = vmatprep.subr.bf16.mxu0 %v13162_v7  ;;  %v13362_v37 = vcombine.high %v20123_v33, %v20122_v15  ;;  %v20125_v53 = vld [vmem:[#allocation94_spill] sm:$0xff]  ;;  %v5494_v7 = vcombine.high %v18497_v30, %v18497_v30 }
 0x537   :  { %v10609_v59 = vpop.f32.mrf.mxu1  ;;  %v13167_v43 = vcombine.low %v20125_v53, %v20124_v46  ;;  %v20126_v61 = vld [vmem:[#allocation191_spill] sm:$0xff] }
 0x538   :  { %v10648_v32 = vpop.f32.mrf.mxu0 }
 0x539   :  { %v13170_v32 = vcombine.high %v20127_v36, %v20126_v61 }
 0x53a   :  { %11626 = vmatpush1.bf16.xpose.msra.mxu1 %v13159_v40  ;;  %v10649_v20 = vpop.f32.mrf.mxu0  ;;  %v13168_v40 = vcombine.high %v20125_v53, %v20124_v46 }
 0x53b   :  { %11703 = vmatprep.subr.bf16.mxu1 %v13356_v5  ;;  %v4695_v5 = vld [vmem:[#allocation3 + $0x160] sm:$0xff] }
 0x53c   :  { %v20129_v20 = vld [vmem:[#allocation288_spill] sm:$0xff]  ;;  %v5502_v54 = vrot.slane %v4695_v5, %v17551_v48 }
 0x53d   :  { %11666 = vmatpush1.bf16.xpose.msra.mxu0 %v13161_v1  ;;  %v20128_v1 = vld [vmem:[#allocation384_spill] sm:$0xff] }
 0x53e   :  { %11743 = vmatprep.subr.bf16.mxu0 %v13358_v8  ;;  %v5495_v8 = vcombine.high %v4695_v5, %v4695_v5  ;;  %v5510_v51 = vcombine.high %v5502_v54, %v5502_v54  ;;  %v20139_v5 = vld [vmem:[#allocation291_spill] sm:$0xff] }
 0x540   :  { %v18521_v6 = vrot.slane %v5495_v8, %v17551_v48  ;;  %v5932_v2 = vpack.c.bf16 %v5510_v51, %v5510_v51  ;;  %v20143_v51 = vld [vmem:[#allocation99_spill] sm:$0xff] }
 0x541   :  { %v10685_v34 = vpop.f32.mrf.mxu1  ;;  %11644 = vmatmul.mubr.bf16.vlgmr.msra.gmra.mxu1 %v5919_v41 }
 0x542   :  { %v10686_v60 = vadd.f32 %v10685_v34, %v10646_v42  ;;  %11704 = vmatpush1.bf16.xpose.msra.mxu1 %v13355_v11  ;;  %11723 = vmatprep.mubr.bf16.mxu1 %v5924_v57  ;;  %v5930_v42 = vpack.c.bf16 %v5494_v7, %v5494_v7  ;;  %v13364_v11 = vcombine.high %v20129_v20, %v20128_v1 }
 0x543   :  { %v10687_v4 = vpop.f32.mrf.mxu1  ;;  %11705 = vmatprep.subr.bf16.mxu1 %v13164_v25  ;;  %v5927_v57 = vpack.c.bf16 %v5485_v22, %v5485_v22  ;;  %v13169_v34 = vcombine.low %v20127_v36, %v20126_v61 }
 0x544   :  { %v10725_v63 = vpop.f32.mrf.mxu0  ;;  %11684 = vmatmul.mubr.bf16.vlgmr.msra.gmra.mxu0 %v5921_v17  ;;  %v13363_v4 = vcombine.low %v20129_v20, %v20128_v1  ;;  %v20130_v17 = vld [vmem:[#allocation385_spill] sm:$0xff]  ;;  %v5933_v20 = vpack.c.bf16 %v18521_v6, %v18521_v6 }
 0x545   :  { %v10688_v0 = vpop.f32.mrf.mxu1  ;;  %v10726_v18 = vadd.f32 %v10725_v63, %v10686_v60  ;;  %11744 = vmatpush1.bf16.xpose.msra.mxu0 %v13357_v47  ;;  %11763 = vmatprep.mubr.bf16.mxu0 %v5926_v23  ;;  %v20132_v47 = vld [vmem:[#allocation192_spill] sm:$0xff]  ;;  %v13365_v63 = vcombine.low %v20131_v29, %v20130_v17 }
 0x546   :  { %v10727_v21 = vpop.f32.mrf.mxu0  ;;  %11745 = vmatprep.subr.bf16.mxu0 %v13166_v24  ;;  %v13366_v0 = vcombine.high %v20131_v29, %v20130_v17  ;;  %v20133_v23 = vld [vmem:[#allocation96_spill] sm:$0xff]  ;;  %v5511_v24 = vcombine.high %v18521_v6, %v18521_v6 }
 0x547   :  { %v10689_v38 = vpop.f32.mrf.mxu1  ;;  %v13171_v55 = vcombine.low %v20133_v23, %v20132_v47  ;;  %v20134_v21 = vld [vmem:[#allocation193_spill] sm:$0xff] }
 0x548   :  { %v10728_v16 = vpop.f32.mrf.mxu0 }
 0x549   :  { %v13174_v16 = vcombine.high %v20135_v35, %v20134_v21 }
 0x54a   :  { %11706 = vmatpush1.bf16.xpose.msra.mxu1 %v13163_v9  ;;  %v10729_v62 = vpop.f32.mrf.mxu0  ;;  %v13172_v9 = vcombine.high %v20133_v23, %v20132_v47 }
 0x54b   :  { %11783 = vmatprep.subr.bf16.mxu1 %v13360_v58  ;;  %v4696_v58 = vld [vmem:[#allocation3 + $0x168] sm:$0xff]  ;;  %v20137_v62 = vld [vmem:[#allocation290_spill] sm:$0xff] }
 0x54c   :  { %v5519_v15 = vrot.slane %v4696_v58, %v17551_v48 }
 0x54d   :  { %11746 = vmatpush1.bf16.xpose.msra.mxu0 %v13165_v45  ;;  %v20136_v45 = vld [vmem:[#allocation386_spill] sm:$0xff] }
 0x54e   :  { %11823 = vmatprep.subr.bf16.mxu0 %v13362_v37  ;;  %v5512_v37 = vcombine.high %v4696_v58, %v4696_v58  ;;  %v5527_v53 = vcombine.high %v5519_v15, %v5519_v15  ;;  %v20147_v58 = vld [vmem:[#allocation293_spill] sm:$0xff] }
 0x550   :  { %v18545_v7 = vrot.slane %v5512_v37, %v17551_v48  ;;  %v5936_v61 = vpack.c.bf16 %v5527_v53, %v5527_v53  ;;  %v20151_v53 = vld [vmem:[#allocation101_spill] sm:$0xff] }
 0x551   :  { %v10765_v19 = vpop.f32.mrf.mxu1  ;;  %11724 = vmatmul.mubr.bf16.vlgmr.msra.gmra.mxu1 %v5923_v56 }
 0x552   :  { %v10766_v59 = vadd.f32 %v10765_v19, %v10726_v18  ;;  %11784 = vmatpush1.bf16.xpose.msra.mxu1 %v13359_v44  ;;  %11803 = vmatprep.mubr.bf16.mxu1 %v5928_v13  ;;  %v5934_v18 = vpack.c.bf16 %v5511_v24, %v5511_v24  ;;  %v13368_v44 = vcombine.high %v20137_v62, %v20136_v45 }
 0x553   :  { %v10767_v50 = vpop.f32.mrf.mxu1  ;;  %11785 = vmatprep.subr.bf16.mxu1 %v13168_v40  ;;  %v5931_v13 = vpack.c.bf16 %v5502_v54, %v5502_v54  ;;  %v13173_v19 = vcombine.low %v20135_v35, %v20134_v21 }
 0x554   :  { %v10805_v28 = vpop.f32.mrf.mxu0  ;;  %11764 = vmatmul.mubr.bf16.vlgmr.msra.gmra.mxu0 %v5925_v39  ;;  %v13367_v50 = vcombine.low %v20137_v62, %v20136_v45  ;;  %v20138_v39 = vld [vmem:[#allocation387_spill] sm:$0xff]  ;;  %v5937_v62 = vpack.c.bf16 %v18545_v7, %v18545_v7 }
 0x555   :  { %v10768_v49 = vpop.f32.mrf.mxu1  ;;  %v10806_v52 = vadd.f32 %v10805_v28, %v10766_v59  ;;  %11824 = vmatpush1.bf16.xpose.msra.mxu0 %v13361_v14  ;;  %11843 = vmatprep.mubr.bf16.mxu0 %v5930_v42  ;;  %v20140_v14 = vld [vmem:[#allocation194_spill] sm:$0xff]  ;;  %v13369_v28 = vcombine.low %v20139_v5, %v20138_v39 }
 0x556   :  { %v10807_v3 = vpop.f32.mrf.mxu0  ;;  %11825 = vmatprep.subr.bf16.mxu0 %v13170_v32  ;;  %v13370_v49 = vcombine.high %v20139_v5, %v20138_v39  ;;  %v20141_v42 = vld [vmem:[#allocation98_spill] sm:$0xff]  ;;  %v5528_v32 = vcombine.high %v18545_v7, %v18545_v7 }
 0x557   :  { %v10769_v41 = vpop.f32.mrf.mxu1  ;;  %v13175_v8 = vcombine.low %v20141_v42, %v20140_v14  ;;  %v20142_v3 = vld [vmem:[#allocation195_spill] sm:$0xff] }
 0x558   :  { %v10808_v25 = vpop.f32.mrf.mxu0 }
 0x559   :  { %v13178_v25 = vcombine.high %v20143_v51, %v20142_v3 }
 0x55a   :  { %11786 = vmatpush1.bf16.xpose.msra.mxu1 %v13167_v43  ;;  %v10809_v60 = vpop.f32.mrf.mxu0  ;;  %v13176_v43 = vcombine.high %v20141_v42, %v20140_v14 }
 0x55b   :  { %11863 = vmatprep.subr.bf16.mxu1 %v13364_v11  ;;  %v4697_v11 = vld [vmem:[#allocation3 + $0x170] sm:$0xff]  ;;  %v20145_v60 = vld [vmem:[#allocation292_spill] sm:$0xff] }
 0x55c   :  { %v5536_v17 = vrot.slane %v4697_v11, %v17551_v48 }
 0x55d   :  { %11826 = vmatpush1.bf16.xpose.msra.mxu0 %v13169_v34  ;;  %v20144_v34 = vld [vmem:[#allocation388_spill] sm:$0xff] }
 0x55e   :  { %11903 = vmatprep.subr.bf16.mxu0 %v13366_v0  ;;  %v5529_v0 = vcombine.high %v4697_v11, %v4697_v11  ;;  %v5544_v23 = vcombine.high %v5536_v17, %v5536_v17  ;;  %v20155_v11 = vld [vmem:[#allocation295_spill] sm:$0xff] }
 0x560   :  { %v18569_v24 = vrot.slane %v5529_v0, %v17551_v48  ;;  %v5940_v21 = vpack.c.bf16 %v5544_v23, %v5544_v23  ;;  %v20159_v0 = vld [vmem:[#allocation103_spill] sm:$0xff] }
 0x561   :  { %v10845_v26 = vpop.f32.mrf.mxu1  ;;  %11804 = vmatmul.mubr.bf16.vlgmr.msra.gmra.mxu1 %v5927_v57 }
 0x562   :  { %v10846_v38 = vadd.f32 %v10845_v26, %v10806_v52  ;;  %11864 = vmatpush1.bf16.xpose.msra.mxu1 %v13363_v4  ;;  %11883 = vmatprep.mubr.bf16.mxu1 %v5932_v2  ;;  %v5938_v52 = vpack.c.bf16 %v5528_v32, %v5528_v32  ;;  %v13372_v4 = vcombine.high %v20145_v60, %v20144_v34 }
 0x563   :  { %v10847_v31 = vpop.f32.mrf.mxu1  ;;  %11865 = vmatprep.subr.bf16.mxu1 %v13172_v9  ;;  %v5935_v2 = vpack.c.bf16 %v5519_v15, %v5519_v15  ;;  %v13177_v26 = vcombine.low %v20143_v51, %v20142_v3 }
 0x564   :  { %v10885_v33 = vpop.f32.mrf.mxu0  ;;  %11844 = vmatmul.mubr.bf16.vlgmr.msra.gmra.mxu0 %v5929_v27  ;;  %v13371_v31 = vcombine.low %v20145_v60, %v20144_v34  ;;  %v20146_v27 = vld [vmem:[#allocation389_spill] sm:$0xff] }
 0x565   :  { %v10848_v22 = vpop.f32.mrf.mxu1  ;;  %v10886_v30 = vadd.f32 %v10885_v33, %v10846_v38  ;;  %11904 = vmatpush1.bf16.xpose.msra.mxu0 %v13365_v63  ;;  %11923 = vmatprep.mubr.bf16.mxu0 %v5934_v18  ;;  %v20148_v63 = vld [vmem:[#allocation196_spill] sm:$0xff]  ;;  %v13373_v33 = vcombine.low %v20147_v58, %v20146_v27 }
 0x566   :  { %v10887_v46 = vpop.f32.mrf.mxu0  ;;  %11905 = vmatprep.subr.bf16.mxu0 %v13174_v16  ;;  %v13374_v22 = vcombine.high %v20147_v58, %v20146_v27  ;;  %v20149_v18 = vld [vmem:[#allocation100_spill] sm:$0xff]  ;;  %v5545_v16 = vcombine.high %v18569_v24, %v18569_v24 }
 0x567   :  { %v10849_v56 = vpop.f32.mrf.mxu1  ;;  %v13179_v37 = vcombine.low %v20149_v18, %v20148_v63  ;;  %v20150_v46 = vld [vmem:[#allocation197_spill] sm:$0xff] }
 0x568   :  { %v10888_v40 = vpop.f32.mrf.mxu0 }
 0x569   :  { %v13182_v40 = vcombine.high %v20151_v53, %v20150_v46 }
 0x56a   :  { %11866 = vmatpush1.bf16.xpose.msra.mxu1 %v13171_v55  ;;  %v10889_v59 = vpop.f32.mrf.mxu0  ;;  %v13180_v55 = vcombine.high %v20149_v18, %v20148_v63 }
 0x56b   :  { %11943 = vmatprep.subr.bf16.mxu1 %v13368_v44  ;;  %v4698_v44 = vld [vmem:[#allocation3 + $0x178] sm:$0xff] }
 0x56c   :  { %v20153_v59 = vld [vmem:[#allocation294_spill] sm:$0xff]  ;;  %v5553_v39 = vrot.slane %v4698_v44, %v17551_v48 }
 0x56d   :  { %11906 = vmatpush1.bf16.xpose.msra.mxu0 %v13173_v19  ;;  %v20152_v19 = vld [vmem:[#allocation390_spill] sm:$0xff] }
 0x56e   :  { %11983 = vmatprep.subr.bf16.mxu0 %v13370_v49  ;;  %v5546_v49 = vcombine.high %v4698_v44, %v4698_v44  ;;  %v5561_v42 = vcombine.high %v5553_v39, %v5553_v39 }
 0x570   :  { %v5560_v32 = vrot.slane %v5546_v49, %v17551_v48  ;;  %v5944_v3 = vpack.c.bf16 %v5561_v42, %v5561_v42  ;;  %v5941_v48 = vpack.c.bf16 %v18569_v24, %v18569_v24 }
 0x571   :  { %v10925_v36 = vpop.f32.mrf.mxu1  ;;  %11884 = vmatmul.mubr.bf16.vlgmr.msra.gmra.mxu1 %v5931_v13 }
 0x572   :  { %v10926_v41 = vadd.f32 %v10925_v36, %v10886_v30  ;;  %11944 = vmatpush1.bf16.xpose.msra.mxu1 %v13367_v50  ;;  %11963 = vmatprep.mubr.bf16.mxu1 %v5936_v61  ;;  %v5942_v30 = vpack.c.bf16 %v5545_v16, %v5545_v16  ;;  %v13376_v50 = vcombine.high %v20153_v59, %v20152_v19 }
 0x573   :  { %v10927_v1 = vpop.f32.mrf.mxu1  ;;  %11945 = vmatprep.subr.bf16.mxu1 %v13176_v43  ;;  %v5939_v61 = vpack.c.bf16 %v5536_v17, %v5536_v17  ;;  %v13181_v36 = vcombine.low %v20151_v53, %v20150_v46  ;;  %v5945_v18 = vpack.c.bf16 %v5560_v32, %v5560_v32 }
 0x574   :  { %v10965_v29 = vpop.f32.mrf.mxu0  ;;  %11924 = vmatmul.mubr.bf16.vlgmr.msra.gmra.mxu0 %v5933_v20  ;;  %v13375_v1 = vcombine.low %v20153_v59, %v20152_v19  ;;  %v20154_v20 = vld [vmem:[#allocation391_spill] sm:$0xff] }
 0x575   :  { %v10928_v54 = vpop.f32.mrf.mxu1  ;;  %v10966_v6 = vadd.f32 %v10965_v29, %v10926_v41  ;;  %11984 = vmatpush1.bf16.xpose.msra.mxu0 %v13369_v28  ;;  %12003 = vmatprep.mubr.bf16.mxu0 %v5938_v52  ;;  %v20156_v28 = vld [vmem:[#allocation198_spill] sm:$0xff] }
 0x576   :  { %v10967_v47 = vpop.f32.mrf.mxu0  ;;  %11985 = vmatprep.subr.bf16.mxu0 %v13178_v25  ;;  %v13378_v54 = vcombine.high %v20155_v11, %v20154_v20  ;;  %v20157_v52 = vld [vmem:[#allocation102_spill] sm:$0xff]  ;;  %v5562_v25 = vcombine.high %v5560_v32, %v5560_v32 }
 0x577   :  { %v10929_v57 = vpop.f32.mrf.mxu1  ;;  %v13183_v29 = vcombine.low %v20157_v52, %v20156_v28 }
 0x578   :  { %v10968_v9 = vpop.f32.mrf.mxu0  ;;  %v5946_v17 = vpack.c.bf16 %v5562_v25, %v5562_v25 }
 0x57a   :  { %11946 = vmatpush1.bf16.xpose.msra.mxu1 %v13175_v8  ;;  %v10969_v38 = vpop.f32.mrf.mxu0  ;;  %v13184_v8 = vcombine.high %v20157_v52, %v20156_v28 }
 0x57b   :  { %12023 = vmatprep.subr.bf16.mxu1 %v13372_v4  ;;  %v13377_v4 = vcombine.low %v20155_v11, %v20154_v20  ;;  %v5943_v38 = vpack.c.bf16 %v5553_v39, %v5553_v39 }
 0x57d   :  { %11986 = vmatpush1.bf16.xpose.msra.mxu0 %v13177_v26 }
 0x57e   :  { %12063 = vmatprep.subr.bf16.mxu0 %v13374_v22 }
 0x581   :  { %v11005_v35 = vpop.f32.mrf.mxu1  ;;  %11964 = vmatmul.mubr.bf16.vlgmr.msra.gmra.mxu1 %v5935_v2 }
 0x582   :  { %v11006_v56 = vadd.f32 %v11005_v35, %v10966_v6  ;;  %12024 = vmatpush1.bf16.xpose.msra.mxu1 %v13371_v31  ;;  %12043 = vmatprep.mubr.bf16.mxu1 %v5940_v21  ;;  %v20158_v6 = vld [vmem:[#allocation199_spill] sm:$0xff] }
 0x583   :  { %v11007_v45 = vpop.f32.mrf.mxu1  ;;  %12025 = vmatprep.subr.bf16.mxu1 %v13180_v55  ;;  %v13186_v47 = vcombine.high %v20159_v0, %v20158_v6  ;;  %v13185_v31 = vcombine.low %v20159_v0, %v20158_v6  ;;  %v12181_v6 = vld [vmem:[%s18876_s7 + $0x8] sm:$0xff] }
 0x584   :  { %v11045_v5 = vpop.f32.mrf.mxu0  ;;  %12004 = vmatmul.mubr.bf16.vlgmr.msra.gmra.mxu0 %v5937_v62 }
 0x585   :  { %v11008_v15 = vpop.f32.mrf.mxu1  ;;  %v11046_v7 = vadd.f32 %v11045_v5, %v11006_v56  ;;  %12064 = vmatpush1.bf16.xpose.msra.mxu0 %v13373_v33  ;;  %12083 = vmatprep.mubr.bf16.mxu0 %v5942_v30 }
 0x586   :  { %v11047_v14 = vpop.f32.mrf.mxu0  ;;  %12065 = vmatprep.subr.bf16.mxu0 %v13182_v40 }
 0x587   :  { %v11009_v13 = vpop.f32.mrf.mxu1 }
 0x588   :  { %v11048_v43 = vpop.f32.mrf.mxu0 }
 0x58a   :  { %12026 = vmatpush1.bf16.xpose.msra.mxu1 %v13179_v37  ;;  %v11049_v41 = vpop.f32.mrf.mxu0 }
 0x58b   :  { %12103 = vmatprep.subr.bf16.mxu1 %v13376_v50 }
 0x58d   :  { %12066 = vmatpush1.bf16.xpose.msra.mxu0 %v13181_v36 }
 0x58e   :  { %12143 = vmatprep.subr.bf16.mxu0 %v13378_v54 }
 0x591   :  { %v11085_v51 = vpop.f32.mrf.mxu1  ;;  %12044 = vmatmul.mubr.bf16.vlgmr.msra.gmra.mxu1 %v5939_v61 }
 0x592   :  { %v11086_v57 = vadd.f32 %v11085_v51, %v11046_v7  ;;  %12104 = vmatpush1.bf16.xpose.msra.mxu1 %v13375_v1  ;;  %12123 = vmatprep.mubr.bf16.mxu1 %v5944_v3 }
 0x593   :  { %v11087_v34 = vpop.f32.mrf.mxu1  ;;  %12105 = vmatprep.subr.bf16.mxu1 %v13184_v8 }
 0x594   :  { %v11125_v9 = vpop.f32.mrf.mxu0  ;;  %12084 = vmatmul.mubr.bf16.vlgmr.msra.gmra.mxu0 %v5941_v48  ;;  %v12183_v34 = vld [vmem:[%s18876_s7 + $0x18] sm:$0xff] }
 0x595   :  { %v11088_v60 = vpop.f32.mrf.mxu1  ;;  %v11126_v2 = vadd.f32 %v11125_v9, %v11086_v57  ;;  %12144 = vmatpush1.bf16.xpose.msra.mxu0 %v13377_v4  ;;  %12163 = vmatprep.mubr.bf16.mxu0 %v5946_v17  ;;  %v12182_v4 = vld [vmem:[%s18876_s7 + $0x10] sm:$0xff] }
 0x596   :  { %v11127_v26 = vpop.f32.mrf.mxu0  ;;  %12145 = vmatprep.subr.bf16.mxu0 %v13186_v47  ;;  %v12180_v47 = vld [vmem:[%s18876_s7] sm:$0xff] }
 0x597   :  { %v11089_v23 = vpop.f32.mrf.mxu1 }
 0x598   :  { %v11128_v24 = vpop.f32.mrf.mxu0 }
 0x59a   :  { %12106 = vmatpush1.bf16.xpose.msra.mxu1 %v13183_v29  ;;  %v11129_v27 = vpop.f32.mrf.mxu0 }
 0x59b   :  { %13644 = vmatprep.subr.mxu1 %v13816_v12 }
 0x59d   :  { %12146 = vmatpush1.bf16.xpose.msra.mxu0 %v13185_v31 }
 0x59e   :  { %12609 = vmatprep.subr.mxu0 %v13816_v12 }
 0x5a1   :  { %v11165_v58 = vpop.f32.mrf.mxu1  ;;  %12124 = vmatmul.mubr.bf16.vlgmr.msra.gmra.mxu1 %v5943_v38 }
 0x5a2   :  { %v11166_v22 = vadd.f32 %v11165_v58, %v11126_v2  ;;  %13652 = vmatprep.mubr.msk.f32.mxu1 %vm13817_vm3, %v13816_v12  ;;  %13645 = vmatpush3.msra.mxu1 %v12183_v34 }
 0x5a3   :  { %v11167_v63 = vpop.f32.mrf.mxu1  ;;  %13646 = vmatprep.subr.mxu1 %v13816_v12 }
 0x5a4   :  { %v11205_v35 = vpop.f32.mrf.mxu0  ;;  %12164 = vmatmul.mubr.bf16.vlgmr.msra.gmra.mxu0 %v5945_v18  ;;  %13647 = vmatpush3.msra.mxu1 %v12182_v4 }
 0x5a5   :  { %v11168_v55 = vpop.f32.mrf.mxu1  ;;  %v11206_v16 = vadd.f32 %v11205_v35, %v11166_v22  ;;  %13648 = vmatprep.subr.mxu1 %v13816_v12 }
 0x5a6   :  { %v11207_v56 = vpop.f32.mrf.mxu0  ;;  %13649 = vmatpush3.msra.mxu1 %v12181_v6 }
 0x5a7   :  { %v11169_v21 = vpop.f32.mrf.mxu1  ;;  %13650 = vmatprep.subr.mxu1 %v13816_v12 }
 0x5a8   :  { %v11208_v45 = vpop.f32.mrf.mxu0  ;;  %13651 = vmatpush3.msra.mxu1 %v12180_v47 }
 0x5a9   :  { %13655 = vmatprep.subr.mxu1 %v13816_v12 }
 0x5aa   :  { %v11209_v62 = vpop.f32.mrf.mxu0 }
 0x5b1   :  { %v11245_v44 = vpop.f32.mrf.mxu1 }
 0x5b2   :  { %v11246_v15 = vadd.f32 %v11245_v44, %v11206_v16 }
 0x5b3   :  { %v11247_v33 = vpop.f32.mrf.mxu1 }
 0x5b4   :  { %v11285_v46 = vpop.f32.mrf.mxu0 }
 0x5b5   :  { %v11248_v30 = vpop.f32.mrf.mxu1  ;;  %v11286_v53 = vadd.f32 %v11285_v46, %v11246_v15 }
 0x5b6   :  { %v11287_v40 = vpop.f32.mrf.mxu0 }
 0x5b7   :  { %v11249_v37 = vpop.f32.mrf.mxu1 }
 0x5b8   :  { %v11288_v13 = vpop.f32.mrf.mxu0 }
 0x5ba   :  { %v11289_v19 = vpop.f32.mrf.mxu0 }
 0x5c1   :  { %v11325_v59 = vpop.f32.mrf.mxu1 }
 0x5c2   :  { %v11326_v50 = vadd.f32 %v11325_v59, %v11286_v53 }
 0x5c3   :  { %v11327_v39 = vpop.f32.mrf.mxu1 }
 0x5c4   :  { %v11365_v49 = vpop.f32.mrf.mxu0 }
 0x5c5   :  { %v11328_v5 = vpop.f32.mrf.mxu1  ;;  %v11366_v14 = vadd.f32 %v11365_v49, %v11326_v50 }
 0x5c6   :  { %v11367_v42 = vpop.f32.mrf.mxu0 }
 0x5c7   :  { %v11329_v7 = vpop.f32.mrf.mxu1 }
 0x5c8   :  { %v11368_v43 = vpop.f32.mrf.mxu0 }
 0x5ca   :  { %v11369_v61 = vpop.f32.mrf.mxu0 }
 0x5d1   :  { %v11405_v36 = vpop.f32.mrf.mxu1 }
 0x5d2   :  { %v11406_v32 = vadd.f32 %v11405_v36, %v11366_v14 }
 0x5d3   :  { %v11407_v41 = vpop.f32.mrf.mxu1 }
 0x5d4   :  { %v11445_v11 = vpop.f32.mrf.mxu0 }
 0x5d5   :  { %v11408_v1 = vpop.f32.mrf.mxu1  ;;  %v11446_v54 = vadd.f32 %v11445_v11, %v11406_v32 }
 0x5d6   :  { %v11447_v28 = vpop.f32.mrf.mxu0 }
 0x5d7   :  { %v11409_v20 = vpop.f32.mrf.mxu1 }
 0x5d8   :  { %v11448_v52 = vpop.f32.mrf.mxu0 }
 0x5da   :  { %v11449_v8 = vpop.f32.mrf.mxu0 }
 0x5e1   :  { %v11485_v3 = vpop.f32.mrf.mxu1 }
 0x5e2   :  { %v11486_v51 = vadd.f32 %v11485_v3, %v11446_v54 }
 0x5e3   :  { %v11487_v25 = vpop.f32.mrf.mxu1 }
 0x5e4   :  { %v11525_v60 = vpop.f32.mrf.mxu0 }
 0x5e5   :  { %v11488_v57 = vpop.f32.mrf.mxu1  ;;  %v11526_v17 = vadd.f32 %v11525_v60, %v11486_v51 }
 0x5e6   :  { %v11527_v29 = vpop.f32.mrf.mxu0 }
 0x5e7   :  { %v11489_v48 = vpop.f32.mrf.mxu1 }
 0x5e8   :  { %v11528_v0 = vpop.f32.mrf.mxu0 }
 0x5ea   :  { %v11529_v23 = vpop.f32.mrf.mxu0 }
 0x5f1   :  { %v11565_v9 = vpop.f32.mrf.mxu1 }
 0x5f2   :  { %v11566_v2 = vadd.f32 %v11565_v9, %v11526_v17 }
 0x5f3   :  { %v11567_v26 = vpop.f32.mrf.mxu1 }
 0x5f4   :  { %v11605_v31 = vpop.f32.mrf.mxu0 }
 0x5f5   :  { %v11568_v24 = vpop.f32.mrf.mxu1  ;;  %v11606_v27 = vadd.f32 %v11605_v31, %v11566_v2 }
 0x5f6   :  { %v11607_v58 = vpop.f32.mrf.mxu0 }
 0x5f7   :  { %v11569_v38 = vpop.f32.mrf.mxu1 }
 0x5f8   :  { %v11608_v22 = vpop.f32.mrf.mxu0 }
 0x5fa   :  { %v11609_v63 = vpop.f32.mrf.mxu0 }
 0x601   :  { %v11645_v18 = vpop.f32.mrf.mxu1 }
 0x602   :  { %v11646_v55 = vadd.f32 %v11645_v18, %v11606_v27 }
 0x603   :  { %v11647_v21 = vpop.f32.mrf.mxu1 }
 0x604   :  { %v11685_v56 = vpop.f32.mrf.mxu0 }
 0x605   :  { %v11648_v35 = vpop.f32.mrf.mxu1  ;;  %v11686_v45 = vadd.f32 %v11685_v56, %v11646_v55 }
 0x606   :  { %v11687_v62 = vpop.f32.mrf.mxu0 }
 0x607   :  { %v11649_v16 = vpop.f32.mrf.mxu1 }
 0x608   :  { %v11688_v44 = vpop.f32.mrf.mxu0  ;;  %v13379_v16 = vld [vmem:[%s18875_s6] ss:$0 sm:$0xff] }
 0x60a   :  { %v11689_v15 = vpop.f32.mrf.mxu0 }
 0x611   :  { %v11725_v33 = vpop.f32.mrf.mxu1 }
 0x612   :  { %v11726_v30 = vadd.f32 %v11725_v33, %v11686_v45  ;;  %v12268_v33 = vld [vmem:[%s18877_s8 + $0x18] sm:$0xff] }
 0x613   :  { %v11727_v37 = vpop.f32.mrf.mxu1 }
 0x614   :  { %v11765_v40 = vpop.f32.mrf.mxu0  ;;  %v12267_v37 = vld [vmem:[%s18877_s8 + $0x10] sm:$0xff] }
 0x615   :  { %v11728_v46 = vpop.f32.mrf.mxu1  ;;  %v11766_v4 = vadd.f32 %v11765_v40, %v11726_v30 }
 0x616   :  { %v11767_v13 = vpop.f32.mrf.mxu0  ;;  %v12266_v46 = vld [vmem:[%s18877_s8 + $0x8] sm:$0xff] }
 0x617   :  { %v11729_v53 = vpop.f32.mrf.mxu1 }
 0x618   :  { %v11768_v19 = vpop.f32.mrf.mxu0  ;;  %v12265_v53 = vld [vmem:[%s18877_s8] sm:$0xff] }
 0x619   :  { %v12269_v19 = vld [vmem:[%s18879_s10] sm:$0x1]  ;;  %s13820_s10 = smov 96  }
 0x61a   :  { %v11769_v59 = vpop.f32.mrf.mxu0 }
 0x621   :  { %v11805_v50 = vpop.f32.mrf.mxu1 }
 0x622   :  { %v11806_v29 = vadd.f32 %v11805_v50, %v11766_v4 }
 0x623   :  { %v11807_v39 = vpop.f32.mrf.mxu1 }
 0x624   :  { %v11845_v49 = vpop.f32.mrf.mxu0 }
 0x625   :  { %v11808_v5 = vpop.f32.mrf.mxu1  ;;  %v11846_v47 = vadd.f32 %v11845_v49, %v11806_v29 }
 0x626   :  { %v11847_v14 = vpop.f32.mrf.mxu0  ;;  %v13380_v5 = vld [vmem:[%s18878_s9] ss:$0 sm:$0xff] }
 0x627   :  { %v11809_v7 = vpop.f32.mrf.mxu1 }
 0x628   :  { %v11848_v42 = vpop.f32.mrf.mxu0 }
 0x62a   :  { %v11849_v43 = vpop.f32.mrf.mxu0 }
 0x631   :  { %v11885_v61 = vpop.f32.mrf.mxu1 }
 0x632   :  { %v11886_v9 = vadd.f32 %v11885_v61, %v11846_v47 }
 0x633   :  { %v11887_v36 = vpop.f32.mrf.mxu1 }
 0x634   :  { %v11925_v1 = vpop.f32.mrf.mxu0 }
 0x635   :  { %v11888_v32 = vpop.f32.mrf.mxu1  ;;  %v11926_v26 = vadd.f32 %v11925_v1, %v11886_v9  ;;  %v12483_v9 = vld [vmem:[%s18880_s11 + $0x38] sm:$0xff] }
 0x636   :  { %v11927_v20 = vpop.f32.mrf.mxu0 }
 0x637   :  { %v11889_v41 = vpop.f32.mrf.mxu1 }
 0x638   :  { %v11928_v11 = vpop.f32.mrf.mxu0 }
 0x63a   :  { %v11929_v54 = vpop.f32.mrf.mxu0 }
 0x641   :  { %v11965_v28 = vpop.f32.mrf.mxu1 }
 0x642   :  { %v11966_v38 = vadd.f32 %v11965_v28, %v11926_v26  ;;  %v12481_v26 = vld [vmem:[%s18880_s11 + $0x28] sm:$0xff] }
 0x643   :  { %v11967_v52 = vpop.f32.mrf.mxu1 }
 0x644   :  { %v12005_v51 = vpop.f32.mrf.mxu0 }
 0x645   :  { %v11968_v8 = vpop.f32.mrf.mxu1  ;;  %v12006_v31 = vadd.f32 %v12005_v51, %v11966_v38  ;;  %v12479_v38 = vld [vmem:[%s18880_s11 + $0x18] sm:$0xff] }
 0x646   :  { %v12007_v25 = vpop.f32.mrf.mxu0 }
 0x647   :  { %v11969_v3 = vpop.f32.mrf.mxu1 }
 0x648   :  { %v12008_v57 = vpop.f32.mrf.mxu0 }
 0x64a   :  { %v12009_v34 = vpop.f32.mrf.mxu0 }
 0x651   :  { %v12045_v48 = vpop.f32.mrf.mxu1 }
 0x652   :  { %v12046_v58 = vadd.f32 %v12045_v48, %v12006_v31  ;;  %v12478_v31 = vld [vmem:[%s18880_s11 + $0x10] sm:$0xff] }
 0x653   :  { %v12047_v60 = vpop.f32.mrf.mxu1 }
 0x654   :  { %v12085_v0 = vpop.f32.mrf.mxu0 }
 0x655   :  { %v12048_v17 = vpop.f32.mrf.mxu1  ;;  %v12086_v63 = vadd.f32 %v12085_v0, %v12046_v58  ;;  %v12476_v58 = vld [vmem:[%s18880_s11] sm:$0xff] }
 0x656   :  { %v12087_v23 = vpop.f32.mrf.mxu0 }
 0x657   :  { %v12049_v6 = vpop.f32.mrf.mxu1 }
 0x658   :  { %v12088_v2 = vpop.f32.mrf.mxu0 }
 0x659   :  { %v12482_v2 = vld [vmem:[%s18880_s11 + $0x30] sm:$0xff] }
 0x65a   :  { %v12089_v24 = vpop.f32.mrf.mxu0 }
 0x65b   :  { %v12480_v24 = vld [vmem:[%s18880_s11 + $0x20] sm:$0xff] }
 0x661   :  { %v12125_v27 = vpop.f32.mrf.mxu1 }
 0x662   :  { %v12126_v55 = vadd.f32 %v12125_v27, %v12086_v63  ;;  %v12477_v27 = vld [vmem:[%s18880_s11 + $0x8] sm:$0xff]  ;;  %v12589_v63 = vld [vmem:[%s18882_s13 + $0x78] sm:$0xff] }
 0x663   :  { %v12127_v22 = vpop.f32.mrf.mxu1  ;;  %12610 = vmatpush1.msra.mxu0 %v12589_v63 }
 0x664   :  { %v12165_v35 = vpop.f32.mrf.mxu0  ;;  %12611 = vmatprep.subr.mxu0 %v13816_v12 }
 0x665   :  { %v12128_v18 = vpop.f32.mrf.mxu1  ;;  %v12166_v56 = vadd.f32 %v12165_v35, %v12126_v55  ;;  %v12587_v55 = vld [vmem:[%s18882_s13 + $0x68] sm:$0xff] }
 0x666   :  { %v12167_v45 = vpop.f32.mrf.mxu0  ;;  %v12588_v18 = vld [vmem:[%s18882_s13 + $0x70] sm:$0xff] }
 0x667   :  { %v12129_v21 = vpop.f32.mrf.mxu1  ;;  %v12178_v62 = vadd.f32 %v13379_v16, %v12166_v56  ;;  %12612 = vmatpush1.msra.mxu0 %v12588_v18  ;;  %v12585_v56 = vld [vmem:[%s18882_s13 + $0x58] sm:$0xff] }
 0x668   :  { %v12168_v44 = vpop.f32.mrf.mxu0  ;;  %12613 = vmatprep.subr.mxu0 %v13816_v12  ;;  %v12586_v21 = vld [vmem:[%s18882_s13 + $0x60] sm:$0xff] }
 0x669   :  { %v12179_v15 = vmax.f32 %v12178_v62, 0.0  ;;  %12614 = vmatpush1.msra.mxu0 %v12587_v55 }
 0x66a   :  { %v12169_v30 = vpop.f32.mrf.mxu0  ;;  %12615 = vmatprep.subr.mxu0 %v13816_v12 }
 0x66b   :  { %13653 = vmatmul.mubr.msk.f32.vlgmr.msra.gmra.mxu1 %vm12191_vm6, %v12179_v15  ;;  %12616 = vmatpush1.msra.mxu0 %v12586_v21  ;;  %v12584_v15 = vld [vmem:[%s18882_s13 + $0x50] sm:$0xff]  ;;  %v12583_v30 = vld [vmem:[%s18882_s13 + $0x48] sm:$0xff] }
 0x66c   :  { %13656 = vmatpush3.msra.mxu1 %v12268_v33  ;;  %13663 = vmatprep.mubr.msk.f32.mxu1 %vm13817_vm3, %v13816_v12 }
 0x66d   :  { %13657 = vmatprep.subr.mxu1 %v13816_v12  ;;  %12617 = vmatprep.subr.mxu0 %v13816_v12 }
 0x66e   :  { %13658 = vmatpush3.msra.mxu1 %v12267_v37  ;;  %12618 = vmatpush1.msra.mxu0 %v12585_v56 }
 0x66f   :  { %13659 = vmatprep.subr.mxu1 %v13816_v12  ;;  %12619 = vmatprep.subr.mxu0 %v13816_v12 }
 0x670   :  { %13660 = vmatpush3.msra.mxu1 %v12266_v46  ;;  %12620 = vmatpush1.msra.mxu0 %v12584_v15 }
 0x671   :  { %13661 = vmatprep.subr.mxu1 %v13816_v12  ;;  %12621 = vmatprep.subr.mxu0 %v13816_v12 }
 0x672   :  { %13662 = vmatpush3.msra.mxu1 %v12265_v53  ;;  %12622 = vmatpush1.msra.mxu0 %v12583_v30 }
 0x673   :  { %13664 = vmatmul.mubr.f32.vlgmr.msra.gmra.mxu1 %v13816_v12  ;;  %13666 = vmatprep.subr.mxu1 %v13816_v12 }
 0x674   :  { %13667 = vmatpush3.msra.mxu1 %v12268_v33  ;;  %13674 = vmatprep.mubr.msk.f32.mxu1 %vm13817_vm3, %v13816_v12 }
 0x675   :  { %13668 = vmatprep.subr.mxu1 %v13816_v12  ;;  %12623 = vmatprep.subr.mxu0 %v13816_v12 }
 0x676   :  { %13669 = vmatpush3.msra.mxu1 %v12267_v37 }
 0x677   :  { %13670 = vmatprep.subr.mxu1 %v13816_v12 }
 0x678   :  { %13671 = vmatpush3.msra.mxu1 %v12266_v46  ;;  %v12582_v46 = vld [vmem:[%s18882_s13 + $0x40] sm:$0xff] }
 0x679   :  { %13672 = vmatprep.subr.mxu1 %v13816_v12  ;;  %12624 = vmatpush1.msra.mxu0 %v12582_v46 }
 0x67a   :  { %13673 = vmatpush3.msra.mxu1 %v12265_v53  ;;  %v12581_v53 = vld [vmem:[%s18882_s13 + $0x38] sm:$0xff]  ;;  %12625 = vmatprep.subr.mxu0 %v13816_v12 }
 0x67b   :  { %12525 = vmatprep.subr.mxu1 %v12483_v9  ;;  %12626 = vmatpush1.msra.mxu0 %v12581_v53 }
 0x67c   :  { %12627 = vmatprep.subr.mxu0 %v13816_v12 }
 0x72b   :  { %v12261_v40 = vpop.f32.mrf.mxu1 }
 0x72c   :  { %v12262_v7 = vadd.f32 %v13380_v5, %v12261_v40  ;;  %v12580_v40 = vld [vmem:[%s18882_s13 + $0x30] sm:$0xff]  ;;  %v12574_v5 = vld [vmem:[%s18882_s13] sm:$0xff] }
 0x72d   :  { %v13654_v13 = vpop.f32.mrf.mxu1  ;;  %12628 = vmatpush1.msra.mxu0 %v12580_v40 }
 0x72e   :  { %v12579_v13 = vld [vmem:[%s18882_s13 + $0x28] sm:$0xff]  ;;  %12629 = vmatprep.subr.mxu0 %v13816_v12 }
 0x72f   :  { %12630 = vmatpush1.msra.mxu0 %v12579_v13 }
 0x730   :  { %12631 = vmatprep.subr.mxu0 %v13816_v12 }
 0x733   :  { %v12339_v59 = vpop.f32.mrf.mxu1 }
 0x734   :  { %v12340_v50 = vadd.f32 %v12339_v59, %v12269_v19  ;;  %v12577_v59 = vld [vmem:[%s18882_s13 + $0x18] sm:$0xff] }
 0x735   :  { %v13665_v39 = vpop.f32.mrf.mxu1 }
 0x736   :  { %12351 = vrot.lane.b32.xlu0 %v12340_v50, %s13819_s26  ;;  %v12343_v49 = vadd.f32 %v12340_v50, %v12262_v7  ;;  %v12576_v50 = vld [vmem:[%s18882_s13 + $0x10] sm:$0xff]  ;;  %v12575_v39 = vld [vmem:[%s18882_s13 + $0x8] sm:$0xff] }
 0x738   :  { %v13382_v14 = vmul.f32 -1.442695, %v12343_v49  ;;  %v12597_v49 = vld [vmem:[%s18882_s13 + $0xb8] sm:$0xff] }
 0x73a   :  { %13800 = vpow2.f32 %v13382_v14  ;;  %v12596_v14 = vld [vmem:[%s18882_s13 + $0xb0] sm:$0xff] }
 0x747   :  { %v13801_v42 = vpop.eup %13800 }
 0x748   :  { %v12347_v43 = vadd.f32 1.0, %v13801_v42  ;;  %v12595_v42 = vld [vmem:[%s18882_s13 + $0xa8] sm:$0xff] }
 0x74a   :  { %13802 = vrcp.f32 %v12347_v43  ;;  %v12594_v43 = vld [vmem:[%s18882_s13 + $0xa0] sm:$0xff] }
 0x757   :  { %v13803_v61 = vpop.eup %13802 }
 0x758   :  { %v12361_v11 = vsub.f32 1.0, %v13803_v61  ;;  %v12367_v28 = vmul.f32 0.0, %v13803_v61 }
 0x7a8   :  { %v12352_v36 = vpop.permute.xlu0 %12351 }
 0x7a9   :  { %v12354_v32 = vmul.f32 %v13803_v61, %v12352_v36  ;;  %v12593_v36 = vld [vmem:[%s18882_s13 + $0x98] sm:$0xff] }
 0x7ab   :  { %12356 = vrot.lane.b32.xlu0 %v12354_v32, %s13819_s26  ;;  %v12592_v32 = vld [vmem:[%s18882_s13 + $0x90] sm:$0xff] }
 0x81d   :  { %v12357_v41 = vpop.permute.xlu0 %12356 }
 0x81e   :  { %v12359_v1 = vadd.f32 %v12357_v41, %v12262_v7  ;;  %v12591_v41 = vld [vmem:[%s18882_s13 + $0x88] sm:$0xff] }
 0x820   :  { %13804 = vtanh.f32 %v12359_v1  ;;  %v12590_v1 = vld [vmem:[%s18882_s13 + $0x80] sm:$0xff] }
 0x82d   :  { %v13805_v20 = vpop.eup %13804 }
 0x82e   :  { %12363 = vrot.lane.b32.xlu1 %v13805_v20, %s13820_s10  ;;  %v12692_v20 = vld [vmem:[%s18884_s15 + $0x60] sm:$0xf] }
 0x8a0   :  { %v12364_v54 = vpop.permute.xlu1 %12363 }
 0x8a1   :  { %v12366_v52 = vmul.f32 %v12364_v54, %v12361_v11  ;;  %v12691_v11 = vld [vmem:[%s18884_s15 + $0x58] sm:$0xff]  ;;  %v12690_v54 = vld [vmem:[%s18884_s15 + $0x50] sm:$0xff] }
 0x8a3   :  { %v18666_v8 = vadd.f32 %v12367_v28, %v12366_v52  ;;  %v12689_v28 = vld [vmem:[%s18884_s15 + $0x48] sm:$0xff]  ;;  %v12688_v52 = vld [vmem:[%s18884_s15 + $0x40] sm:$0xff] }
 0x8a5   :  { %12370 = vrot.lane.b32.xlu1 %v18666_v8, %s13820_s10  ;;  %v12470_v16 = vrot.slane %v18666_v8, 7 }
 0x917   :  { %v12371_v3 = vpop.permute.xlu1 %12370 }
 0x918   :  { %13675 = vmatmul.mubr.msk.f32.vlgmr.msra.gmra.mxu1 %vm12191_vm6, %v12371_v3  ;;  %v12686_v3 = vld [vmem:[%s18884_s15 + $0x30] sm:$0xff] }
 0x919   :  { %12565 = vmatprep.mubr.f32.mxu1 %v13816_v12  ;;  %12526 = vmatpush1.msra.mxu1 %v12482_v2  ;;  %v12682_v2 = vld [vmem:[%s18884_s15 + $0x10] sm:$0xff] }
 0x91a   :  { %12527 = vmatprep.subr.mxu1 %v12481_v26  ;;  %v12680_v26 = vld [vmem:[%s18884_s15] sm:$0xff] }
 0x91b   :  { %12528 = vmatpush1.msra.mxu1 %v12480_v24  ;;  %v13386_v24 = vld [vmem:[%s18883_s14] ss:$0 sm:$0xff] }
 0x91c   :  { %12529 = vmatprep.subr.mxu1 %v12479_v38 }
 0x91d   :  { %12530 = vmatpush1.msra.mxu1 %v12478_v31 }
 0x91e   :  { %12531 = vmatprep.subr.mxu1 %v12477_v27 }
 0x91f   :  { %12532 = vmatpush1.msra.mxu1 %v12476_v58 }
 0x920   :  { %13677 = vmatprep.subr.mxu1 %v13816_v12 }
 0x9d8   :  { %v12440_v51 = vpop.f32.mrf.mxu1 }
 0x9d9   :  { %v12441_v25 = vadd.f32 %v12440_v51, %v12269_v19  ;;  %v12578_v19 = vld [vmem:[%s18882_s13 + $0x20] sm:$0xff]  ;;  %v12685_v51 = vld [vmem:[%s18884_s15 + $0x28] sm:$0xff] }
 0x9da   :  { %v13676_v57 = vpop.f32.mrf.mxu1  ;;  %12632 = vmatpush1.msra.mxu0 %v12578_v19 }
 0x9db   :  { %v12445_v34 = vrot.slane %v12441_v25, 7  ;;  %12633 = vmatprep.subr.mxu0 %v13816_v12  ;;  %v12684_v25 = vld [vmem:[%s18884_s15 + $0x20] sm:$0xff]  ;;  %v12683_v57 = vld [vmem:[%s18884_s15 + $0x18] sm:$0xff] }
 0x9dc   :  { %12634 = vmatpush1.msra.mxu0 %v12577_v59 }
 0x9dd   :  { %12454 = vrot.lane.b32.xlu0 %v12445_v34, %s13819_s26  ;;  %v12447_v48 = vadd.f32 %v12445_v34, %v12262_v7  ;;  %12635 = vmatprep.subr.mxu0 %v13816_v12  ;;  %v12488_v34 = vsub.s32 0, %v19781_v10 }
 0x9de   :  { %12636 = vmatpush1.msra.mxu0 %v12576_v50 }
 0x9df   :  { %v13384_v60 = vmul.f32 -1.442695, %v12447_v48  ;;  %12637 = vmatprep.subr.mxu0 %v13816_v12  ;;  %v12484_v48 = vld [vmem:[%s18881_s12] sm:$0x3] }
 0x9e0   :  { %12638 = vmatpush1.msra.mxu0 %v12575_v39 }
 0x9e1   :  { %13806 = vpow2.f32 %v13384_v60  ;;  %12639 = vmatprep.subr.mxu0 %v13816_v12  ;;  %v12492_v60 = vsub.s32 1, %v19781_v10  ;;  %v12681_v10 = vld [vmem:[%s18884_s15 + $0x8] sm:$0xff] }
 0x9e2   :  { %12640 = vmatpush1.msra.mxu0 %v12574_v5 }
 0x9e3   :  { %12655 = vmatprep.subr.mxu0 %v13816_v12 }
 0x9ee   :  { %v13807_v4 = vpop.eup %13806 }
 0x9ef   :  { %v12451_v17 = vadd.f32 1.0, %v13807_v4  ;;  %v12489_v4 = vrot.slane %v12484_v48, %v12488_v34 }
 0x9f1   :  { %13808 = vrcp.f32 %v12451_v17  ;;  %v12493_v17 = vrot.slane %v12484_v48, %v12492_v60 }
 0x9fe   :  { %v13809_v29 = vpop.eup %13808 }
 0x9ff   :  { %v12464_v35 = vsub.f32 1.0, %v13809_v29  ;;  %v12472_v62 = vmul.f32 %v13809_v29, %v12470_v16 }
 0xa4f   :  { %v12455_v6 = vpop.permute.xlu0 %12454 }
 0xa50   :  { %v12457_v0 = vmul.f32 %v13809_v29, %v12455_v6 }
 0xa52   :  { %12459 = vrot.lane.b32.xlu1 %v12457_v0, %s13819_s26 }
 0xac4   :  { %v12460_v47 = vpop.permute.xlu1 %12459 }
 0xac5   :  { %v12462_v23 = vadd.f32 %v12460_v47, %v12262_v7  ;;  %v12598_v7 = vld [vmem:[%s18882_s13 + $0xc0] sm:$0xff] }
 0xac6   :  { %12656 = vmatpush2.msra.mxu0 %v12598_v7 }
 0xac7   :  { %13810 = vtanh.f32 %v12462_v23  ;;  %12657 = vmatprep.subr.mxu0 %v13816_v12 }
 0xac8   :  { %12658 = vmatpush2.msra.mxu0 %v12597_v49 }
 0xac9   :  { %12659 = vmatprep.subr.mxu0 %v13816_v12 }
 0xaca   :  { %12660 = vmatpush2.msra.mxu0 %v12596_v14 }
 0xacb   :  { %12661 = vmatprep.subr.mxu0 %v13816_v12 }
 0xacc   :  { %12662 = vmatpush2.msra.mxu0 %v12595_v42 }
 0xacd   :  { %12663 = vmatprep.subr.mxu0 %v13816_v12 }
 0xace   :  { %12664 = vmatpush2.msra.mxu0 %v12594_v43 }
 0xacf   :  { %12665 = vmatprep.subr.mxu0 %v13816_v12 }
 0xad0   :  { %12666 = vmatpush2.msra.mxu0 %v12593_v36 }
 0xad1   :  { %12667 = vmatprep.subr.mxu0 %v13816_v12 }
 0xad2   :  { %12668 = vmatpush2.msra.mxu0 %v12592_v32 }
 0xad3   :  { %12669 = vmatprep.subr.mxu0 %v13816_v12 }
 0xad4   :  { %v13811_v22 = vpop.eup %13810  ;;  %12670 = vmatpush2.msra.mxu0 %v12591_v41 }
 0xad5   :  { %12466 = vrot.lane.b32.xlu0 %v13811_v22, %s13820_s10  ;;  %12671 = vmatprep.subr.mxu0 %v13816_v12  ;;  %v13388_v22 = vld [vmem:[#allocation5] ss:$0 sm:$0xff] }
 0xad6   :  { %12672 = vmatpush2.msra.mxu0 %v12590_v1 }
 0xb47   :  { %v12467_v45 = vpop.permute.xlu0 %12466 }
 0xb48   :  { %v12469_v44 = vmul.f32 %v12467_v45, %v12464_v35 }
 0xb4a   :  { %v12473_v33 = vadd.f32 %v12472_v62, %v12469_v44 }
 0xb4c   :  { %v12475_v37 = vsel %vm12474_vm7, %v18666_v8, %v12473_v33  ;;  %v12687_v8 = vld [vmem:[%s18884_s15 + $0x38] sm:$0xff] }
 0xb4d   :  { %12497 = vrot.lane.b32.xlu1 %v12475_v37, %s13820_s10 }
 0xbbf   :  { %v12498_v61 = vpop.permute.xlu1 %12497 }
 0xbc0   :  { %13385 = vmatmul.mubr.msk.f32.vlgmr.msra.gmra.mxu1 %vm12191_vm6, %v12498_v61 }
 0xbc1   :  { %13703 = vmatprep.mubr.msk.f32.mxu1 %vm13817_vm3, %v13816_v12  ;;  %13678 = vmatpush3.msk.msra.mxu1 %vm997_vm0, %v12692_v20 }
 0xbc2   :  { %13679 = vmatprep.subr.mxu1 %v13816_v12 }
 0xbc3   :  { %13680 = vmatpush3.msra.mxu1 %v12691_v11 }
 0xbc4   :  { %13681 = vmatprep.subr.mxu1 %v13816_v12 }
 0xbc5   :  { %13682 = vmatpush3.msra.mxu1 %v12690_v54 }
 0xbc6   :  { %13683 = vmatprep.subr.mxu1 %v13816_v12 }
 0xbc7   :  { %13684 = vmatpush3.msra.mxu1 %v12689_v28 }
 0xbc8   :  { %13685 = vmatprep.subr.mxu1 %v13816_v12 }
 0xbc9   :  { %13686 = vmatpush3.msra.mxu1 %v12688_v52 }
 0xbca   :  { %13687 = vmatprep.subr.mxu1 %v13816_v12 }
 0xbcb   :  { %13688 = vmatpush3.msra.mxu1 %v12687_v8 }
 0xbcc   :  { %13689 = vmatprep.subr.mxu1 %v13816_v12 }
 0xbcd   :  { %13690 = vmatpush3.msra.mxu1 %v12686_v3 }
 0xbce   :  { %13691 = vmatprep.subr.mxu1 %v13816_v12 }
 0xbcf   :  { %13692 = vmatpush3.msra.mxu1 %v12685_v51 }
 0xbd0   :  { %13693 = vmatprep.subr.mxu1 %v13816_v12 }
 0xbd1   :  { %13694 = vmatpush3.msra.mxu1 %v12684_v25 }
 0xbd2   :  { %13695 = vmatprep.subr.mxu1 %v13816_v12 }
 0xbd3   :  { %13696 = vmatpush3.msra.mxu1 %v12683_v57 }
 0xbd4   :  { %13697 = vmatprep.subr.mxu1 %v13816_v12 }
 0xbd5   :  { %13698 = vmatpush3.msra.mxu1 %v12682_v2 }
 0xbd6   :  { %13699 = vmatprep.subr.mxu1 %v13816_v12 }
 0xbd7   :  { %13700 = vmatpush3.msra.mxu1 %v12681_v10 }
 0xbd8   :  { %13701 = vmatprep.subr.mxu1 %v13816_v12 }
 0xbd9   :  { %13702 = vmatpush3.msra.mxu1 %v12680_v26 }
 0xc80   :  { %v12567_v29 = vpop.f32.mrf.mxu1 }
 0xc81   :  { %v12568_v6 = vadd.f32 %v12567_v29, %v12489_v4 }
 0xc82   :  { %v12569_v0 = vpop.f32.mrf.mxu1 }
 0xc83   :  { %v12570_v47 = vadd.f32 %v12569_v0, %v12493_v17  ;;  %v12572_v9 = vmax.f32 %v12568_v6, 0.0 }
 0xc85   :  { %v12573_v23 = vmax.f32 %v12570_v47, 0.0 }
 0xc87   :  { %13387 = vmatprep.mubr.msk.f32.mxu0 %vm984_vm1, %v12573_v23 }
 0xc88   :  { %12674 = vmatmul.mubr.f32.vlgmr.msra.gmra.mxu0 %v12572_v9 }
 0xd48   :  { %v12675_v38 = vpop.f32.mrf.mxu0 }
 0xd49   :  { %v12676_v31 = vadd.f32 %v13386_v24, %v12675_v38 }
 0xd4a   :  { %v12677_v27 = vpop.f32.mrf.mxu0 }
 0xd4b   :  { %v12679_v58 = vmax.f32 %v12676_v31, 0.0 }
 0xd4d   :  { %13704 = vmatmul.mubr.msk.f32.vlgmr.msra.gmra.mxu1 %vm12700_vm8, %v12679_v58 }
 0xe0d   :  { %v12773_v63 = vpop.f32.mrf.mxu1 }
 0xe0e   :  { %v12774_v18 = vadd.f32 %v13388_v22, %v12773_v63 }
 0xe0f   :  { %v13705_v12 = vpop.f32.mrf.mxu1 }
 0xe10   :  { %12778 = vst.msk [vmem:[%s18886_s17] sm:$0x3] %vm12777_vm9, %v12774_v18 }
 0xe11   :  { %12783 = vsyncmov [#allocation4] }
 0xe14   :  { %s12784_s15 = vpop.sfrf %12783 }
 0xe15   :  { %p13391_p0 = scmp.ne.s32.totalorder %s12784_s15, 0 }
 0xe17   :  { %12788 = shalt.err (%p13391_p0)  }

</bundles_post_ra>
